<compile_context>
chip_gen: v5e
topology: v5e:2x2
jax: 0.10.0
libtpu: 0.0.40
codegen_flags: <defaults>
</compile_context>

<pallas_src>
import functools
import math

import jax
import jax.numpy as jnp
from jax.experimental import pallas as pl
from jax.experimental.pallas import tpu as pltpu


_LANE = 128
_TOTAL_FC_TILES = 4      # n_split * nj == 4 always  ->  TN = O_pad / 4


def _num_tensorcores():
    """2 on v7x (megacore: split the FC weight stream), else 1 (v5e/v6e)."""
    try:
        kind = jax.devices()[0].device_kind.lower()
    except Exception:
        return 1
    return 2 if "v7" in kind else 1


# ----------------------------- Pallas kernel -------------------------------

def lstm_fc_fused_kernel(nj, x_ref, wx_ref, wh_ref, b_ref, bfc_ref,
                         wfc_hbm, o_ref, wbuf, sem):
    """grid = (n_split,).  One body invocation per split:
      1. kick off the DMA of this split's first bf16 wfc tile,
      2. run the whole T-step LSTM recurrence (hides that first-tile DMA),
      3. stream the remaining wfc tiles through a manual VMEM double buffer,
         computing h @ wfc_tile + bfc_tile into the lane-dense output block.
    """
    B, T, D = x_ref.shape
    H = wh_ref.shape[0]
    TN = wbuf.shape[-1]
    s = pl.program_id(0)

    def tile_copy(j, slot):
        # wfc_hbm is (n_tiles, H, TN) in HBM; tile index may be dynamic (s).
        return pltpu.make_async_copy(
            wfc_hbm.at[s * nj + j], wbuf.at[slot], sem.at[slot])

    # Prologue: the recurrence only needs x/wx/wh/b, so overlap it with the
    # DMA of the first weight tile instead of blocking on it.
    tile_copy(0, 0).start()

    wx = wx_ref[...]                       # (D, 4H) f32
    wh = wh_ref[...]                       # (H, 4H) f32
    b = b_ref[...]                         # (1, 4H) f32

    # One full-vreg sigmoid per step; the cell gate's tanh is derived via
    # tanh(x) = 2*sigmoid(2x) - 1 on the masked lanes (gate order i,f,g,o).
    lane = jax.lax.broadcasted_iota(jnp.int32, (B, 4 * H), 1)
    is_cell = (lane >= 2 * H) & (lane < 3 * H)

    h = jnp.zeros((B, H), jnp.float32)
    c = jnp.zeros((B, H), jnp.float32)
    for t in range(T):                     # T small & static -> fully unrolled
        gates = (jnp.dot(x_ref[:, t, :], wx, preferred_element_type=jnp.float32)
                 + jnp.dot(h, wh, preferred_element_type=jnp.float32)
                 + b)                                            # (B, 4H)
        sg = jax.nn.sigmoid(jnp.where(is_cell, 2.0 * gates, gates))
        act = jnp.where(is_cell, 2.0 * sg - 1.0, sg)
        ig = act[:, 0 * H:1 * H]
        fg = act[:, 1 * H:2 * H]
        cg = act[:, 2 * H:3 * H]
        og = act[:, 3 * H:4 * H]
        c = c * fg + ig * cg
        h = og * jnp.tanh(c)
    h_bf16 = h.astype(jnp.bfloat16)

    # FC: manually double-buffered bf16 weight stream (the only real work).
    for j in range(nj):                    # nj static -> fully unrolled
        slot = j & 1
        if j + 1 < nj:
            tile_copy(j + 1, 1 - slot).start()
        tile_copy(j, slot).wait()
        fc = jnp.dot(h_bf16, wbuf[slot], preferred_element_type=jnp.float32)
        o_ref[:, j * TN:(j + 1) * TN] = (
            fc + bfc_ref[:, j * TN:(j + 1) * TN].astype(jnp.float32))


# ------------------------------- Wrapper -----------------------------------

def prepare_params(params):
    """One-time parameter prep (outside the hot path):
      * pad the FC output dim to a multiple of _TOTAL_FC_TILES*128 (= 512), so
        50000 -> 50176: lane-dense, evenly tiled output blocks,
      * cast wfc/bfc to bf16 (halves the dominant HBM stream),
      * lay wfc out as contiguous (n_tiles, H, TN) tiles for the manual DMA.
    """
    wx, wh, b, wfc, bfc = params
    H, O = wfc.shape
    mult = _TOTAL_FC_TILES * _LANE
    O_pad = -(-O // mult) * mult
    TN = O_pad // _TOTAL_FC_TILES
    wfc_pad = jnp.pad(wfc, ((0, 0), (0, O_pad - O))).astype(jnp.bfloat16)
    bfc_pad = jnp.pad(bfc, ((0, 0), (0, O_pad - O))).astype(jnp.bfloat16)
    wfc_tiles = wfc_pad.reshape(H, _TOTAL_FC_TILES, TN).transpose(1, 0, 2)
    return (wx, wh, b, wfc_tiles, bfc_pad)


def lstm_model_forward(x, params, output_dim):
    """x: (B, T, D) float32, batch-first.  Returns (-1, 1, 5, 100, 100)."""
    wx, wh, b, wfc_tiles, bfc_pad = params
    B, T, D = x.shape
    H = wh.shape[0]
    n_tiles, _, TN = wfc_tiles.shape
    O_pad = bfc_pad.shape[1]
    assert n_tiles == _TOTAL_FC_TILES and O_pad == n_tiles * TN, (n_tiles, O_pad, TN)

    n_split = _num_tensorcores()           # 2 on v7x megacore, else 1
    nj = n_tiles // n_split                # tiles per split (>= 2: dbl buffer)

    out_pad = pl.pallas_call(
        functools.partial(lstm_fc_fused_kernel, nj),
        out_shape=jax.ShapeDtypeStruct((B, O_pad), jnp.float32),
        grid=(n_split,),
        in_specs=[
            pl.BlockSpec((B, T, D), lambda s: (0, 0, 0)),        # x (resident)
            pl.BlockSpec((D, 4 * H), lambda s: (0, 0)),          # x2h weight^T
            pl.BlockSpec((H, 4 * H), lambda s: (0, 0)),          # h2h weight^T
            pl.BlockSpec((1, 4 * H), lambda s: (0, 0)),          # combined bias
            pl.BlockSpec((1, nj * TN), lambda s: (0, s)),        # fc bias block
            pl.BlockSpec(memory_space=pl.ANY),                   # fc weight (HBM)
        ],
        out_specs=pl.BlockSpec((B, nj * TN), lambda s: (0, s)),
        scratch_shapes=[
            pltpu.VMEM((2, H, TN), jnp.bfloat16),                # weight dbl-buf
            pltpu.SemaphoreType.DMA((2,)),
        ],
        compiler_params=pltpu.CompilerParams(
            dimension_semantics=("parallel",)),
    )(x, wx, wh, b, bfc_pad, wfc_tiles)

    out = out_pad[:, :output_dim]          # drop lane padding
    return out.reshape(-1, 1, 5, 100, 100)


# -------------------------- Pure-JAX reference -----------------------------

def lstm_model_reference(x, params):
    wx, wh, b, wfc, bfc = params
    B, T, D = x.shape
    H = wh.shape[0]
    h = jnp.zeros((B, H), jnp.float32)
    c = jnp.zeros((B, H), jnp.float32)
    for t in range(T):
        gates = x[:, t, :] @ wx + h @ wh + b
        i = jax.nn.sigmoid(gates[:, 0 * H:1 * H])
        f = jax.nn.sigmoid(gates[:, 1 * H:2 * H])
        g = jnp.tanh(gates[:, 2 * H:3 * H])
        o = jax.nn.sigmoid(gates[:, 3 * H:4 * H])
        c = c * f + i * g
        h = o * jnp.tanh(c)
    out = h @ wfc + bfc
    return out.reshape(-1, 1, 5, 100, 100)


# --------------------------------- Main -------------------------------------

if __name__ == "__main__":
    # Shapes implied by the forward pass: out.view(-1, 1, 5, 100, 100)
    # requires output_dim = 5*100*100 = 50000 (one group per batch element).
    B, T, D, H = 2, 8, 16, 32
    O = 5 * 100 * 100   # 50000

    key = jax.random.PRNGKey(0)
    k_x, k_wx, k_bx, k_wh, k_bh, k_wfc, k_bfc = jax.random.split(key, 7)

    # LSTMCell params: uniform(-1/sqrt(H), 1/sqrt(H)) as in reset_parameters().
    std = 1.0 / math.sqrt(H)
    wx = jax.random.uniform(k_wx, (D, 4 * H), jnp.float32, -std, std)   # x2h.weight^T
    bx = jax.random.uniform(k_bx, (4 * H,), jnp.float32, -std, std)     # x2h.bias
    wh = jax.random.uniform(k_wh, (H, 4 * H), jnp.float32, -std, std)   # h2h.weight^T
    bh = jax.random.uniform(k_bh, (4 * H,), jnp.float32, -std, std)     # h2h.bias
    b = (bx + bh).reshape(1, 4 * H)                                     # combined bias

    # fc params: torch.nn.Linear default init ~ uniform(-1/sqrt(H), 1/sqrt(H)).
    std_fc = 1.0 / math.sqrt(H)
    wfc = jax.random.uniform(k_wfc, (H, O), jnp.float32, -std_fc, std_fc)
    bfc = jax.random.uniform(k_bfc, (1, O), jnp.float32, -std_fc, std_fc)

    ref_params = (wx, wh, b, wfc, bfc)
    kernel_params = prepare_params(ref_params)   # pad + bf16 + tile layout

    x = jax.random.normal(k_x, (B, T, D), jnp.float32)

    out = lstm_model_forward(x, kernel_params, O)
    out = jax.block_until_ready(out)

    ref = lstm_model_reference(x, ref_params)
    assert out.shape == (B, 1, 5, 100, 100), out.shape
    # bf16 FC weights (and bf16 h at the FC matmul) -> loosened tolerance.
    assert jnp.allclose(out, ref, rtol=5e-2, atol=5e-2), \
        float(jnp.max(jnp.abs(out - ref)))

    print("KERNEL_OK")
</pallas_src>

<mosaic_0001>
module attributes {stable_mosaic.version = 11 : i64} {
  func.func @lstm_fc_fused_kernel(%arg0: i32, %arg1: memref<2x8x16xf32, #tpu.memory_space<vmem>>, %arg2: memref<16x128xf32, #tpu.memory_space<vmem>>, %arg3: memref<32x128xf32, #tpu.memory_space<vmem>>, %arg4: memref<1x128xf32, #tpu.memory_space<vmem>>, %arg5: memref<1x50176xbf16, #tpu.memory_space<vmem>>, %arg6: memref<4x32x12544xbf16, #tpu.memory_space<any>>, %arg7: memref<2x50176xf32, #tpu.memory_space<vmem>>, %arg8: memref<2x32x12544xbf16, #tpu.memory_space<vmem>>, %arg9: memref<2x!tpu.dma_semaphore, #tpu.memory_space<semaphore_mem>>) attributes {dimension_semantics = [#tpu.dimension_semantics<parallel>], iteration_bounds = array<i64: 1>, scalar_prefetch = 0 : i64, scratch_operands = 2 : i64, tpu.core_type = #tpu.core_type<tc>, window_params = [{pipeline_mode = #tpu.pipeline_mode<synchronous>, transform_indices = @transform_0, window_bounds = array<i64: 2, 8, 16>}, {pipeline_mode = #tpu.pipeline_mode<synchronous>, transform_indices = @transform_1, window_bounds = array<i64: 16, 128>}, {pipeline_mode = #tpu.pipeline_mode<synchronous>, transform_indices = @transform_2, window_bounds = array<i64: 32, 128>}, {pipeline_mode = #tpu.pipeline_mode<synchronous>, transform_indices = @transform_3, window_bounds = array<i64: 1, 128>}, {transform_indices = @transform_4, window_bounds = array<i64: 1, 50176>}, {}, {transform_indices = @transform_6, window_bounds = array<i64: 2, 50176>}]} {
    %c4_i32 = arith.constant 4 : i32
    %0 = arith.muli %arg0, %c4_i32 : i32
    %c0_i32 = arith.constant 0 : i32
    %1 = arith.addi %0, %c0_i32 : i32
    %c0_i32_0 = arith.constant 0 : i32
    %c0_i32_1 = arith.constant 0 : i32
    %c0_i32_2 = arith.constant 0 : i32
    %c0_i32_3 = arith.constant 0 : i32
    %2 = tpu.memref_slice %arg6[%1, %c0_i32_2, %c0_i32_3] : memref<4x32x12544xbf16, #tpu.memory_space<any>> -> memref<1x32x12544xbf16, #tpu.memory_space<any>>
    %3 = tpu.memref_squeeze %2 : memref<1x32x12544xbf16, #tpu.memory_space<any>> -> memref<32x12544xbf16, #tpu.memory_space<any>>
    %c0_i32_4 = arith.constant 0 : i32
    %c0_i32_5 = arith.constant 0 : i32
    %4 = tpu.memref_slice %arg8[%c0_i32_0, %c0_i32_4, %c0_i32_5] : memref<2x32x12544xbf16, #tpu.memory_space<vmem>> -> memref<1x32x12544xbf16, #tpu.memory_space<vmem>>
    %5 = tpu.memref_squeeze %4 : memref<1x32x12544xbf16, #tpu.memory_space<vmem>> -> memref<32x12544xbf16, #tpu.memory_space<vmem>>
    %6 = tpu.memref_slice %arg9[%c0_i32_1] : memref<2x!tpu.dma_semaphore, #tpu.memory_space<semaphore_mem>> -> memref<1x!tpu.dma_semaphore, #tpu.memory_space<semaphore_mem>>
    %7 = tpu.memref_squeeze %6 : memref<1x!tpu.dma_semaphore, #tpu.memory_space<semaphore_mem>> -> memref<!tpu.dma_semaphore, #tpu.memory_space<semaphore_mem>>
    tpu.enqueue_dma source(%3 : memref<32x12544xbf16, #tpu.memory_space<any>>) target(%5 : memref<32x12544xbf16, #tpu.memory_space<vmem>>) target_semaphore(%7 : memref<!tpu.dma_semaphore, #tpu.memory_space<semaphore_mem>>)
    %c0 = arith.constant 0 : index
    %c0_6 = arith.constant 0 : index
    %8 = vector.load %arg2[%c0, %c0_6] : memref<16x128xf32, #tpu.memory_space<vmem>>, vector<16x128xf32>
    %c0_7 = arith.constant 0 : index
    %c0_8 = arith.constant 0 : index
    %9 = vector.load %arg3[%c0_7, %c0_8] : memref<32x128xf32, #tpu.memory_space<vmem>>, vector<32x128xf32>
    %c0_9 = arith.constant 0 : index
    %c0_10 = arith.constant 0 : index
    %10 = vector.load %arg4[%c0_9, %c0_10] : memref<1x128xf32, #tpu.memory_space<vmem>>, vector<1x128xf32>
    %11 = tpu.iota {dimensions = array<i32: 1>} : vector<2x128xi32>
    %c64_i32 = arith.constant 64 : i32
    %12 = vector.broadcast %c64_i32 : i32 to vector<2x128xi32>
    %13 = arith.cmpi sge, %11, %12 : vector<2x128xi32>
    %c96_i32 = arith.constant 96 : i32
    %14 = vector.broadcast %c96_i32 : i32 to vector<2x128xi32>
    %15 = arith.cmpi slt, %11, %14 : vector<2x128xi32>
    %16 = arith.andi %13, %15 : vector<2x128xi1>
    %cst = arith.constant 0.000000e+00 : f32
    %17 = vector.broadcast %cst : f32 to vector<2x32xf32>
    %cst_11 = arith.constant 0.000000e+00 : f32
    %18 = vector.broadcast %cst_11 : f32 to vector<2x32xf32>
    %c0_12 = arith.constant 0 : index
    %c0_13 = arith.constant 0 : index
    %c0_14 = arith.constant 0 : index
    %19 = vector.load %arg1[%c0_12, %c0_13, %c0_14] : memref<2x8x16xf32, #tpu.memory_space<vmem>>, vector<2x1x16xf32>
    %20 = vector.shape_cast %19 : vector<2x1x16xf32> to vector<2x16xf32>
    %cst_15 = arith.constant dense<0.000000e+00> : vector<2x128xf32>
    %21 = tpu.matmul %20, %8, %cst_15 {dimension_numbers = #tpu.dot_dimension_numbers<[1], [0], [0], [1], [0, 0, 1, 1], [], []>} : vector<2x16xf32>, vector<16x128xf32>, vector<2x128xf32> -> vector<2x128xf32>
    %cst_16 = arith.constant dense<0.000000e+00> : vector<2x128xf32>
    %22 = tpu.matmul %17, %9, %cst_16 {dimension_numbers = #tpu.dot_dimension_numbers<[1], [0], [0], [1], [0, 0, 1, 1], [], []>} : vector<2x32xf32>, vector<32x128xf32>, vector<2x128xf32> -> vector<2x128xf32>
    %23 = arith.addf %21, %22 : vector<2x128xf32>
    %24 = vector.broadcast %10 : vector<1x128xf32> to vector<2x128xf32>
    %25 = arith.addf %23, %24 : vector<2x128xf32>
    %cst_17 = arith.constant 2.000000e+00 : f32
    %26 = vector.broadcast %cst_17 : f32 to vector<2x128xf32>
    %27 = arith.mulf %26, %25 : vector<2x128xf32>
    %28 = arith.select %16, %27, %25 : vector<2x128xi1>, vector<2x128xf32>
    %29 = arith.negf %28 : vector<2x128xf32>
    %30 = math.exp %29 : vector<2x128xf32>
    %cst_18 = arith.constant 1.000000e+00 : f32
    %31 = vector.broadcast %cst_18 : f32 to vector<2x128xf32>
    %32 = arith.addf %31, %30 : vector<2x128xf32>
    %33 = arith.divf %31, %32 : vector<2x128xf32>
    %cst_19 = arith.constant 2.000000e+00 : f32
    %34 = vector.broadcast %cst_19 : f32 to vector<2x128xf32>
    %35 = arith.mulf %34, %33 : vector<2x128xf32>
    %cst_20 = arith.constant 1.000000e+00 : f32
    %36 = vector.broadcast %cst_20 : f32 to vector<2x128xf32>
    %37 = arith.subf %35, %36 : vector<2x128xf32>
    %38 = arith.select %16, %37, %33 : vector<2x128xi1>, vector<2x128xf32>
    %39 = vector.extract_strided_slice %38 {offsets = [0, 0], sizes = [2, 32], strides = [1, 1]} : vector<2x128xf32> to vector<2x32xf32>
    %40 = vector.extract_strided_slice %38 {offsets = [0, 32], sizes = [2, 32], strides = [1, 1]} : vector<2x128xf32> to vector<2x32xf32>
    %41 = vector.extract_strided_slice %38 {offsets = [0, 64], sizes = [2, 32], strides = [1, 1]} : vector<2x128xf32> to vector<2x32xf32>
    %42 = vector.extract_strided_slice %38 {offsets = [0, 96], sizes = [2, 32], strides = [1, 1]} : vector<2x128xf32> to vector<2x32xf32>
    %43 = arith.mulf %18, %40 : vector<2x32xf32>
    %44 = arith.mulf %39, %41 : vector<2x32xf32>
    %45 = arith.addf %43, %44 : vector<2x32xf32>
    %46 = math.tanh %45 : vector<2x32xf32>
    %47 = arith.mulf %42, %46 : vector<2x32xf32>
    %c0_21 = arith.constant 0 : index
    %c1 = arith.constant 1 : index
    %c0_22 = arith.constant 0 : index
    %48 = vector.load %arg1[%c0_21, %c1, %c0_22] : memref<2x8x16xf32, #tpu.memory_space<vmem>>, vector<2x1x16xf32>
    %49 = vector.shape_cast %48 : vector<2x1x16xf32> to vector<2x16xf32>
    %cst_23 = arith.constant dense<0.000000e+00> : vector<2x128xf32>
    %50 = tpu.matmul %49, %8, %cst_23 {dimension_numbers = #tpu.dot_dimension_numbers<[1], [0], [0], [1], [0, 0, 1, 1], [], []>} : vector<2x16xf32>, vector<16x128xf32>, vector<2x128xf32> -> vector<2x128xf32>
    %cst_24 = arith.constant dense<0.000000e+00> : vector<2x128xf32>
    %51 = tpu.matmul %47, %9, %cst_24 {dimension_numbers = #tpu.dot_dimension_numbers<[1], [0], [0], [1], [0, 0, 1, 1], [], []>} : vector<2x32xf32>, vector<32x128xf32>, vector<2x128xf32> -> vector<2x128xf32>
    %52 = arith.addf %50, %51 : vector<2x128xf32>
    %53 = vector.broadcast %10 : vector<1x128xf32> to vector<2x128xf32>
    %54 = arith.addf %52, %53 : vector<2x128xf32>
    %cst_25 = arith.constant 2.000000e+00 : f32
    %55 = vector.broadcast %cst_25 : f32 to vector<2x128xf32>
    %56 = arith.mulf %55, %54 : vector<2x128xf32>
    %57 = arith.select %16, %56, %54 : vector<2x128xi1>, vector<2x128xf32>
    %58 = arith.negf %57 : vector<2x128xf32>
    %59 = math.exp %58 : vector<2x128xf32>
    %cst_26 = arith.constant 1.000000e+00 : f32
    %60 = vector.broadcast %cst_26 : f32 to vector<2x128xf32>
    %61 = arith.addf %60, %59 : vector<2x128xf32>
    %62 = arith.divf %60, %61 : vector<2x128xf32>
    %cst_27 = arith.constant 2.000000e+00 : f32
    %63 = vector.broadcast %cst_27 : f32 to vector<2x128xf32>
    %64 = arith.mulf %63, %62 : vector<2x128xf32>
    %cst_28 = arith.constant 1.000000e+00 : f32
    %65 = vector.broadcast %cst_28 : f32 to vector<2x128xf32>
    %66 = arith.subf %64, %65 : vector<2x128xf32>
    %67 = arith.select %16, %66, %62 : vector<2x128xi1>, vector<2x128xf32>
    %68 = vector.extract_strided_slice %67 {offsets = [0, 0], sizes = [2, 32], strides = [1, 1]} : vector<2x128xf32> to vector<2x32xf32>
    %69 = vector.extract_strided_slice %67 {offsets = [0, 32], sizes = [2, 32], strides = [1, 1]} : vector<2x128xf32> to vector<2x32xf32>
    %70 = vector.extract_strided_slice %67 {offsets = [0, 64], sizes = [2, 32], strides = [1, 1]} : vector<2x128xf32> to vector<2x32xf32>
    %71 = vector.extract_strided_slice %67 {offsets = [0, 96], sizes = [2, 32], strides = [1, 1]} : vector<2x128xf32> to vector<2x32xf32>
    %72 = arith.mulf %45, %69 : vector<2x32xf32>
    %73 = arith.mulf %68, %70 : vector<2x32xf32>
    %74 = arith.addf %72, %73 : vector<2x32xf32>
    %75 = math.tanh %74 : vector<2x32xf32>
    %76 = arith.mulf %71, %75 : vector<2x32xf32>
    %c0_29 = arith.constant 0 : index
    %c2 = arith.constant 2 : index
    %c0_30 = arith.constant 0 : index
    %77 = vector.load %arg1[%c0_29, %c2, %c0_30] : memref<2x8x16xf32, #tpu.memory_space<vmem>>, vector<2x1x16xf32>
    %78 = vector.shape_cast %77 : vector<2x1x16xf32> to vector<2x16xf32>
    %cst_31 = arith.constant dense<0.000000e+00> : vector<2x128xf32>
    %79 = tpu.matmul %78, %8, %cst_31 {dimension_numbers = #tpu.dot_dimension_numbers<[1], [0], [0], [1], [0, 0, 1, 1], [], []>} : vector<2x16xf32>, vector<16x128xf32>, vector<2x128xf32> -> vector<2x128xf32>
    %cst_32 = arith.constant dense<0.000000e+00> : vector<2x128xf32>
    %80 = tpu.matmul %76, %9, %cst_32 {dimension_numbers = #tpu.dot_dimension_numbers<[1], [0], [0], [1], [0, 0, 1, 1], [], []>} : vector<2x32xf32>, vector<32x128xf32>, vector<2x128xf32> -> vector<2x128xf32>
    %81 = arith.addf %79, %80 : vector<2x128xf32>
    %82 = vector.broadcast %10 : vector<1x128xf32> to vector<2x128xf32>
    %83 = arith.addf %81, %82 : vector<2x128xf32>
    %cst_33 = arith.constant 2.000000e+00 : f32
    %84 = vector.broadcast %cst_33 : f32 to vector<2x128xf32>
    %85 = arith.mulf %84, %83 : vector<2x128xf32>
    %86 = arith.select %16, %85, %83 : vector<2x128xi1>, vector<2x128xf32>
    %87 = arith.negf %86 : vector<2x128xf32>
    %88 = math.exp %87 : vector<2x128xf32>
    %cst_34 = arith.constant 1.000000e+00 : f32
    %89 = vector.broadcast %cst_34 : f32 to vector<2x128xf32>
    %90 = arith.addf %89, %88 : vector<2x128xf32>
    %91 = arith.divf %89, %90 : vector<2x128xf32>
    %cst_35 = arith.constant 2.000000e+00 : f32
    %92 = vector.broadcast %cst_35 : f32 to vector<2x128xf32>
    %93 = arith.mulf %92, %91 : vector<2x128xf32>
    %cst_36 = arith.constant 1.000000e+00 : f32
    %94 = vector.broadcast %cst_36 : f32 to vector<2x128xf32>
    %95 = arith.subf %93, %94 : vector<2x128xf32>
    %96 = arith.select %16, %95, %91 : vector<2x128xi1>, vector<2x128xf32>
    %97 = vector.extract_strided_slice %96 {offsets = [0, 0], sizes = [2, 32], strides = [1, 1]} : vector<2x128xf32> to vector<2x32xf32>
    %98 = vector.extract_strided_slice %96 {offsets = [0, 32], sizes = [2, 32], strides = [1, 1]} : vector<2x128xf32> to vector<2x32xf32>
    %99 = vector.extract_strided_slice %96 {offsets = [0, 64], sizes = [2, 32], strides = [1, 1]} : vector<2x128xf32> to vector<2x32xf32>
    %100 = vector.extract_strided_slice %96 {offsets = [0, 96], sizes = [2, 32], strides = [1, 1]} : vector<2x128xf32> to vector<2x32xf32>
    %101 = arith.mulf %74, %98 : vector<2x32xf32>
    %102 = arith.mulf %97, %99 : vector<2x32xf32>
    %103 = arith.addf %101, %102 : vector<2x32xf32>
    %104 = math.tanh %103 : vector<2x32xf32>
    %105 = arith.mulf %100, %104 : vector<2x32xf32>
    %c0_37 = arith.constant 0 : index
    %c3 = arith.constant 3 : index
    %c0_38 = arith.constant 0 : index
    %106 = vector.load %arg1[%c0_37, %c3, %c0_38] : memref<2x8x16xf32, #tpu.memory_space<vmem>>, vector<2x1x16xf32>
    %107 = vector.shape_cast %106 : vector<2x1x16xf32> to vector<2x16xf32>
    %cst_39 = arith.constant dense<0.000000e+00> : vector<2x128xf32>
    %108 = tpu.matmul %107, %8, %cst_39 {dimension_numbers = #tpu.dot_dimension_numbers<[1], [0], [0], [1], [0, 0, 1, 1], [], []>} : vector<2x16xf32>, vector<16x128xf32>, vector<2x128xf32> -> vector<2x128xf32>
    %cst_40 = arith.constant dense<0.000000e+00> : vector<2x128xf32>
    %109 = tpu.matmul %105, %9, %cst_40 {dimension_numbers = #tpu.dot_dimension_numbers<[1], [0], [0], [1], [0, 0, 1, 1], [], []>} : vector<2x32xf32>, vector<32x128xf32>, vector<2x128xf32> -> vector<2x128xf32>
    %110 = arith.addf %108, %109 : vector<2x128xf32>
    %111 = vector.broadcast %10 : vector<1x128xf32> to vector<2x128xf32>
    %112 = arith.addf %110, %111 : vector<2x128xf32>
    %cst_41 = arith.constant 2.000000e+00 : f32
    %113 = vector.broadcast %cst_41 : f32 to vector<2x128xf32>
    %114 = arith.mulf %113, %112 : vector<2x128xf32>
    %115 = arith.select %16, %114, %112 : vector<2x128xi1>, vector<2x128xf32>
    %116 = arith.negf %115 : vector<2x128xf32>
    %117 = math.exp %116 : vector<2x128xf32>
    %cst_42 = arith.constant 1.000000e+00 : f32
    %118 = vector.broadcast %cst_42 : f32 to vector<2x128xf32>
    %119 = arith.addf %118, %117 : vector<2x128xf32>
    %120 = arith.divf %118, %119 : vector<2x128xf32>
    %cst_43 = arith.constant 2.000000e+00 : f32
    %121 = vector.broadcast %cst_43 : f32 to vector<2x128xf32>
    %122 = arith.mulf %121, %120 : vector<2x128xf32>
    %cst_44 = arith.constant 1.000000e+00 : f32
    %123 = vector.broadcast %cst_44 : f32 to vector<2x128xf32>
    %124 = arith.subf %122, %123 : vector<2x128xf32>
    %125 = arith.select %16, %124, %120 : vector<2x128xi1>, vector<2x128xf32>
    %126 = vector.extract_strided_slice %125 {offsets = [0, 0], sizes = [2, 32], strides = [1, 1]} : vector<2x128xf32> to vector<2x32xf32>
    %127 = vector.extract_strided_slice %125 {offsets = [0, 32], sizes = [2, 32], strides = [1, 1]} : vector<2x128xf32> to vector<2x32xf32>
    %128 = vector.extract_strided_slice %125 {offsets = [0, 64], sizes = [2, 32], strides = [1, 1]} : vector<2x128xf32> to vector<2x32xf32>
    %129 = vector.extract_strided_slice %125 {offsets = [0, 96], sizes = [2, 32], strides = [1, 1]} : vector<2x128xf32> to vector<2x32xf32>
    %130 = arith.mulf %103, %127 : vector<2x32xf32>
    %131 = arith.mulf %126, %128 : vector<2x32xf32>
    %132 = arith.addf %130, %131 : vector<2x32xf32>
    %133 = math.tanh %132 : vector<2x32xf32>
    %134 = arith.mulf %129, %133 : vector<2x32xf32>
    %c0_45 = arith.constant 0 : index
    %c4 = arith.constant 4 : index
    %c0_46 = arith.constant 0 : index
    %135 = vector.load %arg1[%c0_45, %c4, %c0_46] : memref<2x8x16xf32, #tpu.memory_space<vmem>>, vector<2x1x16xf32>
    %136 = vector.shape_cast %135 : vector<2x1x16xf32> to vector<2x16xf32>
    %cst_47 = arith.constant dense<0.000000e+00> : vector<2x128xf32>
    %137 = tpu.matmul %136, %8, %cst_47 {dimension_numbers = #tpu.dot_dimension_numbers<[1], [0], [0], [1], [0, 0, 1, 1], [], []>} : vector<2x16xf32>, vector<16x128xf32>, vector<2x128xf32> -> vector<2x128xf32>
    %cst_48 = arith.constant dense<0.000000e+00> : vector<2x128xf32>
    %138 = tpu.matmul %134, %9, %cst_48 {dimension_numbers = #tpu.dot_dimension_numbers<[1], [0], [0], [1], [0, 0, 1, 1], [], []>} : vector<2x32xf32>, vector<32x128xf32>, vector<2x128xf32> -> vector<2x128xf32>
    %139 = arith.addf %137, %138 : vector<2x128xf32>
    %140 = vector.broadcast %10 : vector<1x128xf32> to vector<2x128xf32>
    %141 = arith.addf %139, %140 : vector<2x128xf32>
    %cst_49 = arith.constant 2.000000e+00 : f32
    %142 = vector.broadcast %cst_49 : f32 to vector<2x128xf32>
    %143 = arith.mulf %142, %141 : vector<2x128xf32>
    %144 = arith.select %16, %143, %141 : vector<2x128xi1>, vector<2x128xf32>
    %145 = arith.negf %144 : vector<2x128xf32>
    %146 = math.exp %145 : vector<2x128xf32>
    %cst_50 = arith.constant 1.000000e+00 : f32
    %147 = vector.broadcast %cst_50 : f32 to vector<2x128xf32>
    %148 = arith.addf %147, %146 : vector<2x128xf32>
    %149 = arith.divf %147, %148 : vector<2x128xf32>
    %cst_51 = arith.constant 2.000000e+00 : f32
    %150 = vector.broadcast %cst_51 : f32 to vector<2x128xf32>
    %151 = arith.mulf %150, %149 : vector<2x128xf32>
    %cst_52 = arith.constant 1.000000e+00 : f32
    %152 = vector.broadcast %cst_52 : f32 to vector<2x128xf32>
    %153 = arith.subf %151, %152 : vector<2x128xf32>
    %154 = arith.select %16, %153, %149 : vector<2x128xi1>, vector<2x128xf32>
    %155 = vector.extract_strided_slice %154 {offsets = [0, 0], sizes = [2, 32], strides = [1, 1]} : vector<2x128xf32> to vector<2x32xf32>
    %156 = vector.extract_strided_slice %154 {offsets = [0, 32], sizes = [2, 32], strides = [1, 1]} : vector<2x128xf32> to vector<2x32xf32>
    %157 = vector.extract_strided_slice %154 {offsets = [0, 64], sizes = [2, 32], strides = [1, 1]} : vector<2x128xf32> to vector<2x32xf32>
    %158 = vector.extract_strided_slice %154 {offsets = [0, 96], sizes = [2, 32], strides = [1, 1]} : vector<2x128xf32> to vector<2x32xf32>
    %159 = arith.mulf %132, %156 : vector<2x32xf32>
    %160 = arith.mulf %155, %157 : vector<2x32xf32>
    %161 = arith.addf %159, %160 : vector<2x32xf32>
    %162 = math.tanh %161 : vector<2x32xf32>
    %163 = arith.mulf %158, %162 : vector<2x32xf32>
    %c0_53 = arith.constant 0 : index
    %c5 = arith.constant 5 : index
    %c0_54 = arith.constant 0 : index
    %164 = vector.load %arg1[%c0_53, %c5, %c0_54] : memref<2x8x16xf32, #tpu.memory_space<vmem>>, vector<2x1x16xf32>
    %165 = vector.shape_cast %164 : vector<2x1x16xf32> to vector<2x16xf32>
    %cst_55 = arith.constant dense<0.000000e+00> : vector<2x128xf32>
    %166 = tpu.matmul %165, %8, %cst_55 {dimension_numbers = #tpu.dot_dimension_numbers<[1], [0], [0], [1], [0, 0, 1, 1], [], []>} : vector<2x16xf32>, vector<16x128xf32>, vector<2x128xf32> -> vector<2x128xf32>
    %cst_56 = arith.constant dense<0.000000e+00> : vector<2x128xf32>
    %167 = tpu.matmul %163, %9, %cst_56 {dimension_numbers = #tpu.dot_dimension_numbers<[1], [0], [0], [1], [0, 0, 1, 1], [], []>} : vector<2x32xf32>, vector<32x128xf32>, vector<2x128xf32> -> vector<2x128xf32>
    %168 = arith.addf %166, %167 : vector<2x128xf32>
    %169 = vector.broadcast %10 : vector<1x128xf32> to vector<2x128xf32>
    %170 = arith.addf %168, %169 : vector<2x128xf32>
    %cst_57 = arith.constant 2.000000e+00 : f32
    %171 = vector.broadcast %cst_57 : f32 to vector<2x128xf32>
    %172 = arith.mulf %171, %170 : vector<2x128xf32>
    %173 = arith.select %16, %172, %170 : vector<2x128xi1>, vector<2x128xf32>
    %174 = arith.negf %173 : vector<2x128xf32>
    %175 = math.exp %174 : vector<2x128xf32>
    %cst_58 = arith.constant 1.000000e+00 : f32
    %176 = vector.broadcast %cst_58 : f32 to vector<2x128xf32>
    %177 = arith.addf %176, %175 : vector<2x128xf32>
    %178 = arith.divf %176, %177 : vector<2x128xf32>
    %cst_59 = arith.constant 2.000000e+00 : f32
    %179 = vector.broadcast %cst_59 : f32 to vector<2x128xf32>
    %180 = arith.mulf %179, %178 : vector<2x128xf32>
    %cst_60 = arith.constant 1.000000e+00 : f32
    %181 = vector.broadcast %cst_60 : f32 to vector<2x128xf32>
    %182 = arith.subf %180, %181 : vector<2x128xf32>
    %183 = arith.select %16, %182, %178 : vector<2x128xi1>, vector<2x128xf32>
    %184 = vector.extract_strided_slice %183 {offsets = [0, 0], sizes = [2, 32], strides = [1, 1]} : vector<2x128xf32> to vector<2x32xf32>
    %185 = vector.extract_strided_slice %183 {offsets = [0, 32], sizes = [2, 32], strides = [1, 1]} : vector<2x128xf32> to vector<2x32xf32>
    %186 = vector.extract_strided_slice %183 {offsets = [0, 64], sizes = [2, 32], strides = [1, 1]} : vector<2x128xf32> to vector<2x32xf32>
    %187 = vector.extract_strided_slice %183 {offsets = [0, 96], sizes = [2, 32], strides = [1, 1]} : vector<2x128xf32> to vector<2x32xf32>
    %188 = arith.mulf %161, %185 : vector<2x32xf32>
    %189 = arith.mulf %184, %186 : vector<2x32xf32>
    %190 = arith.addf %188, %189 : vector<2x32xf32>
    %191 = math.tanh %190 : vector<2x32xf32>
    %192 = arith.mulf %187, %191 : vector<2x32xf32>
    %c0_61 = arith.constant 0 : index
    %c6 = arith.constant 6 : index
    %c0_62 = arith.constant 0 : index
    %193 = vector.load %arg1[%c0_61, %c6, %c0_62] : memref<2x8x16xf32, #tpu.memory_space<vmem>>, vector<2x1x16xf32>
    %194 = vector.shape_cast %193 : vector<2x1x16xf32> to vector<2x16xf32>
    %cst_63 = arith.constant dense<0.000000e+00> : vector<2x128xf32>
    %195 = tpu.matmul %194, %8, %cst_63 {dimension_numbers = #tpu.dot_dimension_numbers<[1], [0], [0], [1], [0, 0, 1, 1], [], []>} : vector<2x16xf32>, vector<16x128xf32>, vector<2x128xf32> -> vector<2x128xf32>
    %cst_64 = arith.constant dense<0.000000e+00> : vector<2x128xf32>
    %196 = tpu.matmul %192, %9, %cst_64 {dimension_numbers = #tpu.dot_dimension_numbers<[1], [0], [0], [1], [0, 0, 1, 1], [], []>} : vector<2x32xf32>, vector<32x128xf32>, vector<2x128xf32> -> vector<2x128xf32>
    %197 = arith.addf %195, %196 : vector<2x128xf32>
    %198 = vector.broadcast %10 : vector<1x128xf32> to vector<2x128xf32>
    %199 = arith.addf %197, %198 : vector<2x128xf32>
    %cst_65 = arith.constant 2.000000e+00 : f32
    %200 = vector.broadcast %cst_65 : f32 to vector<2x128xf32>
    %201 = arith.mulf %200, %199 : vector<2x128xf32>
    %202 = arith.select %16, %201, %199 : vector<2x128xi1>, vector<2x128xf32>
    %203 = arith.negf %202 : vector<2x128xf32>
    %204 = math.exp %203 : vector<2x128xf32>
    %cst_66 = arith.constant 1.000000e+00 : f32
    %205 = vector.broadcast %cst_66 : f32 to vector<2x128xf32>
    %206 = arith.addf %205, %204 : vector<2x128xf32>
    %207 = arith.divf %205, %206 : vector<2x128xf32>
    %cst_67 = arith.constant 2.000000e+00 : f32
    %208 = vector.broadcast %cst_67 : f32 to vector<2x128xf32>
    %209 = arith.mulf %208, %207 : vector<2x128xf32>
    %cst_68 = arith.constant 1.000000e+00 : f32
    %210 = vector.broadcast %cst_68 : f32 to vector<2x128xf32>
    %211 = arith.subf %209, %210 : vector<2x128xf32>
    %212 = arith.select %16, %211, %207 : vector<2x128xi1>, vector<2x128xf32>
    %213 = vector.extract_strided_slice %212 {offsets = [0, 0], sizes = [2, 32], strides = [1, 1]} : vector<2x128xf32> to vector<2x32xf32>
    %214 = vector.extract_strided_slice %212 {offsets = [0, 32], sizes = [2, 32], strides = [1, 1]} : vector<2x128xf32> to vector<2x32xf32>
    %215 = vector.extract_strided_slice %212 {offsets = [0, 64], sizes = [2, 32], strides = [1, 1]} : vector<2x128xf32> to vector<2x32xf32>
    %216 = vector.extract_strided_slice %212 {offsets = [0, 96], sizes = [2, 32], strides = [1, 1]} : vector<2x128xf32> to vector<2x32xf32>
    %217 = arith.mulf %190, %214 : vector<2x32xf32>
    %218 = arith.mulf %213, %215 : vector<2x32xf32>
    %219 = arith.addf %217, %218 : vector<2x32xf32>
    %220 = math.tanh %219 : vector<2x32xf32>
    %221 = arith.mulf %216, %220 : vector<2x32xf32>
    %c0_69 = arith.constant 0 : index
    %c7 = arith.constant 7 : index
    %c0_70 = arith.constant 0 : index
    %222 = vector.load %arg1[%c0_69, %c7, %c0_70] : memref<2x8x16xf32, #tpu.memory_space<vmem>>, vector<2x1x16xf32>
    %223 = vector.shape_cast %222 : vector<2x1x16xf32> to vector<2x16xf32>
    %cst_71 = arith.constant dense<0.000000e+00> : vector<2x128xf32>
    %224 = tpu.matmul %223, %8, %cst_71 {dimension_numbers = #tpu.dot_dimension_numbers<[1], [0], [0], [1], [0, 0, 1, 1], [], []>} : vector<2x16xf32>, vector<16x128xf32>, vector<2x128xf32> -> vector<2x128xf32>
    %cst_72 = arith.constant dense<0.000000e+00> : vector<2x128xf32>
    %225 = tpu.matmul %221, %9, %cst_72 {dimension_numbers = #tpu.dot_dimension_numbers<[1], [0], [0], [1], [0, 0, 1, 1], [], []>} : vector<2x32xf32>, vector<32x128xf32>, vector<2x128xf32> -> vector<2x128xf32>
    %226 = arith.addf %224, %225 : vector<2x128xf32>
    %227 = vector.broadcast %10 : vector<1x128xf32> to vector<2x128xf32>
    %228 = arith.addf %226, %227 : vector<2x128xf32>
    %cst_73 = arith.constant 2.000000e+00 : f32
    %229 = vector.broadcast %cst_73 : f32 to vector<2x128xf32>
    %230 = arith.mulf %229, %228 : vector<2x128xf32>
    %231 = arith.select %16, %230, %228 : vector<2x128xi1>, vector<2x128xf32>
    %232 = arith.negf %231 : vector<2x128xf32>
    %233 = math.exp %232 : vector<2x128xf32>
    %cst_74 = arith.constant 1.000000e+00 : f32
    %234 = vector.broadcast %cst_74 : f32 to vector<2x128xf32>
    %235 = arith.addf %234, %233 : vector<2x128xf32>
    %236 = arith.divf %234, %235 : vector<2x128xf32>
    %cst_75 = arith.constant 2.000000e+00 : f32
    %237 = vector.broadcast %cst_75 : f32 to vector<2x128xf32>
    %238 = arith.mulf %237, %236 : vector<2x128xf32>
    %cst_76 = arith.constant 1.000000e+00 : f32
    %239 = vector.broadcast %cst_76 : f32 to vector<2x128xf32>
    %240 = arith.subf %238, %239 : vector<2x128xf32>
    %241 = arith.select %16, %240, %236 : vector<2x128xi1>, vector<2x128xf32>
    %242 = vector.extract_strided_slice %241 {offsets = [0, 0], sizes = [2, 32], strides = [1, 1]} : vector<2x128xf32> to vector<2x32xf32>
    %243 = vector.extract_strided_slice %241 {offsets = [0, 32], sizes = [2, 32], strides = [1, 1]} : vector<2x128xf32> to vector<2x32xf32>
    %244 = vector.extract_strided_slice %241 {offsets = [0, 64], sizes = [2, 32], strides = [1, 1]} : vector<2x128xf32> to vector<2x32xf32>
    %245 = vector.extract_strided_slice %241 {offsets = [0, 96], sizes = [2, 32], strides = [1, 1]} : vector<2x128xf32> to vector<2x32xf32>
    %246 = arith.mulf %219, %243 : vector<2x32xf32>
    %247 = arith.mulf %242, %244 : vector<2x32xf32>
    %248 = arith.addf %246, %247 : vector<2x32xf32>
    %249 = math.tanh %248 : vector<2x32xf32>
    %250 = arith.mulf %245, %249 : vector<2x32xf32>
    %251 = arith.truncf %250 : vector<2x32xf32> to vector<2x32xbf16>
    %c4_i32_77 = arith.constant 4 : i32
    %252 = arith.muli %arg0, %c4_i32_77 : i32
    %c1_i32 = arith.constant 1 : i32
    %253 = arith.addi %252, %c1_i32 : i32
    %c1_i32_78 = arith.constant 1 : i32
    %c1_i32_79 = arith.constant 1 : i32
    %c0_i32_80 = arith.constant 0 : i32
    %c0_i32_81 = arith.constant 0 : i32
    %254 = tpu.memref_slice %arg6[%253, %c0_i32_80, %c0_i32_81] : memref<4x32x12544xbf16, #tpu.memory_space<any>> -> memref<1x32x12544xbf16, #tpu.memory_space<any>>
    %255 = tpu.memref_squeeze %254 : memref<1x32x12544xbf16, #tpu.memory_space<any>> -> memref<32x12544xbf16, #tpu.memory_space<any>>
    %c0_i32_82 = arith.constant 0 : i32
    %c0_i32_83 = arith.constant 0 : i32
    %256 = tpu.memref_slice %arg8[%c1_i32_78, %c0_i32_82, %c0_i32_83] : memref<2x32x12544xbf16, #tpu.memory_space<vmem>> -> memref<1x32x12544xbf16, #tpu.memory_space<vmem>>
    %257 = tpu.memref_squeeze %256 : memref<1x32x12544xbf16, #tpu.memory_space<vmem>> -> memref<32x12544xbf16, #tpu.memory_space<vmem>>
    %258 = tpu.memref_slice %arg9[%c1_i32_79] : memref<2x!tpu.dma_semaphore, #tpu.memory_space<semaphore_mem>> -> memref<1x!tpu.dma_semaphore, #tpu.memory_space<semaphore_mem>>
    %259 = tpu.memref_squeeze %258 : memref<1x!tpu.dma_semaphore, #tpu.memory_space<semaphore_mem>> -> memref<!tpu.dma_semaphore, #tpu.memory_space<semaphore_mem>>
    tpu.enqueue_dma source(%255 : memref<32x12544xbf16, #tpu.memory_space<any>>) target(%257 : memref<32x12544xbf16, #tpu.memory_space<vmem>>) target_semaphore(%259 : memref<!tpu.dma_semaphore, #tpu.memory_space<semaphore_mem>>)
    %c4_i32_84 = arith.constant 4 : i32
    %260 = arith.muli %arg0, %c4_i32_84 : i32
    %c0_i32_85 = arith.constant 0 : i32
    %261 = arith.addi %260, %c0_i32_85 : i32
    %c0_i32_86 = arith.constant 0 : i32
    %c0_i32_87 = arith.constant 0 : i32
    %c0_i32_88 = arith.constant 0 : i32
    %c0_i32_89 = arith.constant 0 : i32
    %262 = tpu.memref_slice %arg6[%261, %c0_i32_88, %c0_i32_89] : memref<4x32x12544xbf16, #tpu.memory_space<any>> -> memref<1x32x12544xbf16, #tpu.memory_space<any>>
    %263 = tpu.memref_squeeze %262 : memref<1x32x12544xbf16, #tpu.memory_space<any>> -> memref<32x12544xbf16, #tpu.memory_space<any>>
    %c0_i32_90 = arith.constant 0 : i32
    %c0_i32_91 = arith.constant 0 : i32
    %264 = tpu.memref_slice %arg8[%c0_i32_86, %c0_i32_90, %c0_i32_91] : memref<2x32x12544xbf16, #tpu.memory_space<vmem>> -> memref<1x32x12544xbf16, #tpu.memory_space<vmem>>
    %265 = tpu.memref_squeeze %264 : memref<1x32x12544xbf16, #tpu.memory_space<vmem>> -> memref<32x12544xbf16, #tpu.memory_space<vmem>>
    %266 = tpu.memref_slice %arg9[%c0_i32_87] : memref<2x!tpu.dma_semaphore, #tpu.memory_space<semaphore_mem>> -> memref<1x!tpu.dma_semaphore, #tpu.memory_space<semaphore_mem>>
    %267 = tpu.memref_squeeze %266 : memref<1x!tpu.dma_semaphore, #tpu.memory_space<semaphore_mem>> -> memref<!tpu.dma_semaphore, #tpu.memory_space<semaphore_mem>>
    tpu.wait_dma2 semaphore(%267 : memref<!tpu.dma_semaphore, #tpu.memory_space<semaphore_mem>>) src(%263 : memref<32x12544xbf16, #tpu.memory_space<any>>) dst(%265 : memref<32x12544xbf16, #tpu.memory_space<vmem>>)
    %c0_92 = arith.constant 0 : index
    %c0_93 = arith.constant 0 : index
    %c0_94 = arith.constant 0 : index
    %268 = vector.load %arg8[%c0_92, %c0_93, %c0_94] : memref<2x32x12544xbf16, #tpu.memory_space<vmem>>, vector<1x32x12544xbf16>
    %269 = vector.shape_cast %268 : vector<1x32x12544xbf16> to vector<32x12544xbf16>
    %cst_95 = arith.constant dense<0.000000e+00> : vector<2x12544xf32>
    %270 = tpu.matmul %251, %269, %cst_95 {dimension_numbers = #tpu.dot_dimension_numbers<[1], [0], [0], [1], [0, 0, 1, 1], [], []>} : vector<2x32xbf16>, vector<32x12544xbf16>, vector<2x12544xf32> -> vector<2x12544xf32>
    %c0_96 = arith.constant 0 : index
    %c0_97 = arith.constant 0 : index
    %271 = vector.load %arg5[%c0_96, %c0_97] : memref<1x50176xbf16, #tpu.memory_space<vmem>>, vector<1x12544xbf16>
    %272 = arith.extf %271 : vector<1x12544xbf16> to vector<1x12544xf32>
    %273 = vector.broadcast %272 : vector<1x12544xf32> to vector<2x12544xf32>
    %274 = arith.addf %270, %273 : vector<2x12544xf32>
    %c0_98 = arith.constant 0 : index
    %c0_99 = arith.constant 0 : index
    %275 = vector.load %arg7[%c0_98, %c0_99] : memref<2x50176xf32, #tpu.memory_space<vmem>>, vector<2x12544xf32>
    tpu.vector_store %arg7[%c0_98, %c0_99], %274 {strides = array<i32>} : memref<2x50176xf32, #tpu.memory_space<vmem>>, vector<2x12544xf32>,
    %c4_i32_100 = arith.constant 4 : i32
    %276 = arith.muli %arg0, %c4_i32_100 : i32
    %c2_i32 = arith.constant 2 : i32
    %277 = arith.addi %276, %c2_i32 : i32
    %c0_i32_101 = arith.constant 0 : i32
    %c0_i32_102 = arith.constant 0 : i32
    %c0_i32_103 = arith.constant 0 : i32
    %c0_i32_104 = arith.constant 0 : i32
    %278 = tpu.memref_slice %arg6[%277, %c0_i32_103, %c0_i32_104] : memref<4x32x12544xbf16, #tpu.memory_space<any>> -> memref<1x32x12544xbf16, #tpu.memory_space<any>>
    %279 = tpu.memref_squeeze %278 : memref<1x32x12544xbf16, #tpu.memory_space<any>> -> memref<32x12544xbf16, #tpu.memory_space<any>>
    %c0_i32_105 = arith.constant 0 : i32
    %c0_i32_106 = arith.constant 0 : i32
    %280 = tpu.memref_slice %arg8[%c0_i32_101, %c0_i32_105, %c0_i32_106] : memref<2x32x12544xbf16, #tpu.memory_space<vmem>> -> memref<1x32x12544xbf16, #tpu.memory_space<vmem>>
    %281 = tpu.memref_squeeze %280 : memref<1x32x12544xbf16, #tpu.memory_space<vmem>> -> memref<32x12544xbf16, #tpu.memory_space<vmem>>
    %282 = tpu.memref_slice %arg9[%c0_i32_102] : memref<2x!tpu.dma_semaphore, #tpu.memory_space<semaphore_mem>> -> memref<1x!tpu.dma_semaphore, #tpu.memory_space<semaphore_mem>>
    %283 = tpu.memref_squeeze %282 : memref<1x!tpu.dma_semaphore, #tpu.memory_space<semaphore_mem>> -> memref<!tpu.dma_semaphore, #tpu.memory_space<semaphore_mem>>
    tpu.enqueue_dma source(%279 : memref<32x12544xbf16, #tpu.memory_space<any>>) target(%281 : memref<32x12544xbf16, #tpu.memory_space<vmem>>) target_semaphore(%283 : memref<!tpu.dma_semaphore, #tpu.memory_space<semaphore_mem>>)
    %c4_i32_107 = arith.constant 4 : i32
    %284 = arith.muli %arg0, %c4_i32_107 : i32
    %c1_i32_108 = arith.constant 1 : i32
    %285 = arith.addi %284, %c1_i32_108 : i32
    %c1_i32_109 = arith.constant 1 : i32
    %c1_i32_110 = arith.constant 1 : i32
    %c0_i32_111 = arith.constant 0 : i32
    %c0_i32_112 = arith.constant 0 : i32
    %286 = tpu.memref_slice %arg6[%285, %c0_i32_111, %c0_i32_112] : memref<4x32x12544xbf16, #tpu.memory_space<any>> -> memref<1x32x12544xbf16, #tpu.memory_space<any>>
    %287 = tpu.memref_squeeze %286 : memref<1x32x12544xbf16, #tpu.memory_space<any>> -> memref<32x12544xbf16, #tpu.memory_space<any>>
    %c0_i32_113 = arith.constant 0 : i32
    %c0_i32_114 = arith.constant 0 : i32
    %288 = tpu.memref_slice %arg8[%c1_i32_109, %c0_i32_113, %c0_i32_114] : memref<2x32x12544xbf16, #tpu.memory_space<vmem>> -> memref<1x32x12544xbf16, #tpu.memory_space<vmem>>
    %289 = tpu.memref_squeeze %288 : memref<1x32x12544xbf16, #tpu.memory_space<vmem>> -> memref<32x12544xbf16, #tpu.memory_space<vmem>>
    %290 = tpu.memref_slice %arg9[%c1_i32_110] : memref<2x!tpu.dma_semaphore, #tpu.memory_space<semaphore_mem>> -> memref<1x!tpu.dma_semaphore, #tpu.memory_space<semaphore_mem>>
    %291 = tpu.memref_squeeze %290 : memref<1x!tpu.dma_semaphore, #tpu.memory_space<semaphore_mem>> -> memref<!tpu.dma_semaphore, #tpu.memory_space<semaphore_mem>>
    tpu.wait_dma2 semaphore(%291 : memref<!tpu.dma_semaphore, #tpu.memory_space<semaphore_mem>>) src(%287 : memref<32x12544xbf16, #tpu.memory_space<any>>) dst(%289 : memref<32x12544xbf16, #tpu.memory_space<vmem>>)
    %c1_115 = arith.constant 1 : index
    %c0_116 = arith.constant 0 : index
    %c0_117 = arith.constant 0 : index
    %292 = vector.load %arg8[%c1_115, %c0_116, %c0_117] : memref<2x32x12544xbf16, #tpu.memory_space<vmem>>, vector<1x32x12544xbf16>
    %293 = vector.shape_cast %292 : vector<1x32x12544xbf16> to vector<32x12544xbf16>
    %cst_118 = arith.constant dense<0.000000e+00> : vector<2x12544xf32>
    %294 = tpu.matmul %251, %293, %cst_118 {dimension_numbers = #tpu.dot_dimension_numbers<[1], [0], [0], [1], [0, 0, 1, 1], [], []>} : vector<2x32xbf16>, vector<32x12544xbf16>, vector<2x12544xf32> -> vector<2x12544xf32>
    %c0_119 = arith.constant 0 : index
    %c12544 = arith.constant 12544 : index
    %295 = vector.load %arg5[%c0_119, %c12544] : memref<1x50176xbf16, #tpu.memory_space<vmem>>, vector<1x12544xbf16>
    %296 = arith.extf %295 : vector<1x12544xbf16> to vector<1x12544xf32>
    %297 = vector.broadcast %296 : vector<1x12544xf32> to vector<2x12544xf32>
    %298 = arith.addf %294, %297 : vector<2x12544xf32>
    %c0_120 = arith.constant 0 : index
    %c12544_121 = arith.constant 12544 : index
    %299 = vector.load %arg7[%c0_120, %c12544_121] : memref<2x50176xf32, #tpu.memory_space<vmem>>, vector<2x12544xf32>
    tpu.vector_store %arg7[%c0_120, %c12544_121], %298 {strides = array<i32>} : memref<2x50176xf32, #tpu.memory_space<vmem>>, vector<2x12544xf32>,
    %c4_i32_122 = arith.constant 4 : i32
    %300 = arith.muli %arg0, %c4_i32_122 : i32
    %c3_i32 = arith.constant 3 : i32
    %301 = arith.addi %300, %c3_i32 : i32
    %c1_i32_123 = arith.constant 1 : i32
    %c1_i32_124 = arith.constant 1 : i32
    %c0_i32_125 = arith.constant 0 : i32
    %c0_i32_126 = arith.constant 0 : i32
    %302 = tpu.memref_slice %arg6[%301, %c0_i32_125, %c0_i32_126] : memref<4x32x12544xbf16, #tpu.memory_space<any>> -> memref<1x32x12544xbf16, #tpu.memory_space<any>>
    %303 = tpu.memref_squeeze %302 : memref<1x32x12544xbf16, #tpu.memory_space<any>> -> memref<32x12544xbf16, #tpu.memory_space<any>>
    %c0_i32_127 = arith.constant 0 : i32
    %c0_i32_128 = arith.constant 0 : i32
    %304 = tpu.memref_slice %arg8[%c1_i32_123, %c0_i32_127, %c0_i32_128] : memref<2x32x12544xbf16, #tpu.memory_space<vmem>> -> memref<1x32x12544xbf16, #tpu.memory_space<vmem>>
    %305 = tpu.memref_squeeze %304 : memref<1x32x12544xbf16, #tpu.memory_space<vmem>> -> memref<32x12544xbf16, #tpu.memory_space<vmem>>
    %306 = tpu.memref_slice %arg9[%c1_i32_124] : memref<2x!tpu.dma_semaphore, #tpu.memory_space<semaphore_mem>> -> memref<1x!tpu.dma_semaphore, #tpu.memory_space<semaphore_mem>>
    %307 = tpu.memref_squeeze %306 : memref<1x!tpu.dma_semaphore, #tpu.memory_space<semaphore_mem>> -> memref<!tpu.dma_semaphore, #tpu.memory_space<semaphore_mem>>
    tpu.enqueue_dma source(%303 : memref<32x12544xbf16, #tpu.memory_space<any>>) target(%305 : memref<32x12544xbf16, #tpu.memory_space<vmem>>) target_semaphore(%307 : memref<!tpu.dma_semaphore, #tpu.memory_space<semaphore_mem>>)
    %c4_i32_129 = arith.constant 4 : i32
    %308 = arith.muli %arg0, %c4_i32_129 : i32
    %c2_i32_130 = arith.constant 2 : i32
    %309 = arith.addi %308, %c2_i32_130 : i32
    %c0_i32_131 = arith.constant 0 : i32
    %c0_i32_132 = arith.constant 0 : i32
    %c0_i32_133 = arith.constant 0 : i32
    %c0_i32_134 = arith.constant 0 : i32
    %310 = tpu.memref_slice %arg6[%309, %c0_i32_133, %c0_i32_134] : memref<4x32x12544xbf16, #tpu.memory_space<any>> -> memref<1x32x12544xbf16, #tpu.memory_space<any>>
    %311 = tpu.memref_squeeze %310 : memref<1x32x12544xbf16, #tpu.memory_space<any>> -> memref<32x12544xbf16, #tpu.memory_space<any>>
    %c0_i32_135 = arith.constant 0 : i32
    %c0_i32_136 = arith.constant 0 : i32
    %312 = tpu.memref_slice %arg8[%c0_i32_131, %c0_i32_135, %c0_i32_136] : memref<2x32x12544xbf16, #tpu.memory_space<vmem>> -> memref<1x32x12544xbf16, #tpu.memory_space<vmem>>
    %313 = tpu.memref_squeeze %312 : memref<1x32x12544xbf16, #tpu.memory_space<vmem>> -> memref<32x12544xbf16, #tpu.memory_space<vmem>>
    %314 = tpu.memref_slice %arg9[%c0_i32_132] : memref<2x!tpu.dma_semaphore, #tpu.memory_space<semaphore_mem>> -> memref<1x!tpu.dma_semaphore, #tpu.memory_space<semaphore_mem>>
    %315 = tpu.memref_squeeze %314 : memref<1x!tpu.dma_semaphore, #tpu.memory_space<semaphore_mem>> -> memref<!tpu.dma_semaphore, #tpu.memory_space<semaphore_mem>>
    tpu.wait_dma2 semaphore(%315 : memref<!tpu.dma_semaphore, #tpu.memory_space<semaphore_mem>>) src(%311 : memref<32x12544xbf16, #tpu.memory_space<any>>) dst(%313 : memref<32x12544xbf16, #tpu.memory_space<vmem>>)
    %c0_137 = arith.constant 0 : index
    %c0_138 = arith.constant 0 : index
    %c0_139 = arith.constant 0 : index
    %316 = vector.load %arg8[%c0_137, %c0_138, %c0_139] : memref<2x32x12544xbf16, #tpu.memory_space<vmem>>, vector<1x32x12544xbf16>
    %317 = vector.shape_cast %316 : vector<1x32x12544xbf16> to vector<32x12544xbf16>
    %cst_140 = arith.constant dense<0.000000e+00> : vector<2x12544xf32>
    %318 = tpu.matmul %251, %317, %cst_140 {dimension_numbers = #tpu.dot_dimension_numbers<[1], [0], [0], [1], [0, 0, 1, 1], [], []>} : vector<2x32xbf16>, vector<32x12544xbf16>, vector<2x12544xf32> -> vector<2x12544xf32>
    %c0_141 = arith.constant 0 : index
    %c25088 = arith.constant 25088 : index
    %319 = vector.load %arg5[%c0_141, %c25088] : memref<1x50176xbf16, #tpu.memory_space<vmem>>, vector<1x12544xbf16>
    %320 = arith.extf %319 : vector<1x12544xbf16> to vector<1x12544xf32>
    %321 = vector.broadcast %320 : vector<1x12544xf32> to vector<2x12544xf32>
    %322 = arith.addf %318, %321 : vector<2x12544xf32>
    %c0_142 = arith.constant 0 : index
    %c25088_143 = arith.constant 25088 : index
    %323 = vector.load %arg7[%c0_142, %c25088_143] : memref<2x50176xf32, #tpu.memory_space<vmem>>, vector<2x12544xf32>
    tpu.vector_store %arg7[%c0_142, %c25088_143], %322 {strides = array<i32>} : memref<2x50176xf32, #tpu.memory_space<vmem>>, vector<2x12544xf32>,
    %c4_i32_144 = arith.constant 4 : i32
    %324 = arith.muli %arg0, %c4_i32_144 : i32
    %c3_i32_145 = arith.constant 3 : i32
    %325 = arith.addi %324, %c3_i32_145 : i32
    %c1_i32_146 = arith.constant 1 : i32
    %c1_i32_147 = arith.constant 1 : i32
    %c0_i32_148 = arith.constant 0 : i32
    %c0_i32_149 = arith.constant 0 : i32
    %326 = tpu.memref_slice %arg6[%325, %c0_i32_148, %c0_i32_149] : memref<4x32x12544xbf16, #tpu.memory_space<any>> -> memref<1x32x12544xbf16, #tpu.memory_space<any>>
    %327 = tpu.memref_squeeze %326 : memref<1x32x12544xbf16, #tpu.memory_space<any>> -> memref<32x12544xbf16, #tpu.memory_space<any>>
    %c0_i32_150 = arith.constant 0 : i32
    %c0_i32_151 = arith.constant 0 : i32
    %328 = tpu.memref_slice %arg8[%c1_i32_146, %c0_i32_150, %c0_i32_151] : memref<2x32x12544xbf16, #tpu.memory_space<vmem>> -> memref<1x32x12544xbf16, #tpu.memory_space<vmem>>
    %329 = tpu.memref_squeeze %328 : memref<1x32x12544xbf16, #tpu.memory_space<vmem>> -> memref<32x12544xbf16, #tpu.memory_space<vmem>>
    %330 = tpu.memref_slice %arg9[%c1_i32_147] : memref<2x!tpu.dma_semaphore, #tpu.memory_space<semaphore_mem>> -> memref<1x!tpu.dma_semaphore, #tpu.memory_space<semaphore_mem>>
    %331 = tpu.memref_squeeze %330 : memref<1x!tpu.dma_semaphore, #tpu.memory_space<semaphore_mem>> -> memref<!tpu.dma_semaphore, #tpu.memory_space<semaphore_mem>>
    tpu.wait_dma2 semaphore(%331 : memref<!tpu.dma_semaphore, #tpu.memory_space<semaphore_mem>>) src(%327 : memref<32x12544xbf16, #tpu.memory_space<any>>) dst(%329 : memref<32x12544xbf16, #tpu.memory_space<vmem>>)
    %c1_152 = arith.constant 1 : index
    %c0_153 = arith.constant 0 : index
    %c0_154 = arith.constant 0 : index
    %332 = vector.load %arg8[%c1_152, %c0_153, %c0_154] : memref<2x32x12544xbf16, #tpu.memory_space<vmem>>, vector<1x32x12544xbf16>
    %333 = vector.shape_cast %332 : vector<1x32x12544xbf16> to vector<32x12544xbf16>
    %cst_155 = arith.constant dense<0.000000e+00> : vector<2x12544xf32>
    %334 = tpu.matmul %251, %333, %cst_155 {dimension_numbers = #tpu.dot_dimension_numbers<[1], [0], [0], [1], [0, 0, 1, 1], [], []>} : vector<2x32xbf16>, vector<32x12544xbf16>, vector<2x12544xf32> -> vector<2x12544xf32>
    %c0_156 = arith.constant 0 : index
    %c37632 = arith.constant 37632 : index
    %335 = vector.load %arg5[%c0_156, %c37632] : memref<1x50176xbf16, #tpu.memory_space<vmem>>, vector<1x12544xbf16>
    %336 = arith.extf %335 : vector<1x12544xbf16> to vector<1x12544xf32>
    %337 = vector.broadcast %336 : vector<1x12544xf32> to vector<2x12544xf32>
    %338 = arith.addf %334, %337 : vector<2x12544xf32>
    %c0_157 = arith.constant 0 : index
    %c37632_158 = arith.constant 37632 : index
    %339 = vector.load %arg7[%c0_157, %c37632_158] : memref<2x50176xf32, #tpu.memory_space<vmem>>, vector<2x12544xf32>
    tpu.vector_store %arg7[%c0_157, %c37632_158], %338 {strides = array<i32>} : memref<2x50176xf32, #tpu.memory_space<vmem>>, vector<2x12544xf32>,
    return
  }
  func.func @transform_0(%arg0: i32) -> (i32, i32, i32) {
    %c0_i32 = arith.constant 0 : i32
    %c0_i32_0 = arith.constant 0 : i32
    %c0_i32_1 = arith.constant 0 : i32
    %c0_i32_2 = arith.constant 0 : i32
    return %c0_i32, %c0_i32_0, %c0_i32_1 : i32, i32, i32
  }
  func.func @transform_1(%arg0: i32) -> (i32, i32) {
    %c0_i32 = arith.constant 0 : i32
    %c0_i32_0 = arith.constant 0 : i32
    %c0_i32_1 = arith.constant 0 : i32
    return %c0_i32, %c0_i32_0 : i32, i32
  }
  func.func @transform_2(%arg0: i32) -> (i32, i32) {
    %c0_i32 = arith.constant 0 : i32
    %c0_i32_0 = arith.constant 0 : i32
    %c0_i32_1 = arith.constant 0 : i32
    return %c0_i32, %c0_i32_0 : i32, i32
  }
  func.func @transform_3(%arg0: i32) -> (i32, i32) {
    %c0_i32 = arith.constant 0 : i32
    %c0_i32_0 = arith.constant 0 : i32
    %c0_i32_1 = arith.constant 0 : i32
    return %c0_i32, %c0_i32_0 : i32, i32
  }
  func.func @transform_4(%arg0: i32) -> (i32, i32) {
    %c0_i32 = arith.constant 0 : i32
    %c0_i32_0 = arith.constant 0 : i32
    return %c0_i32, %arg0 : i32, i32
  }
  func.func @transform_6(%arg0: i32) -> (i32, i32) {
    %c0_i32 = arith.constant 0 : i32
    %c0_i32_0 = arith.constant 0 : i32
    return %c0_i32, %arg0 : i32, i32
  }
}

</mosaic_0001>

<bundles_post_ra>
// kernel: tpu_custom_call.1
= control target key start
LH: loop header
LB: loop body
LE: loop exit
PB: predicated region body
PF: predicated region fallthrough
CT: control target
= control target key end

     0   :  { %11 = vsyncpa [#allocation5], 0  ;;  %s19508_s0 = inlined_call_operand.hbm [shape: f32[2,8,16], index: 0, kind: input, shape index: {}]   ;;  %s19509_s1 = inlined_call_operand.hbm [shape: f32[16,128], index: 1, kind: input, shape index: {}]   ;;  %s19510_s2 = inlined_call_operand.hbm [shape: f32[32,128], index: 2, kind: input, shape index: {}]   ;;  %s19511_s3 = inlined_call_operand.hbm [shape: f32[1,128], index: 3, kind: input, shape index: {}]   ;;  %s19512_s4 = inlined_call_operand.hbm [shape: bf16[1,50176], index: 4, kind: input, shape index: {}]   ;;  %s19513_s5 = inlined_call_operand.hbm [shape: bf16[4,32,12544], index: 5, kind: input, shape index: {}]   ;;  %s19514_s6 = inlined_call_operand.hbm [shape: f32[2,50176], index: 6, kind: output, shape index: {}]  }
   0x1   :  { %12 = vsyncpa [#allocation8], 0 }
   0x2   :  { %13 = vsyncpa [#allocation11], 0 }
   0x3   :  { %14 = vsyncpa [#allocation6], 0  ;;  %s32_s23 = sshll.u32 %s19509_s1, 4  ;;  %s18065_s24 = smov [#allocation7]   ;;  %s33_s23 = int_to_ptr.hbm [resolvable:$true] %s32_s23 }
   0x4   :  { %s34_s25 = sshll.u32 %s18065_s24, 4  ;;  %s59_s28 = sshll.u32 %s19511_s3, 4  ;;  %s35_s25 = int_to_ptr.vmem [resolvable:$true] %s34_s25  ;;  %s60_s28 = int_to_ptr.hbm [resolvable:$true] %s59_s28 }
   0x5   :  { %s18066_s29 = smov 128   ;;  %s18067_s30 = smov 8  }
   0x6   :  { %40 = dma.hbm_to_vmem [thread:$0]  %s33_s23, 256, %s35_s25, [#allocation8], %s18066_s29, %s18066_s29, %s18067_s30  }
   0x7   :  { %s18068_s7 = smov [#allocation10]   ;;  %s19_s11 = sshll.u32 %s19508_s0, 4  ;;  %s20_s11 = int_to_ptr.hbm [resolvable:$true] %s19_s11 }
   0x8   :  { %s61_s8 = sshll.u32 %s18068_s7, 4  ;;  %s45_s13 = sshll.u32 %s19510_s2, 4  ;;  %s62_s8 = int_to_ptr.vmem [resolvable:$true] %s61_s8  ;;  %s46_s13 = int_to_ptr.hbm [resolvable:$true] %s45_s13 }
   0x9   :  { %64 = dma.hbm_to_vmem [thread:$0]  %s60_s28, 16, %s62_s8, [#allocation11]  }
   0xa   :  { %s18069_s14 = smov [#allocation4]   ;;  %s18070_s3 = smov [#allocation9]  }
   0xb   :  { %s21_s15 = sshll.u32 %s18069_s14, 4  ;;  %s47_s16 = sshll.u32 %s18070_s3, 4  ;;  %s22_s15 = int_to_ptr.vmem [resolvable:$true] %s21_s15  ;;  %s48_s16 = int_to_ptr.vmem [resolvable:$true] %s47_s16 }
   0xc   :  { %27 = dma.hbm_to_vmem [thread:$0]  %s20_s11, 256, %s22_s15, [#allocation5], %s18066_s29, %s18066_s29, %s18067_s30  }
   0xd   :  { %s70_s19 = sshll.u32 %s19512_s4, 4  ;;  %s18071_s0 = smov [#allocation12]   ;;  %s71_s19 = int_to_ptr.hbm [resolvable:$true] %s70_s19 }
   0xe   :  { %53 = dma.hbm_to_vmem [thread:$0]  %s46_s13, 512, %s48_s16, [#allocation8], %s18066_s29, %s18066_s29, %s18067_s30  }
   0xf   :  { %s72_s20 = sshll.u32 %s18071_s0, 4  ;;  %s73_s20 = int_to_ptr.vmem [resolvable:$true] %s72_s20 }
  0x10   :  { %75 = dma.hbm_to_vmem [thread:$0]  %s71_s19, 6272, %s73_s20, [#allocation11]  }
  0x11   :  { %18049 = dma.done.wait [#allocation5], 256  }
  0x12   :  { %18050 = vsyncadd [#allocation5], 4294967040 }
  0x13   :  { %18051 = dma.done.wait [#allocation8], 768  }
  0x14   :  { %18052 = vsyncadd [#allocation8], 4294966528 }
  0x15   :  { %18053 = dma.done.wait [#allocation11], 6288  }
  0x16   :  { %18054 = vsyncadd [#allocation11], 4294961008  ;;  %v18128_v0 = vld [vmem:[#allocation9 + $0x18] sm:$0xff]  ;;  %v18130_v1 = vld [vmem:[#allocation9 + $0x10] sm:$0xff]  ;;  %vm155_vm0 = vcmask 1041409   ;;  %vm157_vm1 = vcmask 130048   ;;  %v121_v11 = vlaneseq }
  0x17   :  { %144 = vmatpush.msra.mxu0 %v18128_v0  ;;  %v18133_v2 = vld [vmem:[#allocation9 + $0x8] sm:$0xff]  ;;  %v18135_v3 = vld [vmem:[#allocation7 + $0x8] sm:$0xff]  ;;  %v18137_v4 = vld [vmem:[#allocation7] sm:$0xff]  ;;  %244 = vmatpush.msra.mxu2 %v18128_v0  ;;  %v18072_v10 = vmov 0.0   ;;  %s18073_s2 = smov 64   ;;  %s18074_s4 = smov 32  }
  0x18   :  { %174 = vmatpush.msra.mxu1 %v18135_v3  ;;  %v126_v5 = vld [vmem:[#allocation4] sm:$0x1]  ;;  %v127_v6 = vld [vmem:[#allocation4 + $0x8] sm:$0x1]  ;;  %272 = vmatpush.msra.mxu3 %v18135_v3  ;;  %v122_v12 = vand.u32 127, %v121_v11  ;;  %vm128_vm9 = vcmask 261120  }
  0x19   :  { %145 = vmatpush.msra.mxu0 %v18130_v1  ;;  %v154_v7 = vrot.slane %v127_v6, 7  ;;  %245 = vmatpush.msra.mxu2 %v18130_v1  ;;  %v18144_v8 = vld [vmem:[#allocation9] sm:$0xff]  ;;  %v226_v45 = vld [vmem:[#allocation4 + $0x9] sm:$0x1]  ;;  %s108_s23 = sshll.u32 %s19513_s5, 4  ;;  %s18075_s24 = smov [#allocation2]   ;;  %s109_s23 = int_to_ptr.hbm [resolvable:$true] %s108_s23 }
  0x1a   :  { %175 = vmatpush.msra.mxu1 %v18137_v4  ;;  %273 = vmatpush.msra.mxu3 %v18137_v4  ;;  %v18174_v14 = vld [vmem:[#allocation10] ss:$0 sm:$0xff]  ;;  %vm123_vm2 = vcmp.ge.s32.totalorder %v122_v12, 64  ;;  %vm124_vm3 = vcmp.lt.s32.totalorder %v122_v12, 96  ;;  %v254_v46 = vrot.slane %v226_v45, 7  ;;  %s18290_s25 = sshll.u32 %s18075_s24, 4  ;;  %s111_s25 = int_to_ptr.vmem [resolvable:$true] %s18290_s25 }
  0x1b   :  { %146 = vmatpush.msra.mxu0 %v18133_v2  ;;  %v156_v9 = vsel %vm155_vm0, %v154_v7, %v126_v5  ;;  %246 = vmatpush.msra.mxu2 %v18133_v2  ;;  %vm18177_vm4 = vmand %vm123_vm2, %vm124_vm3  ;;  %v225_v47 = vld [vmem:[#allocation4 + $0x1] sm:$0x1]  ;;  %113 = dma.hbm_to_vmem [thread:$0]  %s109_s23, 25088, %s111_s25, [#allocation3] }
  0x1c   :  { %13402 = vmatmul.msk.f32.vlgmr.msra.gmra.mxu1 %vm157_vm1, %v156_v9  ;;  %367 = vmatpush.msrb.mxu3 %v18135_v3  ;;  %v255_v48 = vsel %vm155_vm0, %v254_v46, %v225_v47  ;;  %s13399_s28 = scalar_lea.hbm %s19513_s5, 1568  ;;  %s18076_s30 = smov [#allocation2 + $0x620]  }
  0x1d   :  { %147 = vmatpush.msra.mxu0 %v18144_v8  ;;  %247 = vmatpush.msra.mxu2 %v18144_v8  ;;  %s904_s29 = sshll.u32 %s13399_s28, 4  ;;  %s18298_s7 = sshll.u32 %s18076_s30, 4  ;;  %s905_s29 = int_to_ptr.hbm [resolvable:$true] %s904_s29  ;;  %s907_s7 = int_to_ptr.vmem [resolvable:$true] %s18298_s7 }
  0x1e   :  { %148 = vmatmul.f32.vlgmr.msra.gmra.mxu0 %v18072_v10  ;;  %368 = vmatpush.msrb.mxu3 %v18137_v4  ;;  %909 = dma.hbm_to_vmem [thread:$0]  %s905_s29, 25088, %s907_s7, [#allocation3 + $0x1] }
  0x1f   :  { %339 = vmatpush.msrb.mxu1 %v18128_v0  ;;  %462 = vmatpush.msrb.mxu2 %v18135_v3 }
  0x20   :  { %434 = vmatpush.msrb.mxu0 %v18128_v0  ;;  %13406 = vmatmul.msk.f32.vlgmr.msra.gmra.mxu3 %vm157_vm1, %v255_v48 }
  0x21   :  { %340 = vmatpush.msrb.mxu1 %v18130_v1  ;;  %463 = vmatpush.msrb.mxu2 %v18137_v4 }
  0x22   :  { %435 = vmatpush.msrb.mxu0 %v18130_v1  ;;  %557 = vmatpush.msra.mxu3 %v18135_v3 }
  0x23   :  { %341 = vmatpush.msrb.mxu1 %v18133_v2 }
  0x24   :  { %436 = vmatpush.msrb.mxu0 %v18133_v2  ;;  %558 = vmatpush.msra.mxu3 %v18137_v4 }
  0x25   :  { %342 = vmatpush.msrb.mxu1 %v18144_v8 }
  0x26   :  { %437 = vmatpush.msrb.mxu0 %v18144_v8 }
  0x27   :  { %529 = vmatpush.msra.mxu1 %v18128_v0 }
  0x28   :  { %624 = vmatpush.msra.mxu0 %v18128_v0 }
  0x29   :  { %530 = vmatpush.msra.mxu1 %v18130_v1 }
  0x2a   :  { %625 = vmatpush.msra.mxu0 %v18130_v1 }
  0x2b   :  { %531 = vmatpush.msra.mxu1 %v18133_v2 }
  0x2c   :  { %626 = vmatpush.msra.mxu0 %v18133_v2 }
  0x2d   :  { %532 = vmatpush.msra.mxu1 %v18144_v8 }
  0x2e   :  { %627 = vmatpush.msra.mxu0 %v18144_v8 }
  0x99   :  { %v177_v13 = vpop.f32.mrf.mxu1 }
  0x9b   :  { %v149_v15 = vpop.f32.mrf.mxu0 }
  0x9c   :  { %v178_v16 = vadd.f32 %v177_v13, %v149_v15 }
  0x9e   :  { %v183_v17 = vadd.f32 %v18174_v14, %v178_v16 }
  0xa0   :  { %v184_v19 = vmul.f32 2.0, %v183_v17 }
  0xa2   :  { %v185_v20 = vsel %vm18177_vm4, %v184_v19, %v183_v17 }
  0xa3   :  { %v13403_v21 = vmul.f32 -1.442695, %v185_v20  ;;  %v275_v50 = vpop.f32.mrf.mxu3 }
  0xa5   :  { %17761 = vpow2.f32 %v13403_v21 }
  0xab   :  { %v17762_v22 = vpop.eup %17761 }
  0xac   :  { %v189_v23 = vadd.f32 1.0, %v17762_v22  ;;  %v320_v22 = vld [vmem:[#allocation4 + $0x2] sm:$0x1] }
  0xae   :  { %17763 = vrcp.f32 %v189_v23  ;;  %v201_v27 = vand.u32 2147483648, %v189_v23  ;;  %v199_v29 = vand.u32 2147483647, %v189_v23  ;;  %vm195_vm6 = vweird.f32 %v189_v23 }
  0xb0   :  { %v202_v31 = vor.u32 1.1754944e-38, %v201_v27  ;;  %vm200_vm8 = vcmp.eq.f32.partialorder %v199_v29, 8.507059e+37 }
  0xb4   :  { %v17764_v24 = vpop.eup %17763 }
  0xb5   :  { %v191_v25 = vmul.f32 %v17764_v24, %v189_v23  ;;  %vm196_vm5 = vweird.f32 %v17764_v24  ;;  %v321_v23 = vld [vmem:[#allocation4 + $0xa] sm:$0x1] }
  0xb6   :  { %vm197_vm7 = vmor %vm195_vm6, %vm196_vm5 }
  0xb7   :  { %v192_v26 = vsub.f32 1.0, %v191_v25 }
  0xb9   :  { %v193_v28 = vmul.f32 %v17764_v24, %v192_v26 }
  0xbb   :  { %v194_v30 = vadd.f32 %v17764_v24, %v193_v28 }
  0xbd   :  { %v198_v32 = vsel %vm197_vm7, %v17764_v24, %v194_v30  ;;  %v349_v24 = vrot.slane %v321_v23, 7 }
  0xbe   :  { %v203_v33 = vsel %vm200_vm8, %v202_v31, %v198_v32 }
  0xbf   :  { %v205_v34 = vmul.f32 2.0, %v203_v33  ;;  %v350_v25 = vsel %vm155_vm0, %v349_v24, %v320_v22 }
  0xc0   :  { %13410 = vmatmul.msk.f32.vlgmr.msrb.gmra.mxu3 %vm157_vm1, %v350_v25 }
  0xc1   :  { %v13404_v35 = vadd.f32 -1.0, %v205_v34  ;;  %747 = vmatpush.msrb.mxu3 %v18135_v3 }
  0xc3   :  { %v207_v36 = vsel %vm18177_vm4, %v13404_v35, %v203_v33  ;;  %748 = vmatpush.msrb.mxu3 %v18137_v4 }
  0xc4   :  { %210 = vrot.lane.b32.xlu0 %v207_v36, %s18073_s2  ;;  %v208_v39 = vmul.f32 0.0, %v207_v36 }
 0x136   :  { %v211_v37 = vpop.permute.xlu0 %210 }
 0x137   :  { %v213_v38 = vmul.f32 %v211_v37, %v207_v36 }
 0x139   :  { %215 = vrot.lane.b32.xlu0 %v213_v38, %s18074_s4 }
 0x143   :  { %v370_v29 = vpop.f32.mrf.mxu3 }
 0x1ab   :  { %v216_v40 = vpop.permute.xlu0 %215 }
 0x1ac   :  { %v218_v41 = vadd.f32 %v216_v40, %v208_v39 }
 0x1ae   :  { %17765 = vtanh.f32 %v218_v41 }
 0x1b4   :  { %v17766_v42 = vpop.eup %17765 }
 0x1b5   :  { %221 = vrot.lane.b32.xlu1 %v17766_v42, %s18073_s2 }
 0x227   :  { %v222_v43 = vpop.permute.xlu1 %221 }
 0x228   :  { %v224_v44 = vmul.f32 %v222_v43, %v207_v36 }
 0x22a   :  { %228 = vrot.lane.b32.xlu1 %v224_v44, %s18074_s4 }
 0x29c   :  { %v229_v49 = vpop.permute.xlu1 %228 }
 0x29d   :  { %13405 = vmatmul.msk.f32.vlgmr.msra.gmra.mxu2 %vm128_vm9, %v229_v49 }
 0x29e   :  { %652 = vmatpush.msra.mxu2 %v18135_v3 }
 0x2a0   :  { %653 = vmatpush.msra.mxu2 %v18137_v4 }
 0x320   :  { %v249_v51 = vpop.f32.mrf.mxu2 }
 0x321   :  { %v276_v52 = vadd.f32 %v275_v50, %v249_v51 }
 0x323   :  { %v278_v53 = vadd.f32 %v18174_v14, %v276_v52 }
 0x325   :  { %v279_v54 = vmul.f32 2.0, %v278_v53 }
 0x327   :  { %v280_v55 = vsel %vm18177_vm4, %v279_v54, %v278_v53 }
 0x328   :  { %v13407_v56 = vmul.f32 -1.442695, %v280_v55 }
 0x32a   :  { %17767 = vpow2.f32 %v13407_v56 }
 0x330   :  { %v17768_v57 = vpop.eup %17767 }
 0x331   :  { %v284_v58 = vadd.f32 1.0, %v17768_v57  ;;  %v415_v57 = vld [vmem:[#allocation4 + $0x3] sm:$0x1] }
 0x333   :  { %17769 = vrcp.f32 %v284_v58  ;;  %v296_v62 = vand.u32 2147483648, %v284_v58  ;;  %v294_v5 = vand.u32 2147483647, %v284_v58  ;;  %vm290_vm11 = vweird.f32 %v284_v58 }
 0x335   :  { %v297_v7 = vor.u32 1.1754944e-38, %v296_v62  ;;  %vm295_vm13 = vcmp.eq.f32.partialorder %v294_v5, 8.507059e+37 }
 0x339   :  { %v17770_v59 = vpop.eup %17769 }
 0x33a   :  { %v286_v60 = vmul.f32 %v17770_v59, %v284_v58  ;;  %vm291_vm10 = vweird.f32 %v17770_v59  ;;  %v416_v58 = vld [vmem:[#allocation4 + $0xb] sm:$0x1] }
 0x33b   :  { %vm292_vm12 = vmor %vm290_vm11, %vm291_vm10 }
 0x33c   :  { %v287_v61 = vsub.f32 1.0, %v286_v60 }
 0x33e   :  { %v288_v63 = vmul.f32 %v17770_v59, %v287_v61 }
 0x340   :  { %v289_v6 = vadd.f32 %v17770_v59, %v288_v63 }
 0x342   :  { %v293_v9 = vsel %vm292_vm12, %v17770_v59, %v289_v6  ;;  %v444_v59 = vrot.slane %v416_v58, 7 }
 0x343   :  { %v298_v10 = vsel %vm295_vm13, %v297_v7, %v293_v9 }
 0x344   :  { %v300_v11 = vmul.f32 2.0, %v298_v10  ;;  %v445_v60 = vsel %vm155_vm0, %v444_v59, %v415_v57 }
 0x345   :  { %13414 = vmatmul.msk.f32.vlgmr.msrb.gmra.mxu2 %vm157_vm1, %v445_v60 }
 0x346   :  { %v13408_v12 = vadd.f32 -1.0, %v300_v11  ;;  %842 = vmatpush.msrb.mxu2 %v18135_v3 }
 0x348   :  { %v302_v13 = vsel %vm18177_vm4, %v13408_v12, %v298_v10  ;;  %843 = vmatpush.msrb.mxu2 %v18137_v4 }
 0x349   :  { %305 = vrot.lane.b32.xlu2 %v302_v13, %s18073_s2  ;;  %v303_v17 = vmul.f32 %v302_v13, %v218_v41 }
 0x3a3   :  { %v306_v15 = vpop.permute.xlu2 %305 }
 0x3a4   :  { %v308_v16 = vmul.f32 %v306_v15, %v302_v13 }
 0x3a6   :  { %310 = vrot.lane.b32.xlu2 %v308_v16, %s18074_s4 }
 0x3c8   :  { %v465_v5 = vpop.f32.mrf.mxu2 }
 0x400   :  { %v311_v19 = vpop.permute.xlu2 %310 }
 0x401   :  { %v313_v20 = vadd.f32 %v311_v19, %v303_v17 }
 0x403   :  { %17771 = vtanh.f32 %v313_v20 }
 0x409   :  { %v17772_v21 = vpop.eup %17771 }
 0x40a   :  { %316 = vrot.lane.b32.xlu0 %v17772_v21, %s18073_s2 }
 0x47c   :  { %v317_v26 = vpop.permute.xlu0 %316 }
 0x47d   :  { %v319_v27 = vmul.f32 %v317_v26, %v302_v13 }
 0x47f   :  { %323 = vrot.lane.b32.xlu1 %v319_v27, %s18074_s4 }
 0x4f1   :  { %v324_v28 = vpop.permute.xlu1 %323 }
 0x4f2   :  { %13409 = vmatmul.msk.f32.vlgmr.msrb.gmra.mxu1 %vm128_vm9, %v324_v28 }
 0x4f3   :  { %719 = vmatpush.msrb.mxu1 %v18128_v0 }
 0x4f5   :  { %720 = vmatpush.msrb.mxu1 %v18130_v1 }
 0x4f7   :  { %721 = vmatpush.msrb.mxu1 %v18133_v2 }
 0x4f9   :  { %722 = vmatpush.msrb.mxu1 %v18144_v8 }
 0x56f   :  { %v344_v30 = vpop.f32.mrf.mxu1 }
 0x570   :  { %v371_v31 = vadd.f32 %v370_v29, %v344_v30  ;;  %v510_v30 = vld [vmem:[#allocation4 + $0x4] sm:$0x1] }
 0x572   :  { %v373_v32 = vadd.f32 %v18174_v14, %v371_v31  ;;  %v511_v31 = vld [vmem:[#allocation4 + $0xc] sm:$0x1] }
 0x574   :  { %v374_v33 = vmul.f32 2.0, %v373_v32 }
 0x576   :  { %v375_v34 = vsel %vm18177_vm4, %v374_v33, %v373_v32  ;;  %v539_v32 = vrot.slane %v511_v31, 7 }
 0x577   :  { %v13411_v35 = vmul.f32 -1.442695, %v375_v34 }
 0x578   :  { %v540_v33 = vsel %vm155_vm0, %v539_v32, %v510_v30 }
 0x579   :  { %17773 = vpow2.f32 %v13411_v35  ;;  %13418 = vmatmul.msk.f32.vlgmr.msra.gmra.mxu3 %vm157_vm1, %v540_v33 }
 0x57f   :  { %v17774_v36 = vpop.eup %17773 }
 0x580   :  { %v379_v37 = vadd.f32 1.0, %v17774_v36 }
 0x582   :  { %17775 = vrcp.f32 %v379_v37  ;;  %v391_v41 = vand.u32 2147483648, %v379_v37  ;;  %v389_v43 = vand.u32 2147483647, %v379_v37  ;;  %vm385_vm15 = vweird.f32 %v379_v37 }
 0x584   :  { %v392_v45 = vor.u32 1.1754944e-38, %v391_v41  ;;  %vm390_vm3 = vcmp.eq.f32.partialorder %v389_v43, 8.507059e+37 }
 0x588   :  { %v17776_v38 = vpop.eup %17775 }
 0x589   :  { %v381_v39 = vmul.f32 %v17776_v38, %v379_v37  ;;  %vm386_vm14 = vweird.f32 %v17776_v38 }
 0x58a   :  { %vm387_vm2 = vmor %vm385_vm15, %vm386_vm14 }
 0x58b   :  { %v382_v40 = vsub.f32 1.0, %v381_v39 }
 0x58d   :  { %v383_v42 = vmul.f32 %v17776_v38, %v382_v40 }
 0x58f   :  { %v384_v44 = vadd.f32 %v17776_v38, %v383_v42 }
 0x591   :  { %v388_v46 = vsel %vm387_vm2, %v17776_v38, %v384_v44 }
 0x592   :  { %v393_v47 = vsel %vm390_vm3, %v392_v45, %v388_v46 }
 0x593   :  { %v395_v48 = vmul.f32 2.0, %v393_v47 }
 0x595   :  { %v13412_v49 = vadd.f32 -1.0, %v395_v48 }
 0x597   :  { %v397_v50 = vsel %vm18177_vm4, %v13412_v49, %v393_v47 }
 0x598   :  { %400 = vrot.lane.b32.xlu2 %v397_v50, %s18073_s2  ;;  %v398_v53 = vmul.f32 %v397_v50, %v313_v20 }
 0x5f2   :  { %v401_v51 = vpop.permute.xlu2 %400 }
 0x5f3   :  { %v403_v52 = vmul.f32 %v401_v51, %v397_v50 }
 0x5f5   :  { %405 = vrot.lane.b32.xlu0 %v403_v52, %s18074_s4 }
 0x5fc   :  { %v560_v37 = vpop.f32.mrf.mxu3 }
 0x667   :  { %v406_v54 = vpop.permute.xlu0 %405 }
 0x668   :  { %v408_v55 = vadd.f32 %v406_v54, %v398_v53 }
 0x66a   :  { %17777 = vtanh.f32 %v408_v55 }
 0x670   :  { %v17778_v56 = vpop.eup %17777 }
 0x671   :  { %411 = vrot.lane.b32.xlu1 %v17778_v56, %s18073_s2 }
 0x6e3   :  { %v412_v61 = vpop.permute.xlu1 %411 }
 0x6e4   :  { %v414_v62 = vmul.f32 %v412_v61, %v397_v50 }
 0x6e6   :  { %418 = vrot.lane.b32.xlu2 %v414_v62, %s18074_s4 }
 0x740   :  { %v419_v63 = vpop.permute.xlu2 %418 }
 0x741   :  { %13413 = vmatmul.msk.f32.vlgmr.msrb.gmra.mxu0 %vm128_vm9, %v419_v63 }
 0x742   :  { %814 = vmatpush.msrb.mxu0 %v18128_v0 }
 0x744   :  { %815 = vmatpush.msrb.mxu0 %v18130_v1 }
 0x746   :  { %816 = vmatpush.msrb.mxu0 %v18133_v2 }
 0x748   :  { %817 = vmatpush.msrb.mxu0 %v18144_v8 }
 0x7be   :  { %v439_v6 = vpop.f32.mrf.mxu0 }
 0x7bf   :  { %v466_v3 = vadd.f32 %v465_v5, %v439_v6  ;;  %v605_v6 = vld [vmem:[#allocation4 + $0x5] sm:$0x1] }
 0x7c1   :  { %v468_v4 = vadd.f32 %v18174_v14, %v466_v3  ;;  %v606_v3 = vld [vmem:[#allocation4 + $0xd] sm:$0x1] }
 0x7c3   :  { %v469_v7 = vmul.f32 2.0, %v468_v4 }
 0x7c5   :  { %v470_v9 = vsel %vm18177_vm4, %v469_v7, %v468_v4  ;;  %v634_v4 = vrot.slane %v606_v3, 7 }
 0x7c6   :  { %v13415_v10 = vmul.f32 -1.442695, %v470_v9 }
 0x7c7   :  { %v635_v7 = vsel %vm155_vm0, %v634_v4, %v605_v6 }
 0x7c8   :  { %17779 = vpow2.f32 %v13415_v10  ;;  %13422 = vmatmul.msk.f32.vlgmr.msra.gmra.mxu2 %vm157_vm1, %v635_v7 }
 0x7ce   :  { %v17780_v11 = vpop.eup %17779 }
 0x7cf   :  { %v474_v12 = vadd.f32 1.0, %v17780_v11 }
 0x7d1   :  { %17781 = vrcp.f32 %v474_v12  ;;  %v486_v2 = vand.u32 2147483648, %v474_v12  ;;  %v484_v8 = vand.u32 2147483647, %v474_v12  ;;  %vm480_vm6 = vweird.f32 %v474_v12 }
 0x7d3   :  { %v487_v17 = vor.u32 1.1754944e-38, %v486_v2  ;;  %vm485_vm8 = vcmp.eq.f32.partialorder %v484_v8, 8.507059e+37 }
 0x7d7   :  { %v17782_v0 = vpop.eup %17781 }
 0x7d8   :  { %v476_v1 = vmul.f32 %v17782_v0, %v474_v12  ;;  %vm481_vm5 = vweird.f32 %v17782_v0 }
 0x7d9   :  { %vm482_vm7 = vmor %vm480_vm6, %vm481_vm5 }
 0x7da   :  { %v477_v13 = vsub.f32 1.0, %v476_v1 }
 0x7dc   :  { %v478_v15 = vmul.f32 %v17782_v0, %v477_v13 }
 0x7de   :  { %v479_v16 = vadd.f32 %v17782_v0, %v478_v15 }
 0x7e0   :  { %v483_v19 = vsel %vm482_vm7, %v17782_v0, %v479_v16 }
 0x7e1   :  { %v488_v20 = vsel %vm485_vm8, %v487_v17, %v483_v19 }
 0x7e2   :  { %v490_v21 = vmul.f32 2.0, %v488_v20 }
 0x7e4   :  { %v13416_v22 = vadd.f32 -1.0, %v490_v21 }
 0x7e6   :  { %v492_v23 = vsel %vm18177_vm4, %v13416_v22, %v488_v20 }
 0x7e7   :  { %495 = vrot.lane.b32.xlu0 %v492_v23, %s18073_s2  ;;  %v493_v26 = vmul.f32 %v492_v23, %v408_v55 }
 0x84b   :  { %v655_v12 = vpop.f32.mrf.mxu2 }
 0x859   :  { %v496_v24 = vpop.permute.xlu0 %495 }
 0x85a   :  { %v498_v25 = vmul.f32 %v496_v24, %v492_v23 }
 0x85c   :  { %500 = vrot.lane.b32.xlu1 %v498_v25, %s18074_s4 }
 0x8ce   :  { %v501_v27 = vpop.permute.xlu1 %500 }
 0x8cf   :  { %v503_v28 = vadd.f32 %v501_v27, %v493_v26 }
 0x8d1   :  { %17783 = vtanh.f32 %v503_v28 }
 0x8d7   :  { %v17784_v29 = vpop.eup %17783 }
 0x8d8   :  { %506 = vrot.lane.b32.xlu2 %v17784_v29, %s18073_s2 }
 0x932   :  { %v507_v34 = vpop.permute.xlu2 %506 }
 0x933   :  { %v509_v35 = vmul.f32 %v507_v34, %v492_v23 }
 0x935   :  { %513 = vrot.lane.b32.xlu0 %v509_v35, %s18074_s4 }
 0x9a7   :  { %v514_v36 = vpop.permute.xlu0 %513 }
 0x9a8   :  { %13417 = vmatmul.msk.f32.vlgmr.msra.gmra.mxu1 %vm128_vm9, %v514_v36 }
 0xa25   :  { %v534_v38 = vpop.f32.mrf.mxu1 }
 0xa26   :  { %v561_v39 = vadd.f32 %v560_v37, %v534_v38  ;;  %v700_v38 = vld [vmem:[#allocation4 + $0x6] sm:$0x1] }
 0xa28   :  { %v563_v40 = vadd.f32 %v18174_v14, %v561_v39  ;;  %v701_v39 = vld [vmem:[#allocation4 + $0xe] sm:$0x1] }
 0xa2a   :  { %v564_v41 = vmul.f32 2.0, %v563_v40 }
 0xa2c   :  { %v565_v42 = vsel %vm18177_vm4, %v564_v41, %v563_v40  ;;  %v729_v40 = vrot.slane %v701_v39, 7 }
 0xa2d   :  { %v13419_v43 = vmul.f32 -1.442695, %v565_v42 }
 0xa2e   :  { %v730_v41 = vsel %vm155_vm0, %v729_v40, %v700_v38 }
 0xa2f   :  { %17785 = vpow2.f32 %v13419_v43  ;;  %13426 = vmatmul.msk.f32.vlgmr.msrb.gmra.mxu3 %vm157_vm1, %v730_v41 }
 0xa35   :  { %v17786_v44 = vpop.eup %17785 }
 0xa36   :  { %v569_v45 = vadd.f32 1.0, %v17786_v44 }
 0xa38   :  { %17787 = vrcp.f32 %v569_v45  ;;  %v581_v49 = vand.u32 2147483648, %v569_v45  ;;  %v579_v51 = vand.u32 2147483647, %v569_v45  ;;  %vm575_vm11 = vweird.f32 %v569_v45 }
 0xa3a   :  { %v582_v53 = vor.u32 1.1754944e-38, %v581_v49  ;;  %vm580_vm13 = vcmp.eq.f32.partialorder %v579_v51, 8.507059e+37 }
 0xa3e   :  { %v17788_v46 = vpop.eup %17787 }
 0xa3f   :  { %v571_v47 = vmul.f32 %v17788_v46, %v569_v45  ;;  %vm576_vm10 = vweird.f32 %v17788_v46 }
 0xa40   :  { %vm577_vm12 = vmor %vm575_vm11, %vm576_vm10 }
 0xa41   :  { %v572_v48 = vsub.f32 1.0, %v571_v47 }
 0xa43   :  { %v573_v50 = vmul.f32 %v17788_v46, %v572_v48 }
 0xa45   :  { %v574_v52 = vadd.f32 %v17788_v46, %v573_v50 }
 0xa47   :  { %v578_v54 = vsel %vm577_vm12, %v17788_v46, %v574_v52 }
 0xa48   :  { %v583_v55 = vsel %vm580_vm13, %v582_v53, %v578_v54 }
 0xa49   :  { %v585_v56 = vmul.f32 2.0, %v583_v55 }
 0xa4b   :  { %v13420_v57 = vadd.f32 -1.0, %v585_v56 }
 0xa4d   :  { %v587_v58 = vsel %vm18177_vm4, %v13420_v57, %v583_v55 }
 0xa4e   :  { %590 = vrot.lane.b32.xlu1 %v587_v58, %s18073_s2  ;;  %v588_v61 = vmul.f32 %v587_v58, %v503_v28 }
 0xab2   :  { %v750_v45 = vpop.f32.mrf.mxu3 }
 0xac0   :  { %v591_v59 = vpop.permute.xlu1 %590 }
 0xac1   :  { %v593_v60 = vmul.f32 %v591_v59, %v587_v58 }
 0xac3   :  { %595 = vrot.lane.b32.xlu2 %v593_v60, %s18074_s4 }
 0xb1d   :  { %v596_v62 = vpop.permute.xlu2 %595 }
 0xb1e   :  { %v598_v63 = vadd.f32 %v596_v62, %v588_v61 }
 0xb20   :  { %17789 = vtanh.f32 %v598_v63 }
 0xb26   :  { %v17790_v5 = vpop.eup %17789 }
 0xb27   :  { %601 = vrot.lane.b32.xlu0 %v17790_v5, %s18073_s2 }
 0xb99   :  { %v602_v9 = vpop.permute.xlu0 %601 }
 0xb9a   :  { %v604_v10 = vmul.f32 %v602_v9, %v587_v58 }
 0xb9c   :  { %608 = vrot.lane.b32.xlu1 %v604_v10, %s18074_s4 }
 0xc0e   :  { %v609_v11 = vpop.permute.xlu1 %608 }
 0xc0f   :  { %13421 = vmatmul.msk.f32.vlgmr.msra.gmra.mxu0 %vm128_vm9, %v609_v11 }
 0xc8c   :  { %v629_v0 = vpop.f32.mrf.mxu0 }
 0xc8d   :  { %v656_v1 = vadd.f32 %v655_v12, %v629_v0  ;;  %v795_v0 = vld [vmem:[#allocation4 + $0x7] sm:$0x1] }
 0xc8f   :  { %v658_v13 = vadd.f32 %v18174_v14, %v656_v1  ;;  %v796_v1 = vld [vmem:[#allocation4 + $0xf] sm:$0x1] }
 0xc91   :  { %v659_v2 = vmul.f32 2.0, %v658_v13 }
 0xc93   :  { %v660_v15 = vsel %vm18177_vm4, %v659_v2, %v658_v13  ;;  %v824_v13 = vrot.slane %v796_v1, 7 }
 0xc94   :  { %v13423_v8 = vmul.f32 -1.442695, %v660_v15 }
 0xc95   :  { %v825_v2 = vsel %vm155_vm0, %v824_v13, %v795_v0 }
 0xc96   :  { %17791 = vpow2.f32 %v13423_v8  ;;  %13430 = vmatmul.msk.f32.vlgmr.msrb.gmra.mxu2 %vm157_vm1, %v825_v2 }
 0xc9c   :  { %v17792_v16 = vpop.eup %17791 }
 0xc9d   :  { %v664_v17 = vadd.f32 1.0, %v17792_v16 }
 0xc9f   :  { %17793 = vrcp.f32 %v664_v17  ;;  %v676_v22 = vand.u32 2147483648, %v664_v17  ;;  %v674_v24 = vand.u32 2147483647, %v664_v17  ;;  %vm670_vm15 = vweird.f32 %v664_v17 }
 0xca1   :  { %v677_v26 = vor.u32 1.1754944e-38, %v676_v22  ;;  %vm675_vm3 = vcmp.eq.f32.partialorder %v674_v24, 8.507059e+37 }
 0xca5   :  { %v17794_v19 = vpop.eup %17793 }
 0xca6   :  { %v666_v20 = vmul.f32 %v17794_v19, %v664_v17  ;;  %vm671_vm14 = vweird.f32 %v17794_v19 }
 0xca7   :  { %vm672_vm2 = vmor %vm670_vm15, %vm671_vm14 }
 0xca8   :  { %v667_v21 = vsub.f32 1.0, %v666_v20 }
 0xcaa   :  { %v668_v23 = vmul.f32 %v17794_v19, %v667_v21 }
 0xcac   :  { %v669_v25 = vadd.f32 %v17794_v19, %v668_v23 }
 0xcae   :  { %v673_v27 = vsel %vm672_vm2, %v17794_v19, %v669_v25 }
 0xcaf   :  { %v678_v28 = vsel %vm675_vm3, %v677_v26, %v673_v27 }
 0xcb0   :  { %v680_v29 = vmul.f32 2.0, %v678_v28 }
 0xcb2   :  { %v13424_v30 = vadd.f32 -1.0, %v680_v29 }
 0xcb4   :  { %v682_v31 = vsel %vm18177_vm4, %v13424_v30, %v678_v28 }
 0xcb5   :  { %685 = vrot.lane.b32.xlu2 %v682_v31, %s18073_s2  ;;  %v683_v34 = vmul.f32 %v682_v31, %v598_v63 }
 0xd0f   :  { %v686_v32 = vpop.permute.xlu2 %685 }
 0xd10   :  { %v688_v33 = vmul.f32 %v686_v32, %v682_v31 }
 0xd12   :  { %690 = vrot.lane.b32.xlu0 %v688_v33, %s18074_s4 }
 0xd19   :  { %v845_v17 = vpop.f32.mrf.mxu2 }
 0xd84   :  { %v691_v35 = vpop.permute.xlu0 %690 }
 0xd85   :  { %v693_v36 = vadd.f32 %v691_v35, %v683_v34 }
 0xd87   :  { %17795 = vtanh.f32 %v693_v36 }
 0xd8d   :  { %v17796_v37 = vpop.eup %17795 }
 0xd8e   :  { %696 = vrot.lane.b32.xlu1 %v17796_v37, %s18073_s2 }
 0xe00   :  { %v697_v42 = vpop.permute.xlu1 %696 }
 0xe01   :  { %v699_v43 = vmul.f32 %v697_v42, %v682_v31 }
 0xe03   :  { %703 = vrot.lane.b32.xlu2 %v699_v43, %s18074_s4 }
 0xe5d   :  { %v704_v44 = vpop.permute.xlu2 %703 }
 0xe5e   :  { %13425 = vmatmul.msk.f32.vlgmr.msrb.gmra.mxu1 %vm128_vm9, %v704_v44 }
 0xedb   :  { %v724_v46 = vpop.f32.mrf.mxu1 }
 0xedc   :  { %v751_v47 = vadd.f32 %v750_v45, %v724_v46 }
 0xede   :  { %v753_v48 = vadd.f32 %v18174_v14, %v751_v47 }
 0xee0   :  { %v754_v49 = vmul.f32 2.0, %v753_v48 }
 0xee2   :  { %v755_v50 = vsel %vm18177_vm4, %v754_v49, %v753_v48 }
 0xee3   :  { %v13427_v51 = vmul.f32 -1.442695, %v755_v50 }
 0xee5   :  { %17797 = vpow2.f32 %v13427_v51 }
 0xeeb   :  { %v17798_v52 = vpop.eup %17797 }
 0xeec   :  { %v759_v53 = vadd.f32 1.0, %v17798_v52 }
 0xeee   :  { %17799 = vrcp.f32 %v759_v53  ;;  %v771_v57 = vand.u32 2147483648, %v759_v53  ;;  %v769_v59 = vand.u32 2147483647, %v759_v53  ;;  %vm765_vm6 = vweird.f32 %v759_v53 }
 0xef0   :  { %v772_v61 = vor.u32 1.1754944e-38, %v771_v57  ;;  %vm770_vm8 = vcmp.eq.f32.partialorder %v769_v59, 8.507059e+37 }
 0xef4   :  { %v17800_v54 = vpop.eup %17799 }
 0xef5   :  { %v761_v55 = vmul.f32 %v17800_v54, %v759_v53  ;;  %vm766_vm5 = vweird.f32 %v17800_v54 }
 0xef6   :  { %vm767_vm7 = vmor %vm765_vm6, %vm766_vm5 }
 0xef7   :  { %v762_v56 = vsub.f32 1.0, %v761_v55 }
 0xef9   :  { %v763_v58 = vmul.f32 %v17800_v54, %v762_v56 }
 0xefb   :  { %v764_v60 = vadd.f32 %v17800_v54, %v763_v58 }
 0xefd   :  { %v768_v62 = vsel %vm767_vm7, %v17800_v54, %v764_v60 }
 0xefe   :  { %v773_v63 = vsel %vm770_vm8, %v772_v61, %v768_v62 }
 0xeff   :  { %v775_v5 = vmul.f32 2.0, %v773_v63 }
 0xf01   :  { %v13428_v6 = vadd.f32 -1.0, %v775_v5 }
 0xf03   :  { %v777_v3 = vsel %vm18177_vm4, %v13428_v6, %v773_v63 }
 0xf04   :  { %780 = vrot.lane.b32.xlu0 %v777_v3, %s18073_s2  ;;  %v778_v9 = vmul.f32 %v777_v3, %v693_v36 }
 0xf76   :  { %v781_v4 = vpop.permute.xlu0 %780 }
 0xf77   :  { %v783_v7 = vmul.f32 %v781_v4, %v777_v3 }
 0xf79   :  { %785 = vrot.lane.b32.xlu1 %v783_v7, %s18074_s4 }
 0xfeb   :  { %v786_v10 = vpop.permute.xlu1 %785 }
 0xfec   :  { %v788_v11 = vadd.f32 %v786_v10, %v778_v9 }
 0xfee   :  { %17801 = vtanh.f32 %v788_v11 }
 0xff4   :  { %v17802_v12 = vpop.eup %17801 }
 0xff5   :  { %791 = vrot.lane.b32.xlu2 %v17802_v12, %s18073_s2 }
0x104f   :  { %v792_v15 = vpop.permute.xlu2 %791 }
0x1050   :  { %v794_v8 = vmul.f32 %v792_v15, %v777_v3 }
0x1052   :  { %798 = vrot.lane.b32.xlu0 %v794_v8, %s18074_s4 }
0x10c4   :  { %v799_v16 = vpop.permute.xlu0 %798 }
0x10c5   :  { %13429 = vmatmul.msk.f32.vlgmr.msrb.gmra.mxu0 %vm128_vm9, %v799_v16 }
0x1142   :  { %v819_v19 = vpop.f32.mrf.mxu0 }
0x1143   :  { %v846_v20 = vadd.f32 %v845_v17, %v819_v19 }
0x1145   :  { %v848_v21 = vadd.f32 %v18174_v14, %v846_v20 }
0x1147   :  { %v849_v22 = vmul.f32 2.0, %v848_v21 }
0x1149   :  { %v850_v23 = vsel %vm18177_vm4, %v849_v22, %v848_v21 }
0x114a   :  { %v13431_v24 = vmul.f32 -1.442695, %v850_v23 }
0x114c   :  { %17803 = vpow2.f32 %v13431_v24 }
0x1152   :  { %v17804_v25 = vpop.eup %17803 }
0x1153   :  { %v854_v26 = vadd.f32 1.0, %v17804_v25 }
0x1155   :  { %17805 = vrcp.f32 %v854_v26  ;;  %v866_v30 = vand.u32 2147483648, %v854_v26  ;;  %v864_v32 = vand.u32 2147483647, %v854_v26  ;;  %vm860_vm1 = vweird.f32 %v854_v26 }
0x1157   :  { %v867_v14 = vor.u32 1.1754944e-38, %v866_v30  ;;  %vm865_vm11 = vcmp.eq.f32.partialorder %v864_v32, 8.507059e+37 }
0x115b   :  { %v17806_v27 = vpop.eup %17805 }
0x115c   :  { %v856_v28 = vmul.f32 %v17806_v27, %v854_v26  ;;  %vm861_vm0 = vweird.f32 %v17806_v27 }
0x115d   :  { %vm862_vm10 = vmor %vm860_vm1, %vm861_vm0 }
0x115e   :  { %v857_v29 = vsub.f32 1.0, %v856_v28 }
0x1160   :  { %v858_v31 = vmul.f32 %v17806_v27, %v857_v29 }
0x1162   :  { %v859_v33 = vadd.f32 %v17806_v27, %v858_v31 }
0x1164   :  { %v863_v34 = vsel %vm862_vm10, %v17806_v27, %v859_v33 }
0x1165   :  { %v868_v35 = vsel %vm865_vm11, %v867_v14, %v863_v34 }
0x1166   :  { %v870_v36 = vmul.f32 2.0, %v868_v35 }
0x1168   :  { %v13432_v37 = vadd.f32 -1.0, %v870_v36 }
0x116a   :  { %v872_v38 = vsel %vm18177_vm4, %v13432_v37, %v868_v35 }
0x116b   :  { %875 = vrot.lane.b32.xlu1 %v872_v38, %s18073_s2  ;;  %v873_v18 = vmul.f32 %v872_v38, %v788_v11 }
0x11dd   :  { %v876_v39 = vpop.permute.xlu1 %875 }
0x11de   :  { %v878_v40 = vmul.f32 %v876_v39, %v872_v38 }
0x11e0   :  { %880 = vrot.lane.b32.xlu2 %v878_v40, %s18074_s4 }
0x123a   :  { %v881_v41 = vpop.permute.xlu2 %880 }
0x123b   :  { %v883_v42 = vadd.f32 %v881_v41, %v873_v18 }
0x123d   :  { %17807 = vtanh.f32 %v883_v42 }
0x1243   :  { %v17808_v43 = vpop.eup %17807 }
0x1244   :  { %886 = vrot.lane.b32.xlu0 %v17808_v43, %s18073_s2 }
0x12b6   :  { %v887_v44 = vpop.permute.xlu0 %886 }
0x12b7   :  { %v889_v45 = vmul.f32 %v887_v44, %v872_v38 }
0x12b9   :  { %v890_v46 = vpack.c.bf16 %v889_v45, %v889_v45 }
0x12bb   :  { %1468 = vrot.lane.b32.xlu0 %v890_v46, %s18074_s4 }
0x12bc   :  { %18055 = dma.done.wait [#allocation3], 25088 }
0x12bd   :  { %18056 = vsyncadd [#allocation3], 4294942208  ;;  %v13827_v47 = vld [vmem:[#allocation2 + $0x310] sm:$0xf]  ;;  %v17110_v48 = vld [vmem:[#allocation2 + $0x494] sm:$0xf0] }
0x12be   :  { %v17061_v49 = vld [vmem:[#allocation2 + $0x314] sm:$0xf]  ;;  %v13828_v50 = vor.u32 %v17110_v48, %v13827_v47  ;;  %v13829_v51 = vld [vmem:[#allocation2 + $0x498] sm:$0xf0]  ;;  %v13835_v52 = vld [vmem:[#allocation2 + $0x318] sm:$0xf] }
0x12bf   :  { %v17111_v53 = vld [vmem:[#allocation2 + $0x49c] sm:$0xf0]  ;;  %v13832_v54 = vor.u32 %v17061_v49, %v13829_v51  ;;  %v17062_v56 = vld [vmem:[#allocation2 + $0x31c] sm:$0xf]  ;;  %v13837_v57 = vld [vmem:[#allocation2 + $0x4a0] sm:$0xf0] }
0x12c0   :  { %v13836_v55 = vor.u32 %v17111_v53, %v13835_v52  ;;  %v13435_v58 = vld [vmem:[#allocation2] sm:$0xf]  ;;  %2459 = vmatpush.bf16.msra.mxu1 %v13828_v50  ;;  %v13840_v59 = vor.u32 %v17062_v56, %v13837_v57  ;;  %v17012_v60 = vld [vmem:[#allocation2 + $0x184] sm:$0xf0]  ;;  %v16963_v61 = vld [vmem:[#allocation2 + $0x4] sm:$0xf] }
0x12c1   :  { %v13437_v62 = vld [vmem:[#allocation2 + $0x188] sm:$0xf0]  ;;  %2472 = vmatpush.bf16.msra.mxu3 %v13832_v54  ;;  %v13436_v63 = vor.u32 %v17012_v60, %v13435_v58  ;;  %v13443_v6 = vld [vmem:[#allocation2 + $0x8] sm:$0xf]  ;;  %v17013_v3 = vld [vmem:[#allocation2 + $0x18c] sm:$0xf0] }
0x12c2   :  { %2485 = vmatpush.bf16.msra.mxu0 %v13836_v55  ;;  %v13440_v5 = vor.u32 %v16963_v61, %v13437_v62  ;;  %v16964_v4 = vld [vmem:[#allocation2 + $0xc] sm:$0xf]  ;;  %2498 = vmatpush.bf16.msra.mxu2 %v13840_v59  ;;  %v13444_v7 = vor.u32 %v17013_v3, %v13443_v6  ;;  %v13445_v9 = vld [vmem:[#allocation2 + $0x190] sm:$0xf0]  ;;  %v17063_v11 = vld [vmem:[#allocation2 + $0x324] sm:$0xf] }
0x12c3   :  { %v13448_v10 = vor.u32 %v16964_v4, %v13445_v9  ;;  %v13845_v12 = vld [vmem:[#allocation2 + $0x4a8] sm:$0xf0]  ;;  %v13843_v0 = vld [vmem:[#allocation2 + $0x320] sm:$0xf]  ;;  %v17112_v13 = vld [vmem:[#allocation2 + $0x4a4] sm:$0xf0] }
0x12c4   :  { %2460 = vmatpush.bf16.msra.mxu1 %v13436_v63  ;;  %v13848_v1 = vor.u32 %v17063_v11, %v13845_v12  ;;  %v16965_v2 = vld [vmem:[#allocation2 + $0x14] sm:$0xf]  ;;  %v13453_v15 = vld [vmem:[#allocation2 + $0x198] sm:$0xf0]  ;;  %v13844_v8 = vor.u32 %v17112_v13, %v13843_v0  ;;  %v13851_v16 = vld [vmem:[#allocation2 + $0x328] sm:$0xf] }
0x12c5   :  { %2473 = vmatpush.bf16.msra.mxu3 %v13440_v5  ;;  %v17113_v17 = vld [vmem:[#allocation2 + $0x4ac] sm:$0xf0]  ;;  %v17064_v19 = vld [vmem:[#allocation2 + $0x32c] sm:$0xf]  ;;  %v13456_v20 = vor.u32 %v16965_v2, %v13453_v15  ;;  %v13853_v22 = vld [vmem:[#allocation2 + $0x4b0] sm:$0xf0] }
0x12c6   :  { %2486 = vmatpush.bf16.msra.mxu0 %v13444_v7  ;;  %2499 = vmatpush.bf16.msra.mxu2 %v13448_v10  ;;  %v13852_v21 = vor.u32 %v17113_v17, %v13851_v16  ;;  %v13451_v23 = vld [vmem:[#allocation2 + $0x10] sm:$0xf]  ;;  %v17014_v24 = vld [vmem:[#allocation2 + $0x194] sm:$0xf0]  ;;  %v13856_v25 = vor.u32 %v17064_v19, %v13853_v22  ;;  %v17015_v28 = vld [vmem:[#allocation2 + $0x19c] sm:$0xf0] }
0x12c7   :  { %v13452_v26 = vor.u32 %v17014_v24, %v13451_v23  ;;  %v13459_v27 = vld [vmem:[#allocation2 + $0x18] sm:$0xf]  ;;  %v16966_v29 = vld [vmem:[#allocation2 + $0x1c] sm:$0xf]  ;;  %v13461_v31 = vld [vmem:[#allocation2 + $0x1a0] sm:$0xf0] }
0x12c8   :  { %2511 = vmatpush.bf16.msrb.mxu1 %v13844_v8  ;;  %v13460_v30 = vor.u32 %v17015_v28, %v13459_v27  ;;  %v13464_v32 = vor.u32 %v16966_v29, %v13461_v31  ;;  %v17065_v33 = vld [vmem:[#allocation2 + $0x334] sm:$0xf]  ;;  %v13861_v14 = vld [vmem:[#allocation2 + $0x4b8] sm:$0xf0]  ;;  %v13859_v34 = vld [vmem:[#allocation2 + $0x330] sm:$0xf] }
0x12c9   :  { %2524 = vmatpush.bf16.msrb.mxu3 %v13848_v1  ;;  %v17114_v35 = vld [vmem:[#allocation2 + $0x4b4] sm:$0xf0]  ;;  %v17115_v37 = vld [vmem:[#allocation2 + $0x4bc] sm:$0xf0]  ;;  %v17066_v38 = vld [vmem:[#allocation2 + $0x33c] sm:$0xf]  ;;  %v13864_v40 = vor.u32 %v17065_v33, %v13861_v14 }
0x12ca   :  { %2537 = vmatpush.bf16.msrb.mxu0 %v13852_v21  ;;  %2550 = vmatpush.bf16.msrb.mxu2 %v13856_v25  ;;  %v13867_v36 = vld [vmem:[#allocation2 + $0x338] sm:$0xf]  ;;  %v13869_v39 = vld [vmem:[#allocation2 + $0x4c0] sm:$0xf0]  ;;  %v13860_v18 = vor.u32 %v17114_v35, %v13859_v34  ;;  %v13469_v42 = vld [vmem:[#allocation2 + $0x1a8] sm:$0xf0] }
0x12cb   :  { %v16967_v41 = vld [vmem:[#allocation2 + $0x24] sm:$0xf]  ;;  %v13868_v44 = vor.u32 %v17115_v37, %v13867_v36  ;;  %v13872_v45 = vor.u32 %v17066_v38, %v13869_v39  ;;  %v13467_v46 = vld [vmem:[#allocation2 + $0x20] sm:$0xf]  ;;  %v17016_v47 = vld [vmem:[#allocation2 + $0x1a4] sm:$0xf0] }
0x12cc   :  { %2512 = vmatpush.bf16.msrb.mxu1 %v13452_v26  ;;  %v13475_v48 = vld [vmem:[#allocation2 + $0x28] sm:$0xf]  ;;  %v17017_v49 = vld [vmem:[#allocation2 + $0x1ac] sm:$0xf0]  ;;  %v16968_v50 = vld [vmem:[#allocation2 + $0x2c] sm:$0xf]  ;;  %v13472_v52 = vor.u32 %v16967_v41, %v13469_v42  ;;  %v13468_v53 = vor.u32 %v17016_v47, %v13467_v46 }
0x12cd   :  { %2525 = vmatpush.bf16.msrb.mxu3 %v13456_v20  ;;  %v13477_v51 = vld [vmem:[#allocation2 + $0x1b0] sm:$0xf0]  ;;  %v13476_v54 = vor.u32 %v17017_v49, %v13475_v48  ;;  %v17067_v56 = vld [vmem:[#allocation2 + $0x344] sm:$0xf]  ;;  %v13877_v57 = vld [vmem:[#allocation2 + $0x4c8] sm:$0xf0] }
0x12ce   :  { %2538 = vmatpush.bf16.msrb.mxu0 %v13460_v30  ;;  %2551 = vmatpush.bf16.msrb.mxu2 %v13464_v32  ;;  %v13480_v55 = vor.u32 %v16968_v50, %v13477_v51  ;;  %v13875_v58 = vld [vmem:[#allocation2 + $0x340] sm:$0xf]  ;;  %v17116_v59 = vld [vmem:[#allocation2 + $0x4c4] sm:$0xf0]  ;;  %v17117_v61 = vld [vmem:[#allocation2 + $0x4cc] sm:$0xf0]  ;;  %v13880_v5 = vor.u32 %v17067_v56, %v13877_v57 }
0x12cf   :  { %v13883_v60 = vld [vmem:[#allocation2 + $0x348] sm:$0xf]  ;;  %v17068_v62 = vld [vmem:[#allocation2 + $0x34c] sm:$0xf]  ;;  %v13885_v63 = vld [vmem:[#allocation2 + $0x4d0] sm:$0xf0]  ;;  %v13876_v6 = vor.u32 %v17116_v59, %v13875_v58 }
0x12d0   :  { %v16969_v3 = vld [vmem:[#allocation2 + $0x34] sm:$0xf]  ;;  %v13485_v4 = vld [vmem:[#allocation2 + $0x1b8] sm:$0xf0]  ;;  %v13884_v7 = vor.u32 %v17117_v61, %v13883_v60  ;;  %v13888_v9 = vor.u32 %v17068_v62, %v13885_v63  ;;  %v13483_v10 = vld [vmem:[#allocation2 + $0x30] sm:$0xf] }
0x12d1   :  { %v17018_v11 = vld [vmem:[#allocation2 + $0x1b4] sm:$0xf0]  ;;  %v17019_v0 = vld [vmem:[#allocation2 + $0x1bc] sm:$0xf0]  ;;  %v16970_v1 = vld [vmem:[#allocation2 + $0x3c] sm:$0xf]  ;;  %v13488_v2 = vor.u32 %v16969_v3, %v13485_v4 }
0x12d2   :  { %v13491_v12 = vld [vmem:[#allocation2 + $0x38] sm:$0xf]  ;;  %v13493_v13 = vld [vmem:[#allocation2 + $0x1c0] sm:$0xf0]  ;;  %v13484_v15 = vor.u32 %v17018_v11, %v13483_v10  ;;  %v17069_v17 = vld [vmem:[#allocation2 + $0x354] sm:$0xf] }
0x12d3   :  { %v13492_v8 = vor.u32 %v17019_v0, %v13491_v12  ;;  %v13496_v16 = vor.u32 %v16970_v1, %v13493_v13  ;;  %v13893_v19 = vld [vmem:[#allocation2 + $0x4d8] sm:$0xf0]  ;;  %v13891_v20 = vld [vmem:[#allocation2 + $0x350] sm:$0xf]  ;;  %v17118_v21 = vld [vmem:[#allocation2 + $0x4d4] sm:$0xf0] }
0x12d4   :  { %v13899_v22 = vld [vmem:[#allocation2 + $0x358] sm:$0xf]  ;;  %v17119_v23 = vld [vmem:[#allocation2 + $0x4dc] sm:$0xf0]  ;;  %v17070_v24 = vld [vmem:[#allocation2 + $0x35c] sm:$0xf]  ;;  %v13896_v26 = vor.u32 %v17069_v17, %v13893_v19  ;;  %v13892_v27 = vor.u32 %v17118_v21, %v13891_v20 }
0x12d5   :  { %v13901_v25 = vld [vmem:[#allocation2 + $0x4e0] sm:$0xf0]  ;;  %v13501_v29 = vld [vmem:[#allocation2 + $0x1c8] sm:$0xf0]  ;;  %v13900_v30 = vor.u32 %v17119_v23, %v13899_v22  ;;  %v13499_v32 = vld [vmem:[#allocation2 + $0x40] sm:$0xf] }
0x12d6   :  { %v16971_v28 = vld [vmem:[#allocation2 + $0x44] sm:$0xf]  ;;  %v13904_v31 = vor.u32 %v17070_v24, %v13901_v25  ;;  %v17020_v33 = vld [vmem:[#allocation2 + $0x1c4] sm:$0xf0]  ;;  %v17021_v34 = vld [vmem:[#allocation2 + $0x1cc] sm:$0xf0] }
0x12d7   :  { %v13507_v14 = vld [vmem:[#allocation2 + $0x48] sm:$0xf]  ;;  %v16972_v35 = vld [vmem:[#allocation2 + $0x4c] sm:$0xf]  ;;  %v13509_v36 = vld [vmem:[#allocation2 + $0x1d0] sm:$0xf0]  ;;  %v13504_v37 = vor.u32 %v16971_v28, %v13501_v29  ;;  %v13500_v38 = vor.u32 %v17020_v33, %v13499_v32 }
0x12d8   :  { %v13508_v39 = vor.u32 %v17021_v34, %v13507_v14  ;;  %v13909_v41 = vld [vmem:[#allocation2 + $0x4e8] sm:$0xf0]  ;;  %v13907_v42 = vld [vmem:[#allocation2 + $0x360] sm:$0xf]  ;;  %v17121_v46 = vld [vmem:[#allocation2 + $0x4ec] sm:$0xf0] }
0x12d9   :  { %v17072_v47 = vld [vmem:[#allocation2 + $0x36c] sm:$0xf]  ;;  %v13917_v48 = vld [vmem:[#allocation2 + $0x4f0] sm:$0xf0]  ;;  %v17022_v56 = vld [vmem:[#allocation2 + $0x1d4] sm:$0xf0] }
0x12da   :  { %v16973_v51 = vld [vmem:[#allocation2 + $0x54] sm:$0xf]  ;;  %v13523_v57 = vld [vmem:[#allocation2 + $0x58] sm:$0xf]  ;;  %v17023_v58 = vld [vmem:[#allocation2 + $0x1dc] sm:$0xf0] }
0x12db   :  { %v16974_v59 = vld [vmem:[#allocation2 + $0x5c] sm:$0xf]  ;;  %v13525_v60 = vld [vmem:[#allocation2 + $0x1e0] sm:$0xf0]  ;;  %v13524_v63 = vor.u32 %v17023_v58, %v13523_v57  ;;  %v13923_v4 = vld [vmem:[#allocation2 + $0x370] sm:$0xf] }
0x12dc   :  { %v13925_v3 = vld [vmem:[#allocation2 + $0x4f8] sm:$0xf0]  ;;  %v17123_v10 = vld [vmem:[#allocation2 + $0x4fc] sm:$0xf0]  ;;  %v13933_v12 = vld [vmem:[#allocation2 + $0x500] sm:$0xf0] }
0x12dd   :  { %v17074_v11 = vld [vmem:[#allocation2 + $0x37c] sm:$0xf]  ;;  %v16975_v13 = vld [vmem:[#allocation2 + $0x64] sm:$0xf]  ;;  %v17024_v17 = vld [vmem:[#allocation2 + $0x1e4] sm:$0xf0] }
0x12de   :  { %v13539_v19 = vld [vmem:[#allocation2 + $0x68] sm:$0xf]  ;;  %v17025_v20 = vld [vmem:[#allocation2 + $0x1ec] sm:$0xf0]  ;;  %v16976_v21 = vld [vmem:[#allocation2 + $0x6c] sm:$0xf] }
0x12df   :  { %v13541_v22 = vld [vmem:[#allocation2 + $0x1f0] sm:$0xf0]  ;;  %v13540_v25 = vor.u32 %v17025_v20, %v13539_v19  ;;  %v13941_v28 = vld [vmem:[#allocation2 + $0x508] sm:$0xf0]  ;;  %v13939_v29 = vld [vmem:[#allocation2 + $0x380] sm:$0xf] }
0x12e0   :  { %v17125_v32 = vld [vmem:[#allocation2 + $0x50c] sm:$0xf0]  ;;  %v17076_v33 = vld [vmem:[#allocation2 + $0x38c] sm:$0xf]  ;;  %v13949_v14 = vld [vmem:[#allocation2 + $0x510] sm:$0xf0] }
0x12e1   :  { %v13965_v57 = vld [vmem:[#allocation2 + $0x520] sm:$0xf0]  ;;  %v13981_v19 = vld [vmem:[#allocation2 + $0x530] sm:$0xf0]  ;;  %vm3898_vm4 = vcmask 1041408   ;;  %vm3900_vm12 = vcmask 1045508  }
0x12e2   :  { %vm3902_vm13 = vcmask 1043456   ;;  %s13400_s10 = scalar_lea.hbm %s19513_s5, 3136 }
0x12e3   :  { %s4035_s11 = sshll.u32 %s13400_s10, 4  ;;  %s4036_s11 = int_to_ptr.hbm [resolvable:$true] %s4035_s11 }
0x132d   :  { %v18305_v43 = vpop.permute.xlu0 %1468 }
0x132e   :  { %14217 = vmatmul.msk.bf16.vlgmr.msra.gmra.mxu1 %vm128_vm9, %v18305_v43  ;;  %14218 = vmatmul.msk.bf16.vlgmr.msra.gmra.mxu3 %vm128_vm9, %v18305_v43 }
0x132f   :  { %14219 = vmatmul.msk.bf16.vlgmr.msra.gmra.mxu0 %vm128_vm9, %v18305_v43  ;;  %14220 = vmatmul.msk.bf16.vlgmr.msra.gmra.mxu2 %vm128_vm9, %v18305_v43 }
0x1330   :  { %2576 = vmatpush.bf16.msra.mxu3 %v13864_v40  ;;  %2563 = vmatpush.bf16.msra.mxu1 %v13860_v18  ;;  %v13512_v40 = vor.u32 %v16972_v35, %v13509_v36  ;;  %v17071_v18 = vld [vmem:[#allocation2 + $0x364] sm:$0xf]  ;;  %v16977_v36 = vld [vmem:[#allocation2 + $0x74] sm:$0xf] }
0x1331   :  { %2589 = vmatpush.bf16.msra.mxu0 %v13868_v44  ;;  %2602 = vmatpush.bf16.msra.mxu2 %v13872_v45  ;;  %v17120_v44 = vld [vmem:[#allocation2 + $0x4e4] sm:$0xf0]  ;;  %v13912_v49 = vor.u32 %v17071_v18, %v13909_v41  ;;  %v17026_v18 = vld [vmem:[#allocation2 + $0x1f4] sm:$0xf0] }
0x1332   :  { %v13915_v45 = vld [vmem:[#allocation2 + $0x368] sm:$0xf]  ;;  %v13908_v50 = vor.u32 %v17120_v44, %v13907_v42  ;;  %v13555_v41 = vld [vmem:[#allocation2 + $0x78] sm:$0xf]  ;;  %v17027_v42 = vld [vmem:[#allocation2 + $0x1fc] sm:$0xf0] }
0x1333   :  { %v16978_v44 = vld [vmem:[#allocation2 + $0x7c] sm:$0xf] }
0x1334   :  { %2577 = vmatpush.bf16.msra.mxu3 %v13472_v52  ;;  %2564 = vmatpush.bf16.msra.mxu1 %v13468_v53  ;;  %v13517_v52 = vld [vmem:[#allocation2 + $0x1d8] sm:$0xf0]  ;;  %v13916_v53 = vor.u32 %v17121_v46, %v13915_v45  ;;  %v13557_v45 = vld [vmem:[#allocation2 + $0x200] sm:$0xf0] }
0x1335   :  { %2590 = vmatpush.bf16.msra.mxu0 %v13476_v54  ;;  %2603 = vmatpush.bf16.msra.mxu2 %v13480_v55  ;;  %v13920_v54 = vor.u32 %v17072_v47, %v13917_v48  ;;  %v13515_v55 = vld [vmem:[#allocation2 + $0x50] sm:$0xf]  ;;  %v13520_v61 = vor.u32 %v16973_v51, %v13517_v52  ;;  %v13556_v48 = vor.u32 %v17027_v42, %v13555_v41  ;;  %v13957_v51 = vld [vmem:[#allocation2 + $0x518] sm:$0xf0]  ;;  %v17130_v41 = vld [vmem:[#allocation2 + $0x534] sm:$0xf0] }
0x1336   :  { %v13516_v62 = vor.u32 %v17022_v56, %v13515_v55  ;;  %v13955_v52 = vld [vmem:[#allocation2 + $0x390] sm:$0xf]  ;;  %v17127_v55 = vld [vmem:[#allocation2 + $0x51c] sm:$0xf0]  ;;  %v17078_v56 = vld [vmem:[#allocation2 + $0x39c] sm:$0xf] }
0x1337   :  { %v13995_v42 = vld [vmem:[#allocation2 + $0x3b8] sm:$0xf] }
0x133e   :  { %14221 = vmatmul.msk.bf16.vlgmr.msrb.gmra.mxu1 %vm128_vm9, %v18305_v43  ;;  %14222 = vmatmul.msk.bf16.vlgmr.msrb.gmra.mxu3 %vm128_vm9, %v18305_v43 }
0x133f   :  { %14223 = vmatmul.msk.bf16.vlgmr.msrb.gmra.mxu0 %vm128_vm9, %v18305_v43  ;;  %14224 = vmatmul.msk.bf16.vlgmr.msrb.gmra.mxu2 %vm128_vm9, %v18305_v43 }
0x1340   :  { %2628 = vmatpush.bf16.msrb.mxu3 %v13880_v5  ;;  %2615 = vmatpush.bf16.msrb.mxu1 %v13876_v6  ;;  %v13528_v5 = vor.u32 %v16974_v59, %v13525_v60  ;;  %v17073_v6 = vld [vmem:[#allocation2 + $0x374] sm:$0xf]  ;;  %v16979_v60 = vld [vmem:[#allocation2 + $0x84] sm:$0xf] }
0x1341   :  { %2641 = vmatpush.bf16.msrb.mxu0 %v13884_v7  ;;  %2654 = vmatpush.bf16.msrb.mxu2 %v13888_v9  ;;  %v17122_v7 = vld [vmem:[#allocation2 + $0x4f4] sm:$0xf0]  ;;  %v13928_v0 = vor.u32 %v17073_v6, %v13925_v3  ;;  %v17028_v6 = vld [vmem:[#allocation2 + $0x204] sm:$0xf0] }
0x1342   :  { %v13931_v9 = vld [vmem:[#allocation2 + $0x378] sm:$0xf]  ;;  %v13924_v1 = vor.u32 %v17122_v7, %v13923_v4  ;;  %v13571_v3 = vld [vmem:[#allocation2 + $0x88] sm:$0xf]  ;;  %v17029_v4 = vld [vmem:[#allocation2 + $0x20c] sm:$0xf0] }
0x1343   :  { %v16980_v7 = vld [vmem:[#allocation2 + $0x8c] sm:$0xf] }
0x1344   :  { %2629 = vmatpush.bf16.msrb.mxu3 %v13488_v2  ;;  %2616 = vmatpush.bf16.msrb.mxu1 %v13484_v15  ;;  %v13533_v2 = vld [vmem:[#allocation2 + $0x1e8] sm:$0xf0]  ;;  %v13932_v15 = vor.u32 %v17123_v10, %v13931_v9  ;;  %v13573_v9 = vld [vmem:[#allocation2 + $0x210] sm:$0xf0] }
0x1345   :  { %2642 = vmatpush.bf16.msrb.mxu0 %v13492_v8  ;;  %2655 = vmatpush.bf16.msrb.mxu2 %v13496_v16  ;;  %v13936_v8 = vor.u32 %v17074_v11, %v13933_v12  ;;  %v13531_v16 = vld [vmem:[#allocation2 + $0x60] sm:$0xf]  ;;  %v13536_v23 = vor.u32 %v16975_v13, %v13533_v2  ;;  %v13572_v12 = vor.u32 %v17029_v4, %v13571_v3  ;;  %v13973_v13 = vld [vmem:[#allocation2 + $0x528] sm:$0xf0] }
0x1346   :  { %v13532_v24 = vor.u32 %v17024_v17, %v13531_v16  ;;  %v13971_v2 = vld [vmem:[#allocation2 + $0x3a0] sm:$0xf]  ;;  %v17129_v16 = vld [vmem:[#allocation2 + $0x52c] sm:$0xf0]  ;;  %v17080_v17 = vld [vmem:[#allocation2 + $0x3ac] sm:$0xf] }
0x134e   :  { %14225 = vmatmul.msk.bf16.vlgmr.msra.gmra.mxu1 %vm128_vm9, %v18305_v43  ;;  %14226 = vmatmul.msk.bf16.vlgmr.msra.gmra.mxu3 %vm128_vm9, %v18305_v43 }
0x134f   :  { %14227 = vmatmul.msk.bf16.vlgmr.msra.gmra.mxu0 %vm128_vm9, %v18305_v43  ;;  %14228 = vmatmul.msk.bf16.vlgmr.msra.gmra.mxu2 %vm128_vm9, %v18305_v43 }
0x1350   :  { %2680 = vmatpush.bf16.msra.mxu3 %v13896_v26  ;;  %2667 = vmatpush.bf16.msra.mxu1 %v13892_v27  ;;  %v13544_v26 = vor.u32 %v16976_v21, %v13541_v22  ;;  %v17075_v27 = vld [vmem:[#allocation2 + $0x384] sm:$0xf]  ;;  %v16981_v22 = vld [vmem:[#allocation2 + $0x94] sm:$0xf] }
0x1351   :  { %2693 = vmatpush.bf16.msra.mxu0 %v13900_v30  ;;  %2706 = vmatpush.bf16.msra.mxu2 %v13904_v31  ;;  %v17124_v30 = vld [vmem:[#allocation2 + $0x504] sm:$0xf0]  ;;  %v13944_v34 = vor.u32 %v17075_v27, %v13941_v28  ;;  %v17030_v27 = vld [vmem:[#allocation2 + $0x214] sm:$0xf0] }
0x1352   :  { %v13947_v31 = vld [vmem:[#allocation2 + $0x388] sm:$0xf]  ;;  %v13940_v35 = vor.u32 %v17124_v30, %v13939_v29  ;;  %v13587_v28 = vld [vmem:[#allocation2 + $0x98] sm:$0xf]  ;;  %v17031_v29 = vld [vmem:[#allocation2 + $0x21c] sm:$0xf0] }
0x1353   :  { %v16982_v30 = vld [vmem:[#allocation2 + $0x9c] sm:$0xf] }
0x1354   :  { %2681 = vmatpush.bf16.msra.mxu3 %v13504_v37  ;;  %2668 = vmatpush.bf16.msra.mxu1 %v13500_v38  ;;  %v13549_v37 = vld [vmem:[#allocation2 + $0x1f8] sm:$0xf0]  ;;  %v13948_v38 = vor.u32 %v17125_v32, %v13947_v31  ;;  %v13589_v31 = vld [vmem:[#allocation2 + $0x220] sm:$0xf0] }
0x1355   :  { %2694 = vmatpush.bf16.msra.mxu0 %v13508_v39  ;;  %2707 = vmatpush.bf16.msra.mxu2 %v13512_v40  ;;  %v13952_v39 = vor.u32 %v17076_v33, %v13949_v14  ;;  %v13547_v40 = vld [vmem:[#allocation2 + $0x70] sm:$0xf]  ;;  %v13552_v46 = vor.u32 %v16977_v36, %v13549_v37  ;;  %v1110_v14 = vld [vmem:[#allocation12] sm:$0xff] }
0x1356   :  { %v13548_v47 = vor.u32 %v17026_v18, %v13547_v40  ;;  %v1123_v36 = vunpack.c.l.bf16 %v1110_v14  ;;  %v13989_v40 = vld [vmem:[#allocation2 + $0x538] sm:$0xf0]  ;;  %v13987_v18 = vld [vmem:[#allocation2 + $0x3b0] sm:$0xf] }
0x1358   :  { %v1175_v37 = vperm.slane %v1123_v36, 4 }
0x135e   :  { %14229 = vmatmul.msk.bf16.vlgmr.msrb.gmra.mxu1 %vm128_vm9, %v18305_v43  ;;  %14230 = vmatmul.msk.bf16.vlgmr.msrb.gmra.mxu3 %vm128_vm9, %v18305_v43 }
0x135f   :  { %14231 = vmatmul.msk.bf16.vlgmr.msrb.gmra.mxu0 %vm128_vm9, %v18305_v43  ;;  %14232 = vmatmul.msk.bf16.vlgmr.msrb.gmra.mxu2 %vm128_vm9, %v18305_v43 }
0x1360   :  { %2732 = vmatpush.bf16.msrb.mxu3 %v13912_v49  ;;  %2719 = vmatpush.bf16.msrb.mxu1 %v13908_v50  ;;  %v13560_v49 = vor.u32 %v16978_v44, %v13557_v45  ;;  %v17077_v50 = vld [vmem:[#allocation2 + $0x394] sm:$0xf]  ;;  %v17131_v44 = vld [vmem:[#allocation2 + $0x53c] sm:$0xf0]  ;;  %v17082_v45 = vld [vmem:[#allocation2 + $0x3bc] sm:$0xf] }
0x1361   :  { %2745 = vmatpush.bf16.msrb.mxu0 %v13916_v53  ;;  %2758 = vmatpush.bf16.msrb.mxu2 %v13920_v54  ;;  %v17126_v53 = vld [vmem:[#allocation2 + $0x514] sm:$0xf0]  ;;  %v13960_v58 = vor.u32 %v17077_v50, %v13957_v51  ;;  %v1371_v50 = vperm.slane %v1175_v37, 0 }
0x1362   :  { %v13963_v54 = vld [vmem:[#allocation2 + $0x398] sm:$0xf]  ;;  %v13956_v59 = vor.u32 %v17126_v53, %v13955_v52 }
0x1364   :  { %2733 = vmatpush.bf16.msrb.mxu3 %v13520_v61  ;;  %2720 = vmatpush.bf16.msrb.mxu1 %v13516_v62  ;;  %v13565_v61 = vld [vmem:[#allocation2 + $0x208] sm:$0xf0]  ;;  %v13964_v62 = vor.u32 %v17127_v55, %v13963_v54  ;;  %v13988_v54 = vor.u32 %v17130_v41, %v13987_v18  ;;  %v16983_v55 = vld [vmem:[#allocation2 + $0xa4] sm:$0xf] }
0x1365   :  { %2746 = vmatpush.bf16.msrb.mxu0 %v13524_v63  ;;  %2759 = vmatpush.bf16.msrb.mxu2 %v13528_v5  ;;  %v13968_v63 = vor.u32 %v17078_v56, %v13965_v57  ;;  %v13563_v5 = vld [vmem:[#allocation2 + $0x80] sm:$0xf]  ;;  %v13568_v10 = vor.u32 %v16979_v60, %v13565_v61  ;;  %v13597_v56 = vld [vmem:[#allocation2 + $0x228] sm:$0xf0]  ;;  %v13996_v57 = vor.u32 %v17131_v44, %v13995_v42  ;;  %v17032_v60 = vld [vmem:[#allocation2 + $0x224] sm:$0xf0] }
0x1366   :  { %v13564_v11 = vor.u32 %v17028_v6, %v13563_v5  ;;  %v13603_v61 = vld [vmem:[#allocation2 + $0xa8] sm:$0xf]  ;;  %v13605_v5 = vld [vmem:[#allocation2 + $0x230] sm:$0xf0]  ;;  %v13600_v4 = vor.u32 %v16983_v55, %v13597_v56  ;;  %v13613_v44 = vld [vmem:[#allocation2 + $0x238] sm:$0xf0] }
0x1367   :  { %v16985_v42 = vld [vmem:[#allocation2 + $0xb4] sm:$0xf]  ;;  %v18390_v55 = vld [vmem:[#allocation12 + $0x8] sm:$0xff] }
0x1368   :  { %v13616_v56 = vor.u32 %v16985_v42, %v13613_v44 }
0x136e   :  { %14233 = vmatmul.msk.bf16.vlgmr.msra.gmra.mxu1 %vm128_vm9, %v18305_v43  ;;  %14234 = vmatmul.msk.bf16.vlgmr.msra.gmra.mxu3 %vm128_vm9, %v18305_v43 }
0x136f   :  { %14235 = vmatmul.msk.bf16.vlgmr.msra.gmra.mxu0 %vm128_vm9, %v18305_v43  ;;  %14236 = vmatmul.msk.bf16.vlgmr.msra.gmra.mxu2 %vm128_vm9, %v18305_v43 }
0x1370   :  { %2784 = vmatpush.bf16.msra.mxu3 %v13928_v0  ;;  %2771 = vmatpush.bf16.msra.mxu1 %v13924_v1  ;;  %v13576_v0 = vor.u32 %v16980_v7, %v13573_v9  ;;  %v17079_v1 = vld [vmem:[#allocation2 + $0x3a4] sm:$0xf] }
0x1371   :  { %2797 = vmatpush.bf16.msra.mxu0 %v13932_v15  ;;  %2810 = vmatpush.bf16.msra.mxu2 %v13936_v8  ;;  %v17128_v15 = vld [vmem:[#allocation2 + $0x524] sm:$0xf0]  ;;  %v13976_v20 = vor.u32 %v17079_v1, %v13973_v13 }
0x1372   :  { %v13979_v8 = vld [vmem:[#allocation2 + $0x3a8] sm:$0xf]  ;;  %v13972_v21 = vor.u32 %v17128_v15, %v13971_v2  ;;  %v1124_v15 = vunpack.c.h.bf16 %v1110_v14  ;;  %v17084_v14 = vld [vmem:[#allocation2 + $0x3cc] sm:$0xf] }
0x1374   :  { %2785 = vmatpush.bf16.msra.mxu3 %v13536_v23  ;;  %2772 = vmatpush.bf16.msra.mxu1 %v13532_v24  ;;  %v13581_v23 = vld [vmem:[#allocation2 + $0x218] sm:$0xf0]  ;;  %v13980_v24 = vor.u32 %v17129_v16, %v13979_v8  ;;  %v1180_v37 = vperm.slane %v1124_v15, 6 }
0x1375   :  { %2798 = vmatpush.bf16.msra.mxu0 %v13540_v25  ;;  %2811 = vmatpush.bf16.msra.mxu2 %v13544_v26  ;;  %v13984_v25 = vor.u32 %v17080_v17, %v13981_v19  ;;  %v13579_v26 = vld [vmem:[#allocation2 + $0x90] sm:$0xf]  ;;  %v13584_v32 = vor.u32 %v16981_v22, %v13581_v23  ;;  %v1179_v23 = vperm.slane %v1124_v15, 4 }
0x1376   :  { %v13580_v33 = vor.u32 %v17030_v27, %v13579_v26  ;;  %v17083_v26 = vld [vmem:[#allocation2 + $0x3c4] sm:$0xf]  ;;  %v14005_v27 = vld [vmem:[#allocation2 + $0x548] sm:$0xf0] }
0x1377   :  { %v14008_v18 = vor.u32 %v17083_v26, %v14005_v27 }
0x137e   :  { %14237 = vmatmul.msk.bf16.vlgmr.msrb.gmra.mxu1 %vm128_vm9, %v18305_v43  ;;  %14238 = vmatmul.msk.bf16.vlgmr.msrb.gmra.mxu3 %vm128_vm9, %v18305_v43 }
0x137f   :  { %14239 = vmatmul.msk.bf16.vlgmr.msrb.gmra.mxu0 %vm128_vm9, %v18305_v43  ;;  %14240 = vmatmul.msk.bf16.vlgmr.msrb.gmra.mxu2 %vm128_vm9, %v18305_v43 }
0x1380   :  { %2836 = vmatpush.bf16.msrb.mxu3 %v13944_v34  ;;  %2823 = vmatpush.bf16.msrb.mxu1 %v13940_v35  ;;  %v13588_v34 = vor.u32 %v17031_v29, %v13587_v28  ;;  %v13592_v35 = vor.u32 %v16982_v30, %v13589_v31  ;;  %v14003_v28 = vld [vmem:[#allocation2 + $0x3c0] sm:$0xf]  ;;  %v17132_v30 = vld [vmem:[#allocation2 + $0x544] sm:$0xf0] }
0x1381   :  { %2849 = vmatpush.bf16.msrb.mxu0 %v13948_v38  ;;  %2862 = vmatpush.bf16.msrb.mxu2 %v13952_v39  ;;  %v1174_v38 = vperm.slane %v1123_v36, 2  ;;  %v17081_v39 = vld [vmem:[#allocation2 + $0x3b4] sm:$0xf]  ;;  %v14011_v31 = vld [vmem:[#allocation2 + $0x3c8] sm:$0xf]  ;;  %v14004_v41 = vor.u32 %v17132_v30, %v14003_v28 }
0x1382   :  { %v13992_v53 = vor.u32 %v17081_v39, %v13989_v40 }
0x1383   :  { %v1370_v52 = vperm.slane %v1174_v38, 0  ;;  %v1375_v38 = vperm.slane %v1179_v23, 0  ;;  %v17086_v23 = vld [vmem:[#allocation2 + $0x3dc] sm:$0xf] }
0x1384   :  { %2837 = vmatpush.bf16.msrb.mxu3 %v13552_v46  ;;  %2824 = vmatpush.bf16.msrb.mxu1 %v13548_v47  ;;  %v13997_v46 = vld [vmem:[#allocation2 + $0x540] sm:$0xf0]  ;;  %v1173_v47 = vperm.slane %v1123_v36, 0 }
0x1385   :  { %2850 = vmatpush.bf16.msrb.mxu0 %v13556_v48  ;;  %2863 = vmatpush.bf16.msrb.mxu2 %v13560_v49  ;;  %v1176_v49 = vperm.slane %v1123_v36, 6 }
0x1386   :  { %v1369_v3 = vperm.slane %v1173_v47, 0  ;;  %v13611_v47 = vld [vmem:[#allocation2 + $0xb0] sm:$0xf] }
0x1387   :  { %v1372_v6 = vperm.slane %v1176_v49, 0  ;;  %v13619_v49 = vld [vmem:[#allocation2 + $0xb8] sm:$0xf] }
0x138e   :  { %14241 = vmatmul.msk.bf16.vlgmr.msra.gmra.mxu1 %vm128_vm9, %v18305_v43  ;;  %14242 = vmatmul.msk.bf16.vlgmr.msra.gmra.mxu3 %vm128_vm9, %v18305_v43 }
0x138f   :  { %14243 = vmatmul.msk.bf16.vlgmr.msra.gmra.mxu0 %vm128_vm9, %v18305_v43  ;;  %14244 = vmatmul.msk.bf16.vlgmr.msra.gmra.mxu2 %vm128_vm9, %v18305_v43 }
0x1390   :  { %2888 = vmatpush.bf16.msra.mxu3 %v13960_v58  ;;  %2875 = vmatpush.bf16.msra.mxu1 %v13956_v59  ;;  %v14000_v58 = vor.u32 %v17082_v45, %v13997_v46  ;;  %v13595_v59 = vld [vmem:[#allocation2 + $0xa0] sm:$0xf] }
0x1391   :  { %2901 = vmatpush.bf16.msra.mxu0 %v13964_v62  ;;  %2914 = vmatpush.bf16.msra.mxu2 %v13968_v63  ;;  %v17033_v62 = vld [vmem:[#allocation2 + $0x22c] sm:$0xf0]  ;;  %v16984_v63 = vld [vmem:[#allocation2 + $0xac] sm:$0xf]  ;;  %v13596_v7 = vor.u32 %v17032_v60, %v13595_v59 }
0x1394   :  { %2889 = vmatpush.bf16.msra.mxu3 %v13568_v10  ;;  %2876 = vmatpush.bf16.msra.mxu1 %v13564_v11  ;;  %v13604_v11 = vor.u32 %v17033_v62, %v13603_v61 }
0x1395   :  { %2902 = vmatpush.bf16.msra.mxu0 %v13572_v12  ;;  %2915 = vmatpush.bf16.msra.mxu2 %v13576_v0  ;;  %v13608_v12 = vor.u32 %v16984_v63, %v13605_v5 }
0x139e   :  { %14245 = vmatmul.msk.bf16.vlgmr.msrb.gmra.mxu1 %vm128_vm9, %v18305_v43  ;;  %14246 = vmatmul.msk.bf16.vlgmr.msrb.gmra.mxu3 %vm128_vm9, %v18305_v43 }
0x139f   :  { %14247 = vmatmul.msk.bf16.vlgmr.msrb.gmra.mxu0 %vm128_vm9, %v18305_v43  ;;  %14248 = vmatmul.msk.bf16.vlgmr.msrb.gmra.mxu2 %vm128_vm9, %v18305_v43 }
0x13a0   :  { %2940 = vmatpush.bf16.msrb.mxu3 %v13976_v20  ;;  %2927 = vmatpush.bf16.msrb.mxu1 %v13972_v21 }
0x13a1   :  { %2953 = vmatpush.bf16.msrb.mxu0 %v13980_v24  ;;  %2966 = vmatpush.bf16.msrb.mxu2 %v13984_v25  ;;  %v1178_v24 = vperm.slane %v1124_v15, 2 }
0x13a3   :  { %v1374_v40 = vperm.slane %v1178_v24, 0  ;;  %v14029_v24 = vld [vmem:[#allocation2 + $0x560] sm:$0xf0] }
0x13a4   :  { %2941 = vmatpush.bf16.msrb.mxu3 %v13584_v32  ;;  %2928 = vmatpush.bf16.msrb.mxu1 %v13580_v33  ;;  %v17133_v33 = vld [vmem:[#allocation2 + $0x54c] sm:$0xf0] }
0x13a5   :  { %2954 = vmatpush.bf16.msrb.mxu0 %v13588_v34  ;;  %2967 = vmatpush.bf16.msrb.mxu2 %v13592_v35  ;;  %v14013_v34 = vld [vmem:[#allocation2 + $0x550] sm:$0xf0]  ;;  %v1177_v35 = vperm.slane %v1124_v15, 0  ;;  %v14012_v45 = vor.u32 %v17133_v33, %v14011_v31  ;;  %v16987_v33 = vld [vmem:[#allocation2 + $0xc4] sm:$0xf] }
0x13a6   :  { %v14016_v46 = vor.u32 %v17084_v14, %v14013_v34  ;;  %v17085_v15 = vld [vmem:[#allocation2 + $0x3d4] sm:$0xf]  ;;  %v13629_v14 = vld [vmem:[#allocation2 + $0x248] sm:$0xf0] }
0x13a7   :  { %v13632_v44 = vor.u32 %v16987_v33, %v13629_v14  ;;  %v18416_v33 = vld [vmem:[#allocation12 + $0x10] sm:$0xff] }
0x13ab   :  { %v2462_v48 = vpop.f32.mrf.mxu1 }
0x13ac   :  { %v2488_v51 = vpop.f32.mrf.mxu0  ;;  %v2463_v8 = vadd.f32 %v2462_v48, %v1369_v3  ;;  %v17034_v48 = vld [vmem:[#allocation2 + $0x234] sm:$0xf0]  ;;  %v1125_v3 = vunpack.c.l.bf16 %v18390_v55 }
0x13ad   :  { %v2489_v9 = vadd.f32 %v2488_v51, %v1371_v50  ;;  %v17035_v50 = vld [vmem:[#allocation2 + $0x23c] sm:$0xf0]  ;;  %v16986_v51 = vld [vmem:[#allocation2 + $0xbc] sm:$0xf] }
0x13ae   :  { %14249 = vmatmul.msk.bf16.vlgmr.msra.gmra.mxu1 %vm128_vm9, %v18305_v43  ;;  %14250 = vmatmul.msk.bf16.vlgmr.msra.gmra.mxu3 %vm128_vm9, %v18305_v43  ;;  %v13620_v60 = vor.u32 %v17035_v50, %v13619_v49  ;;  %v1184_v27 = vperm.slane %v1125_v3, 6 }
0x13af   :  { %14251 = vmatmul.msk.bf16.vlgmr.msra.gmra.mxu0 %vm128_vm9, %v18305_v43  ;;  %14252 = vmatmul.msk.bf16.vlgmr.msra.gmra.mxu2 %vm128_vm9, %v18305_v43  ;;  %v3826_v19 = vrot.slane %v2489_v9, 4 }
0x13b0   :  { %2992 = vmatpush.bf16.msra.mxu3 %v13992_v53  ;;  %2979 = vmatpush.bf16.msra.mxu1 %v13988_v54  ;;  %v1376_v53 = vperm.slane %v1180_v37, 0  ;;  %v1373_v54 = vperm.slane %v1177_v35, 0  ;;  %v14032_v35 = vor.u32 %v17086_v23, %v14029_v24  ;;  %v17036_v37 = vld [vmem:[#allocation2 + $0x244] sm:$0xf0] }
0x13b1   :  { %v2475_v10 = vpop.f32.mrf.mxu3  ;;  %3005 = vmatpush.bf16.msra.mxu0 %v13996_v57  ;;  %3018 = vmatpush.bf16.msra.mxu2 %v14000_v58  ;;  %v13612_v57 = vor.u32 %v17034_v48, %v13611_v47 }
0x13b2   :  { %v2476_v0 = vadd.f32 %v2475_v10, %v1370_v52  ;;  %v2501_v1 = vpop.f32.mrf.mxu2  ;;  %v13621_v52 = vld [vmem:[#allocation2 + $0x240] sm:$0xf0] }
0x13b3   :  { %v2502_v13 = vadd.f32 %v2501_v1, %v1372_v6  ;;  %v2464_v2 = vpop.f32.mrf.mxu1  ;;  %v13624_v61 = vor.u32 %v16986_v51, %v13621_v52  ;;  %v1183_v1 = vperm.slane %v1125_v3, 4 }
0x13b4   :  { %v3825_v16 = vrot.slane %v2476_v0, 6  ;;  %v2490_v17 = vpop.f32.mrf.mxu0  ;;  %2993 = vmatpush.bf16.msra.mxu3 %v13600_v4  ;;  %2980 = vmatpush.bf16.msra.mxu1 %v13596_v7 }
0x13b5   :  { %v3827_v20 = vrot.slane %v2502_v13, 2  ;;  %3006 = vmatpush.bf16.msra.mxu0 %v13604_v11  ;;  %3019 = vmatpush.bf16.msra.mxu2 %v13608_v12  ;;  %v1182_v13 = vperm.slane %v1125_v3, 2  ;;  %v1379_v28 = vperm.slane %v1183_v1, 0  ;;  %v14045_v1 = vld [vmem:[#allocation2 + $0x570] sm:$0xf0] }
0x13b6   :  { %v3899_v21 = vsel %vm3898_vm4, %v2463_v8, %v3825_v16  ;;  %v14021_v8 = vld [vmem:[#allocation2 + $0x558] sm:$0xf0]  ;;  %v14019_v16 = vld [vmem:[#allocation2 + $0x3d0] sm:$0xf] }
0x13b7   :  { %v3901_v22 = vsel %vm3900_vm12, %v3826_v19, %v3827_v20  ;;  %v17134_v19 = vld [vmem:[#allocation2 + $0x554] sm:$0xf0]  ;;  %v1378_v30 = vperm.slane %v1182_v13, 0  ;;  %v14024_v31 = vor.u32 %v17085_v15, %v14021_v8 }
0x13b8   :  { %v3903_v25 = vsel %vm3902_vm13, %v3899_v21, %v3901_v22  ;;  %v14027_v20 = vld [vmem:[#allocation2 + $0x3d8] sm:$0xf]  ;;  %v17135_v22 = vld [vmem:[#allocation2 + $0x55c] sm:$0xf0] }
0x13b9   :  { %3999 = vst [vmem:[#allocation13] sm:$0xff] %v3903_v25  ;;  %v2477_v29 = vpop.f32.mrf.mxu3  ;;  %v1181_v25 = vperm.slane %v1125_v3, 0  ;;  %v14028_v34 = vor.u32 %v17135_v22, %v14027_v20  ;;  %v17087_v3 = vld [vmem:[#allocation2 + $0x3e4] sm:$0xf]  ;;  %v13645_v22 = vld [vmem:[#allocation2 + $0x258] sm:$0xf0] }
0x13ba   :  { %v2503_v32 = vpop.f32.mrf.mxu2 }
0x13bb   :  { %v2514_v36 = vpop.f32.mrf.mxu1  ;;  %v14020_v32 = vor.u32 %v17134_v19, %v14019_v16  ;;  %v1377_v42 = vperm.slane %v1181_v25, 0  ;;  %v13643_v25 = vld [vmem:[#allocation2 + $0xd0] sm:$0xf] }
0x13bc   :  { %v2540_v39 = vpop.f32.mrf.mxu0  ;;  %v2515_v4 = vadd.f32 %v2514_v36, %v1373_v54  ;;  %v13627_v36 = vld [vmem:[#allocation2 + $0xc0] sm:$0xf]  ;;  %v1126_v54 = vunpack.c.h.bf16 %v18390_v55 }
0x13bd   :  { %v2541_v58 = vadd.f32 %v2540_v39, %v1375_v38  ;;  %v13635_v38 = vld [vmem:[#allocation2 + $0xc8] sm:$0xf]  ;;  %v17037_v39 = vld [vmem:[#allocation2 + $0x24c] sm:$0xf0]  ;;  %v14035_v55 = vld [vmem:[#allocation2 + $0x3e0] sm:$0xf] }
0x13be   :  { %14253 = vmatmul.msk.bf16.vlgmr.msrb.gmra.mxu1 %vm128_vm9, %v18305_v43  ;;  %14254 = vmatmul.msk.bf16.vlgmr.msrb.gmra.mxu3 %vm128_vm9, %v18305_v43  ;;  %v13636_v48 = vor.u32 %v17037_v39, %v13635_v38  ;;  %v1185_v13 = vperm.slane %v1126_v54, 0  ;;  %v1188_v15 = vperm.slane %v1126_v54, 6 }
0x13bf   :  { %14255 = vmatmul.msk.bf16.vlgmr.msrb.gmra.mxu0 %vm128_vm9, %v18305_v43  ;;  %14256 = vmatmul.msk.bf16.vlgmr.msrb.gmra.mxu2 %vm128_vm9, %v18305_v43  ;;  %v3829_v10 = vrot.slane %v2541_v58, 4 }
0x13c0   :  { %3044 = vmatpush.bf16.msrb.mxu3 %v14008_v18  ;;  %3031 = vmatpush.bf16.msrb.mxu1 %v14004_v41  ;;  %v13637_v18 = vld [vmem:[#allocation2 + $0x250] sm:$0xf0]  ;;  %v1380_v41 = vperm.slane %v1184_v27, 0  ;;  %v13651_v27 = vld [vmem:[#allocation2 + $0xd8] sm:$0xf] }
0x13c1   :  { %v2527_v59 = vpop.f32.mrf.mxu3  ;;  %3057 = vmatpush.bf16.msrb.mxu0 %v14012_v45  ;;  %3070 = vmatpush.bf16.msrb.mxu2 %v14016_v46  ;;  %v13628_v45 = vor.u32 %v17036_v37, %v13627_v36 }
0x13c2   :  { %v2528_v62 = vadd.f32 %v2527_v59, %v1374_v40  ;;  %v2553_v63 = vpop.f32.mrf.mxu2  ;;  %v16988_v40 = vld [vmem:[#allocation2 + $0xcc] sm:$0xf] }
0x13c3   :  { %v2554_v5 = vadd.f32 %v2553_v63, %v1376_v53  ;;  %v2516_v6 = vpop.f32.mrf.mxu1  ;;  %v13640_v49 = vor.u32 %v16988_v40, %v13637_v18  ;;  %v1187_v63 = vperm.slane %v1126_v54, 4 }
0x13c4   :  { %v3828_v7 = vrot.slane %v2528_v62, 6  ;;  %v2542_v9 = vpop.f32.mrf.mxu0  ;;  %3045 = vmatpush.bf16.msrb.mxu3 %v13616_v56  ;;  %3032 = vmatpush.bf16.msrb.mxu1 %v13612_v57 }
0x13c5   :  { %v3830_v11 = vrot.slane %v2554_v5, 2  ;;  %3058 = vmatpush.bf16.msrb.mxu0 %v13620_v60  ;;  %3071 = vmatpush.bf16.msrb.mxu2 %v13624_v61  ;;  %v1186_v5 = vperm.slane %v1126_v54, 2  ;;  %v17136_v9 = vld [vmem:[#allocation2 + $0x564] sm:$0xf0]  ;;  %v1383_v8 = vperm.slane %v1187_v63, 0 }
0x13c6   :  { %v3904_v12 = vsel %vm3898_vm4, %v2515_v4, %v3828_v7  ;;  %v14037_v4 = vld [vmem:[#allocation2 + $0x568] sm:$0xf0]  ;;  %v14036_v20 = vor.u32 %v17136_v9, %v14035_v55  ;;  %v17089_v54 = vld [vmem:[#allocation2 + $0x3f4] sm:$0xf]  ;;  %v17090_v63 = vld [vmem:[#allocation2 + $0x3fc] sm:$0xf] }
0x13c7   :  { %v3905_v0 = vsel %vm3900_vm12, %v3829_v10, %v3830_v11  ;;  %v14043_v10 = vld [vmem:[#allocation2 + $0x3e8] sm:$0xf]  ;;  %v14040_v19 = vor.u32 %v17087_v3, %v14037_v4 }
0x13c8   :  { %v3906_v2 = vsel %vm3902_vm13, %v3904_v12, %v3905_v0  ;;  %v17137_v12 = vld [vmem:[#allocation2 + $0x56c] sm:$0xf0]  ;;  %v17088_v0 = vld [vmem:[#allocation2 + $0x3ec] sm:$0xf] }
0x13c9   :  { %4000 = vst [vmem:[#allocation13 + $0x8] sm:$0xff] %v3906_v2  ;;  %v2529_v17 = vpop.f32.mrf.mxu3  ;;  %v14044_v23 = vor.u32 %v17137_v12, %v14043_v10  ;;  %v14048_v24 = vor.u32 %v17088_v0, %v14045_v1  ;;  %v16991_v12 = vld [vmem:[#allocation2 + $0xe4] sm:$0xf]  ;;  %v13661_v0 = vld [vmem:[#allocation2 + $0x268] sm:$0xf0] }
0x13ca   :  { %v2555_v21 = vpop.f32.mrf.mxu2  ;;  %v1382_v17 = vperm.slane %v1186_v5, 0  ;;  %v14061_v5 = vld [vmem:[#allocation2 + $0x580] sm:$0xf0] }
0x13cb   :  { %v2566_v26 = vpop.f32.mrf.mxu1  ;;  %v16989_v21 = vld [vmem:[#allocation2 + $0xd4] sm:$0xf] }
0x13cc   :  { %v2592_v29 = vpop.f32.mrf.mxu0  ;;  %v2567_v56 = vadd.f32 %v2566_v26, %v1377_v42  ;;  %v17038_v26 = vld [vmem:[#allocation2 + $0x254] sm:$0xf0]  ;;  %v13648_v14 = vor.u32 %v16989_v21, %v13645_v22  ;;  %v1127_v42 = vunpack.c.l.bf16 %v18416_v33  ;;  %v13664_v22 = vor.u32 %v16991_v12, %v13661_v0 }
0x13cd   :  { %v2593_v46 = vadd.f32 %v2592_v29, %v1379_v28  ;;  %v17039_v28 = vld [vmem:[#allocation2 + $0x25c] sm:$0xf0]  ;;  %v16990_v29 = vld [vmem:[#allocation2 + $0xdc] sm:$0xf] }
0x13ce   :  { %14257 = vmatmul.msk.bf16.vlgmr.msra.gmra.mxu1 %vm128_vm9, %v18305_v43  ;;  %14258 = vmatmul.msk.bf16.vlgmr.msra.gmra.mxu3 %vm128_vm9, %v18305_v43  ;;  %v13652_v37 = vor.u32 %v17039_v28, %v13651_v27  ;;  %v1192_v4 = vperm.slane %v1127_v42, 6  ;;  %v18442_v12 = vld [vmem:[#allocation12 + $0x18] sm:$0xff] }
0x13cf   :  { %14259 = vmatmul.msk.bf16.vlgmr.msra.gmra.mxu0 %vm128_vm9, %v18305_v43  ;;  %14260 = vmatmul.msk.bf16.vlgmr.msra.gmra.mxu2 %vm128_vm9, %v18305_v43  ;;  %v3832_v59 = vrot.slane %v2593_v46, 4 }
0x13d0   :  { %3096 = vmatpush.bf16.msra.mxu3 %v14024_v31  ;;  %3083 = vmatpush.bf16.msra.mxu1 %v14020_v32  ;;  %v1384_v31 = vperm.slane %v1188_v15, 0  ;;  %v1381_v32 = vperm.slane %v1185_v13, 0  ;;  %v14064_v13 = vor.u32 %v17090_v63, %v14061_v5  ;;  %v17040_v15 = vld [vmem:[#allocation2 + $0x264] sm:$0xf0] }
0x13d1   :  { %v2579_v47 = vpop.f32.mrf.mxu3  ;;  %3109 = vmatpush.bf16.msra.mxu0 %v14028_v34  ;;  %3122 = vmatpush.bf16.msra.mxu2 %v14032_v35  ;;  %v13644_v34 = vor.u32 %v17038_v26, %v13643_v25 }
0x13d2   :  { %v2580_v50 = vadd.f32 %v2579_v47, %v1378_v30  ;;  %v2605_v51 = vpop.f32.mrf.mxu2  ;;  %v13653_v30 = vld [vmem:[#allocation2 + $0x260] sm:$0xf0] }
0x13d3   :  { %v2606_v52 = vadd.f32 %v2605_v51, %v1380_v41  ;;  %v2568_v53 = vpop.f32.mrf.mxu1  ;;  %v13656_v38 = vor.u32 %v16990_v29, %v13653_v30  ;;  %v1191_v51 = vperm.slane %v1127_v42, 4 }
0x13d4   :  { %v3831_v57 = vrot.slane %v2580_v50, 6  ;;  %v2594_v58 = vpop.f32.mrf.mxu0  ;;  %3097 = vmatpush.bf16.msra.mxu3 %v13632_v44  ;;  %3084 = vmatpush.bf16.msra.mxu1 %v13628_v45 }
0x13d5   :  { %v3833_v60 = vrot.slane %v2606_v52, 2  ;;  %3110 = vmatpush.bf16.msra.mxu0 %v13636_v48  ;;  %3123 = vmatpush.bf16.msra.mxu2 %v13640_v49  ;;  %v1190_v52 = vperm.slane %v1127_v42, 2  ;;  %v1387_v55 = vperm.slane %v1191_v51, 0  ;;  %v14077_v51 = vld [vmem:[#allocation2 + $0x590] sm:$0xf0] }
0x13d6   :  { %v3907_v61 = vsel %vm3898_vm4, %v2567_v56, %v3831_v57  ;;  %v14053_v56 = vld [vmem:[#allocation2 + $0x578] sm:$0xf0]  ;;  %v14051_v57 = vld [vmem:[#allocation2 + $0x3f0] sm:$0xf] }
0x13d7   :  { %v3908_v62 = vsel %vm3900_vm12, %v3832_v59, %v3833_v60  ;;  %v17138_v59 = vld [vmem:[#allocation2 + $0x574] sm:$0xf0]  ;;  %v1386_v9 = vperm.slane %v1190_v52, 0  ;;  %v14056_v10 = vor.u32 %v17089_v54, %v14053_v56 }
0x13d8   :  { %v3909_v6 = vsel %vm3902_vm13, %v3907_v61, %v3908_v62  ;;  %v14059_v60 = vld [vmem:[#allocation2 + $0x3f8] sm:$0xf]  ;;  %v17139_v62 = vld [vmem:[#allocation2 + $0x57c] sm:$0xf0] }
0x13d9   :  { %4001 = vst [vmem:[#allocation13 + $0x10] sm:$0xff] %v3909_v6  ;;  %v2581_v7 = vpop.f32.mrf.mxu3  ;;  %v1189_v6 = vperm.slane %v1127_v42, 0  ;;  %v14060_v1 = vor.u32 %v17139_v62, %v14059_v60  ;;  %v17091_v42 = vld [vmem:[#allocation2 + $0x404] sm:$0xf]  ;;  %v13677_v62 = vld [vmem:[#allocation2 + $0x278] sm:$0xf0] }
0x13da   :  { %v2607_v11 = vpop.f32.mrf.mxu2 }
0x13db   :  { %v2618_v2 = vpop.f32.mrf.mxu1  ;;  %v14052_v11 = vor.u32 %v17138_v59, %v14051_v57  ;;  %v1385_v21 = vperm.slane %v1189_v6, 0  ;;  %v13675_v6 = vld [vmem:[#allocation2 + $0xf0] sm:$0xf] }
0x13dc   :  { %v2644_v16 = vpop.f32.mrf.mxu0  ;;  %v2619_v44 = vadd.f32 %v2618_v2, %v1381_v32  ;;  %v13659_v2 = vld [vmem:[#allocation2 + $0xe0] sm:$0xf]  ;;  %v1128_v32 = vunpack.c.h.bf16 %v18416_v33 }
0x13dd   :  { %v2645_v35 = vadd.f32 %v2644_v16, %v1383_v8  ;;  %v13667_v8 = vld [vmem:[#allocation2 + $0xe8] sm:$0xf]  ;;  %v17041_v16 = vld [vmem:[#allocation2 + $0x26c] sm:$0xf0]  ;;  %v14067_v33 = vld [vmem:[#allocation2 + $0x400] sm:$0xf] }
0x13de   :  { %14261 = vmatmul.msk.bf16.vlgmr.msrb.gmra.mxu1 %vm128_vm9, %v18305_v43  ;;  %14262 = vmatmul.msk.bf16.vlgmr.msrb.gmra.mxu3 %vm128_vm9, %v18305_v43  ;;  %v13668_v26 = vor.u32 %v17041_v16, %v13667_v8  ;;  %v1193_v52 = vperm.slane %v1128_v32, 0  ;;  %v1196_v54 = vperm.slane %v1128_v32, 6 }
0x13df   :  { %14263 = vmatmul.msk.bf16.vlgmr.msrb.gmra.mxu0 %vm128_vm9, %v18305_v43  ;;  %14264 = vmatmul.msk.bf16.vlgmr.msrb.gmra.mxu2 %vm128_vm9, %v18305_v43  ;;  %v3835_v47 = vrot.slane %v2645_v35, 4 }
0x13e0   :  { %3148 = vmatpush.bf16.msrb.mxu3 %v14040_v19  ;;  %3135 = vmatpush.bf16.msrb.mxu1 %v14036_v20  ;;  %v13669_v19 = vld [vmem:[#allocation2 + $0x270] sm:$0xf0]  ;;  %v1388_v20 = vperm.slane %v1192_v4, 0  ;;  %v13683_v4 = vld [vmem:[#allocation2 + $0xf8] sm:$0xf] }
0x13e1   :  { %v2631_v36 = vpop.f32.mrf.mxu3  ;;  %3161 = vmatpush.bf16.msrb.mxu0 %v14044_v23  ;;  %3174 = vmatpush.bf16.msrb.mxu2 %v14048_v24  ;;  %v13660_v23 = vor.u32 %v17040_v15, %v13659_v2 }
0x13e2   :  { %v2632_v39 = vadd.f32 %v2631_v36, %v1382_v17  ;;  %v2657_v40 = vpop.f32.mrf.mxu2  ;;  %v16992_v17 = vld [vmem:[#allocation2 + $0xec] sm:$0xf] }
0x13e3   :  { %v2658_v18 = vadd.f32 %v2657_v40, %v1384_v31  ;;  %v2620_v41 = vpop.f32.mrf.mxu1  ;;  %v13672_v27 = vor.u32 %v16992_v17, %v13669_v19  ;;  %v1195_v40 = vperm.slane %v1128_v32, 4 }
0x13e4   :  { %v3834_v45 = vrot.slane %v2632_v39, 6  ;;  %v2646_v46 = vpop.f32.mrf.mxu0  ;;  %3149 = vmatpush.bf16.msrb.mxu3 %v13648_v14  ;;  %3136 = vmatpush.bf16.msrb.mxu1 %v13644_v34 }
0x13e5   :  { %v3836_v48 = vrot.slane %v2658_v18, 2  ;;  %3162 = vmatpush.bf16.msrb.mxu0 %v13652_v37  ;;  %3175 = vmatpush.bf16.msrb.mxu2 %v13656_v38  ;;  %v1194_v18 = vperm.slane %v1128_v32, 2  ;;  %v17140_v46 = vld [vmem:[#allocation2 + $0x584] sm:$0xf0]  ;;  %v1391_v56 = vperm.slane %v1195_v40, 0 }
0x13e6   :  { %v3910_v49 = vsel %vm3898_vm4, %v2619_v44, %v3834_v45  ;;  %v14069_v44 = vld [vmem:[#allocation2 + $0x588] sm:$0xf0]  ;;  %v14068_v60 = vor.u32 %v17140_v46, %v14067_v33  ;;  %v17093_v32 = vld [vmem:[#allocation2 + $0x414] sm:$0xf]  ;;  %v17094_v40 = vld [vmem:[#allocation2 + $0x41c] sm:$0xf] }
0x13e7   :  { %v3911_v50 = vsel %vm3900_vm12, %v3835_v47, %v3836_v48  ;;  %v14075_v47 = vld [vmem:[#allocation2 + $0x408] sm:$0xf]  ;;  %v14072_v59 = vor.u32 %v17091_v42, %v14069_v44 }
0x13e8   :  { %v3912_v53 = vsel %vm3902_vm13, %v3910_v49, %v3911_v50  ;;  %v17141_v49 = vld [vmem:[#allocation2 + $0x58c] sm:$0xf0]  ;;  %v17092_v50 = vld [vmem:[#allocation2 + $0x40c] sm:$0xf] }
0x13e9   :  { %4002 = vst [vmem:[#allocation13 + $0x18] sm:$0xff] %v3912_v53  ;;  %v2633_v58 = vpop.f32.mrf.mxu3  ;;  %v14076_v63 = vor.u32 %v17141_v49, %v14075_v47  ;;  %v14080_v5 = vor.u32 %v17092_v50, %v14077_v51  ;;  %v16995_v49 = vld [vmem:[#allocation2 + $0x104] sm:$0xf]  ;;  %v13693_v50 = vld [vmem:[#allocation2 + $0x288] sm:$0xf0] }
0x13ea   :  { %v2659_v61 = vpop.f32.mrf.mxu2  ;;  %v1390_v58 = vperm.slane %v1194_v18, 0  ;;  %v14093_v18 = vld [vmem:[#allocation2 + $0x5a0] sm:$0xf0] }
0x13eb   :  { %v2670_v3 = vpop.f32.mrf.mxu1  ;;  %v16993_v61 = vld [vmem:[#allocation2 + $0xf4] sm:$0xf] }
0x13ec   :  { %v2696_v7 = vpop.f32.mrf.mxu0  ;;  %v2671_v14 = vadd.f32 %v2670_v3, %v1385_v21  ;;  %v17042_v3 = vld [vmem:[#allocation2 + $0x274] sm:$0xf0]  ;;  %v13680_v0 = vor.u32 %v16993_v61, %v13677_v62  ;;  %v1129_v21 = vunpack.c.l.bf16 %v18442_v12  ;;  %v13696_v62 = vor.u32 %v16995_v49, %v13693_v50  ;;  %v18468_v49 = vld [vmem:[#allocation12 + $0x20] sm:$0xff] }
0x13ed   :  { %v2697_v24 = vadd.f32 %v2696_v7, %v1387_v55  ;;  %v17043_v55 = vld [vmem:[#allocation2 + $0x27c] sm:$0xf0]  ;;  %v16994_v7 = vld [vmem:[#allocation2 + $0xfc] sm:$0xf] }
0x13ee   :  { %14265 = vmatmul.msk.bf16.vlgmr.msra.gmra.mxu1 %vm128_vm9, %v18305_v43  ;;  %14266 = vmatmul.msk.bf16.vlgmr.msra.gmra.mxu3 %vm128_vm9, %v18305_v43  ;;  %v13684_v15 = vor.u32 %v17043_v55, %v13683_v4  ;;  %v1200_v44 = vperm.slane %v1129_v21, 6 }
0x13ef   :  { %14267 = vmatmul.msk.bf16.vlgmr.msra.gmra.mxu0 %vm128_vm9, %v18305_v43  ;;  %14268 = vmatmul.msk.bf16.vlgmr.msra.gmra.mxu2 %vm128_vm9, %v18305_v43  ;;  %v3838_v36 = vrot.slane %v2697_v24, 4 }
0x13f0   :  { %3200 = vmatpush.bf16.msra.mxu3 %v14056_v10  ;;  %3187 = vmatpush.bf16.msra.mxu1 %v14052_v11  ;;  %v1392_v10 = vperm.slane %v1196_v54, 0  ;;  %v1389_v11 = vperm.slane %v1193_v52, 0  ;;  %v14096_v52 = vor.u32 %v17094_v40, %v14093_v18  ;;  %v17044_v54 = vld [vmem:[#allocation2 + $0x284] sm:$0xf0] }
0x13f1   :  { %v2683_v25 = vpop.f32.mrf.mxu3  ;;  %3213 = vmatpush.bf16.msra.mxu0 %v14060_v1  ;;  %3226 = vmatpush.bf16.msra.mxu2 %v14064_v13  ;;  %v13676_v1 = vor.u32 %v17042_v3, %v13675_v6 }
0x13f2   :  { %v2684_v28 = vadd.f32 %v2683_v25, %v1386_v9  ;;  %v2709_v29 = vpop.f32.mrf.mxu2  ;;  %v13685_v9 = vld [vmem:[#allocation2 + $0x280] sm:$0xf0] }
0x13f3   :  { %v2710_v30 = vadd.f32 %v2709_v29, %v1388_v20  ;;  %v2672_v31 = vpop.f32.mrf.mxu1  ;;  %v13688_v8 = vor.u32 %v16994_v7, %v13685_v9  ;;  %v1199_v29 = vperm.slane %v1129_v21, 4 }
0x13f4   :  { %v3837_v34 = vrot.slane %v2684_v28, 6  ;;  %v2698_v35 = vpop.f32.mrf.mxu0  ;;  %3201 = vmatpush.bf16.msra.mxu3 %v13664_v22  ;;  %3188 = vmatpush.bf16.msra.mxu1 %v13660_v23 }
0x13f5   :  { %v3839_v37 = vrot.slane %v2710_v30, 2  ;;  %3214 = vmatpush.bf16.msra.mxu0 %v13668_v26  ;;  %3227 = vmatpush.bf16.msra.mxu2 %v13672_v27  ;;  %v1198_v30 = vperm.slane %v1129_v21, 2  ;;  %v1395_v33 = vperm.slane %v1199_v29, 0  ;;  %v14109_v29 = vld [vmem:[#allocation2 + $0x5b0] sm:$0xf0] }
0x13f6   :  { %v3913_v38 = vsel %vm3898_vm4, %v2671_v14, %v3837_v34  ;;  %v14085_v14 = vld [vmem:[#allocation2 + $0x598] sm:$0xf0]  ;;  %v14083_v34 = vld [vmem:[#allocation2 + $0x410] sm:$0xf] }
0x13f7   :  { %v3914_v39 = vsel %vm3900_vm12, %v3838_v36, %v3839_v37  ;;  %v17142_v36 = vld [vmem:[#allocation2 + $0x594] sm:$0xf0]  ;;  %v1394_v46 = vperm.slane %v1198_v30, 0  ;;  %v14088_v47 = vor.u32 %v17093_v32, %v14085_v14 }
0x13f8   :  { %v3915_v41 = vsel %vm3902_vm13, %v3913_v38, %v3914_v39  ;;  %v14091_v37 = vld [vmem:[#allocation2 + $0x418] sm:$0xf]  ;;  %v17143_v39 = vld [vmem:[#allocation2 + $0x59c] sm:$0xf0] }
0x13f9   :  { %4003 = vst [vmem:[#allocation13 + $0x20] sm:$0xff] %v3915_v41  ;;  %v2685_v45 = vpop.f32.mrf.mxu3  ;;  %v1197_v41 = vperm.slane %v1129_v21, 0  ;;  %v14092_v51 = vor.u32 %v17143_v39, %v14091_v37  ;;  %v17095_v21 = vld [vmem:[#allocation2 + $0x424] sm:$0xf]  ;;  %v13709_v39 = vld [vmem:[#allocation2 + $0x298] sm:$0xf0] }
0x13fa   :  { %v2711_v48 = vpop.f32.mrf.mxu2 }
0x13fb   :  { %v2722_v53 = vpop.f32.mrf.mxu1  ;;  %v14084_v48 = vor.u32 %v17142_v36, %v14083_v34  ;;  %v1393_v61 = vperm.slane %v1197_v41, 0  ;;  %v13707_v41 = vld [vmem:[#allocation2 + $0x110] sm:$0xf] }
0x13fc   :  { %v2748_v57 = vpop.f32.mrf.mxu0  ;;  %v2723_v22 = vadd.f32 %v2722_v53, %v1389_v11  ;;  %v13691_v53 = vld [vmem:[#allocation2 + $0x100] sm:$0xf]  ;;  %v1130_v11 = vunpack.c.h.bf16 %v18442_v12 }
0x13fd   :  { %v2749_v13 = vadd.f32 %v2748_v57, %v1391_v56  ;;  %v13699_v56 = vld [vmem:[#allocation2 + $0x108] sm:$0xf]  ;;  %v17045_v57 = vld [vmem:[#allocation2 + $0x28c] sm:$0xf0]  ;;  %v14099_v12 = vld [vmem:[#allocation2 + $0x420] sm:$0xf] }
0x13fe   :  { %14269 = vmatmul.msk.bf16.vlgmr.msrb.gmra.mxu1 %vm128_vm9, %v18305_v43  ;;  %14270 = vmatmul.msk.bf16.vlgmr.msrb.gmra.mxu3 %vm128_vm9, %v18305_v43  ;;  %v13700_v3 = vor.u32 %v17045_v57, %v13699_v56  ;;  %v1201_v30 = vperm.slane %v1130_v11, 0  ;;  %v1204_v32 = vperm.slane %v1130_v11, 6 }
0x13ff   :  { %14271 = vmatmul.msk.bf16.vlgmr.msrb.gmra.mxu0 %vm128_vm9, %v18305_v43  ;;  %14272 = vmatmul.msk.bf16.vlgmr.msrb.gmra.mxu2 %vm128_vm9, %v18305_v43  ;;  %v3841_v25 = vrot.slane %v2749_v13, 4 }
0x1400   :  { %3252 = vmatpush.bf16.msrb.mxu3 %v14072_v59  ;;  %3239 = vmatpush.bf16.msrb.mxu1 %v14068_v60  ;;  %v13701_v59 = vld [vmem:[#allocation2 + $0x290] sm:$0xf0]  ;;  %v1396_v60 = vperm.slane %v1200_v44, 0  ;;  %v13715_v44 = vld [vmem:[#allocation2 + $0x118] sm:$0xf] }
0x1401   :  { %v2735_v2 = vpop.f32.mrf.mxu3  ;;  %3265 = vmatpush.bf16.msrb.mxu0 %v14076_v63  ;;  %3278 = vmatpush.bf16.msrb.mxu2 %v14080_v5  ;;  %v13692_v63 = vor.u32 %v17044_v54, %v13691_v53 }
0x1402   :  { %v2736_v16 = vadd.f32 %v2735_v2, %v1390_v58  ;;  %v2761_v17 = vpop.f32.mrf.mxu2  ;;  %v16996_v58 = vld [vmem:[#allocation2 + $0x10c] sm:$0xf] }
0x1403   :  { %v2762_v19 = vadd.f32 %v2761_v17, %v1392_v10  ;;  %v2724_v20 = vpop.f32.mrf.mxu1  ;;  %v13704_v4 = vor.u32 %v16996_v58, %v13701_v59  ;;  %v1203_v17 = vperm.slane %v1130_v11, 4 }
0x1404   :  { %v3840_v23 = vrot.slane %v2736_v16, 6  ;;  %v2750_v24 = vpop.f32.mrf.mxu0  ;;  %3253 = vmatpush.bf16.msrb.mxu3 %v13680_v0  ;;  %3240 = vmatpush.bf16.msrb.mxu1 %v13676_v1 }
0x1405   :  { %v3842_v26 = vrot.slane %v2762_v19, 2  ;;  %3266 = vmatpush.bf16.msrb.mxu0 %v13684_v15  ;;  %3279 = vmatpush.bf16.msrb.mxu2 %v13688_v8  ;;  %v1202_v19 = vperm.slane %v1130_v11, 2  ;;  %v17144_v24 = vld [vmem:[#allocation2 + $0x5a4] sm:$0xf0]  ;;  %v1399_v14 = vperm.slane %v1203_v17, 0 }
0x1406   :  { %v3916_v27 = vsel %vm3898_vm4, %v2723_v22, %v3840_v23  ;;  %v14101_v22 = vld [vmem:[#allocation2 + $0x5a8] sm:$0xf0]  ;;  %v14100_v37 = vor.u32 %v17144_v24, %v14099_v12  ;;  %v17097_v11 = vld [vmem:[#allocation2 + $0x434] sm:$0xf]  ;;  %v17098_v17 = vld [vmem:[#allocation2 + $0x43c] sm:$0xf] }
0x1407   :  { %v3917_v28 = vsel %vm3900_vm12, %v3841_v25, %v3842_v26  ;;  %v14107_v25 = vld [vmem:[#allocation2 + $0x428] sm:$0xf]  ;;  %v14104_v36 = vor.u32 %v17095_v21, %v14101_v22 }
0x1408   :  { %v3918_v31 = vsel %vm3902_vm13, %v3916_v27, %v3917_v28  ;;  %v17145_v27 = vld [vmem:[#allocation2 + $0x5ac] sm:$0xf0]  ;;  %v17096_v28 = vld [vmem:[#allocation2 + $0x42c] sm:$0xf] }
0x1409   :  { %4004 = vst [vmem:[#allocation13 + $0x28] sm:$0xff] %v3918_v31  ;;  %v2737_v35 = vpop.f32.mrf.mxu3  ;;  %v14108_v40 = vor.u32 %v17145_v27, %v14107_v25  ;;  %v14112_v18 = vor.u32 %v17096_v28, %v14109_v29  ;;  %v16999_v27 = vld [vmem:[#allocation2 + $0x124] sm:$0xf]  ;;  %v13725_v28 = vld [vmem:[#allocation2 + $0x2a8] sm:$0xf0] }
0x140a   :  { %v2763_v38 = vpop.f32.mrf.mxu2  ;;  %v1398_v35 = vperm.slane %v1202_v19, 0  ;;  %v14125_v19 = vld [vmem:[#allocation2 + $0x5c0] sm:$0xf0] }
0x140b   :  { %v2774_v42 = vpop.f32.mrf.mxu1  ;;  %v16997_v38 = vld [vmem:[#allocation2 + $0x114] sm:$0xf] }
0x140c   :  { %v2800_v45 = vpop.f32.mrf.mxu0  ;;  %v2775_v0 = vadd.f32 %v2774_v42, %v1393_v61  ;;  %v17046_v42 = vld [vmem:[#allocation2 + $0x294] sm:$0xf0]  ;;  %v13712_v50 = vor.u32 %v16997_v38, %v13709_v39  ;;  %v1131_v61 = vunpack.c.l.bf16 %v18468_v49  ;;  %v13728_v39 = vor.u32 %v16999_v27, %v13725_v28  ;;  %v18494_v27 = vld [vmem:[#allocation12 + $0x28] sm:$0xff] }
0x140d   :  { %v2801_v5 = vadd.f32 %v2800_v45, %v1395_v33  ;;  %v17047_v33 = vld [vmem:[#allocation2 + $0x29c] sm:$0xf0]  ;;  %v16998_v45 = vld [vmem:[#allocation2 + $0x11c] sm:$0xf] }
0x140e   :  { %14273 = vmatmul.msk.bf16.vlgmr.msra.gmra.mxu1 %vm128_vm9, %v18305_v43  ;;  %14274 = vmatmul.msk.bf16.vlgmr.msra.gmra.mxu3 %vm128_vm9, %v18305_v43  ;;  %v13716_v54 = vor.u32 %v17047_v33, %v13715_v44  ;;  %v1208_v22 = vperm.slane %v1131_v61, 6 }
0x140f   :  { %14275 = vmatmul.msk.bf16.vlgmr.msra.gmra.mxu0 %vm128_vm9, %v18305_v43  ;;  %14276 = vmatmul.msk.bf16.vlgmr.msra.gmra.mxu2 %vm128_vm9, %v18305_v43  ;;  %v3844_v2 = vrot.slane %v2801_v5, 4 }
0x1410   :  { %3304 = vmatpush.bf16.msra.mxu3 %v14088_v47  ;;  %3291 = vmatpush.bf16.msra.mxu1 %v14084_v48  ;;  %v1400_v47 = vperm.slane %v1204_v32, 0  ;;  %v1397_v48 = vperm.slane %v1201_v30, 0  ;;  %v14128_v30 = vor.u32 %v17098_v17, %v14125_v19  ;;  %v17048_v32 = vld [vmem:[#allocation2 + $0x2a4] sm:$0xf0] }
0x1411   :  { %v2787_v6 = vpop.f32.mrf.mxu3  ;;  %3317 = vmatpush.bf16.msra.mxu0 %v14092_v51  ;;  %3330 = vmatpush.bf16.msra.mxu2 %v14096_v52  ;;  %v13708_v51 = vor.u32 %v17046_v42, %v13707_v41 }
0x1412   :  { %v2788_v55 = vadd.f32 %v2787_v6, %v1394_v46  ;;  %v2813_v7 = vpop.f32.mrf.mxu2  ;;  %v13717_v46 = vld [vmem:[#allocation2 + $0x2a0] sm:$0xf0] }
0x1413   :  { %v2814_v9 = vadd.f32 %v2813_v7, %v1396_v60  ;;  %v2776_v10 = vpop.f32.mrf.mxu1  ;;  %v13720_v56 = vor.u32 %v16998_v45, %v13717_v46  ;;  %v1207_v7 = vperm.slane %v1131_v61, 4 }
0x1414   :  { %v3843_v1 = vrot.slane %v2788_v55, 6  ;;  %v2802_v13 = vpop.f32.mrf.mxu0  ;;  %3305 = vmatpush.bf16.msra.mxu3 %v13696_v62  ;;  %3292 = vmatpush.bf16.msra.mxu1 %v13692_v63 }
0x1415   :  { %v3845_v15 = vrot.slane %v2814_v9, 2  ;;  %3318 = vmatpush.bf16.msra.mxu0 %v13700_v3  ;;  %3331 = vmatpush.bf16.msra.mxu2 %v13704_v4  ;;  %v1206_v9 = vperm.slane %v1131_v61, 2  ;;  %v1403_v12 = vperm.slane %v1207_v7, 0  ;;  %v14141_v7 = vld [vmem:[#allocation2 + $0x5d0] sm:$0xf0] }
0x1416   :  { %v3919_v8 = vsel %vm3898_vm4, %v2775_v0, %v3843_v1  ;;  %v14117_v0 = vld [vmem:[#allocation2 + $0x5b8] sm:$0xf0]  ;;  %v14115_v1 = vld [vmem:[#allocation2 + $0x430] sm:$0xf] }
0x1417   :  { %v3920_v16 = vsel %vm3900_vm12, %v3844_v2, %v3845_v15  ;;  %v17146_v2 = vld [vmem:[#allocation2 + $0x5b4] sm:$0xf0]  ;;  %v1402_v24 = vperm.slane %v1206_v9, 0  ;;  %v14120_v25 = vor.u32 %v17097_v11, %v14117_v0 }
0x1418   :  { %v3921_v20 = vsel %vm3902_vm13, %v3919_v8, %v3920_v16  ;;  %v14123_v15 = vld [vmem:[#allocation2 + $0x438] sm:$0xf]  ;;  %v17147_v16 = vld [vmem:[#allocation2 + $0x5bc] sm:$0xf0] }
0x1419   :  { %4005 = vst [vmem:[#allocation13 + $0x30] sm:$0xff] %v3921_v20  ;;  %v2789_v23 = vpop.f32.mrf.mxu3  ;;  %v1205_v20 = vperm.slane %v1131_v61, 0  ;;  %v14124_v29 = vor.u32 %v17147_v16, %v14123_v15  ;;  %v17099_v61 = vld [vmem:[#allocation2 + $0x444] sm:$0xf]  ;;  %v13741_v16 = vld [vmem:[#allocation2 + $0x2b8] sm:$0xf0] }
0x141a   :  { %v2815_v26 = vpop.f32.mrf.mxu2 }
0x141b   :  { %v2826_v31 = vpop.f32.mrf.mxu1  ;;  %v14116_v26 = vor.u32 %v17146_v2, %v14115_v1  ;;  %v1401_v38 = vperm.slane %v1205_v20, 0  ;;  %v13739_v20 = vld [vmem:[#allocation2 + $0x130] sm:$0xf] }
0x141c   :  { %v2852_v34 = vpop.f32.mrf.mxu0  ;;  %v2827_v62 = vadd.f32 %v2826_v31, %v1397_v48  ;;  %v13723_v31 = vld [vmem:[#allocation2 + $0x120] sm:$0xf]  ;;  %v1132_v48 = vunpack.c.h.bf16 %v18468_v49 }
0x141d   :  { %v2853_v52 = vadd.f32 %v2852_v34, %v1399_v14  ;;  %v13731_v14 = vld [vmem:[#allocation2 + $0x128] sm:$0xf]  ;;  %v17049_v34 = vld [vmem:[#allocation2 + $0x2ac] sm:$0xf0]  ;;  %v14131_v49 = vld [vmem:[#allocation2 + $0x440] sm:$0xf] }
0x141e   :  { %14277 = vmatmul.msk.bf16.vlgmr.msrb.gmra.mxu1 %vm128_vm9, %v18305_v43  ;;  %14278 = vmatmul.msk.bf16.vlgmr.msrb.gmra.mxu3 %vm128_vm9, %v18305_v43  ;;  %v13732_v42 = vor.u32 %v17049_v34, %v13731_v14  ;;  %v1209_v9 = vperm.slane %v1132_v48, 0  ;;  %v1212_v11 = vperm.slane %v1132_v48, 6 }
0x141f   :  { %14279 = vmatmul.msk.bf16.vlgmr.msrb.gmra.mxu0 %vm128_vm9, %v18305_v43  ;;  %14280 = vmatmul.msk.bf16.vlgmr.msrb.gmra.mxu2 %vm128_vm9, %v18305_v43  ;;  %v3847_v6 = vrot.slane %v2853_v52, 4 }
0x1420   :  { %3356 = vmatpush.bf16.msrb.mxu3 %v14104_v36  ;;  %3343 = vmatpush.bf16.msrb.mxu1 %v14100_v37  ;;  %v13733_v36 = vld [vmem:[#allocation2 + $0x2b0] sm:$0xf0]  ;;  %v1404_v37 = vperm.slane %v1208_v22, 0  ;;  %v13747_v22 = vld [vmem:[#allocation2 + $0x138] sm:$0xf] }
0x1421   :  { %v2839_v53 = vpop.f32.mrf.mxu3  ;;  %3369 = vmatpush.bf16.msrb.mxu0 %v14108_v40  ;;  %3382 = vmatpush.bf16.msrb.mxu2 %v14112_v18  ;;  %v13724_v40 = vor.u32 %v17048_v32, %v13723_v31 }
0x1422   :  { %v2840_v57 = vadd.f32 %v2839_v53, %v1398_v35  ;;  %v2865_v58 = vpop.f32.mrf.mxu2  ;;  %v17000_v35 = vld [vmem:[#allocation2 + $0x12c] sm:$0xf] }
0x1423   :  { %v2866_v59 = vadd.f32 %v2865_v58, %v1400_v47  ;;  %v2828_v60 = vpop.f32.mrf.mxu1  ;;  %v13736_v44 = vor.u32 %v17000_v35, %v13733_v36  ;;  %v1211_v58 = vperm.slane %v1132_v48, 4 }
0x1424   :  { %v3846_v63 = vrot.slane %v2840_v57, 6  ;;  %v2854_v5 = vpop.f32.mrf.mxu0  ;;  %3357 = vmatpush.bf16.msrb.mxu3 %v13712_v50  ;;  %3344 = vmatpush.bf16.msrb.mxu1 %v13708_v51 }
0x1425   :  { %v3848_v3 = vrot.slane %v2866_v59, 2  ;;  %3370 = vmatpush.bf16.msrb.mxu0 %v13716_v54  ;;  %3383 = vmatpush.bf16.msrb.mxu2 %v13720_v56  ;;  %v1210_v59 = vperm.slane %v1132_v48, 2  ;;  %v17148_v5 = vld [vmem:[#allocation2 + $0x5c4] sm:$0xf0]  ;;  %v1407_v0 = vperm.slane %v1211_v58, 0 }
0x1426   :  { %v3922_v4 = vsel %vm3898_vm4, %v2827_v62, %v3846_v63  ;;  %v14133_v62 = vld [vmem:[#allocation2 + $0x5c8] sm:$0xf0]  ;;  %v14132_v15 = vor.u32 %v17148_v5, %v14131_v49  ;;  %v17101_v48 = vld [vmem:[#allocation2 + $0x454] sm:$0xf]  ;;  %v17102_v58 = vld [vmem:[#allocation2 + $0x45c] sm:$0xf] }
0x1427   :  { %v3923_v55 = vsel %vm3900_vm12, %v3847_v6, %v3848_v3  ;;  %v14139_v6 = vld [vmem:[#allocation2 + $0x448] sm:$0xf]  ;;  %v14136_v2 = vor.u32 %v17099_v61, %v14133_v62 }
0x1428   :  { %v3924_v10 = vsel %vm3902_vm13, %v3922_v4, %v3923_v55  ;;  %v17149_v4 = vld [vmem:[#allocation2 + $0x5cc] sm:$0xf0]  ;;  %v17100_v55 = vld [vmem:[#allocation2 + $0x44c] sm:$0xf] }
0x1429   :  { %4006 = vst [vmem:[#allocation13 + $0x38] sm:$0xff] %v3924_v10  ;;  %v2841_v13 = vpop.f32.mrf.mxu3  ;;  %v14140_v17 = vor.u32 %v17149_v4, %v14139_v6  ;;  %v14144_v19 = vor.u32 %v17100_v55, %v14141_v7  ;;  %v17003_v4 = vld [vmem:[#allocation2 + $0x144] sm:$0xf]  ;;  %v13757_v55 = vld [vmem:[#allocation2 + $0x2c8] sm:$0xf0] }
0x142a   :  { %v2867_v8 = vpop.f32.mrf.mxu2  ;;  %v1406_v13 = vperm.slane %v1210_v59, 0  ;;  %v14157_v59 = vld [vmem:[#allocation2 + $0x5e0] sm:$0xf0] }
0x142b   :  { %v2878_v21 = vpop.f32.mrf.mxu1  ;;  %v17001_v8 = vld [vmem:[#allocation2 + $0x134] sm:$0xf] }
0x142c   :  { %v2904_v23 = vpop.f32.mrf.mxu0  ;;  %v2879_v50 = vadd.f32 %v2878_v21, %v1401_v38  ;;  %v17050_v21 = vld [vmem:[#allocation2 + $0x2b4] sm:$0xf0]  ;;  %v13744_v28 = vor.u32 %v17001_v8, %v13741_v16  ;;  %v1133_v38 = vunpack.c.l.bf16 %v18494_v27  ;;  %v13760_v16 = vor.u32 %v17003_v4, %v13757_v55 }
0x142d   :  { %v2905_v18 = vadd.f32 %v2904_v23, %v1403_v12  ;;  %v17051_v12 = vld [vmem:[#allocation2 + $0x2bc] sm:$0xf0]  ;;  %v17002_v23 = vld [vmem:[#allocation2 + $0x13c] sm:$0xf]  ;;  %v18520_v4 = vld [vmem:[#allocation12 + $0x30] sm:$0xff] }
0x142e   :  { %14281 = vmatmul.msk.bf16.vlgmr.msra.gmra.mxu1 %vm128_vm9, %v18305_v43  ;;  %14282 = vmatmul.msk.bf16.vlgmr.msra.gmra.mxu3 %vm128_vm9, %v18305_v43  ;;  %v13748_v32 = vor.u32 %v17051_v12, %v13747_v22  ;;  %v1216_v62 = vperm.slane %v1133_v38, 6 }
0x142f   :  { %14283 = vmatmul.msk.bf16.vlgmr.msra.gmra.mxu0 %vm128_vm9, %v18305_v43  ;;  %14284 = vmatmul.msk.bf16.vlgmr.msra.gmra.mxu2 %vm128_vm9, %v18305_v43  ;;  %v3850_v53 = vrot.slane %v2905_v18, 4 }
0x1430   :  { %3408 = vmatpush.bf16.msra.mxu3 %v14120_v25  ;;  %3395 = vmatpush.bf16.msra.mxu1 %v14116_v26  ;;  %v1408_v25 = vperm.slane %v1212_v11, 0  ;;  %v1405_v26 = vperm.slane %v1209_v9, 0  ;;  %v14160_v9 = vor.u32 %v17102_v58, %v14157_v59  ;;  %v17052_v11 = vld [vmem:[#allocation2 + $0x2c4] sm:$0xf0] }
0x1431   :  { %v2891_v41 = vpop.f32.mrf.mxu3  ;;  %3421 = vmatpush.bf16.msra.mxu0 %v14124_v29  ;;  %3434 = vmatpush.bf16.msra.mxu2 %v14128_v30  ;;  %v13740_v29 = vor.u32 %v17050_v21, %v13739_v20 }
0x1432   :  { %v2892_v33 = vadd.f32 %v2891_v41, %v1402_v24  ;;  %v2917_v45 = vpop.f32.mrf.mxu2  ;;  %v13749_v24 = vld [vmem:[#allocation2 + $0x2c0] sm:$0xf0] }
0x1433   :  { %v2918_v46 = vadd.f32 %v2917_v45, %v1404_v37  ;;  %v2880_v47 = vpop.f32.mrf.mxu1  ;;  %v13752_v14 = vor.u32 %v17002_v23, %v13749_v24  ;;  %v1215_v45 = vperm.slane %v1133_v38, 4 }
0x1434   :  { %v3849_v51 = vrot.slane %v2892_v33, 6  ;;  %v2906_v52 = vpop.f32.mrf.mxu0  ;;  %3409 = vmatpush.bf16.msra.mxu3 %v13728_v39  ;;  %3396 = vmatpush.bf16.msra.mxu1 %v13724_v40 }
0x1435   :  { %v3851_v54 = vrot.slane %v2918_v46, 2  ;;  %3422 = vmatpush.bf16.msra.mxu0 %v13732_v42  ;;  %3435 = vmatpush.bf16.msra.mxu2 %v13736_v44  ;;  %v1214_v46 = vperm.slane %v1133_v38, 2  ;;  %v1411_v49 = vperm.slane %v1215_v45, 0  ;;  %v14173_v45 = vld [vmem:[#allocation2 + $0x5f0] sm:$0xf0] }
0x1436   :  { %v3925_v56 = vsel %vm3898_vm4, %v2879_v50, %v3849_v51  ;;  %v14149_v50 = vld [vmem:[#allocation2 + $0x5d8] sm:$0xf0]  ;;  %v14147_v51 = vld [vmem:[#allocation2 + $0x450] sm:$0xf] }
0x1437   :  { %v3926_v57 = vsel %vm3900_vm12, %v3850_v53, %v3851_v54  ;;  %v17150_v53 = vld [vmem:[#allocation2 + $0x5d4] sm:$0xf0]  ;;  %v1410_v5 = vperm.slane %v1214_v46, 0  ;;  %v14152_v6 = vor.u32 %v17101_v48, %v14149_v50 }
0x1438   :  { %v3927_v60 = vsel %vm3902_vm13, %v3925_v56, %v3926_v57  ;;  %v14155_v54 = vld [vmem:[#allocation2 + $0x458] sm:$0xf]  ;;  %v17151_v57 = vld [vmem:[#allocation2 + $0x5dc] sm:$0xf0] }
0x1439   :  { %4007 = vst [vmem:[#allocation13 + $0x40] sm:$0xff] %v3927_v60  ;;  %v2893_v63 = vpop.f32.mrf.mxu3  ;;  %v1213_v60 = vperm.slane %v1133_v38, 0  ;;  %v14156_v7 = vor.u32 %v17151_v57, %v14155_v54  ;;  %v17103_v38 = vld [vmem:[#allocation2 + $0x464] sm:$0xf]  ;;  %v13773_v57 = vld [vmem:[#allocation2 + $0x2d8] sm:$0xf0] }
0x143a   :  { %v2919_v3 = vpop.f32.mrf.mxu2 }
0x143b   :  { %v2930_v10 = vpop.f32.mrf.mxu1  ;;  %v14148_v3 = vor.u32 %v17150_v53, %v14147_v51  ;;  %v1409_v8 = vperm.slane %v1213_v60, 0  ;;  %v13771_v60 = vld [vmem:[#allocation2 + $0x150] sm:$0xf] }
0x143c   :  { %v2956_v1 = vpop.f32.mrf.mxu0  ;;  %v2931_v39 = vadd.f32 %v2930_v10, %v1405_v26  ;;  %v13755_v10 = vld [vmem:[#allocation2 + $0x140] sm:$0xf]  ;;  %v1134_v26 = vunpack.c.h.bf16 %v18494_v27 }
0x143d   :  { %v2957_v30 = vadd.f32 %v2956_v1, %v1407_v0  ;;  %v13763_v0 = vld [vmem:[#allocation2 + $0x148] sm:$0xf]  ;;  %v17053_v1 = vld [vmem:[#allocation2 + $0x2cc] sm:$0xf0]  ;;  %v14163_v27 = vld [vmem:[#allocation2 + $0x460] sm:$0xf] }
0x143e   :  { %14285 = vmatmul.msk.bf16.vlgmr.msrb.gmra.mxu1 %vm128_vm9, %v18305_v43  ;;  %14286 = vmatmul.msk.bf16.vlgmr.msrb.gmra.mxu3 %vm128_vm9, %v18305_v43  ;;  %v13764_v21 = vor.u32 %v17053_v1, %v13763_v0  ;;  %v1217_v46 = vperm.slane %v1134_v26, 0  ;;  %v1220_v48 = vperm.slane %v1134_v26, 6 }
0x143f   :  { %14287 = vmatmul.msk.bf16.vlgmr.msrb.gmra.mxu0 %vm128_vm9, %v18305_v43  ;;  %14288 = vmatmul.msk.bf16.vlgmr.msrb.gmra.mxu2 %vm128_vm9, %v18305_v43  ;;  %v3853_v41 = vrot.slane %v2957_v30, 4 }
0x1440   :  { %3460 = vmatpush.bf16.msrb.mxu3 %v14136_v2  ;;  %3447 = vmatpush.bf16.msrb.mxu1 %v14132_v15  ;;  %v13765_v2 = vld [vmem:[#allocation2 + $0x2d0] sm:$0xf0]  ;;  %v1412_v15 = vperm.slane %v1216_v62, 0  ;;  %v13779_v62 = vld [vmem:[#allocation2 + $0x158] sm:$0xf] }
0x1441   :  { %v2943_v31 = vpop.f32.mrf.mxu3  ;;  %3473 = vmatpush.bf16.msrb.mxu0 %v14140_v17  ;;  %3486 = vmatpush.bf16.msrb.mxu2 %v14144_v19  ;;  %v13756_v17 = vor.u32 %v17052_v11, %v13755_v10 }
0x1442   :  { %v2944_v34 = vadd.f32 %v2943_v31, %v1406_v13  ;;  %v2969_v35 = vpop.f32.mrf.mxu2  ;;  %v17004_v13 = vld [vmem:[#allocation2 + $0x14c] sm:$0xf] }
0x1443   :  { %v2970_v36 = vadd.f32 %v2969_v35, %v1408_v25  ;;  %v2932_v37 = vpop.f32.mrf.mxu1  ;;  %v13768_v22 = vor.u32 %v17004_v13, %v13765_v2  ;;  %v1219_v35 = vperm.slane %v1134_v26, 4 }
0x1444   :  { %v3852_v40 = vrot.slane %v2944_v34, 6  ;;  %v2958_v18 = vpop.f32.mrf.mxu0  ;;  %3461 = vmatpush.bf16.msrb.mxu3 %v13744_v28  ;;  %3448 = vmatpush.bf16.msrb.mxu1 %v13740_v29 }
0x1445   :  { %v3854_v42 = vrot.slane %v2970_v36, 2  ;;  %3474 = vmatpush.bf16.msrb.mxu0 %v13748_v32  ;;  %3487 = vmatpush.bf16.msrb.mxu2 %v13752_v14  ;;  %v1218_v36 = vperm.slane %v1134_v26, 2  ;;  %v17152_v18 = vld [vmem:[#allocation2 + $0x5e4] sm:$0xf0]  ;;  %v1415_v50 = vperm.slane %v1219_v35, 0 }
0x1446   :  { %v3928_v44 = vsel %vm3898_vm4, %v2931_v39, %v3852_v40  ;;  %v14165_v39 = vld [vmem:[#allocation2 + $0x5e8] sm:$0xf0]  ;;  %v14164_v54 = vor.u32 %v17152_v18, %v14163_v27  ;;  %v17105_v26 = vld [vmem:[#allocation2 + $0x474] sm:$0xf]  ;;  %v17106_v35 = vld [vmem:[#allocation2 + $0x47c] sm:$0xf] }
0x1447   :  { %v3929_v33 = vsel %vm3900_vm12, %v3853_v41, %v3854_v42  ;;  %v14171_v41 = vld [vmem:[#allocation2 + $0x468] sm:$0xf]  ;;  %v14168_v53 = vor.u32 %v17103_v38, %v14165_v39 }
0x1448   :  { %v3930_v47 = vsel %vm3902_vm13, %v3928_v44, %v3929_v33  ;;  %v17153_v44 = vld [vmem:[#allocation2 + $0x5ec] sm:$0xf0]  ;;  %v17104_v33 = vld [vmem:[#allocation2 + $0x46c] sm:$0xf] }
0x1449   :  { %4008 = vst [vmem:[#allocation13 + $0x48] sm:$0xff] %v3930_v47  ;;  %v2945_v52 = vpop.f32.mrf.mxu3  ;;  %v14172_v58 = vor.u32 %v17153_v44, %v14171_v41  ;;  %v14176_v59 = vor.u32 %v17104_v33, %v14173_v45  ;;  %v17007_v44 = vld [vmem:[#allocation2 + $0x164] sm:$0xf]  ;;  %v13789_v33 = vld [vmem:[#allocation2 + $0x2e8] sm:$0xf0] }
0x144a   :  { %v2971_v56 = vpop.f32.mrf.mxu2  ;;  %v1414_v52 = vperm.slane %v1218_v36, 0  ;;  %v14189_v36 = vld [vmem:[#allocation2 + $0x600] sm:$0xf0] }
0x144b   :  { %v2982_v61 = vpop.f32.mrf.mxu1  ;;  %v17005_v56 = vld [vmem:[#allocation2 + $0x154] sm:$0xf] }
0x144c   :  { %v3008_v63 = vpop.f32.mrf.mxu0  ;;  %v2983_v28 = vadd.f32 %v2982_v61, %v1409_v8  ;;  %v17054_v61 = vld [vmem:[#allocation2 + $0x2d4] sm:$0xf0]  ;;  %v13776_v55 = vor.u32 %v17005_v56, %v13773_v57  ;;  %v1135_v8 = vunpack.c.l.bf16 %v18520_v4  ;;  %v13792_v57 = vor.u32 %v17007_v44, %v13789_v33 }
0x144d   :  { %v3009_v19 = vadd.f32 %v3008_v63, %v1411_v49  ;;  %v17055_v49 = vld [vmem:[#allocation2 + $0x2dc] sm:$0xf0]  ;;  %v17006_v63 = vld [vmem:[#allocation2 + $0x15c] sm:$0xf] }
0x144e   :  { %14289 = vmatmul.msk.bf16.vlgmr.msra.gmra.mxu1 %vm128_vm9, %v18305_v43  ;;  %14290 = vmatmul.msk.bf16.vlgmr.msra.gmra.mxu3 %vm128_vm9, %v18305_v43  ;;  %v13780_v11 = vor.u32 %v17055_v49, %v13779_v62  ;;  %v1224_v39 = vperm.slane %v1135_v8, 6 }
0x144f   :  { %14291 = vmatmul.msk.bf16.vlgmr.msra.gmra.mxu0 %vm128_vm9, %v18305_v43  ;;  %14292 = vmatmul.msk.bf16.vlgmr.msra.gmra.mxu2 %vm128_vm9, %v18305_v43  ;;  %v3856_v31 = vrot.slane %v3009_v19, 4 }
0x1450   :  { %3512 = vmatpush.bf16.msra.mxu3 %v14152_v6  ;;  %3499 = vmatpush.bf16.msra.mxu1 %v14148_v3  ;;  %v1416_v6 = vperm.slane %v1220_v48, 0  ;;  %v1413_v3 = vperm.slane %v1217_v46, 0  ;;  %v14192_v46 = vor.u32 %v17106_v35, %v14189_v36  ;;  %v17056_v48 = vld [vmem:[#allocation2 + $0x2e4] sm:$0xf0] }
0x1451   :  { %v2995_v20 = vpop.f32.mrf.mxu3  ;;  %3525 = vmatpush.bf16.msra.mxu0 %v14156_v7  ;;  %3538 = vmatpush.bf16.msra.mxu2 %v14160_v9  ;;  %v13772_v7 = vor.u32 %v17054_v61, %v13771_v60 }
0x1452   :  { %v2996_v12 = vadd.f32 %v2995_v20, %v1410_v5  ;;  %v3021_v23 = vpop.f32.mrf.mxu2  ;;  %v13781_v5 = vld [vmem:[#allocation2 + $0x2e0] sm:$0xf0] }
0x1453   :  { %v3022_v24 = vadd.f32 %v3021_v23, %v1412_v15  ;;  %v2984_v25 = vpop.f32.mrf.mxu1  ;;  %v13784_v0 = vor.u32 %v17006_v63, %v13781_v5  ;;  %v1223_v23 = vperm.slane %v1135_v8, 4 }
0x1454   :  { %v3855_v29 = vrot.slane %v2996_v12, 6  ;;  %v3010_v30 = vpop.f32.mrf.mxu0  ;;  %3513 = vmatpush.bf16.msra.mxu3 %v13760_v16  ;;  %3500 = vmatpush.bf16.msra.mxu1 %v13756_v17 }
0x1455   :  { %v3857_v32 = vrot.slane %v3022_v24, 2  ;;  %3526 = vmatpush.bf16.msra.mxu0 %v13764_v21  ;;  %3539 = vmatpush.bf16.msra.mxu2 %v13768_v22  ;;  %v1222_v24 = vperm.slane %v1135_v8, 2  ;;  %v1419_v27 = vperm.slane %v1223_v23, 0  ;;  %v14205_v23 = vld [vmem:[#allocation2 + $0x610] sm:$0xf0] }
0x1456   :  { %v3931_v14 = vsel %vm3898_vm4, %v2983_v28, %v3855_v29  ;;  %v14181_v28 = vld [vmem:[#allocation2 + $0x5f8] sm:$0xf0]  ;;  %v14179_v29 = vld [vmem:[#allocation2 + $0x470] sm:$0xf] }
0x1457   :  { %v3932_v34 = vsel %vm3900_vm12, %v3856_v31, %v3857_v32  ;;  %v17154_v31 = vld [vmem:[#allocation2 + $0x5f4] sm:$0xf0]  ;;  %v1418_v18 = vperm.slane %v1222_v24, 0  ;;  %v14184_v41 = vor.u32 %v17105_v26, %v14181_v28 }
0x1458   :  { %v3933_v37 = vsel %vm3902_vm13, %v3931_v14, %v3932_v34  ;;  %v14187_v32 = vld [vmem:[#allocation2 + $0x478] sm:$0xf]  ;;  %v17155_v34 = vld [vmem:[#allocation2 + $0x5fc] sm:$0xf0] }
0x1459   :  { %4009 = vst [vmem:[#allocation13 + $0x50] sm:$0xff] %v3933_v37  ;;  %v2997_v40 = vpop.f32.mrf.mxu3  ;;  %v1221_v37 = vperm.slane %v1135_v8, 0  ;;  %v14188_v45 = vor.u32 %v17155_v34, %v14187_v32  ;;  %v17107_v8 = vld [vmem:[#allocation2 + $0x484] sm:$0xf]  ;;  %v13805_v34 = vld [vmem:[#allocation2 + $0x2f8] sm:$0xf0] }
0x145a   :  { %v3023_v42 = vpop.f32.mrf.mxu2 }
0x145b   :  { %v3034_v47 = vpop.f32.mrf.mxu1  ;;  %v14180_v42 = vor.u32 %v17154_v31, %v14179_v29  ;;  %v1417_v56 = vperm.slane %v1221_v37, 0  ;;  %v13803_v37 = vld [vmem:[#allocation2 + $0x170] sm:$0xf] }
0x145c   :  { %v3060_v51 = vpop.f32.mrf.mxu0  ;;  %v3035_v16 = vadd.f32 %v3034_v47, %v1413_v3  ;;  %v13787_v47 = vld [vmem:[#allocation2 + $0x160] sm:$0xf]  ;;  %v1136_v3 = vunpack.c.h.bf16 %v18520_v4 }
0x145d   :  { %v3061_v9 = vadd.f32 %v3060_v51, %v1415_v50  ;;  %v13795_v50 = vld [vmem:[#allocation2 + $0x168] sm:$0xf]  ;;  %v17057_v51 = vld [vmem:[#allocation2 + $0x2ec] sm:$0xf0]  ;;  %v14195_v4 = vld [vmem:[#allocation2 + $0x480] sm:$0xf] }
0x145e   :  { %14293 = vmatmul.msk.bf16.vlgmr.msrb.gmra.mxu1 %vm128_vm9, %v18305_v43  ;;  %14294 = vmatmul.msk.bf16.vlgmr.msrb.gmra.mxu3 %vm128_vm9, %v18305_v43  ;;  %v13796_v61 = vor.u32 %v17057_v51, %v13795_v50  ;;  %v1225_v24 = vperm.slane %v1136_v3, 0  ;;  %v1228_v26 = vperm.slane %v1136_v3, 6 }
0x145f   :  { %14295 = vmatmul.msk.bf16.vlgmr.msrb.gmra.mxu0 %vm128_vm9, %v18305_v43  ;;  %14296 = vmatmul.msk.bf16.vlgmr.msrb.gmra.mxu2 %vm128_vm9, %v18305_v43  ;;  %v3859_v20 = vrot.slane %v3061_v9, 4 }
0x1460   :  { %3564 = vmatpush.bf16.msrb.mxu3 %v14168_v53  ;;  %3551 = vmatpush.bf16.msrb.mxu1 %v14164_v54  ;;  %v13797_v53 = vld [vmem:[#allocation2 + $0x2f0] sm:$0xf0]  ;;  %v1420_v54 = vperm.slane %v1224_v39, 0  ;;  %v13811_v39 = vld [vmem:[#allocation2 + $0x178] sm:$0xf] }
0x1461   :  { %v3047_v10 = vpop.f32.mrf.mxu3  ;;  %3577 = vmatpush.bf16.msrb.mxu0 %v14172_v58  ;;  %3590 = vmatpush.bf16.msrb.mxu2 %v14176_v59  ;;  %v13788_v58 = vor.u32 %v17056_v48, %v13787_v47  ;;  %v18546_v47 = vld [vmem:[#allocation12 + $0x38] sm:$0xff] }
0x1462   :  { %v3048_v1 = vadd.f32 %v3047_v10, %v1414_v52  ;;  %v3073_v13 = vpop.f32.mrf.mxu2  ;;  %v17008_v52 = vld [vmem:[#allocation2 + $0x16c] sm:$0xf] }
0x1463   :  { %v3074_v2 = vadd.f32 %v3073_v13, %v1416_v6  ;;  %v3036_v15 = vpop.f32.mrf.mxu1  ;;  %v13800_v62 = vor.u32 %v17008_v52, %v13797_v53  ;;  %v1227_v13 = vperm.slane %v1136_v3, 4 }
0x1464   :  { %v3858_v17 = vrot.slane %v3048_v1, 6  ;;  %v3062_v19 = vpop.f32.mrf.mxu0  ;;  %3565 = vmatpush.bf16.msrb.mxu3 %v13776_v55  ;;  %3552 = vmatpush.bf16.msrb.mxu1 %v13772_v7 }
0x1465   :  { %v3860_v21 = vrot.slane %v3074_v2, 2  ;;  %3578 = vmatpush.bf16.msrb.mxu0 %v13780_v11  ;;  %3591 = vmatpush.bf16.msrb.mxu2 %v13784_v0  ;;  %v1226_v2 = vperm.slane %v1136_v3, 2  ;;  %v17156_v19 = vld [vmem:[#allocation2 + $0x604] sm:$0xf0]  ;;  %v1423_v28 = vperm.slane %v1227_v13, 0 }
0x1466   :  { %v3934_v22 = vsel %vm3898_vm4, %v3035_v16, %v3858_v17  ;;  %v14197_v16 = vld [vmem:[#allocation2 + $0x608] sm:$0xf0]  ;;  %v14196_v32 = vor.u32 %v17156_v19, %v14195_v4  ;;  %v14213_v3 = vld [vmem:[#allocation2 + $0x618] sm:$0xf0]  ;;  %v17011_v4 = vld [vmem:[#allocation2 + $0x184] sm:$0xf] }
0x1467   :  { %v3935_v12 = vsel %vm3900_vm12, %v3859_v20, %v3860_v21  ;;  %v14203_v20 = vld [vmem:[#allocation2 + $0x488] sm:$0xf]  ;;  %v14200_v31 = vor.u32 %v17107_v8, %v14197_v16  ;;  %v13819_v19 = vld [vmem:[#allocation2 + $0x180] sm:$0xf] }
0x1468   :  { %v3936_v25 = vsel %vm3902_vm13, %v3934_v22, %v3935_v12  ;;  %v17157_v22 = vld [vmem:[#allocation2 + $0x60c] sm:$0xf0]  ;;  %v17108_v12 = vld [vmem:[#allocation2 + $0x48c] sm:$0xf] }
0x1469   :  { %4010 = vst [vmem:[#allocation13 + $0x58] sm:$0xff] %v3936_v25  ;;  %v3049_v30 = vpop.f32.mrf.mxu3  ;;  %v14204_v35 = vor.u32 %v17157_v22, %v14203_v20  ;;  %v14208_v36 = vor.u32 %v17108_v12, %v14205_v23  ;;  %v17060_v20 = vld [vmem:[#allocation2 + $0x304] sm:$0xf0] }
0x146a   :  { %v3075_v14 = vpop.f32.mrf.mxu2  ;;  %v1422_v30 = vperm.slane %v1226_v2, 0 }
0x146b   :  { %v3086_v38 = vpop.f32.mrf.mxu1  ;;  %v17009_v14 = vld [vmem:[#allocation2 + $0x174] sm:$0xf] }
0x146c   :  { %v3112_v40 = vpop.f32.mrf.mxu0  ;;  %v3087_v55 = vadd.f32 %v3086_v38, %v1417_v56  ;;  %v17058_v38 = vld [vmem:[#allocation2 + $0x2f4] sm:$0xf0]  ;;  %v13808_v44 = vor.u32 %v17009_v14, %v13805_v34 }
0x146d   :  { %v3113_v59 = vadd.f32 %v3112_v40, %v1419_v27  ;;  %v17059_v27 = vld [vmem:[#allocation2 + $0x2fc] sm:$0xf0]  ;;  %v17010_v40 = vld [vmem:[#allocation2 + $0x17c] sm:$0xf]  ;;  %v13804_v33 = vor.u32 %v17058_v38, %v13803_v37  ;;  %v1138_v37 = vunpack.c.h.bf16 %v18546_v47 }
0x146e   :  { %14297 = vmatmul.msk.bf16.vlgmr.msra.gmra.mxu1 %vm128_vm9, %v18305_v43  ;;  %14298 = vmatmul.msk.bf16.vlgmr.msra.gmra.mxu3 %vm128_vm9, %v18305_v43  ;;  %v13812_v48 = vor.u32 %v17059_v27, %v13811_v39 }
0x146f   :  { %14299 = vmatmul.msk.bf16.vlgmr.msra.gmra.mxu0 %vm128_vm9, %v18305_v43  ;;  %14300 = vmatmul.msk.bf16.vlgmr.msra.gmra.mxu2 %vm128_vm9, %v18305_v43  ;;  %v3862_v10 = vrot.slane %v3113_v59, 4  ;;  %v1137_v59 = vunpack.c.l.bf16 %v18546_v47 }
0x1470   :  { %3616 = vmatpush.bf16.msra.mxu3 %v14184_v41  ;;  %3603 = vmatpush.bf16.msra.mxu1 %v14180_v42  ;;  %v1424_v41 = vperm.slane %v1228_v26, 0  ;;  %v1421_v42 = vperm.slane %v1225_v24, 0  ;;  %v13820_v24 = vor.u32 %v17060_v20, %v13819_v19 }
0x1471   :  { %v3099_v60 = vpop.f32.mrf.mxu3  ;;  %3629 = vmatpush.bf16.msra.mxu0 %v14188_v45  ;;  %3642 = vmatpush.bf16.msra.mxu2 %v14192_v46  ;;  %v1229_v13 = vperm.slane %v1137_v59, 0 }
0x1472   :  { %v3100_v49 = vadd.f32 %v3099_v60, %v1418_v18  ;;  %v3125_v63 = vpop.f32.mrf.mxu2  ;;  %v13813_v18 = vld [vmem:[#allocation2 + $0x300] sm:$0xf0] }
0x1473   :  { %v3126_v5 = vadd.f32 %v3125_v63, %v1420_v54  ;;  %v3088_v6 = vpop.f32.mrf.mxu1  ;;  %v13816_v50 = vor.u32 %v17010_v40, %v13813_v18  ;;  %v1425_v12 = vperm.slane %v1229_v13, 0  ;;  %v1235_v18 = vperm.slane %v1138_v37, 4 }
0x1474   :  { %v3861_v7 = vrot.slane %v3100_v49, 6  ;;  %v3114_v9 = vpop.f32.mrf.mxu0  ;;  %3617 = vmatpush.bf16.msra.mxu3 %v13792_v57  ;;  %3604 = vmatpush.bf16.msra.mxu1 %v13788_v58  ;;  %v17109_v6 = vld [vmem:[#allocation2 + $0x494] sm:$0xf] }
0x1475   :  { %v3863_v11 = vrot.slane %v3126_v5, 2  ;;  %3630 = vmatpush.bf16.msra.mxu0 %v13796_v61  ;;  %3643 = vmatpush.bf16.msra.mxu2 %v13800_v62  ;;  %v1231_v5 = vperm.slane %v1137_v59, 4  ;;  %v17158_v9 = vld [vmem:[#allocation2 + $0x614] sm:$0xf0]  ;;  %v14216_v8 = vor.u32 %v17109_v6, %v14213_v3 }
0x1476   :  { %v3937_v0 = vsel %vm3898_vm4, %v3087_v55, %v3861_v7  ;;  %v14211_v7 = vld [vmem:[#allocation2 + $0x490] sm:$0xf] }
0x1477   :  { %v3938_v1 = vsel %vm3900_vm12, %v3862_v10, %v3863_v11  ;;  %v1230_v11 = vperm.slane %v1137_v59, 2  ;;  %v1427_v2 = vperm.slane %v1231_v5, 0  ;;  %v14212_v16 = vor.u32 %v17158_v9, %v14211_v7 }
0x1478   :  { %v3939_v15 = vsel %vm3902_vm13, %v3937_v0, %v3938_v1  ;;  %v1232_v1 = vperm.slane %v1137_v59, 6 }
0x1479   :  { %4011 = vst [vmem:[#allocation13 + $0x60] sm:$0xff] %v3939_v15  ;;  %v3101_v17 = vpop.f32.mrf.mxu3 }
0x147a   :  { %v3127_v21 = vpop.f32.mrf.mxu2  ;;  %v13821_v17 = vld [vmem:[#allocation2 + $0x308] sm:$0xf0]  ;;  %v1428_v22 = vperm.slane %v1232_v1, 0 }
0x147b   :  { %v3138_v25 = vpop.f32.mrf.mxu1  ;;  %v1426_v21 = vperm.slane %v1230_v11, 0  ;;  %v13824_v23 = vor.u32 %v17011_v4, %v13821_v17  ;;  %4040 = dma.hbm_to_vmem [thread:$0]  %s4036_s11, 25088, %s111_s25, [#allocation3] }
0x147c   :  { %v3164_v29 = vpop.f32.mrf.mxu0  ;;  %v3139_v56 = vadd.f32 %v3138_v25, %v1421_v42  ;;  %v1234_v42 = vperm.slane %v1138_v37, 2 }
0x147d   :  { %v3165_v45 = vadd.f32 %v3164_v29, %v1423_v28 }
0x147e   :  { %14301 = vmatmul.msk.bf16.vlgmr.msrb.gmra.mxu1 %vm128_vm9, %v18305_v43  ;;  %14302 = vmatmul.msk.bf16.vlgmr.msrb.gmra.mxu3 %vm128_vm9, %v18305_v43  ;;  %v1430_v47 = vperm.slane %v1234_v42, 0 }
0x147f   :  { %14303 = vmatmul.msk.bf16.vlgmr.msrb.gmra.mxu0 %vm128_vm9, %v18305_v43  ;;  %14304 = vmatmul.msk.bf16.vlgmr.msrb.gmra.mxu2 %vm128_vm9, %v18305_v43  ;;  %v3865_v60 = vrot.slane %v3165_v45, 4  ;;  %v1233_v45 = vperm.slane %v1138_v37, 0 }
0x1480   :  { %3668 = vmatpush.bf16.msrb.mxu3 %v14200_v31  ;;  %3655 = vmatpush.bf16.msrb.mxu1 %v14196_v32 }
0x1481   :  { %v3151_v46 = vpop.f32.mrf.mxu3  ;;  %3681 = vmatpush.bf16.msrb.mxu0 %v14204_v35  ;;  %3694 = vmatpush.bf16.msrb.mxu2 %v14208_v36 }
0x1482   :  { %v3152_v51 = vadd.f32 %v3151_v46, %v1422_v30  ;;  %v3177_v52 = vpop.f32.mrf.mxu2 }
0x1483   :  { %v3178_v53 = vadd.f32 %v3177_v52, %v1424_v41  ;;  %v3140_v54 = vpop.f32.mrf.mxu1 }
0x1484   :  { %v3864_v57 = vrot.slane %v3152_v51, 6  ;;  %v3166_v58 = vpop.f32.mrf.mxu0  ;;  %3669 = vmatpush.bf16.msrb.mxu3 %v13808_v44  ;;  %3656 = vmatpush.bf16.msrb.mxu1 %v13804_v33  ;;  %v1236_v33 = vperm.slane %v1138_v37, 6  ;;  %v1429_v51 = vperm.slane %v1233_v45, 0 }
0x1485   :  { %v3866_v61 = vrot.slane %v3178_v53, 2  ;;  %3682 = vmatpush.bf16.msrb.mxu0 %v13812_v48  ;;  %3695 = vmatpush.bf16.msrb.mxu2 %v13816_v50  ;;  %v1431_v48 = vperm.slane %v1235_v18, 0 }
0x1486   :  { %v3940_v62 = vsel %vm3898_vm4, %v3139_v56, %v3864_v57  ;;  %v1432_v50 = vperm.slane %v1236_v33, 0  ;;  %v1118_v57 = vld [vmem:[#allocation12 + $0x40] sm:$0xff] }
0x1487   :  { %v3941_v49 = vsel %vm3900_vm12, %v3865_v60, %v3866_v61  ;;  %v1139_v5 = vunpack.c.l.bf16 %v1118_v57 }
0x1488   :  { %v3942_v63 = vsel %vm3902_vm13, %v3940_v62, %v3941_v49 }
0x1489   :  { %4012 = vst [vmem:[#allocation13 + $0x68] sm:$0xff] %v3942_v63  ;;  %v3153_v55 = vpop.f32.mrf.mxu3  ;;  %v1239_v9 = vperm.slane %v1139_v5, 4  ;;  %v1238_v11 = vperm.slane %v1139_v5, 2  ;;  %v1240_v1 = vperm.slane %v1139_v5, 6  ;;  %v1237_v13 = vperm.slane %v1139_v5, 0 }
0x148a   :  { %v3179_v10 = vpop.f32.mrf.mxu2 }
0x148b   :  { %v3190_v0 = vpop.f32.mrf.mxu1  ;;  %v1433_v4 = vperm.slane %v1237_v13, 0 }
0x148c   :  { %v3216_v15 = vpop.f32.mrf.mxu0  ;;  %v3191_v32 = vadd.f32 %v3190_v0, %v1425_v12 }
0x148d   :  { %v3217_v25 = vadd.f32 %v3216_v15, %v1427_v2  ;;  %v1435_v15 = vperm.slane %v1239_v9, 0 }
0x148e   :  { %14305 = vmatmul.msk.bf16.vlgmr.msra.gmra.mxu1 %vm128_vm9, %v18305_v43  ;;  %14306 = vmatmul.msk.bf16.vlgmr.msra.gmra.mxu3 %vm128_vm9, %v18305_v43 }
0x148f   :  { %14307 = vmatmul.msk.bf16.vlgmr.msra.gmra.mxu0 %vm128_vm9, %v18305_v43  ;;  %14308 = vmatmul.msk.bf16.vlgmr.msra.gmra.mxu2 %vm128_vm9, %v18305_v43  ;;  %v3868_v35 = vrot.slane %v3217_v25, 4 }
0x1490   :  { %3720 = vmatpush.bf16.msra.mxu3 %v14216_v8  ;;  %3707 = vmatpush.bf16.msra.mxu1 %v14212_v16  ;;  %v1434_v8 = vperm.slane %v1238_v11, 0  ;;  %v1436_v16 = vperm.slane %v1240_v1, 0 }
0x1491   :  { %v3203_v26 = vpop.f32.mrf.mxu3 }
0x1492   :  { %v3204_v28 = vadd.f32 %v3203_v26, %v1426_v21  ;;  %v3229_v29 = vpop.f32.mrf.mxu2 }
0x1493   :  { %v3230_v30 = vadd.f32 %v3229_v29, %v1428_v22  ;;  %v3192_v31 = vpop.f32.mrf.mxu1  ;;  %v1140_v29 = vunpack.c.h.bf16 %v1118_v57 }
0x1494   :  { %v3867_v14 = vrot.slane %v3204_v28, 6  ;;  %v3218_v34 = vpop.f32.mrf.mxu0  ;;  %3721 = vmatpush.bf16.msra.mxu3 %v13824_v23  ;;  %3708 = vmatpush.bf16.msra.mxu1 %v13820_v24 }
0x1495   :  { %v3869_v36 = vrot.slane %v3230_v30, 2  ;;  %v1243_v34 = vperm.slane %v1140_v29, 4 }
0x1496   :  { %v3943_v38 = vsel %vm3898_vm4, %v3191_v32, %v3867_v14 }
0x1497   :  { %v3944_v39 = vsel %vm3900_vm12, %v3868_v35, %v3869_v36  ;;  %v1242_v36 = vperm.slane %v1140_v29, 2 }
0x1498   :  { %v3945_v27 = vsel %vm3902_vm13, %v3943_v38, %v3944_v39  ;;  %v1244_v38 = vperm.slane %v1140_v29, 6  ;;  %v1241_v39 = vperm.slane %v1140_v29, 0 }
0x1499   :  { %4013 = vst [vmem:[#allocation13 + $0x70] sm:$0xff] %v3945_v27  ;;  %v3205_v40 = vpop.f32.mrf.mxu3  ;;  %v1438_v18 = vperm.slane %v1242_v36, 0 }
0x149a   :  { %v3231_v41 = vpop.f32.mrf.mxu2  ;;  %v1439_v40 = vperm.slane %v1243_v34, 0  ;;  %v1437_v42 = vperm.slane %v1241_v39, 0 }
0x149b   :  { %v3242_v44 = vpop.f32.mrf.mxu1  ;;  %v1440_v41 = vperm.slane %v1244_v38, 0 }
0x149c   :  { %v3268_v46 = vpop.f32.mrf.mxu0  ;;  %v3243_v60 = vadd.f32 %v3242_v44, %v1429_v51 }
0x149d   :  { %v3269_v52 = vadd.f32 %v3268_v46, %v1431_v48  ;;  %v1119_v48 = vld [vmem:[#allocation12 + $0x48] sm:$0xff] }
0x149e   :  { %14309 = vmatmul.msk.bf16.vlgmr.msrb.gmra.mxu1 %vm128_vm9, %v18305_v43  ;;  %14310 = vmatmul.msk.bf16.vlgmr.msrb.gmra.mxu3 %vm128_vm9, %v18305_v43  ;;  %v1141_v57 = vunpack.c.l.bf16 %v1119_v48 }
0x149f   :  { %14311 = vmatmul.msk.bf16.vlgmr.msrb.gmra.mxu0 %vm128_vm9, %v18305_v43  ;;  %14312 = vmatmul.msk.bf16.vlgmr.msrb.gmra.mxu2 %vm128_vm9, %v18305_v43  ;;  %v3871_v49 = vrot.slane %v3269_v52, 4 }
0x14a1   :  { %v3255_v53 = vpop.f32.mrf.mxu3 }
0x14a2   :  { %v3256_v54 = vadd.f32 %v3255_v53, %v1430_v47  ;;  %v3281_v56 = vpop.f32.mrf.mxu2 }
0x14a3   :  { %v3282_v58 = vadd.f32 %v3281_v56, %v1432_v50  ;;  %v3244_v59 = vpop.f32.mrf.mxu1 }
0x14a4   :  { %v3870_v61 = vrot.slane %v3256_v54, 6  ;;  %v3270_v62 = vpop.f32.mrf.mxu0 }
0x14a5   :  { %v3872_v63 = vrot.slane %v3282_v58, 2  ;;  %v1247_v62 = vperm.slane %v1141_v57, 4 }
0x14a6   :  { %v3946_v6 = vsel %vm3898_vm4, %v3243_v60, %v3870_v61 }
0x14a7   :  { %v3947_v3 = vsel %vm3900_vm12, %v3871_v49, %v3872_v63  ;;  %v1246_v63 = vperm.slane %v1141_v57, 2 }
0x14a8   :  { %v3948_v55 = vsel %vm3902_vm13, %v3946_v6, %v3947_v3  ;;  %v1248_v6 = vperm.slane %v1141_v57, 6  ;;  %v1245_v3 = vperm.slane %v1141_v57, 0 }
0x14a9   :  { %4014 = vst [vmem:[#allocation13 + $0x78] sm:$0xff] %v3948_v55  ;;  %v3257_v7 = vpop.f32.mrf.mxu3  ;;  %v1442_v9 = vperm.slane %v1246_v63, 0 }
0x14aa   :  { %v3283_v10 = vpop.f32.mrf.mxu2  ;;  %v1443_v7 = vperm.slane %v1247_v62, 0  ;;  %v1441_v11 = vperm.slane %v1245_v3, 0 }
0x14ab   :  { %v3294_v0 = vpop.f32.mrf.mxu1  ;;  %v1444_v10 = vperm.slane %v1248_v6, 0 }
0x14ac   :  { %v3320_v2 = vpop.f32.mrf.mxu0  ;;  %v3295_v23 = vadd.f32 %v3294_v0, %v1433_v4 }
0x14ad   :  { %v3321_v17 = vadd.f32 %v3320_v2, %v1435_v15 }
0x14ae   :  { %14313 = vmatmul.msk.bf16.vlgmr.msra.gmra.mxu1 %vm128_vm9, %v18305_v43  ;;  %14314 = vmatmul.msk.bf16.vlgmr.msra.gmra.mxu3 %vm128_vm9, %v18305_v43 }
0x14af   :  { %v3874_v26 = vrot.slane %v3321_v17, 4 }
0x14b1   :  { %v3307_v19 = vpop.f32.mrf.mxu3 }
0x14b2   :  { %v3308_v20 = vadd.f32 %v3307_v19, %v1434_v8  ;;  %v3333_v21 = vpop.f32.mrf.mxu2 }
0x14b3   :  { %v3334_v22 = vadd.f32 %v3333_v21, %v1436_v16  ;;  %v3296_v12 = vpop.f32.mrf.mxu1  ;;  %v1142_v21 = vunpack.c.h.bf16 %v1119_v48 }
0x14b4   :  { %v3873_v24 = vrot.slane %v3308_v20, 6  ;;  %v3322_v25 = vpop.f32.mrf.mxu0 }
0x14b5   :  { %v3875_v28 = vrot.slane %v3334_v22, 2  ;;  %v1251_v25 = vperm.slane %v1142_v21, 4 }
0x14b6   :  { %v3949_v30 = vsel %vm3898_vm4, %v3295_v23, %v3873_v24 }
0x14b7   :  { %v3950_v31 = vsel %vm3900_vm12, %v3874_v26, %v3875_v28  ;;  %v1250_v28 = vperm.slane %v1142_v21, 2 }
0x14b8   :  { %v3951_v32 = vsel %vm3902_vm13, %v3949_v30, %v3950_v31  ;;  %v1252_v30 = vperm.slane %v1142_v21, 6  ;;  %v1249_v31 = vperm.slane %v1142_v21, 0 }
0x14b9   :  { %4015 = vst [vmem:[#allocation13 + $0x80] sm:$0xff] %v3951_v32  ;;  %v3309_v14 = vpop.f32.mrf.mxu3  ;;  %v1446_v34 = vperm.slane %v1250_v28, 0 }
0x14ba   :  { %v3335_v35 = vpop.f32.mrf.mxu2  ;;  %v1447_v14 = vperm.slane %v1251_v25, 0  ;;  %v1445_v36 = vperm.slane %v1249_v31, 0 }
0x14bb   :  { %v3346_v37 = vpop.f32.mrf.mxu1  ;;  %v1448_v35 = vperm.slane %v1252_v30, 0 }
0x14bc   :  { %v3372_v27 = vpop.f32.mrf.mxu0  ;;  %v3347_v51 = vadd.f32 %v3346_v37, %v1437_v42 }
0x14bd   :  { %v3373_v44 = vadd.f32 %v3372_v27, %v1439_v40  ;;  %v1120_v40 = vld [vmem:[#allocation12 + $0x50] sm:$0xff] }
0x14be   :  { %v1143_v48 = vunpack.c.l.bf16 %v1120_v40 }
0x14bf   :  { %v3877_v54 = vrot.slane %v3373_v44, 4 }
0x14c1   :  { %v3359_v33 = vpop.f32.mrf.mxu3 }
0x14c2   :  { %v3360_v45 = vadd.f32 %v3359_v33, %v1438_v18  ;;  %v3385_v46 = vpop.f32.mrf.mxu2 }
0x14c3   :  { %v3386_v47 = vadd.f32 %v3385_v46, %v1440_v41  ;;  %v3348_v50 = vpop.f32.mrf.mxu1 }
0x14c4   :  { %v3876_v52 = vrot.slane %v3360_v45, 6  ;;  %v3374_v53 = vpop.f32.mrf.mxu0 }
0x14c5   :  { %v3878_v56 = vrot.slane %v3386_v47, 2  ;;  %v1255_v53 = vperm.slane %v1143_v48, 4 }
0x14c6   :  { %v3952_v58 = vsel %vm3898_vm4, %v3347_v51, %v3876_v52 }
0x14c7   :  { %v3953_v59 = vsel %vm3900_vm12, %v3877_v54, %v3878_v56  ;;  %v1254_v56 = vperm.slane %v1143_v48, 2 }
0x14c8   :  { %v3954_v60 = vsel %vm3902_vm13, %v3952_v58, %v3953_v59  ;;  %v1256_v58 = vperm.slane %v1143_v48, 6  ;;  %v1253_v59 = vperm.slane %v1143_v48, 0 }
0x14c9   :  { %4016 = vst [vmem:[#allocation13 + $0x88] sm:$0xff] %v3954_v60  ;;  %v3361_v61 = vpop.f32.mrf.mxu3  ;;  %v1450_v62 = vperm.slane %v1254_v56, 0 }
0x14ca   :  { %v3387_v49 = vpop.f32.mrf.mxu2  ;;  %v1451_v61 = vperm.slane %v1255_v53, 0  ;;  %v1449_v63 = vperm.slane %v1253_v59, 0 }
0x14cb   :  { %v3398_v5 = vpop.f32.mrf.mxu1  ;;  %v1452_v49 = vperm.slane %v1256_v58, 0 }
0x14cc   :  { %v3424_v55 = vpop.f32.mrf.mxu0  ;;  %v3399_v16 = vadd.f32 %v3398_v5, %v1441_v11 }
0x14cd   :  { %v3425_v0 = vadd.f32 %v3424_v55, %v1443_v7 }
0x14cf   :  { %v3880_v19 = vrot.slane %v3425_v0, 4 }
0x14d1   :  { %v3411_v1 = vpop.f32.mrf.mxu3 }
0x14d2   :  { %v3412_v13 = vadd.f32 %v3411_v1, %v1442_v9  ;;  %v3437_v2 = vpop.f32.mrf.mxu2 }
0x14d3   :  { %v3438_v15 = vadd.f32 %v3437_v2, %v1444_v10  ;;  %v3400_v8 = vpop.f32.mrf.mxu1  ;;  %v1144_v2 = vunpack.c.h.bf16 %v1120_v40 }
0x14d4   :  { %v3879_v4 = vrot.slane %v3412_v13, 6  ;;  %v3426_v17 = vpop.f32.mrf.mxu0 }
0x14d5   :  { %v3881_v20 = vrot.slane %v3438_v15, 2  ;;  %v1259_v17 = vperm.slane %v1144_v2, 4 }
0x14d6   :  { %v3955_v22 = vsel %vm3898_vm4, %v3399_v16, %v3879_v4 }
0x14d7   :  { %v3956_v12 = vsel %vm3900_vm12, %v3880_v19, %v3881_v20  ;;  %v1258_v20 = vperm.slane %v1144_v2, 2 }
0x14d8   :  { %v3957_v23 = vsel %vm3902_vm13, %v3955_v22, %v3956_v12  ;;  %v1260_v22 = vperm.slane %v1144_v2, 6  ;;  %v1257_v12 = vperm.slane %v1144_v2, 0 }
0x14d9   :  { %4017 = vst [vmem:[#allocation13 + $0x90] sm:$0xff] %v3957_v23  ;;  %v3413_v24 = vpop.f32.mrf.mxu3  ;;  %v1454_v25 = vperm.slane %v1258_v20, 0 }
0x14da   :  { %v3439_v26 = vpop.f32.mrf.mxu2  ;;  %v1455_v24 = vperm.slane %v1259_v17, 0  ;;  %v1453_v28 = vperm.slane %v1257_v12, 0 }
0x14db   :  { %v3450_v29 = vpop.f32.mrf.mxu1  ;;  %v1456_v26 = vperm.slane %v1260_v22, 0 }
0x14dc   :  { %v3476_v32 = vpop.f32.mrf.mxu0  ;;  %v3451_v42 = vadd.f32 %v3450_v29, %v1445_v36 }
0x14dd   :  { %v3477_v37 = vadd.f32 %v3476_v32, %v1447_v14  ;;  %v1121_v14 = vld [vmem:[#allocation12 + $0x58] sm:$0xff] }
0x14de   :  { %v1145_v40 = vunpack.c.l.bf16 %v1121_v14 }
0x14df   :  { %v3883_v45 = vrot.slane %v3477_v37, 4 }
0x14e1   :  { %v3463_v38 = vpop.f32.mrf.mxu3 }
0x14e2   :  { %v3464_v39 = vadd.f32 %v3463_v38, %v1446_v34  ;;  %v3489_v27 = vpop.f32.mrf.mxu2 }
0x14e3   :  { %v3490_v18 = vadd.f32 %v3489_v27, %v1448_v35  ;;  %v3452_v41 = vpop.f32.mrf.mxu1 }
0x14e4   :  { %v3882_v44 = vrot.slane %v3464_v39, 6  ;;  %v3478_v33 = vpop.f32.mrf.mxu0 }
0x14e5   :  { %v3884_v46 = vrot.slane %v3490_v18, 2  ;;  %v1263_v33 = vperm.slane %v1145_v40, 4 }
0x14e6   :  { %v3958_v47 = vsel %vm3898_vm4, %v3451_v42, %v3882_v44 }
0x14e7   :  { %v3959_v50 = vsel %vm3900_vm12, %v3883_v45, %v3884_v46  ;;  %v1262_v46 = vperm.slane %v1145_v40, 2 }
0x14e8   :  { %v3960_v51 = vsel %vm3902_vm13, %v3958_v47, %v3959_v50  ;;  %v1264_v47 = vperm.slane %v1145_v40, 6  ;;  %v1261_v50 = vperm.slane %v1145_v40, 0 }
0x14e9   :  { %4018 = vst [vmem:[#allocation13 + $0x98] sm:$0xff] %v3960_v51  ;;  %v3465_v52 = vpop.f32.mrf.mxu3  ;;  %v1458_v53 = vperm.slane %v1262_v46, 0 }
0x14ea   :  { %v3491_v54 = vpop.f32.mrf.mxu2  ;;  %v1459_v52 = vperm.slane %v1263_v33, 0  ;;  %v1457_v56 = vperm.slane %v1261_v50, 0 }
0x14eb   :  { %v3502_v57 = vpop.f32.mrf.mxu1  ;;  %v1460_v54 = vperm.slane %v1264_v47, 0 }
0x14ec   :  { %v3528_v60 = vpop.f32.mrf.mxu0  ;;  %v3503_v10 = vadd.f32 %v3502_v57, %v1449_v63 }
0x14ed   :  { %v3529_v5 = vadd.f32 %v3528_v60, %v1451_v61 }
0x14ef   :  { %v3886_v1 = vrot.slane %v3529_v5, 4 }
0x14f1   :  { %v3515_v6 = vpop.f32.mrf.mxu3 }
0x14f2   :  { %v3516_v3 = vadd.f32 %v3515_v6, %v1450_v62  ;;  %v3541_v55 = vpop.f32.mrf.mxu2 }
0x14f3   :  { %v3542_v7 = vadd.f32 %v3541_v55, %v1452_v49  ;;  %v3504_v9 = vpop.f32.mrf.mxu1  ;;  %v1146_v55 = vunpack.c.h.bf16 %v1121_v14 }
0x14f4   :  { %v3885_v11 = vrot.slane %v3516_v3, 6  ;;  %v3530_v0 = vpop.f32.mrf.mxu0 }
0x14f5   :  { %v3887_v13 = vrot.slane %v3542_v7, 2  ;;  %v1267_v0 = vperm.slane %v1146_v55, 4 }
0x14f6   :  { %v3961_v15 = vsel %vm3898_vm4, %v3503_v10, %v3885_v11 }
0x14f7   :  { %v3962_v8 = vsel %vm3900_vm12, %v3886_v1, %v3887_v13  ;;  %v1266_v13 = vperm.slane %v1146_v55, 2 }
0x14f8   :  { %v3963_v16 = vsel %vm3902_vm13, %v3961_v15, %v3962_v8  ;;  %v1268_v15 = vperm.slane %v1146_v55, 6  ;;  %v1265_v8 = vperm.slane %v1146_v55, 0 }
0x14f9   :  { %4019 = vst [vmem:[#allocation13 + $0xa0] sm:$0xff] %v3963_v16  ;;  %v3517_v4 = vpop.f32.mrf.mxu3  ;;  %v1462_v17 = vperm.slane %v1266_v13, 0 }
0x14fa   :  { %v3543_v19 = vpop.f32.mrf.mxu2  ;;  %v1463_v4 = vperm.slane %v1267_v0, 0  ;;  %v1461_v20 = vperm.slane %v1265_v8, 0 }
0x14fb   :  { %v3554_v21 = vpop.f32.mrf.mxu1  ;;  %v1464_v19 = vperm.slane %v1268_v15, 0 }
0x14fc   :  { %v3580_v23 = vpop.f32.mrf.mxu0  ;;  %v3555_v36 = vadd.f32 %v3554_v21, %v1453_v28 }
0x14fd   :  { %v3581_v29 = vadd.f32 %v3580_v23, %v1455_v24 }
0x14ff   :  { %v3889_v39 = vrot.slane %v3581_v29, 4 }
0x1501   :  { %v3567_v30 = vpop.f32.mrf.mxu3 }
0x1502   :  { %v3568_v31 = vadd.f32 %v3567_v30, %v1454_v25  ;;  %v3593_v32 = vpop.f32.mrf.mxu2 }
0x1503   :  { %v3594_v34 = vadd.f32 %v3593_v32, %v1456_v26  ;;  %v3556_v35 = vpop.f32.mrf.mxu1  ;;  %v1122_v32 = vld [vmem:[#allocation12 + $0x60] sm:$0x3] }
0x1504   :  { %v3888_v37 = vrot.slane %v3568_v31, 6  ;;  %v3582_v38 = vpop.f32.mrf.mxu0 }
0x1505   :  { %v3890_v27 = vrot.slane %v3594_v34, 2 }
0x1506   :  { %v3964_v18 = vsel %vm3898_vm4, %v3555_v36, %v3888_v37  ;;  %v1147_v36 = vunpack.c.l.bf16 %v1122_v32 }
0x1507   :  { %v3965_v41 = vsel %vm3900_vm12, %v3889_v39, %v3890_v27 }
0x1508   :  { %v3966_v42 = vsel %vm3902_vm13, %v3964_v18, %v3965_v41  ;;  %v1270_v39 = vperm.slane %v1147_v36, 2  ;;  %v1269_v40 = vperm.slane %v1147_v36, 0 }
0x1509   :  { %4020 = vst [vmem:[#allocation13 + $0xa8] sm:$0xff] %v3966_v42  ;;  %v3569_v44 = vpop.f32.mrf.mxu3 }
0x150a   :  { %v3595_v45 = vpop.f32.mrf.mxu2  ;;  %v1466_v18 = vperm.slane %v1270_v39, 0  ;;  %v1465_v41 = vperm.slane %v1269_v40, 0 }
0x150b   :  { %v3606_v48 = vpop.f32.mrf.mxu1 }
0x150c   :  { %v3632_v51 = vpop.f32.mrf.mxu0  ;;  %v3607_v49 = vadd.f32 %v3606_v48, %v1457_v56 }
0x150d   :  { %v3633_v57 = vadd.f32 %v3632_v51, %v1459_v52 }
0x150f   :  { %v3892_v6 = vrot.slane %v3633_v57, 4 }
0x1511   :  { %v3619_v58 = vpop.f32.mrf.mxu3 }
0x1512   :  { %v3620_v59 = vadd.f32 %v3619_v58, %v1458_v53  ;;  %v3645_v60 = vpop.f32.mrf.mxu2 }
0x1513   :  { %v3646_v61 = vadd.f32 %v3645_v60, %v1460_v54  ;;  %v3608_v62 = vpop.f32.mrf.mxu1 }
0x1514   :  { %v3891_v63 = vrot.slane %v3620_v59, 6  ;;  %v3634_v5 = vpop.f32.mrf.mxu0 }
0x1515   :  { %v3893_v3 = vrot.slane %v3646_v61, 2 }
0x1516   :  { %v3967_v7 = vsel %vm3898_vm4, %v3607_v49, %v3891_v63 }
0x1517   :  { %v3968_v9 = vsel %vm3900_vm12, %v3892_v6, %v3893_v3 }
0x1518   :  { %v3969_v10 = vsel %vm3902_vm13, %v3967_v7, %v3968_v9 }
0x1519   :  { %4021 = vst [vmem:[#allocation13 + $0xb0] sm:$0xff] %v3969_v10  ;;  %v3621_v11 = vpop.f32.mrf.mxu3 }
0x151a   :  { %v3647_v1 = vpop.f32.mrf.mxu2 }
0x151b   :  { %v3658_v2 = vpop.f32.mrf.mxu1 }
0x151c   :  { %v3684_v16 = vpop.f32.mrf.mxu0  ;;  %v3659_v26 = vadd.f32 %v3658_v2, %v1461_v20 }
0x151d   :  { %v3685_v21 = vadd.f32 %v3684_v16, %v1463_v4 }
0x151f   :  { %v3895_v30 = vrot.slane %v3685_v21, 4 }
0x1521   :  { %v3671_v22 = vpop.f32.mrf.mxu3 }
0x1522   :  { %v3672_v12 = vadd.f32 %v3671_v22, %v1462_v17  ;;  %v3697_v23 = vpop.f32.mrf.mxu2 }
0x1523   :  { %v3698_v24 = vadd.f32 %v3697_v23, %v1464_v19  ;;  %v3660_v25 = vpop.f32.mrf.mxu1 }
0x1524   :  { %v3894_v28 = vrot.slane %v3672_v12, 6  ;;  %v3686_v29 = vpop.f32.mrf.mxu0 }
0x1525   :  { %v3896_v31 = vrot.slane %v3698_v24, 2 }
0x1526   :  { %v3970_v14 = vsel %vm3898_vm4, %v3659_v26, %v3894_v28 }
0x1527   :  { %v3971_v34 = vsel %vm3900_vm12, %v3895_v30, %v3896_v31 }
0x1528   :  { %v3972_v35 = vsel %vm3902_vm13, %v3970_v14, %v3971_v34 }
0x1529   :  { %4022 = vst [vmem:[#allocation13 + $0xb8] sm:$0xff] %v3972_v35  ;;  %v3673_v37 = vpop.f32.mrf.mxu3 }
0x152a   :  { %v3699_v38 = vpop.f32.mrf.mxu2 }
0x152b   :  { %v3710_v27 = vpop.f32.mrf.mxu1 }
0x152c   :  { %v3711_v45 = vadd.f32 %v3710_v27, %v1465_v41 }
0x1531   :  { %v3723_v42 = vpop.f32.mrf.mxu3 }
0x1532   :  { %v3724_v44 = vadd.f32 %v3723_v42, %v1466_v18 }
0x1533   :  { %v3712_v33 = vpop.f32.mrf.mxu1 }
0x1534   :  { %v3897_v46 = vrot.slane %v3724_v44, 6 }
0x1536   :  { %v3973_v48 = vsel %vm3898_vm4, %v3711_v45, %v3897_v46 }
0x1537   :  { %4023 = vst [vmem:[#allocation13 + $0xc0] sm:$0xf] %v3973_v48 }
0x1539   :  { %v3725_v47 = vpop.f32.mrf.mxu3 }
0x153a   :  { %18057 = dma.done.wait [#allocation3 + $0x1], 25088 }
0x153b   :  { %18058 = vsyncadd [#allocation3 + $0x1], 4294942208  ;;  %v14709_v50 = vld [vmem:[#allocation2 + $0x930] sm:$0xf]  ;;  %v17306_v51 = vld [vmem:[#allocation2 + $0xab4] sm:$0xf0] }
0x153c   :  { %v17257_v52 = vld [vmem:[#allocation2 + $0x934] sm:$0xf]  ;;  %v14710_v53 = vor.u32 %v17306_v51, %v14709_v50  ;;  %v14711_v54 = vld [vmem:[#allocation2 + $0xab8] sm:$0xf0]  ;;  %v14719_v57 = vld [vmem:[#allocation2 + $0xac0] sm:$0xf0] }
0x153d   :  { %v17258_v56 = vld [vmem:[#allocation2 + $0x93c] sm:$0xf]  ;;  %v14714_v58 = vor.u32 %v17257_v52, %v14711_v54  ;;  %v14317_v60 = vld [vmem:[#allocation2 + $0x620] sm:$0xf]  ;;  %v17208_v61 = vld [vmem:[#allocation2 + $0x7a4] sm:$0xf0] }
0x153e   :  { %v14722_v59 = vor.u32 %v17258_v56, %v14719_v57  ;;  %v17159_v62 = vld [vmem:[#allocation2 + $0x624] sm:$0xf]  ;;  %5582 = vmatpush.bf16.msra.mxu0 %v14710_v53  ;;  %v14318_v49 = vor.u32 %v17208_v61, %v14317_v60  ;;  %v14319_v63 = vld [vmem:[#allocation2 + $0x7a8] sm:$0xf0]  ;;  %v14327_v6 = vld [vmem:[#allocation2 + $0x7b0] sm:$0xf0] }
0x153f   :  { %v17160_v5 = vld [vmem:[#allocation2 + $0x62c] sm:$0xf]  ;;  %5595 = vmatpush.bf16.msra.mxu2 %v14714_v58  ;;  %v14322_v3 = vor.u32 %v17159_v62, %v14319_v63  ;;  %v14717_v7 = vld [vmem:[#allocation2 + $0x938] sm:$0xf]  ;;  %v17307_v9 = vld [vmem:[#allocation2 + $0xabc] sm:$0xf0] }
0x1540   :  { %5621 = vmatpush.bf16.msrb.mxu3 %v14722_v59  ;;  %v14330_v55 = vor.u32 %v17160_v5, %v14327_v6  ;;  %v17259_v10 = vld [vmem:[#allocation2 + $0x944] sm:$0xf]  ;;  %v14718_v11 = vor.u32 %v17307_v9, %v14717_v7  ;;  %v14727_v0 = vld [vmem:[#allocation2 + $0xac8] sm:$0xf0]  ;;  %v14325_v1 = vld [vmem:[#allocation2 + $0x628] sm:$0xf] }
0x1541   :  { %v17209_v13 = vld [vmem:[#allocation2 + $0x7ac] sm:$0xf0]  ;;  %v14730_v2 = vor.u32 %v17259_v10, %v14727_v0  ;;  %v14725_v15 = vld [vmem:[#allocation2 + $0x940] sm:$0xf]  ;;  %v17308_v8 = vld [vmem:[#allocation2 + $0xac4] sm:$0xf0] }
0x1542   :  { %v17161_v16 = vld [vmem:[#allocation2 + $0x634] sm:$0xf]  ;;  %5583 = vmatpush.bf16.msra.mxu0 %v14318_v49  ;;  %5608 = vmatpush.bf16.msrb.mxu1 %v14718_v11  ;;  %v14726_v4 = vor.u32 %v17308_v8, %v14725_v15  ;;  %v14335_v17 = vld [vmem:[#allocation2 + $0x7b8] sm:$0xf0]  ;;  %v17260_v19 = vld [vmem:[#allocation2 + $0x94c] sm:$0xf]  ;;  %v14326_v21 = vor.u32 %v17209_v13, %v14325_v1 }
0x1543   :  { %v14735_v20 = vld [vmem:[#allocation2 + $0xad0] sm:$0xf0]  ;;  %5596 = vmatpush.bf16.msra.mxu2 %v14322_v3  ;;  %v14333_v12 = vld [vmem:[#allocation2 + $0x630] sm:$0xf]  ;;  %v17210_v23 = vld [vmem:[#allocation2 + $0x7b4] sm:$0xf0]  ;;  %v14338_v25 = vor.u32 %v17161_v16, %v14335_v17 }
0x1544   :  { %5622 = vmatpush.bf16.msrb.mxu3 %v14330_v55  ;;  %v14738_v22 = vor.u32 %v17260_v19, %v14735_v20  ;;  %v17162_v24 = vld [vmem:[#allocation2 + $0x63c] sm:$0xf]  ;;  %v14334_v26 = vor.u32 %v17210_v23, %v14333_v12  ;;  %v14343_v28 = vld [vmem:[#allocation2 + $0x7c0] sm:$0xf0]  ;;  %v14733_v29 = vld [vmem:[#allocation2 + $0x948] sm:$0xf] }
0x1545   :  { %v17309_v30 = vld [vmem:[#allocation2 + $0xacc] sm:$0xf0]  ;;  %15099 = vmatmul.msk.bf16.vlgmr.msra.gmra.mxu0 %vm128_vm9, %v18305_v43  ;;  %v14346_v31 = vor.u32 %v17162_v24, %v14343_v28  ;;  %v17261_v14 = vld [vmem:[#allocation2 + $0x954] sm:$0xf]  ;;  %v14743_v34 = vld [vmem:[#allocation2 + $0xad8] sm:$0xf0] }
0x1546   :  { %5634 = vmatpush.bf16.msrb.mxu0 %v14726_v4  ;;  %v14734_v32 = vor.u32 %v17309_v30, %v14733_v29  ;;  %v14341_v35 = vld [vmem:[#allocation2 + $0x638] sm:$0xf]  ;;  %15100 = vmatmul.msk.bf16.vlgmr.msra.gmra.mxu2 %vm128_vm9, %v18305_v43  ;;  %v14746_v36 = vor.u32 %v17261_v14, %v14743_v34  ;;  %v17211_v37 = vld [vmem:[#allocation2 + $0x7bc] sm:$0xf0]  ;;  %v14741_v38 = vld [vmem:[#allocation2 + $0x950] sm:$0xf] }
0x1547   :  { %5647 = vmatpush.bf16.msrb.mxu2 %v14730_v2  ;;  %15102 = vmatmul.msk.bf16.vlgmr.msrb.gmra.mxu3 %vm128_vm9, %v18305_v43  ;;  %v17310_v39 = vld [vmem:[#allocation2 + $0xad4] sm:$0xf0]  ;;  %v17163_v40 = vld [vmem:[#allocation2 + $0x644] sm:$0xf]  ;;  %v14351_v18 = vld [vmem:[#allocation2 + $0x7c8] sm:$0xf0]  ;;  %v14342_v45 = vor.u32 %v17211_v37, %v14341_v35 }
0x1548   :  { %5673 = vmatpush.bf16.msra.mxu3 %v14738_v22  ;;  %5609 = vmatpush.bf16.msrb.mxu1 %v14326_v21  ;;  %v14742_v27 = vor.u32 %v17310_v39, %v14741_v38  ;;  %v17262_v41 = vld [vmem:[#allocation2 + $0x95c] sm:$0xf]  ;;  %v14751_v42 = vld [vmem:[#allocation2 + $0xae0] sm:$0xf0]  ;;  %v14349_v44 = vld [vmem:[#allocation2 + $0x640] sm:$0xf]  ;;  %v14354_v51 = vor.u32 %v17163_v40, %v14351_v18 }
0x1549   :  { %v17212_v33 = vld [vmem:[#allocation2 + $0x7c4] sm:$0xf0]  ;;  %v14754_v46 = vor.u32 %v17262_v41, %v14751_v42  ;;  %v17164_v48 = vld [vmem:[#allocation2 + $0x64c] sm:$0xf]  ;;  %v14359_v47 = vld [vmem:[#allocation2 + $0x7d0] sm:$0xf0] }
0x154a   :  { %5635 = vmatpush.bf16.msrb.mxu0 %v14334_v26  ;;  %v14749_v50 = vld [vmem:[#allocation2 + $0x958] sm:$0xf]  ;;  %v17311_v52 = vld [vmem:[#allocation2 + $0xadc] sm:$0xf0]  ;;  %v14350_v53 = vor.u32 %v17212_v33, %v14349_v44  ;;  %v14362_v54 = vor.u32 %v17164_v48, %v14359_v47  ;;  %v14357_v57 = vld [vmem:[#allocation2 + $0x648] sm:$0xf] }
0x154b   :  { %5648 = vmatpush.bf16.msrb.mxu2 %v14338_v25  ;;  %15101 = vmatmul.msk.bf16.vlgmr.msrb.gmra.mxu1 %vm128_vm9, %v18305_v43  ;;  %v14750_v56 = vor.u32 %v17311_v52, %v14749_v50  ;;  %v17213_v58 = vld [vmem:[#allocation2 + $0x7cc] sm:$0xf0]  ;;  %v17263_v60 = vld [vmem:[#allocation2 + $0x964] sm:$0xf]  ;;  %v14759_v61 = vld [vmem:[#allocation2 + $0xae8] sm:$0xf0] }
0x154c   :  { %5674 = vmatpush.bf16.msra.mxu3 %v14346_v31  ;;  %5660 = vmatpush.bf16.msra.mxu1 %v14734_v32  ;;  %v14358_v59 = vor.u32 %v17213_v58, %v14357_v57  ;;  %v14757_v62 = vld [vmem:[#allocation2 + $0x960] sm:$0xf]  ;;  %v17312_v49 = vld [vmem:[#allocation2 + $0xae4] sm:$0xf0]  ;;  %v17264_v63 = vld [vmem:[#allocation2 + $0x96c] sm:$0xf]  ;;  %v14762_v6 = vor.u32 %v17263_v60, %v14759_v61 }
0x154d   :  { %v14767_v5 = vld [vmem:[#allocation2 + $0xaf0] sm:$0xf0]  ;;  %v14758_v3 = vor.u32 %v17312_v49, %v14757_v62  ;;  %v14367_v7 = vld [vmem:[#allocation2 + $0x7d8] sm:$0xf0]  ;;  %v14365_v10 = vld [vmem:[#allocation2 + $0x650] sm:$0xf] }
0x154e   :  { %5686 = vmatpush.bf16.msra.mxu0 %v14742_v27  ;;  %v17165_v55 = vld [vmem:[#allocation2 + $0x654] sm:$0xf]  ;;  %v14770_v9 = vor.u32 %v17264_v63, %v14767_v5  ;;  %v17214_v11 = vld [vmem:[#allocation2 + $0x7d4] sm:$0xf0]  ;;  %v17166_v0 = vld [vmem:[#allocation2 + $0x65c] sm:$0xf] }
0x154f   :  { %5699 = vmatpush.bf16.msra.mxu2 %v14746_v36  ;;  %v14375_v1 = vld [vmem:[#allocation2 + $0x7e0] sm:$0xf0]  ;;  %v14765_v13 = vld [vmem:[#allocation2 + $0x968] sm:$0xf]  ;;  %v17313_v2 = vld [vmem:[#allocation2 + $0xaec] sm:$0xf0]  ;;  %v14370_v15 = vor.u32 %v17165_v55, %v14367_v7  ;;  %v14366_v8 = vor.u32 %v17214_v11, %v14365_v10 }
0x1550   :  { %5725 = vmatpush.bf16.msrb.mxu3 %v14754_v46  ;;  %5661 = vmatpush.bf16.msra.mxu1 %v14342_v45  ;;  %v14378_v16 = vor.u32 %v17166_v0, %v14375_v1  ;;  %v14766_v4 = vor.u32 %v17313_v2, %v14765_v13  ;;  %v14373_v17 = vld [vmem:[#allocation2 + $0x658] sm:$0xf]  ;;  %v17215_v19 = vld [vmem:[#allocation2 + $0x7dc] sm:$0xf0]  ;;  %v17265_v21 = vld [vmem:[#allocation2 + $0x974] sm:$0xf] }
0x1551   :  { %v14374_v20 = vor.u32 %v17215_v19, %v14373_v17  ;;  %v14775_v22 = vld [vmem:[#allocation2 + $0xaf8] sm:$0xf0]  ;;  %v14773_v12 = vld [vmem:[#allocation2 + $0x970] sm:$0xf]  ;;  %v17314_v23 = vld [vmem:[#allocation2 + $0xaf4] sm:$0xf0] }
0x1552   :  { %5687 = vmatpush.bf16.msra.mxu0 %v14350_v53  ;;  %v17266_v24 = vld [vmem:[#allocation2 + $0x97c] sm:$0xf]  ;;  %v14783_v25 = vld [vmem:[#allocation2 + $0xb00] sm:$0xf0]  ;;  %v14778_v26 = vor.u32 %v17265_v21, %v14775_v22  ;;  %v14774_v28 = vor.u32 %v17314_v23, %v14773_v12  ;;  %v14383_v30 = vld [vmem:[#allocation2 + $0x7e8] sm:$0xf0] }
0x1553   :  { %5700 = vmatpush.bf16.msra.mxu2 %v14354_v51  ;;  %v17167_v29 = vld [vmem:[#allocation2 + $0x664] sm:$0xf]  ;;  %v14786_v31 = vor.u32 %v17266_v24, %v14783_v25  ;;  %v14381_v32 = vld [vmem:[#allocation2 + $0x660] sm:$0xf]  ;;  %v17216_v14 = vld [vmem:[#allocation2 + $0x7e4] sm:$0xf0] }
0x1554   :  { %5712 = vmatpush.bf16.msrb.mxu1 %v14750_v56  ;;  %5726 = vmatpush.bf16.msrb.mxu3 %v14362_v54  ;;  %v17168_v34 = vld [vmem:[#allocation2 + $0x66c] sm:$0xf]  ;;  %v14391_v35 = vld [vmem:[#allocation2 + $0x7f0] sm:$0xf0]  ;;  %v14781_v36 = vld [vmem:[#allocation2 + $0x978] sm:$0xf]  ;;  %v14386_v38 = vor.u32 %v17167_v29, %v14383_v30  ;;  %v14382_v39 = vor.u32 %v17216_v14, %v14381_v32 }
0x1555   :  { %15103 = vmatmul.msk.bf16.vlgmr.msrb.gmra.mxu0 %vm128_vm9, %v18305_v43  ;;  %v17315_v37 = vld [vmem:[#allocation2 + $0xafc] sm:$0xf0]  ;;  %v14394_v27 = vor.u32 %v17168_v34, %v14391_v35  ;;  %v14389_v18 = vld [vmem:[#allocation2 + $0x668] sm:$0xf]  ;;  %v17217_v41 = vld [vmem:[#allocation2 + $0x7ec] sm:$0xf0] }
0x1556   :  { %15104 = vmatmul.msk.bf16.vlgmr.msrb.gmra.mxu2 %vm128_vm9, %v18305_v43  ;;  %5738 = vmatpush.bf16.msrb.mxu0 %v14758_v3  ;;  %v14782_v40 = vor.u32 %v17315_v37, %v14781_v36  ;;  %v14390_v42 = vor.u32 %v17217_v41, %v14389_v18  ;;  %v17267_v44 = vld [vmem:[#allocation2 + $0x984] sm:$0xf]  ;;  %v14791_v33 = vld [vmem:[#allocation2 + $0xb08] sm:$0xf0]  ;;  %v14789_v45 = vld [vmem:[#allocation2 + $0x980] sm:$0xf] }
0x1557   :  { %15106 = vmatmul.msk.bf16.vlgmr.msra.gmra.mxu3 %vm128_vm9, %v18305_v43  ;;  %5751 = vmatpush.bf16.msrb.mxu2 %v14762_v6  ;;  %v17316_v46 = vld [vmem:[#allocation2 + $0xb04] sm:$0xf0]  ;;  %v17268_v48 = vld [vmem:[#allocation2 + $0x98c] sm:$0xf]  ;;  %v14799_v47 = vld [vmem:[#allocation2 + $0xb10] sm:$0xf0]  ;;  %v14794_v50 = vor.u32 %v17267_v44, %v14791_v33 }
0x1558   :  { %5713 = vmatpush.bf16.msrb.mxu1 %v14358_v59  ;;  %5777 = vmatpush.bf16.msra.mxu3 %v14770_v9  ;;  %v14790_v51 = vor.u32 %v17316_v46, %v14789_v45  ;;  %v17169_v52 = vld [vmem:[#allocation2 + $0x674] sm:$0xf]  ;;  %v14399_v53 = vld [vmem:[#allocation2 + $0x7f8] sm:$0xf0]  ;;  %v14802_v54 = vor.u32 %v17268_v48, %v14799_v47  ;;  %v14397_v56 = vld [vmem:[#allocation2 + $0x670] sm:$0xf] }
0x1559   :  { %v17218_v57 = vld [vmem:[#allocation2 + $0x7f4] sm:$0xf0]  ;;  %v17170_v58 = vld [vmem:[#allocation2 + $0x67c] sm:$0xf]  ;;  %v14407_v59 = vld [vmem:[#allocation2 + $0x800] sm:$0xf0]  ;;  %v14402_v62 = vor.u32 %v17169_v52, %v14399_v53 }
0x155a   :  { %5739 = vmatpush.bf16.msrb.mxu0 %v14366_v8  ;;  %v14797_v60 = vld [vmem:[#allocation2 + $0x988] sm:$0xf]  ;;  %v17317_v61 = vld [vmem:[#allocation2 + $0xb0c] sm:$0xf0]  ;;  %v14398_v49 = vor.u32 %v17218_v57, %v14397_v56  ;;  %v14410_v63 = vor.u32 %v17170_v58, %v14407_v59  ;;  %v14405_v6 = vld [vmem:[#allocation2 + $0x678] sm:$0xf] }
0x155b   :  { %15105 = vmatmul.msk.bf16.vlgmr.msra.gmra.mxu1 %vm128_vm9, %v18305_v43  ;;  %5752 = vmatpush.bf16.msrb.mxu2 %v14370_v15  ;;  %v14798_v5 = vor.u32 %v17317_v61, %v14797_v60  ;;  %v17219_v3 = vld [vmem:[#allocation2 + $0x7fc] sm:$0xf0]  ;;  %v17269_v7 = vld [vmem:[#allocation2 + $0x994] sm:$0xf]  ;;  %v14807_v9 = vld [vmem:[#allocation2 + $0xb18] sm:$0xf0] }
0x155c   :  { %5778 = vmatpush.bf16.msra.mxu3 %v14378_v16  ;;  %5764 = vmatpush.bf16.msra.mxu1 %v14766_v4  ;;  %v14406_v55 = vor.u32 %v17219_v3, %v14405_v6  ;;  %v14805_v10 = vld [vmem:[#allocation2 + $0x990] sm:$0xf]  ;;  %v17318_v11 = vld [vmem:[#allocation2 + $0xb14] sm:$0xf0]  ;;  %v17270_v0 = vld [vmem:[#allocation2 + $0x99c] sm:$0xf]  ;;  %v14810_v13 = vor.u32 %v17269_v7, %v14807_v9 }
0x155d   :  { %v14815_v1 = vld [vmem:[#allocation2 + $0xb20] sm:$0xf0]  ;;  %v14806_v2 = vor.u32 %v17318_v11, %v14805_v10  ;;  %v14415_v8 = vld [vmem:[#allocation2 + $0x808] sm:$0xf0]  ;;  %v14413_v4 = vld [vmem:[#allocation2 + $0x680] sm:$0xf] }
0x155e   :  { %v17171_v15 = vld [vmem:[#allocation2 + $0x684] sm:$0xf]  ;;  %v14818_v16 = vor.u32 %v17270_v0, %v14815_v1  ;;  %v17220_v17 = vld [vmem:[#allocation2 + $0x804] sm:$0xf0]  ;;  %v17172_v19 = vld [vmem:[#allocation2 + $0x68c] sm:$0xf] }
0x155f   :  { %v14813_v21 = vld [vmem:[#allocation2 + $0x998] sm:$0xf]  ;;  %v17319_v22 = vld [vmem:[#allocation2 + $0xb1c] sm:$0xf0]  ;;  %v14418_v12 = vor.u32 %v17171_v15, %v14415_v8  ;;  %v14414_v23 = vor.u32 %v17220_v17, %v14413_v4  ;;  %v17271_v30 = vld [vmem:[#allocation2 + $0x9a4] sm:$0xf] }
0x1560   :  { %5765 = vmatpush.bf16.msra.mxu1 %v14374_v20  ;;  %v14423_v20 = vld [vmem:[#allocation2 + $0x810] sm:$0xf0]  ;;  %v14814_v25 = vor.u32 %v17319_v22, %v14813_v21  ;;  %v14821_v32 = vld [vmem:[#allocation2 + $0x9a0] sm:$0xf]  ;;  %v17320_v14 = vld [vmem:[#allocation2 + $0xb24] sm:$0xf0] }
0x1561   :  { %v14426_v24 = vor.u32 %v17172_v19, %v14423_v20  ;;  %v17272_v34 = vld [vmem:[#allocation2 + $0x9ac] sm:$0xf]  ;;  %v14831_v35 = vld [vmem:[#allocation2 + $0xb30] sm:$0xf0]  ;;  %v14822_v37 = vor.u32 %v17320_v14, %v14821_v32  ;;  %v17222_v18 = vld [vmem:[#allocation2 + $0x814] sm:$0xf0] }
0x1562   :  { %v17174_v41 = vld [vmem:[#allocation2 + $0x69c] sm:$0xf]  ;;  %v14829_v44 = vld [vmem:[#allocation2 + $0x9a8] sm:$0xf]  ;;  %v17321_v33 = vld [vmem:[#allocation2 + $0xb2c] sm:$0xf0] }
0x1563   :  { %v14830_v47 = vor.u32 %v17321_v33, %v14829_v44  ;;  %v17273_v53 = vld [vmem:[#allocation2 + $0x9b4] sm:$0xf]  ;;  %v14837_v56 = vld [vmem:[#allocation2 + $0x9b0] sm:$0xf]  ;;  %v17322_v57 = vld [vmem:[#allocation2 + $0xb34] sm:$0xf0] }
0x1564   :  { %v17274_v58 = vld [vmem:[#allocation2 + $0x9bc] sm:$0xf]  ;;  %v14847_v59 = vld [vmem:[#allocation2 + $0xb40] sm:$0xf0]  ;;  %v14838_v61 = vor.u32 %v17322_v57, %v14837_v56  ;;  %v17224_v6 = vld [vmem:[#allocation2 + $0x824] sm:$0xf0] }
0x1565   :  { %15107 = vmatmul.msk.bf16.vlgmr.msra.gmra.mxu0 %vm128_vm9, %v18305_v43  ;;  %v17176_v3 = vld [vmem:[#allocation2 + $0x6ac] sm:$0xf]  ;;  %v14845_v7 = vld [vmem:[#allocation2 + $0x9b8] sm:$0xf]  ;;  %v17323_v9 = vld [vmem:[#allocation2 + $0xb3c] sm:$0xf0] }
0x1566   :  { %15108 = vmatmul.msk.bf16.vlgmr.msra.gmra.mxu2 %vm128_vm9, %v18305_v43  ;;  %5790 = vmatpush.bf16.msra.mxu0 %v14774_v28  ;;  %v17221_v28 = vld [vmem:[#allocation2 + $0x80c] sm:$0xf0]  ;;  %v14846_v1 = vor.u32 %v17323_v9, %v14845_v7  ;;  %v17275_v8 = vld [vmem:[#allocation2 + $0x9c4] sm:$0xf]  ;;  %v14853_v4 = vld [vmem:[#allocation2 + $0x9c0] sm:$0xf] }
0x1567   :  { %15110 = vmatmul.msk.bf16.vlgmr.msrb.gmra.mxu3 %vm128_vm9, %v18305_v43  ;;  %5803 = vmatpush.bf16.msra.mxu2 %v14778_v26  ;;  %v14421_v26 = vld [vmem:[#allocation2 + $0x688] sm:$0xf]  ;;  %v17276_v19 = vld [vmem:[#allocation2 + $0x9cc] sm:$0xf]  ;;  %v14863_v20 = vld [vmem:[#allocation2 + $0xb50] sm:$0xf0] }
0x1568   :  { %5829 = vmatpush.bf16.msrb.mxu3 %v14786_v31  ;;  %v14422_v29 = vor.u32 %v17221_v28, %v14421_v26  ;;  %v14823_v31 = vld [vmem:[#allocation2 + $0xb28] sm:$0xf0]  ;;  %v17324_v17 = vld [vmem:[#allocation2 + $0xb44] sm:$0xf0]  ;;  %v17226_v26 = vld [vmem:[#allocation2 + $0x834] sm:$0xf0] }
0x1569   :  { %v14826_v36 = vor.u32 %v17271_v30, %v14823_v31  ;;  %v14854_v22 = vor.u32 %v17324_v17, %v14853_v4  ;;  %v17178_v28 = vld [vmem:[#allocation2 + $0x6bc] sm:$0xf]  ;;  %v14861_v30 = vld [vmem:[#allocation2 + $0x9c8] sm:$0xf]  ;;  %v17325_v31 = vld [vmem:[#allocation2 + $0xb4c] sm:$0xf0] }
0x156a   :  { %5791 = vmatpush.bf16.msra.mxu0 %v14382_v39  ;;  %v14431_v39 = vld [vmem:[#allocation2 + $0x818] sm:$0xf0]  ;;  %v17326_v44 = vld [vmem:[#allocation2 + $0xb54] sm:$0xf0]  ;;  %v14479_v56 = vld [vmem:[#allocation2 + $0x848] sm:$0xf0] }
0x156b   :  { %15109 = vmatmul.msk.bf16.vlgmr.msrb.gmra.mxu1 %vm128_vm9, %v18305_v43  ;;  %5804 = vmatpush.bf16.msra.mxu2 %v14386_v38  ;;  %v17173_v38 = vld [vmem:[#allocation2 + $0x694] sm:$0xf]  ;;  %v17278_v33 = vld [vmem:[#allocation2 + $0x9dc] sm:$0xf]  ;;  %s13401_s13 = scalar_lea.hbm %s19513_s5, 4704 }
0x156c   :  { %5830 = vmatpush.bf16.msrb.mxu3 %v14394_v27  ;;  %5816 = vmatpush.bf16.msrb.mxu1 %v14782_v40  ;;  %v14834_v27 = vor.u32 %v17272_v34, %v14831_v35  ;;  %v14429_v40 = vld [vmem:[#allocation2 + $0x690] sm:$0xf]  ;;  %v14434_v45 = vor.u32 %v17173_v38, %v14431_v39  ;;  %v4239_v34 = vld [vmem:[#allocation12 + $0x62] sm:$0xff]  ;;  %v17227_v38 = vld [vmem:[#allocation2 + $0x83c] sm:$0xf0]  ;;  %s7155_s14 = sshll.u32 %s13401_s13, 4  ;;  %s7156_s14 = int_to_ptr.hbm [resolvable:$true] %s7155_s14 }
0x156d   :  { %v14430_v46 = vor.u32 %v17222_v18, %v14429_v40  ;;  %v4252_v39 = vunpack.c.l.bf16 %v4239_v34  ;;  %v17277_v18 = vld [vmem:[#allocation2 + $0x9d4] sm:$0xf]  ;;  %v4253_v17 = vunpack.c.h.bf16 %v4239_v34  ;;  %v17280_v34 = vld [vmem:[#allocation2 + $0x9ec] sm:$0xf] }
0x156f   :  { %v4304_v40 = vperm.slane %v4252_v39, 4 }
0x1570   :  { %5817 = vmatpush.bf16.msrb.mxu1 %v14390_v42  ;;  %v14439_v42 = vld [vmem:[#allocation2 + $0x820] sm:$0xf0] }
0x1571   :  { %v14442_v48 = vor.u32 %v17174_v41, %v14439_v42  ;;  %v14871_v41 = vld [vmem:[#allocation2 + $0xb58] sm:$0xf0]  ;;  %v14869_v42 = vld [vmem:[#allocation2 + $0x9d0] sm:$0xf] }
0x1575   :  { %15111 = vmatmul.msk.bf16.vlgmr.msrb.gmra.mxu0 %vm128_vm9, %v18305_v43 }
0x1576   :  { %15112 = vmatmul.msk.bf16.vlgmr.msrb.gmra.mxu2 %vm128_vm9, %v18305_v43  ;;  %5842 = vmatpush.bf16.msrb.mxu0 %v14790_v51  ;;  %v17223_v51 = vld [vmem:[#allocation2 + $0x81c] sm:$0xf0] }
0x1577   :  { %15114 = vmatmul.msk.bf16.vlgmr.msra.gmra.mxu3 %vm128_vm9, %v18305_v43  ;;  %5855 = vmatpush.bf16.msrb.mxu2 %v14794_v50  ;;  %v14437_v50 = vld [vmem:[#allocation2 + $0x698] sm:$0xf] }
0x1578   :  { %5881 = vmatpush.bf16.msra.mxu3 %v14802_v54  ;;  %v14438_v52 = vor.u32 %v17223_v51, %v14437_v50  ;;  %v14839_v54 = vld [vmem:[#allocation2 + $0xb38] sm:$0xf0]  ;;  %v4302_v50 = vperm.slane %v4252_v39, 0  ;;  %v4500_v51 = vperm.slane %v4304_v40, 0 }
0x1579   :  { %v14842_v60 = vor.u32 %v17273_v53, %v14839_v54  ;;  %v14870_v53 = vor.u32 %v17326_v44, %v14869_v42  ;;  %v17179_v54 = vld [vmem:[#allocation2 + $0x6c4] sm:$0xf]  ;;  %v14495_v42 = vld [vmem:[#allocation2 + $0x858] sm:$0xf0] }
0x157a   :  { %5843 = vmatpush.bf16.msrb.mxu0 %v14398_v49  ;;  %v14447_v49 = vld [vmem:[#allocation2 + $0x828] sm:$0xf0]  ;;  %v4498_v7 = vperm.slane %v4302_v50, 0  ;;  %v17329_v50 = vld [vmem:[#allocation2 + $0xb6c] sm:$0xf0] }
0x157b   :  { %15113 = vmatmul.msk.bf16.vlgmr.msra.gmra.mxu1 %vm128_vm9, %v18305_v43  ;;  %5856 = vmatpush.bf16.msrb.mxu2 %v14402_v62  ;;  %v17175_v62 = vld [vmem:[#allocation2 + $0x6a4] sm:$0xf] }
0x157c   :  { %5882 = vmatpush.bf16.msra.mxu3 %v14410_v63  ;;  %5868 = vmatpush.bf16.msra.mxu1 %v14798_v5  ;;  %v14850_v63 = vor.u32 %v17274_v58, %v14847_v59  ;;  %v14445_v5 = vld [vmem:[#allocation2 + $0x6a0] sm:$0xf]  ;;  %v14450_v10 = vor.u32 %v17175_v62, %v14447_v49  ;;  %v17228_v59 = vld [vmem:[#allocation2 + $0x844] sm:$0xf0]  ;;  %v14877_v62 = vld [vmem:[#allocation2 + $0x9d8] sm:$0xf] }
0x157d   :  { %v14446_v11 = vor.u32 %v17224_v6, %v14445_v5  ;;  %v14477_v58 = vld [vmem:[#allocation2 + $0x6c0] sm:$0xf] }
0x157e   :  { %v17327_v49 = vld [vmem:[#allocation2 + $0xb5c] sm:$0xf0] }
0x1580   :  { %5869 = vmatpush.bf16.msra.mxu1 %v14406_v55  ;;  %v14455_v55 = vld [vmem:[#allocation2 + $0x830] sm:$0xf0] }
0x1581   :  { %v14458_v0 = vor.u32 %v17176_v3, %v14455_v55  ;;  %v14482_v3 = vor.u32 %v17179_v54, %v14479_v56  ;;  %v14478_v55 = vor.u32 %v17228_v59, %v14477_v58  ;;  %v18690_v59 = vld [vmem:[#allocation12 + $0x6a] sm:$0xff] }
0x1585   :  { %15115 = vmatmul.msk.bf16.vlgmr.msra.gmra.mxu0 %vm128_vm9, %v18305_v43 }
0x1586   :  { %15116 = vmatmul.msk.bf16.vlgmr.msra.gmra.mxu2 %vm128_vm9, %v18305_v43  ;;  %5894 = vmatpush.bf16.msra.mxu0 %v14806_v2  ;;  %v17225_v2 = vld [vmem:[#allocation2 + $0x82c] sm:$0xf0] }
0x1587   :  { %15118 = vmatmul.msk.bf16.vlgmr.msrb.gmra.mxu3 %vm128_vm9, %v18305_v43  ;;  %5907 = vmatpush.bf16.msra.mxu2 %v14810_v13  ;;  %v14453_v13 = vld [vmem:[#allocation2 + $0x6a8] sm:$0xf] }
0x1588   :  { %5933 = vmatpush.bf16.msrb.mxu3 %v14818_v16  ;;  %v14454_v15 = vor.u32 %v17225_v2, %v14453_v13  ;;  %v14855_v16 = vld [vmem:[#allocation2 + $0xb48] sm:$0xf0]  ;;  %v14485_v13 = vld [vmem:[#allocation2 + $0x6c8] sm:$0xf]  ;;  %v17229_v2 = vld [vmem:[#allocation2 + $0x84c] sm:$0xf0] }
0x1589   :  { %v14858_v21 = vor.u32 %v17275_v8, %v14855_v16 }
0x158a   :  { %5895 = vmatpush.bf16.msra.mxu0 %v14414_v23  ;;  %v14463_v23 = vld [vmem:[#allocation2 + $0x838] sm:$0xf0] }
0x158b   :  { %15117 = vmatmul.msk.bf16.vlgmr.msrb.gmra.mxu1 %vm128_vm9, %v18305_v43  ;;  %5908 = vmatpush.bf16.msra.mxu2 %v14418_v12  ;;  %v17177_v12 = vld [vmem:[#allocation2 + $0x6b4] sm:$0xf] }
0x158c   :  { %5934 = vmatpush.bf16.msrb.mxu3 %v14426_v24  ;;  %5920 = vmatpush.bf16.msrb.mxu1 %v14814_v25  ;;  %v14866_v24 = vor.u32 %v17276_v19, %v14863_v20  ;;  %v14461_v25 = vld [vmem:[#allocation2 + $0x6b0] sm:$0xf]  ;;  %v14466_v32 = vor.u32 %v17177_v12, %v14463_v23 }
0x158d   :  { %v14462_v14 = vor.u32 %v17226_v26, %v14461_v25  ;;  %v4308_v26 = vperm.slane %v4253_v17, 4 }
0x1590   :  { %5921 = vmatpush.bf16.msrb.mxu1 %v14422_v29  ;;  %v14471_v29 = vld [vmem:[#allocation2 + $0x840] sm:$0xf0] }
0x1591   :  { %v14474_v35 = vor.u32 %v17178_v28, %v14471_v29  ;;  %v17279_v28 = vld [vmem:[#allocation2 + $0x9e4] sm:$0xf]  ;;  %v14887_v29 = vld [vmem:[#allocation2 + $0xb68] sm:$0xf0] }
0x1592   :  { %v14890_v40 = vor.u32 %v17279_v28, %v14887_v29 }
0x1595   :  { %15119 = vmatmul.msk.bf16.vlgmr.msrb.gmra.mxu0 %vm128_vm9, %v18305_v43 }
0x1596   :  { %15120 = vmatmul.msk.bf16.vlgmr.msrb.gmra.mxu2 %vm128_vm9, %v18305_v43  ;;  %5946 = vmatpush.bf16.msrb.mxu0 %v14822_v37  ;;  %v14469_v37 = vld [vmem:[#allocation2 + $0x6b8] sm:$0xf] }
0x1597   :  { %15122 = vmatmul.msk.bf16.vlgmr.msra.gmra.mxu3 %vm128_vm9, %v18305_v43  ;;  %5959 = vmatpush.bf16.msrb.mxu2 %v14826_v36  ;;  %v14862_v36 = vor.u32 %v17325_v31, %v14861_v30  ;;  %v14885_v30 = vld [vmem:[#allocation2 + $0x9e0] sm:$0xf]  ;;  %v17328_v31 = vld [vmem:[#allocation2 + $0xb64] sm:$0xf0] }
0x1598   :  { %5985 = vmatpush.bf16.msra.mxu3 %v14834_v27  ;;  %v14470_v27 = vor.u32 %v17227_v38, %v14469_v37  ;;  %v4307_v37 = vperm.slane %v4253_v17, 2  ;;  %v4309_v38 = vperm.slane %v4253_v17, 6 }
0x159a   :  { %5947 = vmatpush.bf16.msrb.mxu0 %v14430_v46 }
0x159b   :  { %15121 = vmatmul.msk.bf16.vlgmr.msra.gmra.mxu1 %vm128_vm9, %v18305_v43  ;;  %5960 = vmatpush.bf16.msrb.mxu2 %v14434_v45  ;;  %v14879_v45 = vld [vmem:[#allocation2 + $0xb60] sm:$0xf0] }
0x159c   :  { %5986 = vmatpush.bf16.msra.mxu3 %v14442_v48  ;;  %5972 = vmatpush.bf16.msra.mxu1 %v14830_v47  ;;  %v4303_v48 = vperm.slane %v4252_v39, 2  ;;  %v4305_v47 = vperm.slane %v4252_v39, 6  ;;  %v14882_v57 = vor.u32 %v17278_v33, %v14879_v45  ;;  %v4306_v39 = vperm.slane %v4253_v17, 0  ;;  %v14493_v33 = vld [vmem:[#allocation2 + $0x6d0] sm:$0xf] }
0x159d   :  { %v17230_v45 = vld [vmem:[#allocation2 + $0x854] sm:$0xf0]  ;;  %v14903_v17 = vld [vmem:[#allocation2 + $0xb78] sm:$0xf0] }
0x159e   :  { %v4501_v5 = vperm.slane %v4305_v47, 0  ;;  %v14893_v47 = vld [vmem:[#allocation2 + $0x9e8] sm:$0xf]  ;;  %v14494_v56 = vor.u32 %v17230_v45, %v14493_v33 }
0x15a0   :  { %5973 = vmatpush.bf16.msra.mxu1 %v14438_v52  ;;  %v14874_v52 = vor.u32 %v17277_v18, %v14871_v41  ;;  %v14886_v18 = vor.u32 %v17328_v31, %v14885_v30  ;;  %v17181_v41 = vld [vmem:[#allocation2 + $0x6d4] sm:$0xf] }
0x15a1   :  { %v14498_v54 = vor.u32 %v17181_v41, %v14495_v42 }
0x15a5   :  { %15123 = vmatmul.msk.bf16.vlgmr.msra.gmra.mxu0 %vm128_vm9, %v18305_v43 }
0x15a6   :  { %15124 = vmatmul.msk.bf16.vlgmr.msra.gmra.mxu2 %vm128_vm9, %v18305_v43  ;;  %5998 = vmatpush.bf16.msra.mxu0 %v14838_v61  ;;  %v14487_v61 = vld [vmem:[#allocation2 + $0x850] sm:$0xf0] }
0x15a7   :  { %15126 = vmatmul.msk.bf16.vlgmr.msrb.gmra.mxu3 %vm128_vm9, %v18305_v43  ;;  %6011 = vmatpush.bf16.msra.mxu2 %v14842_v60  ;;  %v17180_v60 = vld [vmem:[#allocation2 + $0x6cc] sm:$0xf] }
0x15a8   :  { %6037 = vmatpush.bf16.msrb.mxu3 %v14850_v63  ;;  %v4499_v63 = vperm.slane %v4303_v48, 0  ;;  %v14503_v48 = vld [vmem:[#allocation2 + $0x860] sm:$0xf0] }
0x15aa   :  { %5999 = vmatpush.bf16.msra.mxu0 %v14446_v11  ;;  %v14878_v11 = vor.u32 %v17327_v49, %v14877_v62 }
0x15ab   :  { %15125 = vmatmul.msk.bf16.vlgmr.msrb.gmra.mxu1 %vm128_vm9, %v18305_v43  ;;  %6012 = vmatpush.bf16.msra.mxu2 %v14450_v10  ;;  %v14490_v10 = vor.u32 %v17180_v60, %v14487_v61  ;;  %v14894_v61 = vor.u32 %v17329_v50, %v14893_v47 }
0x15ac   :  { %6038 = vmatpush.bf16.msrb.mxu3 %v14458_v0  ;;  %6024 = vmatpush.bf16.msrb.mxu1 %v14846_v1 }
0x15b0   :  { %6025 = vmatpush.bf16.msrb.mxu1 %v14454_v15 }
0x15b5   :  { %15127 = vmatmul.msk.bf16.vlgmr.msrb.gmra.mxu0 %vm128_vm9, %v18305_v43 }
0x15b6   :  { %15128 = vmatmul.msk.bf16.vlgmr.msrb.gmra.mxu2 %vm128_vm9, %v18305_v43  ;;  %6050 = vmatpush.bf16.msrb.mxu0 %v14854_v22  ;;  %v14486_v22 = vor.u32 %v17229_v2, %v14485_v13 }
0x15b7   :  { %15130 = vmatmul.msk.bf16.vlgmr.msra.gmra.mxu3 %vm128_vm9, %v18305_v43  ;;  %6063 = vmatpush.bf16.msrb.mxu2 %v14858_v21 }
0x15b8   :  { %6089 = vmatpush.bf16.msra.mxu3 %v14866_v24 }
0x15ba   :  { %6051 = vmatpush.bf16.msrb.mxu0 %v14462_v14 }
0x15bb   :  { %15129 = vmatmul.msk.bf16.vlgmr.msra.gmra.mxu1 %vm128_vm9, %v18305_v43  ;;  %6064 = vmatpush.bf16.msrb.mxu2 %v14466_v32 }
0x15bc   :  { %6090 = vmatpush.bf16.msra.mxu3 %v14474_v35  ;;  %6076 = vmatpush.bf16.msra.mxu1 %v14862_v36  ;;  %v14895_v35 = vld [vmem:[#allocation2 + $0xb70] sm:$0xf0] }
0x15bd   :  { %v14898_v44 = vor.u32 %v17280_v34, %v14895_v35  ;;  %v14509_v35 = vld [vmem:[#allocation2 + $0x6e0] sm:$0xf] }
0x15c0   :  { %6077 = vmatpush.bf16.msra.mxu1 %v14470_v27  ;;  %v4504_v27 = vperm.slane %v4308_v26, 0 }
0x15c2   :  { %v5585_v46 = vpop.f32.mrf.mxu0 }
0x15c3   :  { %v5586_v19 = vadd.f32 %v5585_v46, %v4498_v7  ;;  %v17182_v46 = vld [vmem:[#allocation2 + $0x6dc] sm:$0xf] }
0x15c4   :  { %v14506_v60 = vor.u32 %v17182_v46, %v14503_v48 }
0x15c5   :  { %15131 = vmatmul.msk.bf16.vlgmr.msra.gmra.mxu0 %vm128_vm9, %v18305_v43 }
0x15c6   :  { %15132 = vmatmul.msk.bf16.vlgmr.msra.gmra.mxu2 %vm128_vm9, %v18305_v43  ;;  %6102 = vmatpush.bf16.msra.mxu0 %v14870_v53 }
0x15c7   :  { %15134 = vmatmul.msk.bf16.vlgmr.msrb.gmra.mxu3 %vm128_vm9, %v18305_v43  ;;  %6115 = vmatpush.bf16.msra.mxu2 %v14874_v52  ;;  %v4505_v52 = vperm.slane %v4309_v38, 0  ;;  %v14519_v38 = vld [vmem:[#allocation2 + $0x870] sm:$0xf0] }
0x15c8   :  { %v5611_v6 = vpop.f32.mrf.mxu1  ;;  %6141 = vmatpush.bf16.msrb.mxu3 %v14882_v57  ;;  %v4502_v57 = vperm.slane %v4306_v39, 0  ;;  %v14909_v39 = vld [vmem:[#allocation2 + $0x9f8] sm:$0xf] }
0x15c9   :  { %v5612_v9 = vadd.f32 %v5611_v6, %v4500_v51  ;;  %v5598_v0 = vpop.f32.mrf.mxu2  ;;  %v4503_v51 = vperm.slane %v4307_v37, 0  ;;  %v17184_v37 = vld [vmem:[#allocation2 + $0x6ec] sm:$0xf] }
0x15ca   :  { %v5624_v1 = vpop.f32.mrf.mxu3  ;;  %v5599_v15 = vadd.f32 %v5598_v0, %v4499_v63  ;;  %v5587_v4 = vpop.f32.mrf.mxu0  ;;  %6103 = vmatpush.bf16.msra.mxu0 %v14478_v55  ;;  %v14501_v63 = vld [vmem:[#allocation2 + $0x6d8] sm:$0xf]  ;;  %v14522_v46 = vor.u32 %v17184_v37, %v14519_v38 }
0x15cb   :  { %v6949_v8 = vrot.slane %v5612_v9, 4  ;;  %v5625_v16 = vadd.f32 %v5624_v1, %v4501_v5  ;;  %15133 = vmatmul.msk.bf16.vlgmr.msrb.gmra.mxu1 %vm128_vm9, %v18305_v43  ;;  %6116 = vmatpush.bf16.msra.mxu2 %v14482_v3  ;;  %v17231_v5 = vld [vmem:[#allocation2 + $0x85c] sm:$0xf0]  ;;  %v4254_v9 = vunpack.c.l.bf16 %v18690_v59  ;;  %v17281_v4 = vld [vmem:[#allocation2 + $0x9f4] sm:$0xf] }
0x15cc   :  { %v6948_v20 = vrot.slane %v5599_v15, 6  ;;  %6142 = vmatpush.bf16.msrb.mxu3 %v14490_v10  ;;  %6128 = vmatpush.bf16.msrb.mxu1 %v14878_v11  ;;  %v14502_v1 = vor.u32 %v17231_v5, %v14501_v63  ;;  %v14906_v30 = vor.u32 %v17281_v4, %v14903_v17 }
0x15cd   :  { %v6950_v21 = vrot.slane %v5625_v16, 2  ;;  %v4312_v16 = vperm.slane %v4254_v9, 4  ;;  %v4313_v26 = vperm.slane %v4254_v9, 6  ;;  %v4310_v28 = vperm.slane %v4254_v9, 0 }
0x15ce   :  { %v7021_v12 = vsel %vm3898_vm4, %v5586_v19, %v6948_v20  ;;  %v14901_v19 = vld [vmem:[#allocation2 + $0x9f0] sm:$0xf]  ;;  %v17330_v20 = vld [vmem:[#allocation2 + $0xb74] sm:$0xf0] }
0x15cf   :  { %v7022_v23 = vsel %vm3900_vm12, %v6949_v8, %v6950_v21  ;;  %v4508_v29 = vperm.slane %v4312_v16, 0  ;;  %v14902_v31 = vor.u32 %v17330_v20, %v14901_v19  ;;  %v4506_v33 = vperm.slane %v4310_v28, 0  ;;  %v17185_v20 = vld [vmem:[#allocation2 + $0x6f4] sm:$0xf]  ;;  %v17333_v28 = vld [vmem:[#allocation2 + $0xb8c] sm:$0xf0] }
0x15d0   :  { %v7023_v24 = vsel %vm3902_vm13, %v7021_v12, %v7022_v23  ;;  %v5613_v25 = vpop.f32.mrf.mxu1  ;;  %6129 = vmatpush.bf16.msrb.mxu1 %v14486_v22  ;;  %v17282_v12 = vld [vmem:[#allocation2 + $0x9fc] sm:$0xf]  ;;  %v14911_v23 = vld [vmem:[#allocation2 + $0xb80] sm:$0xf0] }
0x15d1   :  { %7119 = vst [vmem:[#allocation13 + $0xc4] sm:$0xff] %v7023_v24  ;;  %v5600_v32 = vpop.f32.mrf.mxu2  ;;  %v4311_v25 = vperm.slane %v4254_v9, 2  ;;  %v14914_v34 = vor.u32 %v17282_v12, %v14911_v23  ;;  %v14919_v9 = vld [vmem:[#allocation2 + $0xb88] sm:$0xf0]  ;;  %v14525_v12 = vld [vmem:[#allocation2 + $0x6f0] sm:$0xf] }
0x15d2   :  { %v5626_v14 = vpop.f32.mrf.mxu3  ;;  %v5637_v36 = vpop.f32.mrf.mxu0  ;;  %v17183_v32 = vld [vmem:[#allocation2 + $0x6e4] sm:$0xf]  ;;  %v17234_v23 = vld [vmem:[#allocation2 + $0x874] sm:$0xf0] }
0x15d3   :  { %v5638_v10 = vadd.f32 %v5637_v36, %v4502_v57  ;;  %v14511_v14 = vld [vmem:[#allocation2 + $0x868] sm:$0xf0]  ;;  %v17232_v36 = vld [vmem:[#allocation2 + $0x864] sm:$0xf0] }
0x15d4   :  { %v14514_v42 = vor.u32 %v17183_v32, %v14511_v14  ;;  %v14526_v14 = vor.u32 %v17234_v23, %v14525_v12 }
0x15d5   :  { %15135 = vmatmul.msk.bf16.vlgmr.msrb.gmra.mxu0 %vm128_vm9, %v18305_v43 }
0x15d6   :  { %15136 = vmatmul.msk.bf16.vlgmr.msrb.gmra.mxu2 %vm128_vm9, %v18305_v43  ;;  %6154 = vmatpush.bf16.msrb.mxu0 %v14886_v18  ;;  %v4509_v18 = vperm.slane %v4313_v26, 0  ;;  %v14925_v26 = vld [vmem:[#allocation2 + $0xa08] sm:$0xf] }
0x15d7   :  { %15138 = vmatmul.msk.bf16.vlgmr.msra.gmra.mxu3 %vm128_vm9, %v18305_v43  ;;  %6167 = vmatpush.bf16.msrb.mxu2 %v14890_v40  ;;  %v4507_v40 = vperm.slane %v4311_v25, 0  ;;  %v14535_v25 = vld [vmem:[#allocation2 + $0x880] sm:$0xf0]  ;;  %v14926_v38 = vor.u32 %v17333_v28, %v14925_v26 }
0x15d8   :  { %v5663_v53 = vpop.f32.mrf.mxu1  ;;  %6193 = vmatpush.bf16.msra.mxu3 %v14898_v44  ;;  %v14510_v44 = vor.u32 %v17232_v36, %v14509_v35  ;;  %v18716_v36 = vld [vmem:[#allocation12 + $0x72] sm:$0xff] }
0x15d9   :  { %v5664_v58 = vadd.f32 %v5663_v53, %v4504_v27  ;;  %v5650_v62 = vpop.f32.mrf.mxu2  ;;  %v17331_v27 = vld [vmem:[#allocation2 + $0xb7c] sm:$0xf0] }
0x15da   :  { %v5676_v49 = vpop.f32.mrf.mxu3  ;;  %v5651_v6 = vadd.f32 %v5650_v62, %v4503_v51  ;;  %v5639_v7 = vpop.f32.mrf.mxu0  ;;  %6155 = vmatpush.bf16.msrb.mxu0 %v14494_v56  ;;  %v14910_v48 = vor.u32 %v17331_v27, %v14909_v39  ;;  %v14517_v51 = vld [vmem:[#allocation2 + $0x6e8] sm:$0xf] }
0x15db   :  { %v6952_v3 = vrot.slane %v5664_v58, 4  ;;  %v5677_v55 = vadd.f32 %v5676_v49, %v4505_v52  ;;  %15137 = vmatmul.msk.bf16.vlgmr.msra.gmra.mxu1 %vm128_vm9, %v18305_v43  ;;  %6168 = vmatpush.bf16.msrb.mxu2 %v14498_v54  ;;  %v17233_v52 = vld [vmem:[#allocation2 + $0x86c] sm:$0xf0]  ;;  %v4255_v58 = vunpack.c.h.bf16 %v18690_v59  ;;  %v17283_v7 = vld [vmem:[#allocation2 + $0xa04] sm:$0xf] }
0x15dc   :  { %v6951_v11 = vrot.slane %v5651_v6, 6  ;;  %6194 = vmatpush.bf16.msra.mxu3 %v14506_v60  ;;  %6180 = vmatpush.bf16.msra.mxu1 %v14894_v61  ;;  %v14518_v49 = vor.u32 %v17233_v52, %v14517_v51  ;;  %v14917_v59 = vld [vmem:[#allocation2 + $0xa00] sm:$0xf]  ;;  %v14922_v17 = vor.u32 %v17283_v7, %v14919_v9 }
0x15dd   :  { %v6953_v0 = vrot.slane %v5677_v55, 2  ;;  %v4316_v55 = vperm.slane %v4255_v58, 4  ;;  %v4314_v16 = vperm.slane %v4255_v58, 0 }
0x15de   :  { %v7024_v13 = vsel %vm3898_vm4, %v5638_v10, %v6951_v11  ;;  %v17332_v10 = vld [vmem:[#allocation2 + $0xb84] sm:$0xf0] }
0x15df   :  { %v7025_v2 = vsel %vm3900_vm12, %v6952_v3, %v6953_v0  ;;  %v4512_v4 = vperm.slane %v4316_v55, 0  ;;  %v14918_v19 = vor.u32 %v17332_v10, %v14917_v59 }
0x15e0   :  { %v7026_v15 = vsel %vm3902_vm13, %v7024_v13, %v7025_v2  ;;  %v5665_v8 = vpop.f32.mrf.mxu1  ;;  %6181 = vmatpush.bf16.msra.mxu1 %v14502_v1  ;;  %v17284_v1 = vld [vmem:[#allocation2 + $0xa0c] sm:$0xf]  ;;  %v14927_v13 = vld [vmem:[#allocation2 + $0xb90] sm:$0xf0] }
0x15e1   :  { %7120 = vst [vmem:[#allocation13 + $0xcc] sm:$0xff] %v7026_v15  ;;  %v5652_v21 = vpop.f32.mrf.mxu2  ;;  %v4315_v15 = vperm.slane %v4255_v58, 2  ;;  %v4317_v8 = vperm.slane %v4255_v58, 6  ;;  %v14935_v58 = vld [vmem:[#allocation2 + $0xb98] sm:$0xf0] }
0x15e2   :  { %v5678_v22 = vpop.f32.mrf.mxu3  ;;  %v5689_v24 = vpop.f32.mrf.mxu0  ;;  %v14527_v21 = vld [vmem:[#allocation2 + $0x878] sm:$0xf0] }
0x15e3   :  { %v5690_v60 = vadd.f32 %v5689_v24, %v4506_v33  ;;  %v14930_v22 = vor.u32 %v17284_v1, %v14927_v13  ;;  %v17186_v24 = vld [vmem:[#allocation2 + $0x6fc] sm:$0xf]  ;;  %v14530_v32 = vor.u32 %v17185_v20, %v14527_v21  ;;  %v14541_v13 = vld [vmem:[#allocation2 + $0x700] sm:$0xf] }
0x15e4   :  { %v14538_v37 = vor.u32 %v17186_v24, %v14535_v25 }
0x15e5   :  { %15139 = vmatmul.msk.bf16.vlgmr.msra.gmra.mxu0 %vm128_vm9, %v18305_v43 }
0x15e6   :  { %15140 = vmatmul.msk.bf16.vlgmr.msra.gmra.mxu2 %vm128_vm9, %v18305_v43  ;;  %6206 = vmatpush.bf16.msra.mxu0 %v14902_v31 }
0x15e7   :  { %15142 = vmatmul.msk.bf16.vlgmr.msrb.gmra.mxu3 %vm128_vm9, %v18305_v43  ;;  %6219 = vmatpush.bf16.msra.mxu2 %v14906_v30  ;;  %v4513_v30 = vperm.slane %v4317_v8, 0  ;;  %v14551_v8 = vld [vmem:[#allocation2 + $0x890] sm:$0xf0] }
0x15e8   :  { %v5715_v41 = vpop.f32.mrf.mxu1  ;;  %6245 = vmatpush.bf16.msrb.mxu3 %v14914_v34  ;;  %v4510_v34 = vperm.slane %v4314_v16, 0  ;;  %v14941_v16 = vld [vmem:[#allocation2 + $0xa18] sm:$0xf] }
0x15e9   :  { %v5716_v45 = vadd.f32 %v5715_v41, %v4508_v29  ;;  %v5702_v47 = vpop.f32.mrf.mxu2  ;;  %v4511_v29 = vperm.slane %v4315_v15, 0  ;;  %v17188_v15 = vld [vmem:[#allocation2 + $0x70c] sm:$0xf] }
0x15ea   :  { %v5728_v50 = vpop.f32.mrf.mxu3  ;;  %v5703_v53 = vadd.f32 %v5702_v47, %v4507_v40  ;;  %v5691_v57 = vpop.f32.mrf.mxu0  ;;  %6207 = vmatpush.bf16.msra.mxu0 %v14510_v44  ;;  %v14533_v40 = vld [vmem:[#allocation2 + $0x6f8] sm:$0xf]  ;;  %v14554_v24 = vor.u32 %v17188_v15, %v14551_v8 }
0x15eb   :  { %v6955_v54 = vrot.slane %v5716_v45, 4  ;;  %v5729_v56 = vadd.f32 %v5728_v50, %v4509_v18  ;;  %15141 = vmatmul.msk.bf16.vlgmr.msrb.gmra.mxu1 %vm128_vm9, %v18305_v43  ;;  %6220 = vmatpush.bf16.msra.mxu2 %v14514_v42  ;;  %v17235_v18 = vld [vmem:[#allocation2 + $0x87c] sm:$0xf0]  ;;  %v4256_v45 = vunpack.c.l.bf16 %v18716_v36  ;;  %v17285_v57 = vld [vmem:[#allocation2 + $0xa14] sm:$0xf] }
0x15ec   :  { %v6954_v61 = vrot.slane %v5703_v53, 6  ;;  %6246 = vmatpush.bf16.msrb.mxu3 %v14522_v46  ;;  %6232 = vmatpush.bf16.msrb.mxu1 %v14910_v48  ;;  %v14534_v50 = vor.u32 %v17235_v18, %v14533_v40  ;;  %v14938_v59 = vor.u32 %v17285_v57, %v14935_v58 }
0x15ed   :  { %v6956_v62 = vrot.slane %v5729_v56, 2  ;;  %v4320_v56 = vperm.slane %v4256_v45, 4  ;;  %v4321_v55 = vperm.slane %v4256_v45, 6  ;;  %v4318_v7 = vperm.slane %v4256_v45, 0 }
0x15ee   :  { %v7027_v63 = vsel %vm3898_vm4, %v5690_v60, %v6954_v61  ;;  %v14933_v60 = vld [vmem:[#allocation2 + $0xa10] sm:$0xf]  ;;  %v17334_v61 = vld [vmem:[#allocation2 + $0xb94] sm:$0xf0] }
0x15ef   :  { %v7028_v5 = vsel %vm3900_vm12, %v6955_v54, %v6956_v62  ;;  %v4516_v9 = vperm.slane %v4320_v56, 0  ;;  %v14934_v10 = vor.u32 %v17334_v61, %v14933_v60  ;;  %v4514_v12 = vperm.slane %v4318_v7, 0  ;;  %v17189_v61 = vld [vmem:[#allocation2 + $0x714] sm:$0xf]  ;;  %v17337_v7 = vld [vmem:[#allocation2 + $0xbac] sm:$0xf0] }
0x15f0   :  { %v7029_v6 = vsel %vm3902_vm13, %v7027_v63, %v7028_v5  ;;  %v5717_v3 = vpop.f32.mrf.mxu1  ;;  %6233 = vmatpush.bf16.msrb.mxu1 %v14518_v49  ;;  %v17286_v63 = vld [vmem:[#allocation2 + $0xa1c] sm:$0xf]  ;;  %v14943_v5 = vld [vmem:[#allocation2 + $0xba0] sm:$0xf0] }
0x15f1   :  { %7121 = vst [vmem:[#allocation13 + $0xd4] sm:$0xff] %v7029_v6  ;;  %v5704_v11 = vpop.f32.mrf.mxu2  ;;  %v4319_v3 = vperm.slane %v4256_v45, 2  ;;  %v14946_v1 = vor.u32 %v17286_v63, %v14943_v5  ;;  %v14951_v45 = vld [vmem:[#allocation2 + $0xba8] sm:$0xf0]  ;;  %v14557_v63 = vld [vmem:[#allocation2 + $0x710] sm:$0xf] }
0x15f2   :  { %v5730_v0 = vpop.f32.mrf.mxu3  ;;  %v5741_v2 = vpop.f32.mrf.mxu0  ;;  %v17187_v11 = vld [vmem:[#allocation2 + $0x704] sm:$0xf]  ;;  %v17238_v5 = vld [vmem:[#allocation2 + $0x894] sm:$0xf0] }
0x15f3   :  { %v5742_v46 = vadd.f32 %v5741_v2, %v4510_v34  ;;  %v14543_v0 = vld [vmem:[#allocation2 + $0x888] sm:$0xf0]  ;;  %v17236_v2 = vld [vmem:[#allocation2 + $0x884] sm:$0xf0] }
0x15f4   :  { %v14546_v21 = vor.u32 %v17187_v11, %v14543_v0  ;;  %v14558_v0 = vor.u32 %v17238_v5, %v14557_v63 }
0x15f5   :  { %15143 = vmatmul.msk.bf16.vlgmr.msrb.gmra.mxu0 %vm128_vm9, %v18305_v43 }
0x15f6   :  { %15144 = vmatmul.msk.bf16.vlgmr.msrb.gmra.mxu2 %vm128_vm9, %v18305_v43  ;;  %6258 = vmatpush.bf16.msrb.mxu0 %v14918_v19  ;;  %v4517_v19 = vperm.slane %v4321_v55, 0  ;;  %v14957_v55 = vld [vmem:[#allocation2 + $0xa28] sm:$0xf] }
0x15f7   :  { %15146 = vmatmul.msk.bf16.vlgmr.msra.gmra.mxu3 %vm128_vm9, %v18305_v43  ;;  %6271 = vmatpush.bf16.msrb.mxu2 %v14922_v17  ;;  %v4515_v17 = vperm.slane %v4319_v3, 0  ;;  %v14567_v3 = vld [vmem:[#allocation2 + $0x8a0] sm:$0xf0]  ;;  %v14958_v8 = vor.u32 %v17337_v7, %v14957_v55 }
0x15f8   :  { %v5767_v31 = vpop.f32.mrf.mxu1  ;;  %6297 = vmatpush.bf16.msra.mxu3 %v14930_v22  ;;  %v14542_v22 = vor.u32 %v17236_v2, %v14541_v13  ;;  %v18742_v2 = vld [vmem:[#allocation12 + $0x7a] sm:$0xff] }
0x15f9   :  { %v5768_v35 = vadd.f32 %v5767_v31, %v4512_v4  ;;  %v5754_v39 = vpop.f32.mrf.mxu2  ;;  %v17335_v4 = vld [vmem:[#allocation2 + $0xb9c] sm:$0xf0] }
0x15fa   :  { %v5780_v27 = vpop.f32.mrf.mxu3  ;;  %v5755_v41 = vadd.f32 %v5754_v39, %v4511_v29  ;;  %v5743_v33 = vpop.f32.mrf.mxu0  ;;  %6259 = vmatpush.bf16.msrb.mxu0 %v14526_v14  ;;  %v14942_v25 = vor.u32 %v17335_v4, %v14941_v16  ;;  %v14549_v29 = vld [vmem:[#allocation2 + $0x708] sm:$0xf] }
0x15fb   :  { %v6958_v42 = vrot.slane %v5768_v35, 4  ;;  %v5781_v44 = vadd.f32 %v5780_v27, %v4513_v30  ;;  %15145 = vmatmul.msk.bf16.vlgmr.msra.gmra.mxu1 %vm128_vm9, %v18305_v43  ;;  %6272 = vmatpush.bf16.msrb.mxu2 %v14530_v32  ;;  %v17237_v30 = vld [vmem:[#allocation2 + $0x88c] sm:$0xf0]  ;;  %v4257_v35 = vunpack.c.h.bf16 %v18716_v36  ;;  %v17287_v33 = vld [vmem:[#allocation2 + $0xa24] sm:$0xf] }
0x15fc   :  { %v6957_v48 = vrot.slane %v5755_v41, 6  ;;  %6298 = vmatpush.bf16.msra.mxu3 %v14538_v37  ;;  %6284 = vmatpush.bf16.msra.mxu1 %v14926_v38  ;;  %v14550_v27 = vor.u32 %v17237_v30, %v14549_v29  ;;  %v14949_v36 = vld [vmem:[#allocation2 + $0xa20] sm:$0xf]  ;;  %v14954_v58 = vor.u32 %v17287_v33, %v14951_v45 }
0x15fd   :  { %v6959_v47 = vrot.slane %v5781_v44, 2  ;;  %v4324_v44 = vperm.slane %v4257_v35, 4  ;;  %v4322_v56 = vperm.slane %v4257_v35, 0 }
0x15fe   :  { %v7030_v51 = vsel %vm3898_vm4, %v5742_v46, %v6957_v48  ;;  %v17336_v46 = vld [vmem:[#allocation2 + $0xba4] sm:$0xf0] }
0x15ff   :  { %v7031_v52 = vsel %vm3900_vm12, %v6958_v42, %v6959_v47  ;;  %v4520_v57 = vperm.slane %v4324_v44, 0  ;;  %v14950_v60 = vor.u32 %v17336_v46, %v14949_v36 }
0x1600   :  { %v7032_v53 = vsel %vm3902_vm13, %v7030_v51, %v7031_v52  ;;  %v5769_v54 = vpop.f32.mrf.mxu1  ;;  %6285 = vmatpush.bf16.msra.mxu1 %v14534_v50  ;;  %v17288_v50 = vld [vmem:[#allocation2 + $0xa2c] sm:$0xf]  ;;  %v14959_v51 = vld [vmem:[#allocation2 + $0xbb0] sm:$0xf0] }
0x1601   :  { %7122 = vst [vmem:[#allocation13 + $0xdc] sm:$0xff] %v7032_v53  ;;  %v5756_v62 = vpop.f32.mrf.mxu2  ;;  %v4323_v53 = vperm.slane %v4257_v35, 2  ;;  %v4325_v54 = vperm.slane %v4257_v35, 6  ;;  %v14967_v35 = vld [vmem:[#allocation2 + $0xbb8] sm:$0xf0] }
0x1602   :  { %v5782_v49 = vpop.f32.mrf.mxu3  ;;  %v5793_v6 = vpop.f32.mrf.mxu0  ;;  %v14559_v62 = vld [vmem:[#allocation2 + $0x898] sm:$0xf0] }
0x1603   :  { %v5794_v37 = vadd.f32 %v5793_v6, %v4514_v12  ;;  %v14962_v49 = vor.u32 %v17288_v50, %v14959_v51  ;;  %v17190_v6 = vld [vmem:[#allocation2 + $0x71c] sm:$0xf]  ;;  %v14562_v11 = vor.u32 %v17189_v61, %v14559_v62  ;;  %v14573_v51 = vld [vmem:[#allocation2 + $0x720] sm:$0xf] }
0x1604   :  { %v14570_v15 = vor.u32 %v17190_v6, %v14567_v3 }
0x1605   :  { %15147 = vmatmul.msk.bf16.vlgmr.msra.gmra.mxu0 %vm128_vm9, %v18305_v43 }
0x1606   :  { %15148 = vmatmul.msk.bf16.vlgmr.msra.gmra.mxu2 %vm128_vm9, %v18305_v43  ;;  %6310 = vmatpush.bf16.msra.mxu0 %v14934_v10 }
0x1607   :  { %15150 = vmatmul.msk.bf16.vlgmr.msrb.gmra.mxu3 %vm128_vm9, %v18305_v43  ;;  %6323 = vmatpush.bf16.msra.mxu2 %v14938_v59  ;;  %v4521_v59 = vperm.slane %v4325_v54, 0  ;;  %v14583_v54 = vld [vmem:[#allocation2 + $0x8b0] sm:$0xf0] }
0x1608   :  { %v5819_v20 = vpop.f32.mrf.mxu1  ;;  %6349 = vmatpush.bf16.msrb.mxu3 %v14946_v1  ;;  %v4518_v1 = vperm.slane %v4322_v56, 0  ;;  %v14973_v56 = vld [vmem:[#allocation2 + $0xa38] sm:$0xf] }
0x1609   :  { %v5820_v23 = vadd.f32 %v5819_v20, %v4516_v9  ;;  %v5806_v26 = vpop.f32.mrf.mxu2  ;;  %v4519_v9 = vperm.slane %v4323_v53, 0  ;;  %v17192_v53 = vld [vmem:[#allocation2 + $0x72c] sm:$0xf] }
0x160a   :  { %v5832_v28 = vpop.f32.mrf.mxu3  ;;  %v5807_v31 = vadd.f32 %v5806_v26, %v4515_v17  ;;  %v5795_v34 = vpop.f32.mrf.mxu0  ;;  %6311 = vmatpush.bf16.msra.mxu0 %v14542_v22  ;;  %v14565_v17 = vld [vmem:[#allocation2 + $0x718] sm:$0xf]  ;;  %v14586_v6 = vor.u32 %v17192_v53, %v14583_v54 }
0x160b   :  { %v6961_v32 = vrot.slane %v5820_v23, 4  ;;  %v5833_v14 = vadd.f32 %v5832_v28, %v4517_v19  ;;  %15149 = vmatmul.msk.bf16.vlgmr.msrb.gmra.mxu1 %vm128_vm9, %v18305_v43  ;;  %6324 = vmatpush.bf16.msra.mxu2 %v14546_v21  ;;  %v17239_v19 = vld [vmem:[#allocation2 + $0x89c] sm:$0xf0]  ;;  %v4258_v23 = vunpack.c.l.bf16 %v18742_v2  ;;  %v17289_v34 = vld [vmem:[#allocation2 + $0xa34] sm:$0xf] }
0x160c   :  { %v6960_v38 = vrot.slane %v5807_v31, 6  ;;  %6350 = vmatpush.bf16.msrb.mxu3 %v14554_v24  ;;  %6336 = vmatpush.bf16.msrb.mxu1 %v14942_v25  ;;  %v14566_v28 = vor.u32 %v17239_v19, %v14565_v17  ;;  %v14970_v36 = vor.u32 %v17289_v34, %v14967_v35 }
0x160d   :  { %v6962_v39 = vrot.slane %v5833_v14, 2  ;;  %v4328_v14 = vperm.slane %v4258_v23, 4  ;;  %v4329_v44 = vperm.slane %v4258_v23, 6  ;;  %v4326_v33 = vperm.slane %v4258_v23, 0 }
0x160e   :  { %v7033_v40 = vsel %vm3898_vm4, %v5794_v37, %v6960_v38  ;;  %v14965_v37 = vld [vmem:[#allocation2 + $0xa30] sm:$0xf]  ;;  %v17338_v38 = vld [vmem:[#allocation2 + $0xbb4] sm:$0xf0] }
0x160f   :  { %v7034_v18 = vsel %vm3900_vm12, %v6961_v32, %v6962_v39  ;;  %v4524_v45 = vperm.slane %v4328_v14, 0  ;;  %v14966_v46 = vor.u32 %v17338_v38, %v14965_v37  ;;  %v4522_v63 = vperm.slane %v4326_v33, 0  ;;  %v17193_v38 = vld [vmem:[#allocation2 + $0x734] sm:$0xf]  ;;  %v17341_v33 = vld [vmem:[#allocation2 + $0xbcc] sm:$0xf0] }
0x1610   :  { %v7035_v41 = vsel %vm3902_vm13, %v7033_v40, %v7034_v18  ;;  %v5821_v42 = vpop.f32.mrf.mxu1  ;;  %6337 = vmatpush.bf16.msrb.mxu1 %v14550_v27  ;;  %v17290_v40 = vld [vmem:[#allocation2 + $0xa3c] sm:$0xf]  ;;  %v14975_v18 = vld [vmem:[#allocation2 + $0xbc0] sm:$0xf0] }
0x1611   :  { %7123 = vst [vmem:[#allocation13 + $0xe4] sm:$0xff] %v7035_v41  ;;  %v5808_v48 = vpop.f32.mrf.mxu2  ;;  %v4327_v42 = vperm.slane %v4258_v23, 2  ;;  %v14978_v50 = vor.u32 %v17290_v40, %v14975_v18  ;;  %v14983_v23 = vld [vmem:[#allocation2 + $0xbc8] sm:$0xf0]  ;;  %v14589_v40 = vld [vmem:[#allocation2 + $0x730] sm:$0xf] }
0x1612   :  { %v5834_v47 = vpop.f32.mrf.mxu3  ;;  %v5845_v52 = vpop.f32.mrf.mxu0  ;;  %v17191_v48 = vld [vmem:[#allocation2 + $0x724] sm:$0xf]  ;;  %v17242_v18 = vld [vmem:[#allocation2 + $0x8b4] sm:$0xf0] }
0x1613   :  { %v5846_v24 = vadd.f32 %v5845_v52, %v4518_v1  ;;  %v14575_v47 = vld [vmem:[#allocation2 + $0x8a8] sm:$0xf0]  ;;  %v17240_v52 = vld [vmem:[#allocation2 + $0x8a4] sm:$0xf0] }
0x1614   :  { %v14578_v62 = vor.u32 %v17191_v48, %v14575_v47  ;;  %v14590_v47 = vor.u32 %v17242_v18, %v14589_v40 }
0x1615   :  { %15151 = vmatmul.msk.bf16.vlgmr.msrb.gmra.mxu0 %vm128_vm9, %v18305_v43 }
0x1616   :  { %15152 = vmatmul.msk.bf16.vlgmr.msrb.gmra.mxu2 %vm128_vm9, %v18305_v43  ;;  %6362 = vmatpush.bf16.msrb.mxu0 %v14950_v60  ;;  %v4525_v60 = vperm.slane %v4329_v44, 0  ;;  %v14989_v44 = vld [vmem:[#allocation2 + $0xa48] sm:$0xf] }
0x1617   :  { %15154 = vmatmul.msk.bf16.vlgmr.msra.gmra.mxu3 %vm128_vm9, %v18305_v43  ;;  %6375 = vmatpush.bf16.msrb.mxu2 %v14954_v58  ;;  %v4523_v58 = vperm.slane %v4327_v42, 0  ;;  %v14599_v42 = vld [vmem:[#allocation2 + $0x8c0] sm:$0xf0]  ;;  %v14990_v54 = vor.u32 %v17341_v33, %v14989_v44 }
0x1618   :  { %v5871_v10 = vpop.f32.mrf.mxu1  ;;  %6401 = vmatpush.bf16.msra.mxu3 %v14962_v49  ;;  %v14574_v49 = vor.u32 %v17240_v52, %v14573_v51  ;;  %v18768_v52 = vld [vmem:[#allocation12 + $0x82] sm:$0xff] }
0x1619   :  { %v5872_v13 = vadd.f32 %v5871_v10, %v4520_v57  ;;  %v5858_v16 = vpop.f32.mrf.mxu2  ;;  %v17339_v57 = vld [vmem:[#allocation2 + $0xbbc] sm:$0xf0] }
0x161a   :  { %v5884_v4 = vpop.f32.mrf.mxu3  ;;  %v5859_v20 = vadd.f32 %v5858_v16, %v4519_v9  ;;  %v5847_v12 = vpop.f32.mrf.mxu0  ;;  %6363 = vmatpush.bf16.msrb.mxu0 %v14558_v0  ;;  %v14974_v3 = vor.u32 %v17339_v57, %v14973_v56  ;;  %v14581_v9 = vld [vmem:[#allocation2 + $0x728] sm:$0xf] }
0x161b   :  { %v6964_v21 = vrot.slane %v5872_v13, 4  ;;  %v5885_v22 = vadd.f32 %v5884_v4, %v4521_v59  ;;  %15153 = vmatmul.msk.bf16.vlgmr.msra.gmra.mxu1 %vm128_vm9, %v18305_v43  ;;  %6376 = vmatpush.bf16.msrb.mxu2 %v14562_v11  ;;  %v17241_v59 = vld [vmem:[#allocation2 + $0x8ac] sm:$0xf0]  ;;  %v4259_v13 = vunpack.c.h.bf16 %v18742_v2  ;;  %v17291_v12 = vld [vmem:[#allocation2 + $0xa44] sm:$0xf] }
0x161c   :  { %v6963_v25 = vrot.slane %v5859_v20, 6  ;;  %6402 = vmatpush.bf16.msra.mxu3 %v14570_v15  ;;  %6388 = vmatpush.bf16.msra.mxu1 %v14958_v8  ;;  %v14582_v4 = vor.u32 %v17241_v59, %v14581_v9  ;;  %v14981_v2 = vld [vmem:[#allocation2 + $0xa40] sm:$0xf]  ;;  %v14986_v35 = vor.u32 %v17291_v12, %v14983_v23 }
0x161d   :  { %v6965_v26 = vrot.slane %v5885_v22, 2  ;;  %v4332_v22 = vperm.slane %v4259_v13, 4  ;;  %v4330_v14 = vperm.slane %v4259_v13, 0 }
0x161e   :  { %v7036_v29 = vsel %vm3898_vm4, %v5846_v24, %v6963_v25  ;;  %v17340_v24 = vld [vmem:[#allocation2 + $0xbc4] sm:$0xf0] }
0x161f   :  { %v7037_v30 = vsel %vm3900_vm12, %v6964_v21, %v6965_v26  ;;  %v4528_v34 = vperm.slane %v4332_v22, 0  ;;  %v14982_v37 = vor.u32 %v17340_v24, %v14981_v2 }
0x1620   :  { %v7038_v31 = vsel %vm3902_vm13, %v7036_v29, %v7037_v30  ;;  %v5873_v32 = vpop.f32.mrf.mxu1  ;;  %6389 = vmatpush.bf16.msra.mxu1 %v14566_v28  ;;  %v17292_v28 = vld [vmem:[#allocation2 + $0xa4c] sm:$0xf]  ;;  %v14991_v29 = vld [vmem:[#allocation2 + $0xbd0] sm:$0xf0] }
0x1621   :  { %7124 = vst [vmem:[#allocation13 + $0xec] sm:$0xff] %v7038_v31  ;;  %v5860_v39 = vpop.f32.mrf.mxu2  ;;  %v4331_v31 = vperm.slane %v4259_v13, 2  ;;  %v4333_v32 = vperm.slane %v4259_v13, 6  ;;  %v14999_v13 = vld [vmem:[#allocation2 + $0xbd8] sm:$0xf0] }
0x1622   :  { %v5886_v27 = vpop.f32.mrf.mxu3  ;;  %v5897_v41 = vpop.f32.mrf.mxu0  ;;  %v14591_v39 = vld [vmem:[#allocation2 + $0x8b8] sm:$0xf0] }
0x1623   :  { %v5898_v15 = vadd.f32 %v5897_v41, %v4522_v63  ;;  %v14994_v27 = vor.u32 %v17292_v28, %v14991_v29  ;;  %v17194_v41 = vld [vmem:[#allocation2 + $0x73c] sm:$0xf]  ;;  %v14594_v48 = vor.u32 %v17193_v38, %v14591_v39  ;;  %v14605_v29 = vld [vmem:[#allocation2 + $0x740] sm:$0xf] }
0x1624   :  { %v14602_v53 = vor.u32 %v17194_v41, %v14599_v42 }
0x1625   :  { %15155 = vmatmul.msk.bf16.vlgmr.msra.gmra.mxu0 %vm128_vm9, %v18305_v43 }
0x1626   :  { %15156 = vmatmul.msk.bf16.vlgmr.msra.gmra.mxu2 %vm128_vm9, %v18305_v43  ;;  %6414 = vmatpush.bf16.msra.mxu0 %v14966_v46 }
0x1627   :  { %15158 = vmatmul.msk.bf16.vlgmr.msrb.gmra.mxu3 %vm128_vm9, %v18305_v43  ;;  %6427 = vmatpush.bf16.msra.mxu2 %v14970_v36  ;;  %v4529_v36 = vperm.slane %v4333_v32, 0  ;;  %v14615_v32 = vld [vmem:[#allocation2 + $0x8d0] sm:$0xf0] }
0x1628   :  { %v5923_v61 = vpop.f32.mrf.mxu1  ;;  %6453 = vmatpush.bf16.msrb.mxu3 %v14978_v50  ;;  %v4526_v50 = vperm.slane %v4330_v14, 0  ;;  %v15005_v14 = vld [vmem:[#allocation2 + $0xa58] sm:$0xf] }
0x1629   :  { %v5924_v5 = vadd.f32 %v5923_v61, %v4524_v45  ;;  %v5910_v55 = vpop.f32.mrf.mxu2  ;;  %v4527_v45 = vperm.slane %v4331_v31, 0  ;;  %v17196_v31 = vld [vmem:[#allocation2 + $0x74c] sm:$0xf] }
0x162a   :  { %v5936_v7 = vpop.f32.mrf.mxu3  ;;  %v5911_v10 = vadd.f32 %v5910_v55, %v4523_v58  ;;  %v5899_v1 = vpop.f32.mrf.mxu0  ;;  %6415 = vmatpush.bf16.msra.mxu0 %v14574_v49  ;;  %v14597_v58 = vld [vmem:[#allocation2 + $0x738] sm:$0xf]  ;;  %v14618_v41 = vor.u32 %v17196_v31, %v14615_v32 }
0x162b   :  { %v6967_v11 = vrot.slane %v5924_v5, 4  ;;  %v5937_v0 = vadd.f32 %v5936_v7, %v4525_v60  ;;  %15157 = vmatmul.msk.bf16.vlgmr.msrb.gmra.mxu1 %vm128_vm9, %v18305_v43  ;;  %6428 = vmatpush.bf16.msra.mxu2 %v14578_v62  ;;  %v17243_v60 = vld [vmem:[#allocation2 + $0x8bc] sm:$0xf0]  ;;  %v4260_v5 = vunpack.c.l.bf16 %v18768_v52  ;;  %v17293_v1 = vld [vmem:[#allocation2 + $0xa54] sm:$0xf] }
0x162c   :  { %v6966_v8 = vrot.slane %v5911_v10, 6  ;;  %6454 = vmatpush.bf16.msrb.mxu3 %v14586_v6  ;;  %6440 = vmatpush.bf16.msrb.mxu1 %v14974_v3  ;;  %v14598_v7 = vor.u32 %v17243_v60, %v14597_v58  ;;  %v15002_v2 = vor.u32 %v17293_v1, %v14999_v13 }
0x162d   :  { %v6968_v16 = vrot.slane %v5937_v0, 2  ;;  %v4336_v0 = vperm.slane %v4260_v5, 4  ;;  %v4337_v22 = vperm.slane %v4260_v5, 6  ;;  %v4334_v12 = vperm.slane %v4260_v5, 0 }
0x162e   :  { %v7039_v17 = vsel %vm3898_vm4, %v5898_v15, %v6966_v8  ;;  %v14997_v15 = vld [vmem:[#allocation2 + $0xa50] sm:$0xf]  ;;  %v17342_v8 = vld [vmem:[#allocation2 + $0xbd4] sm:$0xf0] }
0x162f   :  { %v7040_v19 = vsel %vm3900_vm12, %v6967_v11, %v6968_v16  ;;  %v4532_v23 = vperm.slane %v4336_v0, 0  ;;  %v14998_v24 = vor.u32 %v17342_v8, %v14997_v15  ;;  %v4530_v40 = vperm.slane %v4334_v12, 0  ;;  %v17197_v8 = vld [vmem:[#allocation2 + $0x754] sm:$0xf]  ;;  %v17345_v12 = vld [vmem:[#allocation2 + $0xbec] sm:$0xf0] }
0x1630   :  { %v7041_v20 = vsel %vm3902_vm13, %v7039_v17, %v7040_v19  ;;  %v5925_v21 = vpop.f32.mrf.mxu1  ;;  %6441 = vmatpush.bf16.msrb.mxu1 %v14582_v4  ;;  %v17294_v17 = vld [vmem:[#allocation2 + $0xa5c] sm:$0xf]  ;;  %v15007_v19 = vld [vmem:[#allocation2 + $0xbe0] sm:$0xf0] }
0x1631   :  { %7125 = vst [vmem:[#allocation13 + $0xf4] sm:$0xff] %v7041_v20  ;;  %v5912_v25 = vpop.f32.mrf.mxu2  ;;  %v4335_v21 = vperm.slane %v4260_v5, 2  ;;  %v15010_v28 = vor.u32 %v17294_v17, %v15007_v19  ;;  %v15015_v5 = vld [vmem:[#allocation2 + $0xbe8] sm:$0xf0]  ;;  %v14621_v17 = vld [vmem:[#allocation2 + $0x750] sm:$0xf] }
0x1632   :  { %v5938_v26 = vpop.f32.mrf.mxu3  ;;  %v5949_v30 = vpop.f32.mrf.mxu0  ;;  %v17195_v25 = vld [vmem:[#allocation2 + $0x744] sm:$0xf]  ;;  %v17246_v19 = vld [vmem:[#allocation2 + $0x8d4] sm:$0xf0] }
0x1633   :  { %v5950_v6 = vadd.f32 %v5949_v30, %v4526_v50  ;;  %v14607_v26 = vld [vmem:[#allocation2 + $0x8c8] sm:$0xf0]  ;;  %v17244_v30 = vld [vmem:[#allocation2 + $0x8c4] sm:$0xf0] }
0x1634   :  { %v14610_v39 = vor.u32 %v17195_v25, %v14607_v26  ;;  %v14622_v26 = vor.u32 %v17246_v19, %v14621_v17 }
0x1635   :  { %15159 = vmatmul.msk.bf16.vlgmr.msrb.gmra.mxu0 %vm128_vm9, %v18305_v43 }
0x1636   :  { %15160 = vmatmul.msk.bf16.vlgmr.msrb.gmra.mxu2 %vm128_vm9, %v18305_v43  ;;  %6466 = vmatpush.bf16.msrb.mxu0 %v14982_v37  ;;  %v4533_v37 = vperm.slane %v4337_v22, 0  ;;  %v15021_v22 = vld [vmem:[#allocation2 + $0xa68] sm:$0xf] }
0x1637   :  { %15162 = vmatmul.msk.bf16.vlgmr.msra.gmra.mxu3 %vm128_vm9, %v18305_v43  ;;  %6479 = vmatpush.bf16.msrb.mxu2 %v14986_v35  ;;  %v4531_v35 = vperm.slane %v4335_v21, 0  ;;  %v14631_v21 = vld [vmem:[#allocation2 + $0x8e0] sm:$0xf0]  ;;  %v15022_v32 = vor.u32 %v17345_v12, %v15021_v22 }
0x1638   :  { %v5975_v46 = vpop.f32.mrf.mxu1  ;;  %6505 = vmatpush.bf16.msra.mxu3 %v14994_v27  ;;  %v14606_v27 = vor.u32 %v17244_v30, %v14605_v29  ;;  %v18794_v30 = vld [vmem:[#allocation12 + $0x8a] sm:$0xff] }
0x1639   :  { %v5976_v51 = vadd.f32 %v5975_v46, %v4528_v34  ;;  %v5962_v56 = vpop.f32.mrf.mxu2  ;;  %v17343_v34 = vld [vmem:[#allocation2 + $0xbdc] sm:$0xf0] }
0x163a   :  { %v5988_v57 = vpop.f32.mrf.mxu3  ;;  %v5963_v61 = vadd.f32 %v5962_v56, %v4527_v45  ;;  %v5951_v63 = vpop.f32.mrf.mxu0  ;;  %6467 = vmatpush.bf16.msrb.mxu0 %v14590_v47  ;;  %v15006_v42 = vor.u32 %v17343_v34, %v15005_v14  ;;  %v14613_v45 = vld [vmem:[#allocation2 + $0x748] sm:$0xf] }
0x163b   :  { %v6970_v62 = vrot.slane %v5976_v51, 4  ;;  %v5989_v49 = vadd.f32 %v5988_v57, %v4529_v36  ;;  %15161 = vmatmul.msk.bf16.vlgmr.msra.gmra.mxu1 %vm128_vm9, %v18305_v43  ;;  %6480 = vmatpush.bf16.msrb.mxu2 %v14594_v48  ;;  %v17245_v36 = vld [vmem:[#allocation2 + $0x8cc] sm:$0xf0]  ;;  %v4261_v51 = vunpack.c.h.bf16 %v18768_v52  ;;  %v17295_v63 = vld [vmem:[#allocation2 + $0xa64] sm:$0xf] }
0x163c   :  { %v6969_v3 = vrot.slane %v5963_v61, 6  ;;  %6506 = vmatpush.bf16.msra.mxu3 %v14602_v53  ;;  %6492 = vmatpush.bf16.msra.mxu1 %v14990_v54  ;;  %v14614_v57 = vor.u32 %v17245_v36, %v14613_v45  ;;  %v15013_v52 = vld [vmem:[#allocation2 + $0xa60] sm:$0xf]  ;;  %v15018_v13 = vor.u32 %v17295_v63, %v15015_v5 }
0x163d   :  { %v6971_v55 = vrot.slane %v5989_v49, 2  ;;  %v4340_v49 = vperm.slane %v4261_v51, 4  ;;  %v4338_v0 = vperm.slane %v4261_v51, 0 }
0x163e   :  { %v7042_v9 = vsel %vm3898_vm4, %v5950_v6, %v6969_v3  ;;  %v17344_v6 = vld [vmem:[#allocation2 + $0xbe4] sm:$0xf0] }
0x163f   :  { %v7043_v59 = vsel %vm3900_vm12, %v6970_v62, %v6971_v55  ;;  %v4536_v1 = vperm.slane %v4340_v49, 0  ;;  %v15014_v15 = vor.u32 %v17344_v6, %v15013_v52 }
0x1640   :  { %v7044_v10 = vsel %vm3902_vm13, %v7042_v9, %v7043_v59  ;;  %v5977_v11 = vpop.f32.mrf.mxu1  ;;  %6493 = vmatpush.bf16.msra.mxu1 %v14598_v7  ;;  %v17296_v7 = vld [vmem:[#allocation2 + $0xa6c] sm:$0xf]  ;;  %v15023_v9 = vld [vmem:[#allocation2 + $0xbf0] sm:$0xf0] }
0x1641   :  { %7126 = vst [vmem:[#allocation13 + $0xfc] sm:$0xff] %v7044_v10  ;;  %v5964_v16 = vpop.f32.mrf.mxu2  ;;  %v4339_v10 = vperm.slane %v4261_v51, 2  ;;  %v4341_v11 = vperm.slane %v4261_v51, 6  ;;  %v15031_v51 = vld [vmem:[#allocation2 + $0xbf8] sm:$0xf0] }
0x1642   :  { %v5990_v4 = vpop.f32.mrf.mxu3  ;;  %v6001_v20 = vpop.f32.mrf.mxu0  ;;  %v14623_v16 = vld [vmem:[#allocation2 + $0x8d8] sm:$0xf0] }
0x1643   :  { %v6002_v53 = vadd.f32 %v6001_v20, %v4530_v40  ;;  %v15026_v4 = vor.u32 %v17296_v7, %v15023_v9  ;;  %v17198_v20 = vld [vmem:[#allocation2 + $0x75c] sm:$0xf]  ;;  %v14626_v25 = vor.u32 %v17197_v8, %v14623_v16  ;;  %v14637_v9 = vld [vmem:[#allocation2 + $0x760] sm:$0xf] }
0x1644   :  { %v14634_v31 = vor.u32 %v17198_v20, %v14631_v21 }
0x1645   :  { %15163 = vmatmul.msk.bf16.vlgmr.msra.gmra.mxu0 %vm128_vm9, %v18305_v43 }
0x1646   :  { %15164 = vmatmul.msk.bf16.vlgmr.msra.gmra.mxu2 %vm128_vm9, %v18305_v43  ;;  %6518 = vmatpush.bf16.msra.mxu0 %v14998_v24 }
0x1647   :  { %15166 = vmatmul.msk.bf16.vlgmr.msrb.gmra.mxu3 %vm128_vm9, %v18305_v43  ;;  %6531 = vmatpush.bf16.msra.mxu2 %v15002_v2  ;;  %v4537_v2 = vperm.slane %v4341_v11, 0  ;;  %v14647_v11 = vld [vmem:[#allocation2 + $0x8f0] sm:$0xf0] }
0x1648   :  { %v6027_v38 = vpop.f32.mrf.mxu1  ;;  %6557 = vmatpush.bf16.msrb.mxu3 %v15010_v28  ;;  %v4534_v28 = vperm.slane %v4338_v0, 0  ;;  %v15037_v0 = vld [vmem:[#allocation2 + $0xa78] sm:$0xf] }
0x1649   :  { %v6028_v18 = vadd.f32 %v6027_v38, %v4532_v23  ;;  %v6014_v44 = vpop.f32.mrf.mxu2  ;;  %v4535_v23 = vperm.slane %v4339_v10, 0  ;;  %v17200_v10 = vld [vmem:[#allocation2 + $0x76c] sm:$0xf] }
0x164a   :  { %v6040_v33 = vpop.f32.mrf.mxu3  ;;  %v6015_v46 = vadd.f32 %v6014_v44, %v4531_v35  ;;  %v6003_v50 = vpop.f32.mrf.mxu0  ;;  %6519 = vmatpush.bf16.msra.mxu0 %v14606_v27  ;;  %v14629_v35 = vld [vmem:[#allocation2 + $0x758] sm:$0xf]  ;;  %v14650_v20 = vor.u32 %v17200_v10, %v14647_v11 }
0x164b   :  { %v6973_v48 = vrot.slane %v6028_v18, 4  ;;  %v6041_v47 = vadd.f32 %v6040_v33, %v4533_v37  ;;  %15165 = vmatmul.msk.bf16.vlgmr.msrb.gmra.mxu1 %vm128_vm9, %v18305_v43  ;;  %6532 = vmatpush.bf16.msra.mxu2 %v14610_v39  ;;  %v17247_v37 = vld [vmem:[#allocation2 + $0x8dc] sm:$0xf0]  ;;  %v4262_v18 = vunpack.c.l.bf16 %v18794_v30  ;;  %v17297_v50 = vld [vmem:[#allocation2 + $0xa74] sm:$0xf] }
0x164c   :  { %v6972_v54 = vrot.slane %v6015_v46, 6  ;;  %6558 = vmatpush.bf16.msrb.mxu3 %v14618_v41  ;;  %6544 = vmatpush.bf16.msrb.mxu1 %v15006_v42  ;;  %v14630_v33 = vor.u32 %v17247_v37, %v14629_v35  ;;  %v15034_v52 = vor.u32 %v17297_v50, %v15031_v51 }
0x164d   :  { %v6974_v56 = vrot.slane %v6041_v47, 2  ;;  %v4344_v47 = vperm.slane %v4262_v18, 4  ;;  %v4345_v49 = vperm.slane %v4262_v18, 6  ;;  %v4342_v63 = vperm.slane %v4262_v18, 0 }
0x164e   :  { %v7045_v58 = vsel %vm3898_vm4, %v6002_v53, %v6972_v54  ;;  %v15029_v53 = vld [vmem:[#allocation2 + $0xa70] sm:$0xf]  ;;  %v17346_v54 = vld [vmem:[#allocation2 + $0xbf4] sm:$0xf0] }
0x164f   :  { %v7046_v60 = vsel %vm3900_vm12, %v6973_v48, %v6974_v56  ;;  %v4540_v5 = vperm.slane %v4344_v47, 0  ;;  %v15030_v6 = vor.u32 %v17346_v54, %v15029_v53  ;;  %v4538_v17 = vperm.slane %v4342_v63, 0  ;;  %v17201_v54 = vld [vmem:[#allocation2 + $0x774] sm:$0xf]  ;;  %v17349_v63 = vld [vmem:[#allocation2 + $0xc0c] sm:$0xf0] }
0x1650   :  { %v7047_v61 = vsel %vm3902_vm13, %v7045_v58, %v7046_v60  ;;  %v6029_v62 = vpop.f32.mrf.mxu1  ;;  %6545 = vmatpush.bf16.msrb.mxu1 %v14614_v57  ;;  %v17298_v58 = vld [vmem:[#allocation2 + $0xa7c] sm:$0xf]  ;;  %v15039_v60 = vld [vmem:[#allocation2 + $0xc00] sm:$0xf0] }
0x1651   :  { %7127 = vst [vmem:[#allocation13 + $0x104] sm:$0xff] %v7047_v61  ;;  %v6016_v3 = vpop.f32.mrf.mxu2  ;;  %v4343_v62 = vperm.slane %v4262_v18, 2  ;;  %v15042_v7 = vor.u32 %v17298_v58, %v15039_v60  ;;  %v15047_v18 = vld [vmem:[#allocation2 + $0xc08] sm:$0xf0]  ;;  %v14653_v58 = vld [vmem:[#allocation2 + $0x770] sm:$0xf] }
0x1652   :  { %v6042_v55 = vpop.f32.mrf.mxu3  ;;  %v6053_v59 = vpop.f32.mrf.mxu0  ;;  %v17199_v3 = vld [vmem:[#allocation2 + $0x764] sm:$0xf]  ;;  %v17250_v60 = vld [vmem:[#allocation2 + $0x8f4] sm:$0xf0] }
0x1653   :  { %v6054_v41 = vadd.f32 %v6053_v59, %v4534_v28  ;;  %v14639_v55 = vld [vmem:[#allocation2 + $0x8e8] sm:$0xf0]  ;;  %v17248_v59 = vld [vmem:[#allocation2 + $0x8e4] sm:$0xf0] }
0x1654   :  { %v14642_v16 = vor.u32 %v17199_v3, %v14639_v55  ;;  %v14654_v55 = vor.u32 %v17250_v60, %v14653_v58 }
0x1655   :  { %15167 = vmatmul.msk.bf16.vlgmr.msrb.gmra.mxu0 %vm128_vm9, %v18305_v43 }
0x1656   :  { %15168 = vmatmul.msk.bf16.vlgmr.msrb.gmra.mxu2 %vm128_vm9, %v18305_v43  ;;  %6570 = vmatpush.bf16.msrb.mxu0 %v15014_v15  ;;  %v4541_v15 = vperm.slane %v4345_v49, 0  ;;  %v15053_v49 = vld [vmem:[#allocation2 + $0xa88] sm:$0xf] }
0x1657   :  { %15170 = vmatmul.msk.bf16.vlgmr.msra.gmra.mxu3 %vm128_vm9, %v18305_v43  ;;  %6583 = vmatpush.bf16.msrb.mxu2 %v15018_v13  ;;  %v4539_v13 = vperm.slane %v4343_v62, 0  ;;  %v14663_v62 = vld [vmem:[#allocation2 + $0x900] sm:$0xf0]  ;;  %v15054_v11 = vor.u32 %v17349_v63, %v15053_v49 }
0x1658   :  { %v6079_v24 = vpop.f32.mrf.mxu1  ;;  %6609 = vmatpush.bf16.msra.mxu3 %v15026_v4  ;;  %v14638_v4 = vor.u32 %v17248_v59, %v14637_v9  ;;  %v18820_v59 = vld [vmem:[#allocation12 + $0x92] sm:$0xff] }
0x1659   :  { %v6080_v29 = vadd.f32 %v6079_v24, %v4536_v1  ;;  %v6066_v14 = vpop.f32.mrf.mxu2  ;;  %v17347_v1 = vld [vmem:[#allocation2 + $0xbfc] sm:$0xf0] }
0x165a   :  { %v6092_v34 = vpop.f32.mrf.mxu3  ;;  %v6067_v38 = vadd.f32 %v6066_v14, %v4535_v23  ;;  %v6055_v40 = vpop.f32.mrf.mxu0  ;;  %6571 = vmatpush.bf16.msrb.mxu0 %v14622_v26  ;;  %v15038_v21 = vor.u32 %v17347_v1, %v15037_v0  ;;  %v14645_v23 = vld [vmem:[#allocation2 + $0x768] sm:$0xf] }
0x165b   :  { %v6976_v39 = vrot.slane %v6080_v29, 4  ;;  %v6093_v27 = vadd.f32 %v6092_v34, %v4537_v2  ;;  %15169 = vmatmul.msk.bf16.vlgmr.msra.gmra.mxu1 %vm128_vm9, %v18305_v43  ;;  %6584 = vmatpush.bf16.msrb.mxu2 %v14626_v25  ;;  %v17249_v2 = vld [vmem:[#allocation2 + $0x8ec] sm:$0xf0]  ;;  %v4263_v29 = vunpack.c.h.bf16 %v18794_v30  ;;  %v17299_v40 = vld [vmem:[#allocation2 + $0xa84] sm:$0xf] }
0x165c   :  { %v6975_v42 = vrot.slane %v6067_v38, 6  ;;  %6610 = vmatpush.bf16.msra.mxu3 %v14634_v31  ;;  %6596 = vmatpush.bf16.msra.mxu1 %v15022_v32  ;;  %v14646_v34 = vor.u32 %v17249_v2, %v14645_v23  ;;  %v15045_v30 = vld [vmem:[#allocation2 + $0xa80] sm:$0xf]  ;;  %v15050_v51 = vor.u32 %v17299_v40, %v15047_v18 }
0x165d   :  { %v6977_v44 = vrot.slane %v6093_v27, 2  ;;  %v4348_v27 = vperm.slane %v4263_v29, 4  ;;  %v4346_v47 = vperm.slane %v4263_v29, 0 }
0x165e   :  { %v7048_v45 = vsel %vm3898_vm4, %v6054_v41, %v6975_v42  ;;  %v17348_v41 = vld [vmem:[#allocation2 + $0xc04] sm:$0xf0] }
0x165f   :  { %v7049_v36 = vsel %vm3900_vm12, %v6976_v39, %v6977_v44  ;;  %v4544_v50 = vperm.slane %v4348_v27, 0  ;;  %v15046_v53 = vor.u32 %v17348_v41, %v15045_v30 }
0x1660   :  { %v7050_v46 = vsel %vm3902_vm13, %v7048_v45, %v7049_v36  ;;  %v6081_v48 = vpop.f32.mrf.mxu1  ;;  %6597 = vmatpush.bf16.msra.mxu1 %v14630_v33  ;;  %v17300_v33 = vld [vmem:[#allocation2 + $0xa8c] sm:$0xf]  ;;  %v15055_v45 = vld [vmem:[#allocation2 + $0xc10] sm:$0xf0] }
0x1661   :  { %7128 = vst [vmem:[#allocation13 + $0x10c] sm:$0xff] %v7050_v46  ;;  %v6068_v56 = vpop.f32.mrf.mxu2  ;;  %v4347_v46 = vperm.slane %v4263_v29, 2  ;;  %v4349_v48 = vperm.slane %v4263_v29, 6  ;;  %v15063_v29 = vld [vmem:[#allocation2 + $0xc18] sm:$0xf0] }
0x1662   :  { %v6094_v57 = vpop.f32.mrf.mxu3  ;;  %v6105_v61 = vpop.f32.mrf.mxu0  ;;  %v14655_v56 = vld [vmem:[#allocation2 + $0x8f8] sm:$0xf0] }
0x1663   :  { %v6106_v31 = vadd.f32 %v6105_v61, %v4538_v17  ;;  %v15058_v57 = vor.u32 %v17300_v33, %v15055_v45  ;;  %v17202_v61 = vld [vmem:[#allocation2 + $0x77c] sm:$0xf]  ;;  %v14658_v3 = vor.u32 %v17201_v54, %v14655_v56  ;;  %v14669_v45 = vld [vmem:[#allocation2 + $0x780] sm:$0xf] }
0x1664   :  { %v14666_v10 = vor.u32 %v17202_v61, %v14663_v62 }
0x1665   :  { %15171 = vmatmul.msk.bf16.vlgmr.msra.gmra.mxu0 %vm128_vm9, %v18305_v43 }
0x1666   :  { %15172 = vmatmul.msk.bf16.vlgmr.msra.gmra.mxu2 %vm128_vm9, %v18305_v43  ;;  %6622 = vmatpush.bf16.msra.mxu0 %v15030_v6 }
0x1667   :  { %15174 = vmatmul.msk.bf16.vlgmr.msrb.gmra.mxu3 %vm128_vm9, %v18305_v43  ;;  %6635 = vmatpush.bf16.msra.mxu2 %v15034_v52  ;;  %v4545_v52 = vperm.slane %v4349_v48, 0  ;;  %v14679_v48 = vld [vmem:[#allocation2 + $0x910] sm:$0xf0] }
0x1668   :  { %v6131_v8 = vpop.f32.mrf.mxu1  ;;  %6661 = vmatpush.bf16.msrb.mxu3 %v15042_v7  ;;  %v4542_v7 = vperm.slane %v4346_v47, 0  ;;  %v15069_v47 = vld [vmem:[#allocation2 + $0xa98] sm:$0xf] }
0x1669   :  { %v6132_v19 = vadd.f32 %v6131_v8, %v4540_v5  ;;  %v6118_v22 = vpop.f32.mrf.mxu2  ;;  %v4543_v5 = vperm.slane %v4347_v46, 0  ;;  %v17204_v46 = vld [vmem:[#allocation2 + $0x78c] sm:$0xf] }
0x166a   :  { %v6144_v12 = vpop.f32.mrf.mxu3  ;;  %v6119_v24 = vadd.f32 %v6118_v22, %v4539_v13  ;;  %v6107_v28 = vpop.f32.mrf.mxu0  ;;  %6623 = vmatpush.bf16.msra.mxu0 %v14638_v4  ;;  %v14661_v13 = vld [vmem:[#allocation2 + $0x778] sm:$0xf]  ;;  %v14682_v61 = vor.u32 %v17204_v46, %v14679_v48 }
0x166b   :  { %v6979_v25 = vrot.slane %v6132_v19, 4  ;;  %v6145_v26 = vadd.f32 %v6144_v12, %v4541_v15  ;;  %15173 = vmatmul.msk.bf16.vlgmr.msrb.gmra.mxu1 %vm128_vm9, %v18305_v43  ;;  %6636 = vmatpush.bf16.msra.mxu2 %v14642_v16  ;;  %v17251_v15 = vld [vmem:[#allocation2 + $0x8fc] sm:$0xf0]  ;;  %v4264_v19 = vunpack.c.l.bf16 %v18820_v59  ;;  %v17301_v28 = vld [vmem:[#allocation2 + $0xa94] sm:$0xf] }
0x166c   :  { %v6978_v32 = vrot.slane %v6119_v24, 6  ;;  %6662 = vmatpush.bf16.msrb.mxu3 %v14650_v20  ;;  %6648 = vmatpush.bf16.msrb.mxu1 %v15038_v21  ;;  %v14662_v12 = vor.u32 %v17251_v15, %v14661_v13  ;;  %v15066_v30 = vor.u32 %v17301_v28, %v15063_v29 }
0x166d   :  { %v6980_v14 = vrot.slane %v6145_v26, 2  ;;  %v4352_v26 = vperm.slane %v4264_v19, 4  ;;  %v4353_v27 = vperm.slane %v4264_v19, 6  ;;  %v4350_v40 = vperm.slane %v4264_v19, 0 }
0x166e   :  { %v7051_v35 = vsel %vm3898_vm4, %v6106_v31, %v6978_v32  ;;  %v15061_v31 = vld [vmem:[#allocation2 + $0xa90] sm:$0xf]  ;;  %v17350_v32 = vld [vmem:[#allocation2 + $0xc14] sm:$0xf0] }
0x166f   :  { %v7052_v37 = vsel %vm3900_vm12, %v6979_v25, %v6980_v14  ;;  %v4548_v18 = vperm.slane %v4352_v26, 0  ;;  %v15062_v41 = vor.u32 %v17350_v32, %v15061_v31  ;;  %v4546_v58 = vperm.slane %v4350_v40, 0  ;;  %v17205_v32 = vld [vmem:[#allocation2 + $0x794] sm:$0xf]  ;;  %v17353_v40 = vld [vmem:[#allocation2 + $0xc2c] sm:$0xf0] }
0x1670   :  { %v7053_v38 = vsel %vm3902_vm13, %v7051_v35, %v7052_v37  ;;  %v6133_v39 = vpop.f32.mrf.mxu1  ;;  %6649 = vmatpush.bf16.msrb.mxu1 %v14646_v34  ;;  %v17302_v35 = vld [vmem:[#allocation2 + $0xa9c] sm:$0xf]  ;;  %v15071_v37 = vld [vmem:[#allocation2 + $0xc20] sm:$0xf0] }
0x1671   :  { %7129 = vst [vmem:[#allocation13 + $0x114] sm:$0xff] %v7053_v38  ;;  %v6120_v42 = vpop.f32.mrf.mxu2  ;;  %v4351_v39 = vperm.slane %v4264_v19, 2  ;;  %v15074_v33 = vor.u32 %v17302_v35, %v15071_v37  ;;  %v15079_v19 = vld [vmem:[#allocation2 + $0xc28] sm:$0xf0]  ;;  %v14685_v35 = vld [vmem:[#allocation2 + $0x790] sm:$0xf] }
0x1672   :  { %v6146_v44 = vpop.f32.mrf.mxu3  ;;  %v6157_v36 = vpop.f32.mrf.mxu0  ;;  %v17203_v42 = vld [vmem:[#allocation2 + $0x784] sm:$0xf]  ;;  %v17254_v37 = vld [vmem:[#allocation2 + $0x914] sm:$0xf0] }
0x1673   :  { %v6158_v20 = vadd.f32 %v6157_v36, %v4542_v7  ;;  %v14671_v44 = vld [vmem:[#allocation2 + $0x908] sm:$0xf0]  ;;  %v17252_v36 = vld [vmem:[#allocation2 + $0x904] sm:$0xf0] }
0x1674   :  { %v14674_v56 = vor.u32 %v17203_v42, %v14671_v44  ;;  %v14686_v44 = vor.u32 %v17254_v37, %v14685_v35 }
0x1675   :  { %15175 = vmatmul.msk.bf16.vlgmr.msrb.gmra.mxu0 %vm128_vm9, %v18305_v43 }
0x1676   :  { %15176 = vmatmul.msk.bf16.vlgmr.msrb.gmra.mxu2 %vm128_vm9, %v18305_v43  ;;  %6674 = vmatpush.bf16.msrb.mxu0 %v15046_v53  ;;  %v4549_v53 = vperm.slane %v4353_v27, 0  ;;  %v15085_v27 = vld [vmem:[#allocation2 + $0xaa8] sm:$0xf] }
0x1677   :  { %15178 = vmatmul.msk.bf16.vlgmr.msra.gmra.mxu3 %vm128_vm9, %v18305_v43  ;;  %6687 = vmatpush.bf16.msrb.mxu2 %v15050_v51  ;;  %v4547_v51 = vperm.slane %v4351_v39, 0  ;;  %v14695_v39 = vld [vmem:[#allocation2 + $0x920] sm:$0xf0]  ;;  %v15086_v48 = vor.u32 %v17353_v40, %v15085_v27 }
0x1678   :  { %v6183_v6 = vpop.f32.mrf.mxu1  ;;  %6713 = vmatpush.bf16.msra.mxu3 %v15058_v57  ;;  %v14670_v57 = vor.u32 %v17252_v36, %v14669_v45  ;;  %v18846_v36 = vld [vmem:[#allocation12 + $0x9a] sm:$0xff] }
0x1679   :  { %v6184_v9 = vadd.f32 %v6183_v6, %v4544_v50  ;;  %v6170_v0 = vpop.f32.mrf.mxu2  ;;  %v17351_v50 = vld [vmem:[#allocation2 + $0xc1c] sm:$0xf0]  ;;  %v4267_v27 = vunpack.c.h.bf16 %v18846_v36 }
0x167a   :  { %v6196_v1 = vpop.f32.mrf.mxu3  ;;  %v6171_v8 = vadd.f32 %v6170_v0, %v4543_v5  ;;  %v6159_v17 = vpop.f32.mrf.mxu0  ;;  %6675 = vmatpush.bf16.msrb.mxu0 %v14654_v55  ;;  %v15070_v62 = vor.u32 %v17351_v50, %v15069_v47  ;;  %v14677_v5 = vld [vmem:[#allocation2 + $0x788] sm:$0xf] }
0x167b   :  { %v6982_v16 = vrot.slane %v6184_v9, 4  ;;  %v6197_v4 = vadd.f32 %v6196_v1, %v4545_v52  ;;  %15177 = vmatmul.msk.bf16.vlgmr.msra.gmra.mxu1 %vm128_vm9, %v18305_v43  ;;  %6688 = vmatpush.bf16.msrb.mxu2 %v14658_v3  ;;  %v17253_v52 = vld [vmem:[#allocation2 + $0x90c] sm:$0xf0]  ;;  %v4265_v9 = vunpack.c.h.bf16 %v18820_v59  ;;  %v17303_v17 = vld [vmem:[#allocation2 + $0xaa4] sm:$0xf] }
0x167c   :  { %v6981_v21 = vrot.slane %v6171_v8, 6  ;;  %6714 = vmatpush.bf16.msra.mxu3 %v14666_v10  ;;  %6700 = vmatpush.bf16.msra.mxu1 %v15054_v11  ;;  %v14678_v1 = vor.u32 %v17253_v52, %v14677_v5  ;;  %v15077_v59 = vld [vmem:[#allocation2 + $0xaa0] sm:$0xf]  ;;  %v15082_v29 = vor.u32 %v17303_v17, %v15079_v19 }
0x167d   :  { %v6983_v22 = vrot.slane %v6197_v4, 2  ;;  %v4356_v4 = vperm.slane %v4265_v9, 4  ;;  %v4354_v26 = vperm.slane %v4265_v9, 0 }
0x167e   :  { %v7054_v23 = vsel %vm3898_vm4, %v6158_v20, %v6981_v21  ;;  %v17352_v20 = vld [vmem:[#allocation2 + $0xc24] sm:$0xf0] }
0x167f   :  { %v7055_v2 = vsel %vm3900_vm12, %v6982_v16, %v6983_v22  ;;  %v4552_v28 = vperm.slane %v4356_v4, 0  ;;  %v15078_v31 = vor.u32 %v17352_v20, %v15077_v59  ;;  %v17207_v59 = vld [vmem:[#allocation2 + $0x7a4] sm:$0xf]  ;;  %v14703_v20 = vld [vmem:[#allocation2 + $0x928] sm:$0xf0] }
0x1680   :  { %v7056_v24 = vsel %vm3902_vm13, %v7054_v23, %v7055_v2  ;;  %v6185_v25 = vpop.f32.mrf.mxu1  ;;  %6701 = vmatpush.bf16.msra.mxu1 %v14662_v12  ;;  %v17304_v12 = vld [vmem:[#allocation2 + $0xaac] sm:$0xf]  ;;  %v15087_v23 = vld [vmem:[#allocation2 + $0xc30] sm:$0xf0] }
0x1681   :  { %7130 = vst [vmem:[#allocation13 + $0x11c] sm:$0xff] %v7056_v24  ;;  %v6172_v14 = vpop.f32.mrf.mxu2  ;;  %v4355_v24 = vperm.slane %v4265_v9, 2  ;;  %v4357_v25 = vperm.slane %v4265_v9, 6  ;;  %v15095_v9 = vld [vmem:[#allocation2 + $0xc38] sm:$0xf0] }
0x1682   :  { %v6198_v34 = vpop.f32.mrf.mxu3  ;;  %v6209_v38 = vpop.f32.mrf.mxu0  ;;  %v14687_v14 = vld [vmem:[#allocation2 + $0x918] sm:$0xf0] }
0x1683   :  { %v6210_v10 = vadd.f32 %v6209_v38, %v4546_v58  ;;  %v15090_v34 = vor.u32 %v17304_v12, %v15087_v23  ;;  %v17206_v38 = vld [vmem:[#allocation2 + $0x79c] sm:$0xf]  ;;  %v14690_v42 = vor.u32 %v17205_v32, %v14687_v14 }
0x1684   :  { %v14698_v46 = vor.u32 %v17206_v38, %v14695_v39 }
0x1685   :  { %15179 = vmatmul.msk.bf16.vlgmr.msra.gmra.mxu0 %vm128_vm9, %v18305_v43 }
0x1686   :  { %15180 = vmatmul.msk.bf16.vlgmr.msra.gmra.mxu2 %vm128_vm9, %v18305_v43  ;;  %6726 = vmatpush.bf16.msra.mxu0 %v15062_v41 }
0x1687   :  { %15182 = vmatmul.msk.bf16.vlgmr.msrb.gmra.mxu3 %vm128_vm9, %v18305_v43  ;;  %6739 = vmatpush.bf16.msra.mxu2 %v15066_v30  ;;  %v4553_v30 = vperm.slane %v4357_v25, 0 }
0x1688   :  { %v6235_v54 = vpop.f32.mrf.mxu1  ;;  %6765 = vmatpush.bf16.msrb.mxu3 %v15074_v33  ;;  %v4550_v33 = vperm.slane %v4354_v26, 0 }
0x1689   :  { %v6236_v60 = vadd.f32 %v6235_v54, %v4548_v18  ;;  %v6222_v49 = vpop.f32.mrf.mxu2  ;;  %v4551_v18 = vperm.slane %v4355_v24, 0  ;;  %v14706_v24 = vor.u32 %v17207_v59, %v14703_v20 }
0x168a   :  { %v6248_v63 = vpop.f32.mrf.mxu3  ;;  %v6223_v6 = vadd.f32 %v6222_v49, %v4547_v51  ;;  %v6211_v7 = vpop.f32.mrf.mxu0  ;;  %6727 = vmatpush.bf16.msra.mxu0 %v14670_v57  ;;  %v14693_v51 = vld [vmem:[#allocation2 + $0x798] sm:$0xf] }
0x168b   :  { %v6985_v3 = vrot.slane %v6236_v60, 4  ;;  %v6249_v55 = vadd.f32 %v6248_v63, %v4549_v53  ;;  %15181 = vmatmul.msk.bf16.vlgmr.msrb.gmra.mxu1 %vm128_vm9, %v18305_v43  ;;  %6740 = vmatpush.bf16.msra.mxu2 %v14674_v56  ;;  %v17255_v53 = vld [vmem:[#allocation2 + $0x91c] sm:$0xf0]  ;;  %v4266_v60 = vunpack.c.l.bf16 %v18846_v36  ;;  %v17305_v7 = vld [vmem:[#allocation2 + $0xab4] sm:$0xf] }
0x168c   :  { %v6984_v11 = vrot.slane %v6223_v6, 6  ;;  %6766 = vmatpush.bf16.msrb.mxu3 %v14682_v61  ;;  %6752 = vmatpush.bf16.msrb.mxu1 %v15070_v62  ;;  %v14694_v63 = vor.u32 %v17255_v53, %v14693_v51  ;;  %v15098_v17 = vor.u32 %v17305_v7, %v15095_v9 }
0x168d   :  { %v6986_v0 = vrot.slane %v6249_v55, 2  ;;  %v4360_v55 = vperm.slane %v4266_v60, 4 }
0x168e   :  { %v7057_v13 = vsel %vm3898_vm4, %v6210_v10, %v6984_v11  ;;  %v15093_v10 = vld [vmem:[#allocation2 + $0xab0] sm:$0xf]  ;;  %v17354_v11 = vld [vmem:[#allocation2 + $0xc34] sm:$0xf0] }
0x168f   :  { %v7058_v15 = vsel %vm3900_vm12, %v6985_v3, %v6986_v0  ;;  %v4556_v4 = vperm.slane %v4360_v55, 0  ;;  %v15094_v19 = vor.u32 %v17354_v11, %v15093_v10 }
0x1690   :  { %v7059_v8 = vsel %vm3902_vm13, %v7057_v13, %v7058_v15  ;;  %v6237_v16 = vpop.f32.mrf.mxu1  ;;  %6753 = vmatpush.bf16.msrb.mxu1 %v14678_v1  ;;  %v4359_v15 = vperm.slane %v4266_v60, 2 }
0x1691   :  { %7131 = vst [vmem:[#allocation13 + $0x124] sm:$0xff] %v7059_v8  ;;  %v6224_v21 = vpop.f32.mrf.mxu2  ;;  %v4361_v8 = vperm.slane %v4266_v60, 6  ;;  %v4358_v16 = vperm.slane %v4266_v60, 0  ;;  %v4247_v60 = vld [vmem:[#allocation12 + $0xa2] sm:$0xff] }
0x1692   :  { %v6250_v22 = vpop.f32.mrf.mxu3  ;;  %v6261_v2 = vpop.f32.mrf.mxu0  ;;  %v14701_v21 = vld [vmem:[#allocation2 + $0x7a0] sm:$0xf]  ;;  %v4555_v12 = vperm.slane %v4359_v15, 0 }
0x1693   :  { %v6262_v61 = vadd.f32 %v6261_v2, %v4550_v33  ;;  %v17256_v22 = vld [vmem:[#allocation2 + $0x924] sm:$0xf0]  ;;  %v4557_v23 = vperm.slane %v4361_v8, 0  ;;  %v4554_v26 = vperm.slane %v4358_v16, 0 }
0x1694   :  { %v14702_v25 = vor.u32 %v17256_v22, %v14701_v21  ;;  %7160 = dma.hbm_to_vmem [thread:$0]  %s7156_s14, 25088, %s907_s7, [#allocation3 + $0x1] }
0x1695   :  { %15183 = vmatmul.msk.bf16.vlgmr.msrb.gmra.mxu0 %vm128_vm9, %v18305_v43 }
0x1696   :  { %15184 = vmatmul.msk.bf16.vlgmr.msrb.gmra.mxu2 %vm128_vm9, %v18305_v43  ;;  %6778 = vmatpush.bf16.msrb.mxu0 %v15078_v31 }
0x1697   :  { %15186 = vmatmul.msk.bf16.vlgmr.msra.gmra.mxu3 %vm128_vm9, %v18305_v43  ;;  %6791 = vmatpush.bf16.msrb.mxu2 %v15082_v29 }
0x1698   :  { %v6287_v41 = vpop.f32.mrf.mxu1  ;;  %6817 = vmatpush.bf16.msra.mxu3 %v15090_v34 }
0x1699   :  { %v6288_v45 = vadd.f32 %v6287_v41, %v4552_v28  ;;  %v6274_v47 = vpop.f32.mrf.mxu2 }
0x169a   :  { %v6300_v50 = vpop.f32.mrf.mxu3  ;;  %v6275_v54 = vadd.f32 %v6274_v47, %v4551_v18  ;;  %v6263_v58 = vpop.f32.mrf.mxu0  ;;  %6779 = vmatpush.bf16.msrb.mxu0 %v14686_v44  ;;  %v4362_v47 = vperm.slane %v4267_v27, 0 }
0x169b   :  { %v6988_v56 = vrot.slane %v6288_v45, 4  ;;  %v6301_v57 = vadd.f32 %v6300_v50, %v4553_v30  ;;  %15185 = vmatmul.msk.bf16.vlgmr.msra.gmra.mxu1 %vm128_vm9, %v18305_v43  ;;  %6792 = vmatpush.bf16.msrb.mxu2 %v14690_v42  ;;  %v4364_v42 = vperm.slane %v4267_v27, 4 }
0x169c   :  { %v6987_v62 = vrot.slane %v6275_v54, 6  ;;  %6818 = vmatpush.bf16.msra.mxu3 %v14698_v46  ;;  %6804 = vmatpush.bf16.msra.mxu1 %v15086_v48  ;;  %v4363_v46 = vperm.slane %v4267_v27, 2  ;;  %v4365_v48 = vperm.slane %v4267_v27, 6  ;;  %v4558_v54 = vperm.slane %v4362_v47, 0 }
0x169d   :  { %v6989_v49 = vrot.slane %v6301_v57, 2  ;;  %v4560_v50 = vperm.slane %v4364_v42, 0 }
0x169e   :  { %v7060_v5 = vsel %vm3898_vm4, %v6262_v61, %v6987_v62  ;;  %v4559_v36 = vperm.slane %v4363_v46, 0  ;;  %v4561_v51 = vperm.slane %v4365_v48, 0 }
0x169f   :  { %v7061_v52 = vsel %vm3900_vm12, %v6988_v56, %v6989_v49 }
0x16a0   :  { %v7062_v6 = vsel %vm3902_vm13, %v7060_v5, %v7061_v52  ;;  %v6289_v3 = vpop.f32.mrf.mxu1  ;;  %6805 = vmatpush.bf16.msra.mxu1 %v14694_v63 }
0x16a1   :  { %7132 = vst [vmem:[#allocation13 + $0x12c] sm:$0xff] %v7062_v6  ;;  %v6276_v0 = vpop.f32.mrf.mxu2  ;;  %v4268_v3 = vunpack.c.l.bf16 %v4247_v60 }
0x16a2   :  { %v6302_v1 = vpop.f32.mrf.mxu3  ;;  %v6313_v13 = vpop.f32.mrf.mxu0 }
0x16a3   :  { %v6314_v37 = vadd.f32 %v6313_v13, %v4554_v26  ;;  %v4368_v11 = vperm.slane %v4268_v3, 4  ;;  %v4367_v15 = vperm.slane %v4268_v3, 2  ;;  %v4369_v8 = vperm.slane %v4268_v3, 6 }
0x16a4   :  { %v4366_v16 = vperm.slane %v4268_v3, 0 }
0x16a5   :  { %15187 = vmatmul.msk.bf16.vlgmr.msra.gmra.mxu0 %vm128_vm9, %v18305_v43 }
0x16a6   :  { %15188 = vmatmul.msk.bf16.vlgmr.msra.gmra.mxu2 %vm128_vm9, %v18305_v43  ;;  %6830 = vmatpush.bf16.msra.mxu0 %v15094_v19  ;;  %v4565_v19 = vperm.slane %v4369_v8, 0  ;;  %v4562_v20 = vperm.slane %v4366_v16, 0 }
0x16a7   :  { %15190 = vmatmul.msk.bf16.vlgmr.msrb.gmra.mxu3 %vm128_vm9, %v18305_v43  ;;  %6843 = vmatpush.bf16.msra.mxu2 %v15098_v17  ;;  %v4563_v17 = vperm.slane %v4367_v15, 0 }
0x16a8   :  { %v6339_v2 = vpop.f32.mrf.mxu1 }
0x16a9   :  { %v6340_v28 = vadd.f32 %v6339_v2, %v4556_v4  ;;  %v6326_v29 = vpop.f32.mrf.mxu2  ;;  %v4564_v4 = vperm.slane %v4368_v11, 0 }
0x16aa   :  { %v6352_v31 = vpop.f32.mrf.mxu3  ;;  %v6327_v32 = vadd.f32 %v6326_v29, %v4555_v12  ;;  %v6315_v35 = vpop.f32.mrf.mxu0  ;;  %6831 = vmatpush.bf16.msra.mxu0 %v14702_v25 }
0x16ab   :  { %v6991_v14 = vrot.slane %v6340_v28, 4  ;;  %v6353_v34 = vadd.f32 %v6352_v31, %v4557_v23  ;;  %15189 = vmatmul.msk.bf16.vlgmr.msrb.gmra.mxu1 %vm128_vm9, %v18305_v43  ;;  %6844 = vmatpush.bf16.msra.mxu2 %v14706_v24  ;;  %v4269_v31 = vunpack.c.h.bf16 %v4247_v60 }
0x16ac   :  { %v6990_v38 = vrot.slane %v6327_v32, 6 }
0x16ad   :  { %v6992_v39 = vrot.slane %v6353_v34, 2 }
0x16ae   :  { %v7063_v40 = vsel %vm3898_vm4, %v6314_v37, %v6990_v38  ;;  %v4372_v37 = vperm.slane %v4269_v31, 4 }
0x16af   :  { %v7064_v18 = vsel %vm3900_vm12, %v6991_v14, %v6992_v39 }
0x16b0   :  { %v7065_v30 = vsel %vm3902_vm13, %v7063_v40, %v7064_v18  ;;  %v6341_v41 = vpop.f32.mrf.mxu1  ;;  %v4371_v40 = vperm.slane %v4269_v31, 2  ;;  %v4373_v18 = vperm.slane %v4269_v31, 6 }
0x16b1   :  { %7133 = vst [vmem:[#allocation13 + $0x134] sm:$0xff] %v7065_v30  ;;  %v6328_v44 = vpop.f32.mrf.mxu2  ;;  %v4370_v30 = vperm.slane %v4269_v31, 0  ;;  %v4568_v41 = vperm.slane %v4372_v37, 0 }
0x16b2   :  { %v6354_v33 = vpop.f32.mrf.mxu3  ;;  %v6365_v45 = vpop.f32.mrf.mxu0  ;;  %v4567_v42 = vperm.slane %v4371_v40, 0  ;;  %v4569_v44 = vperm.slane %v4373_v18, 0 }
0x16b3   :  { %v6366_v5 = vadd.f32 %v6365_v45, %v4558_v54  ;;  %v4566_v45 = vperm.slane %v4370_v30, 0 }
0x16b5   :  { %15191 = vmatmul.msk.bf16.vlgmr.msrb.gmra.mxu0 %vm128_vm9, %v18305_v43 }
0x16b6   :  { %15192 = vmatmul.msk.bf16.vlgmr.msrb.gmra.mxu2 %vm128_vm9, %v18305_v43 }
0x16b7   :  { %15194 = vmatmul.msk.bf16.vlgmr.msra.gmra.mxu3 %vm128_vm9, %v18305_v43 }
0x16b8   :  { %v6391_v53 = vpop.f32.mrf.mxu1 }
0x16b9   :  { %v6392_v56 = vadd.f32 %v6391_v53, %v4560_v50  ;;  %v6378_v57 = vpop.f32.mrf.mxu2  ;;  %v4248_v50 = vld [vmem:[#allocation12 + $0xaa] sm:$0xff] }
0x16ba   :  { %v6404_v58 = vpop.f32.mrf.mxu3  ;;  %v6379_v61 = vadd.f32 %v6378_v57, %v4559_v36  ;;  %v6367_v63 = vpop.f32.mrf.mxu0  ;;  %v4270_v60 = vunpack.c.l.bf16 %v4248_v50 }
0x16bb   :  { %v6994_v62 = vrot.slane %v6392_v56, 4  ;;  %v6405_v49 = vadd.f32 %v6404_v58, %v4561_v51  ;;  %15193 = vmatmul.msk.bf16.vlgmr.msra.gmra.mxu1 %vm128_vm9, %v18305_v43 }
0x16bc   :  { %v6993_v52 = vrot.slane %v6379_v61, 6 }
0x16bd   :  { %v6995_v6 = vrot.slane %v6405_v49, 2 }
0x16be   :  { %v7066_v55 = vsel %vm3898_vm4, %v6366_v5, %v6993_v52  ;;  %v4376_v5 = vperm.slane %v4270_v60, 4 }
0x16bf   :  { %v7067_v7 = vsel %vm3900_vm12, %v6994_v62, %v6995_v6 }
0x16c0   :  { %v7068_v9 = vsel %vm3902_vm13, %v7066_v55, %v7067_v7  ;;  %v6393_v10 = vpop.f32.mrf.mxu1  ;;  %v4375_v55 = vperm.slane %v4270_v60, 2  ;;  %v4377_v7 = vperm.slane %v4270_v60, 6 }
0x16c1   :  { %7134 = vst [vmem:[#allocation13 + $0x13c] sm:$0xff] %v7068_v9  ;;  %v6380_v0 = vpop.f32.mrf.mxu2  ;;  %v4374_v9 = vperm.slane %v4270_v60, 0  ;;  %v4572_v10 = vperm.slane %v4376_v5, 0 }
0x16c2   :  { %v6406_v1 = vpop.f32.mrf.mxu3  ;;  %v6417_v13 = vpop.f32.mrf.mxu0  ;;  %v4571_v11 = vperm.slane %v4375_v55, 0  ;;  %v4573_v0 = vperm.slane %v4377_v7, 0 }
0x16c3   :  { %v6418_v26 = vadd.f32 %v6417_v13, %v4562_v20  ;;  %v4570_v13 = vperm.slane %v4374_v9, 0 }
0x16c5   :  { %15195 = vmatmul.msk.bf16.vlgmr.msra.gmra.mxu0 %vm128_vm9, %v18305_v43 }
0x16c6   :  { %15196 = vmatmul.msk.bf16.vlgmr.msra.gmra.mxu2 %vm128_vm9, %v18305_v43 }
0x16c8   :  { %v6443_v59 = vpop.f32.mrf.mxu1 }
0x16c9   :  { %v6444_v21 = vadd.f32 %v6443_v59, %v4564_v4  ;;  %v6430_v22 = vpop.f32.mrf.mxu2 }
0x16ca   :  { %v6456_v12 = vpop.f32.mrf.mxu3  ;;  %v6431_v23 = vadd.f32 %v6430_v22, %v4563_v17  ;;  %v6419_v25 = vpop.f32.mrf.mxu0 }
0x16cb   :  { %v6997_v2 = vrot.slane %v6444_v21, 4  ;;  %v6457_v24 = vadd.f32 %v6456_v12, %v4565_v19  ;;  %v4271_v12 = vunpack.c.h.bf16 %v4248_v50 }
0x16cc   :  { %v6996_v28 = vrot.slane %v6431_v23, 6 }
0x16cd   :  { %v6998_v29 = vrot.slane %v6457_v24, 2 }
0x16ce   :  { %v7069_v32 = vsel %vm3898_vm4, %v6418_v26, %v6996_v28  ;;  %v4380_v26 = vperm.slane %v4271_v12, 4 }
0x16cf   :  { %v7070_v14 = vsel %vm3900_vm12, %v6997_v2, %v6998_v29 }
0x16d0   :  { %v7071_v34 = vsel %vm3902_vm13, %v7069_v32, %v7070_v14  ;;  %v6445_v35 = vpop.f32.mrf.mxu1  ;;  %v4379_v32 = vperm.slane %v4271_v12, 2  ;;  %v4381_v14 = vperm.slane %v4271_v12, 6 }
0x16d1   :  { %7135 = vst [vmem:[#allocation13 + $0x144] sm:$0xff] %v7071_v34  ;;  %v6432_v38 = vpop.f32.mrf.mxu2  ;;  %v4378_v34 = vperm.slane %v4271_v12, 0  ;;  %v4576_v35 = vperm.slane %v4380_v26, 0 }
0x16d2   :  { %v6458_v39 = vpop.f32.mrf.mxu3  ;;  %v6469_v27 = vpop.f32.mrf.mxu0  ;;  %v4575_v37 = vperm.slane %v4379_v32, 0  ;;  %v4577_v38 = vperm.slane %v4381_v14, 0 }
0x16d3   :  { %v6470_v56 = vadd.f32 %v6469_v27, %v4566_v45  ;;  %v4574_v27 = vperm.slane %v4378_v34, 0 }
0x16d8   :  { %v6495_v33 = vpop.f32.mrf.mxu1 }
0x16d9   :  { %v6496_v46 = vadd.f32 %v6495_v33, %v4568_v41  ;;  %v6482_v48 = vpop.f32.mrf.mxu2  ;;  %v4249_v41 = vld [vmem:[#allocation12 + $0xb2] sm:$0xff] }
0x16da   :  { %v6508_v47 = vpop.f32.mrf.mxu3  ;;  %v6483_v36 = vadd.f32 %v6482_v48, %v4567_v42  ;;  %v6471_v54 = vpop.f32.mrf.mxu0  ;;  %v4272_v50 = vunpack.c.l.bf16 %v4249_v41 }
0x16db   :  { %v7000_v51 = vrot.slane %v6496_v46, 4  ;;  %v6509_v53 = vadd.f32 %v6508_v47, %v4569_v44 }
0x16dc   :  { %v6999_v57 = vrot.slane %v6483_v36, 6 }
0x16dd   :  { %v7001_v58 = vrot.slane %v6509_v53, 2 }
0x16de   :  { %v7072_v61 = vsel %vm3898_vm4, %v6470_v56, %v6999_v57  ;;  %v4384_v56 = vperm.slane %v4272_v50, 4 }
0x16df   :  { %v7073_v62 = vsel %vm3900_vm12, %v7000_v51, %v7001_v58 }
0x16e0   :  { %v7074_v49 = vsel %vm3902_vm13, %v7072_v61, %v7073_v62  ;;  %v6497_v63 = vpop.f32.mrf.mxu1  ;;  %v4383_v61 = vperm.slane %v4272_v50, 2  ;;  %v4385_v62 = vperm.slane %v4272_v50, 6 }
0x16e1   :  { %7136 = vst [vmem:[#allocation13 + $0x14c] sm:$0xff] %v7074_v49  ;;  %v6484_v52 = vpop.f32.mrf.mxu2  ;;  %v4382_v49 = vperm.slane %v4272_v50, 0  ;;  %v4580_v63 = vperm.slane %v4384_v56, 0 }
0x16e2   :  { %v6510_v6 = vpop.f32.mrf.mxu3  ;;  %v6521_v3 = vpop.f32.mrf.mxu0  ;;  %v4579_v5 = vperm.slane %v4383_v61, 0  ;;  %v4581_v52 = vperm.slane %v4385_v62, 0 }
0x16e3   :  { %v6522_v20 = vadd.f32 %v6521_v3, %v4570_v13  ;;  %v4578_v3 = vperm.slane %v4382_v49, 0 }
0x16e8   :  { %v6547_v1 = vpop.f32.mrf.mxu1 }
0x16e9   :  { %v6548_v15 = vadd.f32 %v6547_v1, %v4572_v10  ;;  %v6534_v8 = vpop.f32.mrf.mxu2 }
0x16ea   :  { %v6560_v16 = vpop.f32.mrf.mxu3  ;;  %v6535_v4 = vadd.f32 %v6534_v8, %v4571_v11  ;;  %v6523_v59 = vpop.f32.mrf.mxu0 }
0x16eb   :  { %v7003_v17 = vrot.slane %v6548_v15, 4  ;;  %v6561_v19 = vadd.f32 %v6560_v16, %v4573_v0  ;;  %v4273_v16 = vunpack.c.h.bf16 %v4249_v41 }
0x16ec   :  { %v7002_v21 = vrot.slane %v6535_v4, 6 }
0x16ed   :  { %v7004_v22 = vrot.slane %v6561_v19, 2 }
0x16ee   :  { %v7075_v23 = vsel %vm3898_vm4, %v6522_v20, %v7002_v21  ;;  %v4388_v20 = vperm.slane %v4273_v16, 4 }
0x16ef   :  { %v7076_v2 = vsel %vm3900_vm12, %v7003_v17, %v7004_v22 }
0x16f0   :  { %v7077_v24 = vsel %vm3902_vm13, %v7075_v23, %v7076_v2  ;;  %v6549_v25 = vpop.f32.mrf.mxu1  ;;  %v4387_v23 = vperm.slane %v4273_v16, 2  ;;  %v4389_v2 = vperm.slane %v4273_v16, 6 }
0x16f1   :  { %7137 = vst [vmem:[#allocation13 + $0x154] sm:$0xff] %v7077_v24  ;;  %v6536_v28 = vpop.f32.mrf.mxu2  ;;  %v4386_v24 = vperm.slane %v4273_v16, 0  ;;  %v4584_v25 = vperm.slane %v4388_v20, 0 }
0x16f2   :  { %v6562_v29 = vpop.f32.mrf.mxu3  ;;  %v6573_v31 = vpop.f32.mrf.mxu0  ;;  %v4583_v26 = vperm.slane %v4387_v23, 0  ;;  %v4585_v28 = vperm.slane %v4389_v2, 0 }
0x16f3   :  { %v6574_v46 = vadd.f32 %v6573_v31, %v4574_v27  ;;  %v4582_v31 = vperm.slane %v4386_v24, 0 }
0x16f8   :  { %v6599_v39 = vpop.f32.mrf.mxu1 }
0x16f9   :  { %v6600_v40 = vadd.f32 %v6599_v39, %v4576_v35  ;;  %v6586_v18 = vpop.f32.mrf.mxu2  ;;  %v4250_v35 = vld [vmem:[#allocation12 + $0xba] sm:$0xff] }
0x16fa   :  { %v6612_v30 = vpop.f32.mrf.mxu3  ;;  %v6587_v42 = vadd.f32 %v6586_v18, %v4575_v37  ;;  %v6575_v45 = vpop.f32.mrf.mxu0  ;;  %v4274_v41 = vunpack.c.l.bf16 %v4250_v35 }
0x16fb   :  { %v7006_v44 = vrot.slane %v6600_v40, 4  ;;  %v6613_v33 = vadd.f32 %v6612_v30, %v4577_v38 }
0x16fc   :  { %v7005_v48 = vrot.slane %v6587_v42, 6 }
0x16fd   :  { %v7007_v47 = vrot.slane %v6613_v33, 2 }
0x16fe   :  { %v7078_v36 = vsel %vm3898_vm4, %v6574_v46, %v7005_v48  ;;  %v4392_v46 = vperm.slane %v4274_v41, 4 }
0x16ff   :  { %v7079_v51 = vsel %vm3900_vm12, %v7006_v44, %v7007_v47 }
0x1700   :  { %v7080_v53 = vsel %vm3902_vm13, %v7078_v36, %v7079_v51  ;;  %v6601_v54 = vpop.f32.mrf.mxu1  ;;  %v4391_v36 = vperm.slane %v4274_v41, 2  ;;  %v4393_v51 = vperm.slane %v4274_v41, 6 }
0x1701   :  { %7138 = vst [vmem:[#allocation13 + $0x15c] sm:$0xff] %v7080_v53  ;;  %v6588_v57 = vpop.f32.mrf.mxu2  ;;  %v4390_v53 = vperm.slane %v4274_v41, 0  ;;  %v4588_v54 = vperm.slane %v4392_v46, 0 }
0x1702   :  { %v6614_v58 = vpop.f32.mrf.mxu3  ;;  %v6625_v60 = vpop.f32.mrf.mxu0  ;;  %v4587_v56 = vperm.slane %v4391_v36, 0  ;;  %v4589_v57 = vperm.slane %v4393_v51, 0 }
0x1703   :  { %v6626_v13 = vadd.f32 %v6625_v60, %v4578_v3  ;;  %v4586_v60 = vperm.slane %v4390_v53, 0 }
0x1708   :  { %v6651_v6 = vpop.f32.mrf.mxu1 }
0x1709   :  { %v6652_v55 = vadd.f32 %v6651_v6, %v4580_v63  ;;  %v6638_v7 = vpop.f32.mrf.mxu2 }
0x170a   :  { %v6664_v9 = vpop.f32.mrf.mxu3  ;;  %v6639_v10 = vadd.f32 %v6638_v7, %v4579_v5  ;;  %v6627_v1 = vpop.f32.mrf.mxu0 }
0x170b   :  { %v7009_v11 = vrot.slane %v6652_v55, 4  ;;  %v6665_v0 = vadd.f32 %v6664_v9, %v4581_v52  ;;  %v4275_v9 = vunpack.c.h.bf16 %v4250_v35 }
0x170c   :  { %v7008_v15 = vrot.slane %v6639_v10, 6 }
0x170d   :  { %v7010_v8 = vrot.slane %v6665_v0, 2 }
0x170e   :  { %v7081_v4 = vsel %vm3898_vm4, %v6626_v13, %v7008_v15  ;;  %v4396_v13 = vperm.slane %v4275_v9, 4 }
0x170f   :  { %v7082_v17 = vsel %vm3900_vm12, %v7009_v11, %v7010_v8 }
0x1710   :  { %v7083_v19 = vsel %vm3902_vm13, %v7081_v4, %v7082_v17  ;;  %v6653_v59 = vpop.f32.mrf.mxu1  ;;  %v4395_v4 = vperm.slane %v4275_v9, 2  ;;  %v4397_v17 = vperm.slane %v4275_v9, 6 }
0x1711   :  { %7139 = vst [vmem:[#allocation13 + $0x164] sm:$0xff] %v7083_v19  ;;  %v6640_v21 = vpop.f32.mrf.mxu2  ;;  %v4394_v19 = vperm.slane %v4275_v9, 0  ;;  %v4592_v59 = vperm.slane %v4396_v13, 0 }
0x1712   :  { %v6666_v22 = vpop.f32.mrf.mxu3  ;;  %v6677_v12 = vpop.f32.mrf.mxu0  ;;  %v4591_v20 = vperm.slane %v4395_v4, 0  ;;  %v4593_v21 = vperm.slane %v4397_v17, 0 }
0x1713   :  { %v6678_v40 = vadd.f32 %v6677_v12, %v4582_v31  ;;  %v4590_v12 = vperm.slane %v4394_v19, 0  ;;  %v4251_v31 = vld [vmem:[#allocation12 + $0xc2] sm:$0x3] }
0x1718   :  { %v6703_v29 = vpop.f32.mrf.mxu1 }
0x1719   :  { %v6704_v32 = vadd.f32 %v6703_v29, %v4584_v25  ;;  %v6690_v14 = vpop.f32.mrf.mxu2 }
0x171a   :  { %v6716_v34 = vpop.f32.mrf.mxu3  ;;  %v6691_v37 = vadd.f32 %v6690_v14, %v4583_v26  ;;  %v6679_v27 = vpop.f32.mrf.mxu0 }
0x171b   :  { %v7012_v38 = vrot.slane %v6704_v32, 4  ;;  %v6717_v39 = vadd.f32 %v6716_v34, %v4585_v28 }
0x171c   :  { %v7011_v18 = vrot.slane %v6691_v37, 6 }
0x171d   :  { %v7013_v30 = vrot.slane %v6717_v39, 2 }
0x171e   :  { %v7084_v42 = vsel %vm3898_vm4, %v6678_v40, %v7011_v18 }
0x171f   :  { %v7085_v44 = vsel %vm3900_vm12, %v7012_v38, %v7013_v30  ;;  %v4276_v38 = vunpack.c.l.bf16 %v4251_v31 }
0x1720   :  { %v7086_v33 = vsel %vm3902_vm13, %v7084_v42, %v7085_v44  ;;  %v6705_v45 = vpop.f32.mrf.mxu1 }
0x1721   :  { %7140 = vst [vmem:[#allocation13 + $0x16c] sm:$0xff] %v7086_v33  ;;  %v6692_v48 = vpop.f32.mrf.mxu2  ;;  %v4399_v41 = vperm.slane %v4276_v38, 2  ;;  %v4398_v42 = vperm.slane %v4276_v38, 0 }
0x1722   :  { %v6718_v47 = vpop.f32.mrf.mxu3  ;;  %v6729_v50 = vpop.f32.mrf.mxu0 }
0x1723   :  { %v6730_v3 = vadd.f32 %v6729_v50, %v4586_v60  ;;  %v4595_v44 = vperm.slane %v4399_v41, 0  ;;  %v4594_v33 = vperm.slane %v4398_v42, 0 }
0x1728   :  { %v6755_v58 = vpop.f32.mrf.mxu1 }
0x1729   :  { %v6756_v61 = vadd.f32 %v6755_v58, %v4588_v54  ;;  %v6742_v62 = vpop.f32.mrf.mxu2 }
0x172a   :  { %v6768_v49 = vpop.f32.mrf.mxu3  ;;  %v6743_v63 = vadd.f32 %v6742_v62, %v4587_v56  ;;  %v6731_v6 = vpop.f32.mrf.mxu0 }
0x172b   :  { %v7015_v5 = vrot.slane %v6756_v61, 4  ;;  %v6769_v52 = vadd.f32 %v6768_v49, %v4589_v57 }
0x172c   :  { %v7014_v55 = vrot.slane %v6743_v63, 6 }
0x172d   :  { %v7016_v7 = vrot.slane %v6769_v52, 2 }
0x172e   :  { %v7087_v10 = vsel %vm3898_vm4, %v6730_v3, %v7014_v55 }
0x172f   :  { %v7088_v11 = vsel %vm3900_vm12, %v7015_v5, %v7016_v7 }
0x1730   :  { %v7089_v0 = vsel %vm3902_vm13, %v7087_v10, %v7088_v11  ;;  %v6757_v1 = vpop.f32.mrf.mxu1 }
0x1731   :  { %7141 = vst [vmem:[#allocation13 + $0x174] sm:$0xff] %v7089_v0  ;;  %v6744_v15 = vpop.f32.mrf.mxu2 }
0x1732   :  { %v6770_v8 = vpop.f32.mrf.mxu3  ;;  %v6781_v16 = vpop.f32.mrf.mxu0 }
0x1733   :  { %v6782_v32 = vadd.f32 %v6781_v16, %v4590_v12 }
0x1738   :  { %v6807_v22 = vpop.f32.mrf.mxu1 }
0x1739   :  { %v6808_v23 = vadd.f32 %v6807_v22, %v4592_v59  ;;  %v6794_v2 = vpop.f32.mrf.mxu2 }
0x173a   :  { %v6820_v24 = vpop.f32.mrf.mxu3  ;;  %v6795_v25 = vadd.f32 %v6794_v2, %v4591_v20  ;;  %v6783_v29 = vpop.f32.mrf.mxu0 }
0x173b   :  { %v7018_v26 = vrot.slane %v6808_v23, 4  ;;  %v6821_v28 = vadd.f32 %v6820_v24, %v4593_v21 }
0x173c   :  { %v7017_v14 = vrot.slane %v6795_v25, 6 }
0x173d   :  { %v7019_v34 = vrot.slane %v6821_v28, 2 }
0x173e   :  { %v7090_v35 = vsel %vm3898_vm4, %v6782_v32, %v7017_v14 }
0x173f   :  { %v7091_v37 = vsel %vm3900_vm12, %v7018_v26, %v7019_v34 }
0x1740   :  { %v7092_v39 = vsel %vm3902_vm13, %v7090_v35, %v7091_v37  ;;  %v6809_v27 = vpop.f32.mrf.mxu1 }
0x1741   :  { %7142 = vst [vmem:[#allocation13 + $0x17c] sm:$0xff] %v7092_v39  ;;  %v6796_v40 = vpop.f32.mrf.mxu2 }
0x1742   :  { %v6822_v18 = vpop.f32.mrf.mxu3  ;;  %v6833_v30 = vpop.f32.mrf.mxu0 }
0x1743   :  { %v6834_v47 = vadd.f32 %v6833_v30, %v4594_v33 }
0x1749   :  { %v6846_v45 = vpop.f32.mrf.mxu2 }
0x174a   :  { %v6847_v46 = vadd.f32 %v6846_v45, %v4595_v44  ;;  %v6835_v48 = vpop.f32.mrf.mxu0 }
0x174c   :  { %v7020_v50 = vrot.slane %v6847_v46, 6 }
0x174e   :  { %v7093_v36 = vsel %vm3898_vm4, %v6834_v47, %v7020_v50 }
0x174f   :  { %7143 = vst [vmem:[#allocation13 + $0x184] sm:$0xf] %v7093_v36 }
0x1751   :  { %v6848_v51 = vpop.f32.mrf.mxu2 }
0x1752   :  { %18059 = dma.done.wait [#allocation3], 25088 }
0x1753   :  { %18060 = vsyncadd [#allocation3], 4294942208  ;;  %v15591_v53 = vld [vmem:[#allocation2 + $0x310] sm:$0xf]  ;;  %v17502_v54 = vld [vmem:[#allocation2 + $0x494] sm:$0xf0] }
0x1754   :  { %v17453_v56 = vld [vmem:[#allocation2 + $0x314] sm:$0xf]  ;;  %v15592_v57 = vor.u32 %v17502_v54, %v15591_v53  ;;  %v15593_v58 = vld [vmem:[#allocation2 + $0x498] sm:$0xf0]  ;;  %v15601_v61 = vld [vmem:[#allocation2 + $0x4a0] sm:$0xf0] }
0x1755   :  { %v17454_v60 = vld [vmem:[#allocation2 + $0x31c] sm:$0xf]  ;;  %v15596_v62 = vor.u32 %v17453_v56, %v15593_v58  ;;  %v15199_v63 = vld [vmem:[#allocation2] sm:$0xf]  ;;  %v17404_v5 = vld [vmem:[#allocation2 + $0x184] sm:$0xf0] }
0x1756   :  { %v15604_v49 = vor.u32 %v17454_v60, %v15601_v61  ;;  %v17355_v52 = vld [vmem:[#allocation2 + $0x4] sm:$0xf]  ;;  %8702 = vmatpush.bf16.msrb.mxu1 %v15592_v57  ;;  %v15200_v6 = vor.u32 %v17404_v5, %v15199_v63  ;;  %v15201_v3 = vld [vmem:[#allocation2 + $0x188] sm:$0xf0]  ;;  %v15209_v7 = vld [vmem:[#allocation2 + $0x190] sm:$0xf0] }
0x1757   :  { %v17356_v55 = vld [vmem:[#allocation2 + $0xc] sm:$0xf]  ;;  %8715 = vmatpush.bf16.msrb.mxu3 %v15596_v62  ;;  %v15204_v9 = vor.u32 %v17355_v52, %v15201_v3  ;;  %v15599_v11 = vld [vmem:[#allocation2 + $0x318] sm:$0xf]  ;;  %v17503_v0 = vld [vmem:[#allocation2 + $0x49c] sm:$0xf0] }
0x1758   :  { %8741 = vmatpush.bf16.msrb.mxu2 %v15604_v49  ;;  %v15212_v10 = vor.u32 %v17356_v55, %v15209_v7  ;;  %v17455_v1 = vld [vmem:[#allocation2 + $0x324] sm:$0xf]  ;;  %v15600_v13 = vor.u32 %v17503_v0, %v15599_v11  ;;  %v15609_v15 = vld [vmem:[#allocation2 + $0x4a8] sm:$0xf0]  ;;  %v15207_v8 = vld [vmem:[#allocation2 + $0x8] sm:$0xf] }
0x1759   :  { %v17405_v16 = vld [vmem:[#allocation2 + $0x18c] sm:$0xf0]  ;;  %v15612_v4 = vor.u32 %v17455_v1, %v15609_v15  ;;  %v15607_v17 = vld [vmem:[#allocation2 + $0x320] sm:$0xf]  ;;  %v17504_v19 = vld [vmem:[#allocation2 + $0x4a4] sm:$0xf0] }
0x175a   :  { %v17357_v59 = vld [vmem:[#allocation2 + $0x14] sm:$0xf]  ;;  %8703 = vmatpush.bf16.msrb.mxu1 %v15200_v6  ;;  %8728 = vmatpush.bf16.msrb.mxu0 %v15600_v13  ;;  %v15608_v20 = vor.u32 %v17504_v19, %v15607_v17  ;;  %v15217_v21 = vld [vmem:[#allocation2 + $0x198] sm:$0xf0]  ;;  %v17456_v22 = vld [vmem:[#allocation2 + $0x32c] sm:$0xf]  ;;  %v15208_v23 = vor.u32 %v17405_v16, %v15207_v8 }
0x175b   :  { %v15617_v12 = vld [vmem:[#allocation2 + $0x4b0] sm:$0xf0]  ;;  %8716 = vmatpush.bf16.msrb.mxu3 %v15204_v9  ;;  %v15215_v24 = vld [vmem:[#allocation2 + $0x10] sm:$0xf]  ;;  %v17406_v25 = vld [vmem:[#allocation2 + $0x194] sm:$0xf0]  ;;  %v15220_v28 = vor.u32 %v17357_v59, %v15217_v21 }
0x175c   :  { %8742 = vmatpush.bf16.msrb.mxu2 %v15212_v10  ;;  %v15620_v2 = vor.u32 %v17456_v22, %v15617_v12  ;;  %v17358_v26 = vld [vmem:[#allocation2 + $0x1c] sm:$0xf]  ;;  %v15216_v29 = vor.u32 %v17406_v25, %v15215_v24  ;;  %v15225_v31 = vld [vmem:[#allocation2 + $0x1a0] sm:$0xf0]  ;;  %v15615_v32 = vld [vmem:[#allocation2 + $0x328] sm:$0xf] }
0x175d   :  { %v17505_v14 = vld [vmem:[#allocation2 + $0x4ac] sm:$0xf0]  ;;  %15981 = vmatmul.msk.bf16.vlgmr.msrb.gmra.mxu1 %vm128_vm9, %v18305_v43  ;;  %v15228_v34 = vor.u32 %v17358_v26, %v15225_v31  ;;  %v17457_v37 = vld [vmem:[#allocation2 + $0x334] sm:$0xf]  ;;  %v15625_v38 = vld [vmem:[#allocation2 + $0x4b8] sm:$0xf0] }
0x175e   :  { %8754 = vmatpush.bf16.msra.mxu1 %v15608_v20  ;;  %v15616_v35 = vor.u32 %v17505_v14, %v15615_v32  ;;  %v15223_v39 = vld [vmem:[#allocation2 + $0x18] sm:$0xf]  ;;  %15982 = vmatmul.msk.bf16.vlgmr.msrb.gmra.mxu3 %vm128_vm9, %v18305_v43  ;;  %v15628_v27 = vor.u32 %v17457_v37, %v15625_v38  ;;  %v17407_v40 = vld [vmem:[#allocation2 + $0x19c] sm:$0xf0]  ;;  %v15623_v18 = vld [vmem:[#allocation2 + $0x330] sm:$0xf] }
0x175f   :  { %8767 = vmatpush.bf16.msra.mxu3 %v15612_v4  ;;  %15984 = vmatmul.msk.bf16.vlgmr.msrb.gmra.mxu2 %vm128_vm9, %v18305_v43  ;;  %v17506_v30 = vld [vmem:[#allocation2 + $0x4b4] sm:$0xf0]  ;;  %v17359_v42 = vld [vmem:[#allocation2 + $0x24] sm:$0xf]  ;;  %v15233_v44 = vld [vmem:[#allocation2 + $0x1a8] sm:$0xf0]  ;;  %v15224_v47 = vor.u32 %v17407_v40, %v15223_v39 }
0x1760   :  { %8793 = vmatpush.bf16.msra.mxu2 %v15620_v2  ;;  %8729 = vmatpush.bf16.msrb.mxu0 %v15208_v23  ;;  %v15624_v41 = vor.u32 %v17506_v30, %v15623_v18  ;;  %v17458_v33 = vld [vmem:[#allocation2 + $0x33c] sm:$0xf]  ;;  %v15633_v45 = vld [vmem:[#allocation2 + $0x4c0] sm:$0xf0]  ;;  %v15231_v46 = vld [vmem:[#allocation2 + $0x20] sm:$0xf]  ;;  %v15236_v54 = vor.u32 %v17359_v42, %v15233_v44 }
0x1761   :  { %v17408_v48 = vld [vmem:[#allocation2 + $0x1a4] sm:$0xf0]  ;;  %v15636_v50 = vor.u32 %v17458_v33, %v15633_v45  ;;  %v17360_v36 = vld [vmem:[#allocation2 + $0x2c] sm:$0xf]  ;;  %v15241_v51 = vld [vmem:[#allocation2 + $0x1b0] sm:$0xf0] }
0x1762   :  { %8755 = vmatpush.bf16.msra.mxu1 %v15216_v29  ;;  %v15631_v53 = vld [vmem:[#allocation2 + $0x338] sm:$0xf]  ;;  %v17507_v56 = vld [vmem:[#allocation2 + $0x4bc] sm:$0xf0]  ;;  %v15232_v57 = vor.u32 %v17408_v48, %v15231_v46  ;;  %v15244_v58 = vor.u32 %v17360_v36, %v15241_v51  ;;  %v15239_v61 = vld [vmem:[#allocation2 + $0x28] sm:$0xf] }
0x1763   :  { %8768 = vmatpush.bf16.msra.mxu3 %v15220_v28  ;;  %15983 = vmatmul.msk.bf16.vlgmr.msrb.gmra.mxu0 %vm128_vm9, %v18305_v43  ;;  %v15632_v60 = vor.u32 %v17507_v56, %v15631_v53  ;;  %v17409_v62 = vld [vmem:[#allocation2 + $0x1ac] sm:$0xf0]  ;;  %v17459_v63 = vld [vmem:[#allocation2 + $0x344] sm:$0xf]  ;;  %v15641_v5 = vld [vmem:[#allocation2 + $0x4c8] sm:$0xf0] }
0x1764   :  { %8794 = vmatpush.bf16.msra.mxu2 %v15228_v34  ;;  %8780 = vmatpush.bf16.msra.mxu0 %v15616_v35  ;;  %v15240_v49 = vor.u32 %v17409_v62, %v15239_v61  ;;  %v15639_v52 = vld [vmem:[#allocation2 + $0x340] sm:$0xf]  ;;  %v17508_v6 = vld [vmem:[#allocation2 + $0x4c4] sm:$0xf0]  ;;  %v17460_v3 = vld [vmem:[#allocation2 + $0x34c] sm:$0xf]  ;;  %v15644_v7 = vor.u32 %v17459_v63, %v15641_v5 }
0x1765   :  { %v15649_v55 = vld [vmem:[#allocation2 + $0x4d0] sm:$0xf0]  ;;  %v15640_v9 = vor.u32 %v17508_v6, %v15639_v52  ;;  %v15249_v11 = vld [vmem:[#allocation2 + $0x1b8] sm:$0xf0]  ;;  %v15247_v1 = vld [vmem:[#allocation2 + $0x30] sm:$0xf] }
0x1766   :  { %8806 = vmatpush.bf16.msrb.mxu1 %v15624_v41  ;;  %v17361_v10 = vld [vmem:[#allocation2 + $0x34] sm:$0xf]  ;;  %v15652_v0 = vor.u32 %v17460_v3, %v15649_v55  ;;  %v17410_v13 = vld [vmem:[#allocation2 + $0x1b4] sm:$0xf0]  ;;  %v17362_v15 = vld [vmem:[#allocation2 + $0x3c] sm:$0xf] }
0x1767   :  { %8819 = vmatpush.bf16.msrb.mxu3 %v15628_v27  ;;  %v15257_v8 = vld [vmem:[#allocation2 + $0x1c0] sm:$0xf0]  ;;  %v15647_v16 = vld [vmem:[#allocation2 + $0x348] sm:$0xf]  ;;  %v17509_v4 = vld [vmem:[#allocation2 + $0x4cc] sm:$0xf0]  ;;  %v15252_v17 = vor.u32 %v17361_v10, %v15249_v11  ;;  %v15248_v19 = vor.u32 %v17410_v13, %v15247_v1 }
0x1768   :  { %8845 = vmatpush.bf16.msrb.mxu2 %v15636_v50  ;;  %8781 = vmatpush.bf16.msra.mxu0 %v15224_v47  ;;  %v15260_v59 = vor.u32 %v17362_v15, %v15257_v8  ;;  %v15648_v20 = vor.u32 %v17509_v4, %v15647_v16  ;;  %v15255_v21 = vld [vmem:[#allocation2 + $0x38] sm:$0xf]  ;;  %v17411_v22 = vld [vmem:[#allocation2 + $0x1bc] sm:$0xf0]  ;;  %v17461_v23 = vld [vmem:[#allocation2 + $0x354] sm:$0xf] }
0x1769   :  { %v15256_v12 = vor.u32 %v17411_v22, %v15255_v21  ;;  %v15657_v2 = vld [vmem:[#allocation2 + $0x4d8] sm:$0xf0]  ;;  %v15655_v24 = vld [vmem:[#allocation2 + $0x350] sm:$0xf]  ;;  %v17510_v25 = vld [vmem:[#allocation2 + $0x4d4] sm:$0xf0] }
0x176a   :  { %8807 = vmatpush.bf16.msrb.mxu1 %v15232_v57  ;;  %v17462_v26 = vld [vmem:[#allocation2 + $0x35c] sm:$0xf]  ;;  %v15665_v28 = vld [vmem:[#allocation2 + $0x4e0] sm:$0xf0]  ;;  %v15660_v29 = vor.u32 %v17461_v23, %v15657_v2  ;;  %v15656_v31 = vor.u32 %v17510_v25, %v15655_v24  ;;  %v15265_v14 = vld [vmem:[#allocation2 + $0x1c8] sm:$0xf0] }
0x176b   :  { %8820 = vmatpush.bf16.msrb.mxu3 %v15236_v54  ;;  %v17363_v32 = vld [vmem:[#allocation2 + $0x44] sm:$0xf]  ;;  %v15668_v34 = vor.u32 %v17462_v26, %v15665_v28  ;;  %v15263_v35 = vld [vmem:[#allocation2 + $0x40] sm:$0xf]  ;;  %v17412_v37 = vld [vmem:[#allocation2 + $0x1c4] sm:$0xf0] }
0x176c   :  { %8832 = vmatpush.bf16.msrb.mxu0 %v15632_v60  ;;  %8846 = vmatpush.bf16.msrb.mxu2 %v15244_v58  ;;  %v17364_v38 = vld [vmem:[#allocation2 + $0x4c] sm:$0xf]  ;;  %v15273_v39 = vld [vmem:[#allocation2 + $0x1d0] sm:$0xf0]  ;;  %v15663_v27 = vld [vmem:[#allocation2 + $0x358] sm:$0xf]  ;;  %v15268_v18 = vor.u32 %v17363_v32, %v15265_v14  ;;  %v15264_v30 = vor.u32 %v17412_v37, %v15263_v35 }
0x176d   :  { %15985 = vmatmul.msk.bf16.vlgmr.msra.gmra.mxu1 %vm128_vm9, %v18305_v43  ;;  %v17511_v40 = vld [vmem:[#allocation2 + $0x4dc] sm:$0xf0]  ;;  %v15276_v41 = vor.u32 %v17364_v38, %v15273_v39  ;;  %v15271_v44 = vld [vmem:[#allocation2 + $0x48] sm:$0xf]  ;;  %v17413_v33 = vld [vmem:[#allocation2 + $0x1cc] sm:$0xf0] }
0x176e   :  { %15986 = vmatmul.msk.bf16.vlgmr.msra.gmra.mxu3 %vm128_vm9, %v18305_v43  ;;  %8858 = vmatpush.bf16.msra.mxu1 %v15640_v9  ;;  %v15664_v42 = vor.u32 %v17511_v40, %v15663_v27  ;;  %v15272_v45 = vor.u32 %v17413_v33, %v15271_v44  ;;  %v17463_v46 = vld [vmem:[#allocation2 + $0x364] sm:$0xf]  ;;  %v15673_v48 = vld [vmem:[#allocation2 + $0x4e8] sm:$0xf0]  ;;  %v15671_v47 = vld [vmem:[#allocation2 + $0x360] sm:$0xf] }
0x176f   :  { %15988 = vmatmul.msk.bf16.vlgmr.msra.gmra.mxu2 %vm128_vm9, %v18305_v43  ;;  %8871 = vmatpush.bf16.msra.mxu3 %v15644_v7  ;;  %v17512_v50 = vld [vmem:[#allocation2 + $0x4e4] sm:$0xf0]  ;;  %v17464_v36 = vld [vmem:[#allocation2 + $0x36c] sm:$0xf]  ;;  %v15681_v51 = vld [vmem:[#allocation2 + $0x4f0] sm:$0xf0]  ;;  %v15676_v53 = vor.u32 %v17463_v46, %v15673_v48 }
0x1770   :  { %8833 = vmatpush.bf16.msrb.mxu0 %v15240_v49  ;;  %8897 = vmatpush.bf16.msra.mxu2 %v15652_v0  ;;  %v15672_v54 = vor.u32 %v17512_v50, %v15671_v47  ;;  %v17365_v56 = vld [vmem:[#allocation2 + $0x54] sm:$0xf]  ;;  %v15281_v57 = vld [vmem:[#allocation2 + $0x1d8] sm:$0xf0]  ;;  %v15684_v58 = vor.u32 %v17464_v36, %v15681_v51  ;;  %v15279_v60 = vld [vmem:[#allocation2 + $0x50] sm:$0xf] }
0x1771   :  { %v17414_v61 = vld [vmem:[#allocation2 + $0x1d4] sm:$0xf0]  ;;  %v17366_v62 = vld [vmem:[#allocation2 + $0x5c] sm:$0xf]  ;;  %v15289_v49 = vld [vmem:[#allocation2 + $0x1e0] sm:$0xf0]  ;;  %v15284_v52 = vor.u32 %v17365_v56, %v15281_v57 }
0x1772   :  { %8859 = vmatpush.bf16.msra.mxu1 %v15248_v19  ;;  %v15679_v63 = vld [vmem:[#allocation2 + $0x368] sm:$0xf]  ;;  %v17513_v5 = vld [vmem:[#allocation2 + $0x4ec] sm:$0xf0]  ;;  %v15280_v6 = vor.u32 %v17414_v61, %v15279_v60  ;;  %v15292_v3 = vor.u32 %v17366_v62, %v15289_v49  ;;  %v15287_v7 = vld [vmem:[#allocation2 + $0x58] sm:$0xf] }
0x1773   :  { %15987 = vmatmul.msk.bf16.vlgmr.msra.gmra.mxu0 %vm128_vm9, %v18305_v43  ;;  %8872 = vmatpush.bf16.msra.mxu3 %v15252_v17  ;;  %v15680_v55 = vor.u32 %v17513_v5, %v15679_v63  ;;  %v17415_v9 = vld [vmem:[#allocation2 + $0x1dc] sm:$0xf0]  ;;  %v17465_v11 = vld [vmem:[#allocation2 + $0x374] sm:$0xf]  ;;  %v15689_v0 = vld [vmem:[#allocation2 + $0x4f8] sm:$0xf0] }
0x1774   :  { %8898 = vmatpush.bf16.msra.mxu2 %v15260_v59  ;;  %8884 = vmatpush.bf16.msra.mxu0 %v15648_v20  ;;  %v15288_v10 = vor.u32 %v17415_v9, %v15287_v7  ;;  %v15687_v1 = vld [vmem:[#allocation2 + $0x370] sm:$0xf]  ;;  %v17514_v13 = vld [vmem:[#allocation2 + $0x4f4] sm:$0xf0]  ;;  %v17466_v15 = vld [vmem:[#allocation2 + $0x37c] sm:$0xf]  ;;  %v15692_v16 = vor.u32 %v17465_v11, %v15689_v0 }
0x1775   :  { %v15697_v8 = vld [vmem:[#allocation2 + $0x500] sm:$0xf0]  ;;  %v15688_v4 = vor.u32 %v17514_v13, %v15687_v1  ;;  %v15297_v19 = vld [vmem:[#allocation2 + $0x1e8] sm:$0xf0]  ;;  %v15295_v20 = vld [vmem:[#allocation2 + $0x60] sm:$0xf] }
0x1776   :  { %v17367_v17 = vld [vmem:[#allocation2 + $0x64] sm:$0xf]  ;;  %v15700_v59 = vor.u32 %v17466_v15, %v15697_v8  ;;  %v17416_v21 = vld [vmem:[#allocation2 + $0x1e4] sm:$0xf0]  ;;  %v17368_v22 = vld [vmem:[#allocation2 + $0x6c] sm:$0xf] }
0x1777   :  { %v15695_v23 = vld [vmem:[#allocation2 + $0x378] sm:$0xf]  ;;  %v17515_v2 = vld [vmem:[#allocation2 + $0x4fc] sm:$0xf0]  ;;  %v15300_v24 = vor.u32 %v17367_v17, %v15297_v19  ;;  %v15296_v25 = vor.u32 %v17416_v21, %v15295_v20  ;;  %v17467_v14 = vld [vmem:[#allocation2 + $0x384] sm:$0xf] }
0x1778   :  { %8885 = vmatpush.bf16.msra.mxu0 %v15256_v12  ;;  %v15305_v12 = vld [vmem:[#allocation2 + $0x1f0] sm:$0xf0]  ;;  %v15696_v28 = vor.u32 %v17515_v2, %v15695_v23  ;;  %v15703_v35 = vld [vmem:[#allocation2 + $0x380] sm:$0xf]  ;;  %v17516_v37 = vld [vmem:[#allocation2 + $0x504] sm:$0xf0] }
0x1779   :  { %v15308_v26 = vor.u32 %v17368_v22, %v15305_v12  ;;  %v17468_v38 = vld [vmem:[#allocation2 + $0x38c] sm:$0xf]  ;;  %v15713_v39 = vld [vmem:[#allocation2 + $0x510] sm:$0xf0]  ;;  %v15704_v40 = vor.u32 %v17516_v37, %v15703_v35  ;;  %v17418_v44 = vld [vmem:[#allocation2 + $0x1f4] sm:$0xf0] }
0x177a   :  { %v17370_v33 = vld [vmem:[#allocation2 + $0x7c] sm:$0xf]  ;;  %v15711_v46 = vld [vmem:[#allocation2 + $0x388] sm:$0xf]  ;;  %v17517_v48 = vld [vmem:[#allocation2 + $0x50c] sm:$0xf0] }
0x177b   :  { %v15712_v51 = vor.u32 %v17517_v48, %v15711_v46  ;;  %v17469_v57 = vld [vmem:[#allocation2 + $0x394] sm:$0xf]  ;;  %v15719_v60 = vld [vmem:[#allocation2 + $0x390] sm:$0xf]  ;;  %v17518_v61 = vld [vmem:[#allocation2 + $0x514] sm:$0xf0] }
0x177c   :  { %v17470_v62 = vld [vmem:[#allocation2 + $0x39c] sm:$0xf]  ;;  %v15729_v49 = vld [vmem:[#allocation2 + $0x520] sm:$0xf0]  ;;  %v15720_v5 = vor.u32 %v17518_v61, %v15719_v60  ;;  %v17420_v7 = vld [vmem:[#allocation2 + $0x204] sm:$0xf0] }
0x177d   :  { %15989 = vmatmul.msk.bf16.vlgmr.msrb.gmra.mxu1 %vm128_vm9, %v18305_v43  ;;  %v17372_v9 = vld [vmem:[#allocation2 + $0x8c] sm:$0xf]  ;;  %v15727_v11 = vld [vmem:[#allocation2 + $0x398] sm:$0xf]  ;;  %v17519_v0 = vld [vmem:[#allocation2 + $0x51c] sm:$0xf0] }
0x177e   :  { %15990 = vmatmul.msk.bf16.vlgmr.msrb.gmra.mxu3 %vm128_vm9, %v18305_v43  ;;  %8910 = vmatpush.bf16.msrb.mxu1 %v15656_v31  ;;  %v17417_v31 = vld [vmem:[#allocation2 + $0x1ec] sm:$0xf0]  ;;  %v15728_v8 = vor.u32 %v17519_v0, %v15727_v11  ;;  %v17471_v19 = vld [vmem:[#allocation2 + $0x3a4] sm:$0xf]  ;;  %v15735_v20 = vld [vmem:[#allocation2 + $0x3a0] sm:$0xf] }
0x177f   :  { %15992 = vmatmul.msk.bf16.vlgmr.msrb.gmra.mxu2 %vm128_vm9, %v18305_v43  ;;  %8923 = vmatpush.bf16.msrb.mxu3 %v15660_v29  ;;  %v15303_v29 = vld [vmem:[#allocation2 + $0x68] sm:$0xf]  ;;  %v17472_v22 = vld [vmem:[#allocation2 + $0x3ac] sm:$0xf]  ;;  %v15745_v12 = vld [vmem:[#allocation2 + $0x530] sm:$0xf0] }
0x1780   :  { %8949 = vmatpush.bf16.msrb.mxu2 %v15668_v34  ;;  %v15304_v32 = vor.u32 %v17417_v31, %v15303_v29  ;;  %v15705_v34 = vld [vmem:[#allocation2 + $0x508] sm:$0xf0]  ;;  %v17520_v21 = vld [vmem:[#allocation2 + $0x524] sm:$0xf0]  ;;  %v17422_v29 = vld [vmem:[#allocation2 + $0x214] sm:$0xf0] }
0x1781   :  { %v15708_v27 = vor.u32 %v17467_v14, %v15705_v34  ;;  %v15736_v2 = vor.u32 %v17520_v21, %v15735_v20  ;;  %v17374_v31 = vld [vmem:[#allocation2 + $0x9c] sm:$0xf]  ;;  %v15743_v14 = vld [vmem:[#allocation2 + $0x3a8] sm:$0xf]  ;;  %v17521_v34 = vld [vmem:[#allocation2 + $0x52c] sm:$0xf0] }
0x1782   :  { %8911 = vmatpush.bf16.msrb.mxu1 %v15264_v30  ;;  %v15313_v30 = vld [vmem:[#allocation2 + $0x1f8] sm:$0xf0]  ;;  %v17522_v46 = vld [vmem:[#allocation2 + $0x534] sm:$0xf0]  ;;  %v15361_v60 = vld [vmem:[#allocation2 + $0x228] sm:$0xf0] }
0x1783   :  { %15991 = vmatmul.msk.bf16.vlgmr.msrb.gmra.mxu0 %vm128_vm9, %v18305_v43  ;;  %8924 = vmatpush.bf16.msrb.mxu3 %v15268_v18  ;;  %v17369_v18 = vld [vmem:[#allocation2 + $0x74] sm:$0xf]  ;;  %v17474_v48 = vld [vmem:[#allocation2 + $0x3bc] sm:$0xf] }
0x1784   :  { %8950 = vmatpush.bf16.msrb.mxu2 %v15276_v41  ;;  %8936 = vmatpush.bf16.msrb.mxu0 %v15664_v42  ;;  %v15716_v41 = vor.u32 %v17468_v38, %v15713_v39  ;;  %v15311_v42 = vld [vmem:[#allocation2 + $0x70] sm:$0xf]  ;;  %v15316_v47 = vor.u32 %v17369_v18, %v15313_v30  ;;  %v7359_v38 = vld [vmem:[#allocation12 + $0xc4] sm:$0xff]  ;;  %v17423_v18 = vld [vmem:[#allocation2 + $0x21c] sm:$0xf0] }
0x1785   :  { %v15312_v50 = vor.u32 %v17418_v44, %v15311_v42  ;;  %v7372_v30 = vunpack.c.l.bf16 %v7359_v38  ;;  %v17473_v44 = vld [vmem:[#allocation2 + $0x3b4] sm:$0xf]  ;;  %v7373_v21 = vunpack.c.h.bf16 %v7359_v38  ;;  %v17476_v38 = vld [vmem:[#allocation2 + $0x3cc] sm:$0xf] }
0x1787   :  { %v7424_v42 = vperm.slane %v7372_v30, 4 }
0x1788   :  { %8937 = vmatpush.bf16.msrb.mxu0 %v15272_v45  ;;  %v15321_v45 = vld [vmem:[#allocation2 + $0x200] sm:$0xf0] }
0x1789   :  { %v15324_v36 = vor.u32 %v17370_v33, %v15321_v45  ;;  %v15753_v33 = vld [vmem:[#allocation2 + $0x538] sm:$0xf0]  ;;  %v15751_v45 = vld [vmem:[#allocation2 + $0x3b0] sm:$0xf] }
0x178d   :  { %15993 = vmatmul.msk.bf16.vlgmr.msra.gmra.mxu1 %vm128_vm9, %v18305_v43 }
0x178e   :  { %15994 = vmatmul.msk.bf16.vlgmr.msra.gmra.mxu3 %vm128_vm9, %v18305_v43  ;;  %8962 = vmatpush.bf16.msra.mxu1 %v15672_v54  ;;  %v17419_v54 = vld [vmem:[#allocation2 + $0x1fc] sm:$0xf0] }
0x178f   :  { %15996 = vmatmul.msk.bf16.vlgmr.msra.gmra.mxu2 %vm128_vm9, %v18305_v43  ;;  %8975 = vmatpush.bf16.msra.mxu3 %v15676_v53  ;;  %v15319_v53 = vld [vmem:[#allocation2 + $0x78] sm:$0xf] }
0x1790   :  { %9001 = vmatpush.bf16.msra.mxu2 %v15684_v58  ;;  %v15320_v56 = vor.u32 %v17419_v54, %v15319_v53  ;;  %v15721_v58 = vld [vmem:[#allocation2 + $0x518] sm:$0xf0]  ;;  %v7422_v53 = vperm.slane %v7372_v30, 0  ;;  %v7620_v54 = vperm.slane %v7424_v42, 0 }
0x1791   :  { %v15724_v63 = vor.u32 %v17469_v57, %v15721_v58  ;;  %v15752_v57 = vor.u32 %v17522_v46, %v15751_v45  ;;  %v17375_v58 = vld [vmem:[#allocation2 + $0xa4] sm:$0xf]  ;;  %v15377_v45 = vld [vmem:[#allocation2 + $0x238] sm:$0xf0] }
0x1792   :  { %8963 = vmatpush.bf16.msra.mxu1 %v15280_v6  ;;  %v15329_v6 = vld [vmem:[#allocation2 + $0x208] sm:$0xf0]  ;;  %v7618_v11 = vperm.slane %v7422_v53, 0  ;;  %v17525_v53 = vld [vmem:[#allocation2 + $0x54c] sm:$0xf0] }
0x1793   :  { %15995 = vmatmul.msk.bf16.vlgmr.msra.gmra.mxu0 %vm128_vm9, %v18305_v43  ;;  %8976 = vmatpush.bf16.msra.mxu3 %v15284_v52  ;;  %v17371_v52 = vld [vmem:[#allocation2 + $0x84] sm:$0xf] }
0x1794   :  { %9002 = vmatpush.bf16.msra.mxu2 %v15292_v3  ;;  %8988 = vmatpush.bf16.msra.mxu0 %v15680_v55  ;;  %v15732_v3 = vor.u32 %v17470_v62, %v15729_v49  ;;  %v15327_v55 = vld [vmem:[#allocation2 + $0x80] sm:$0xf]  ;;  %v15332_v1 = vor.u32 %v17371_v52, %v15329_v6  ;;  %v17424_v49 = vld [vmem:[#allocation2 + $0x224] sm:$0xf0]  ;;  %v15759_v52 = vld [vmem:[#allocation2 + $0x3b8] sm:$0xf] }
0x1795   :  { %v15328_v13 = vor.u32 %v17420_v7, %v15327_v55  ;;  %v15359_v62 = vld [vmem:[#allocation2 + $0xa0] sm:$0xf] }
0x1796   :  { %v17523_v6 = vld [vmem:[#allocation2 + $0x53c] sm:$0xf0] }
0x1798   :  { %8989 = vmatpush.bf16.msra.mxu0 %v15288_v10  ;;  %v15337_v10 = vld [vmem:[#allocation2 + $0x210] sm:$0xf0] }
0x1799   :  { %v15340_v15 = vor.u32 %v17372_v9, %v15337_v10  ;;  %v15364_v9 = vor.u32 %v17375_v58, %v15361_v60  ;;  %v15360_v10 = vor.u32 %v17424_v49, %v15359_v62  ;;  %v18992_v49 = vld [vmem:[#allocation12 + $0xcc] sm:$0xff] }
0x179d   :  { %15997 = vmatmul.msk.bf16.vlgmr.msrb.gmra.mxu1 %vm128_vm9, %v18305_v43 }
0x179e   :  { %15998 = vmatmul.msk.bf16.vlgmr.msrb.gmra.mxu3 %vm128_vm9, %v18305_v43  ;;  %9014 = vmatpush.bf16.msrb.mxu1 %v15688_v4  ;;  %v17421_v4 = vld [vmem:[#allocation2 + $0x20c] sm:$0xf0] }
0x179f   :  { %16000 = vmatmul.msk.bf16.vlgmr.msrb.gmra.mxu2 %vm128_vm9, %v18305_v43  ;;  %9027 = vmatpush.bf16.msrb.mxu3 %v15692_v16  ;;  %v15335_v16 = vld [vmem:[#allocation2 + $0x88] sm:$0xf] }
0x17a0   :  { %9053 = vmatpush.bf16.msrb.mxu2 %v15700_v59  ;;  %v15336_v17 = vor.u32 %v17421_v4, %v15335_v16  ;;  %v15737_v59 = vld [vmem:[#allocation2 + $0x528] sm:$0xf0]  ;;  %v15367_v16 = vld [vmem:[#allocation2 + $0xa8] sm:$0xf]  ;;  %v17425_v4 = vld [vmem:[#allocation2 + $0x22c] sm:$0xf0] }
0x17a1   :  { %v15740_v23 = vor.u32 %v17471_v19, %v15737_v59 }
0x17a2   :  { %9015 = vmatpush.bf16.msrb.mxu1 %v15296_v25  ;;  %v15345_v25 = vld [vmem:[#allocation2 + $0x218] sm:$0xf0] }
0x17a3   :  { %15999 = vmatmul.msk.bf16.vlgmr.msrb.gmra.mxu0 %vm128_vm9, %v18305_v43  ;;  %9028 = vmatpush.bf16.msrb.mxu3 %v15300_v24  ;;  %v17373_v24 = vld [vmem:[#allocation2 + $0x94] sm:$0xf] }
0x17a4   :  { %9054 = vmatpush.bf16.msrb.mxu2 %v15308_v26  ;;  %9040 = vmatpush.bf16.msrb.mxu0 %v15696_v28  ;;  %v15748_v26 = vor.u32 %v17472_v22, %v15745_v12  ;;  %v15343_v28 = vld [vmem:[#allocation2 + $0x90] sm:$0xf]  ;;  %v15348_v35 = vor.u32 %v17373_v24, %v15345_v25 }
0x17a5   :  { %v15344_v37 = vor.u32 %v17422_v29, %v15343_v28  ;;  %v7428_v29 = vperm.slane %v7373_v21, 4 }
0x17a8   :  { %9041 = vmatpush.bf16.msrb.mxu0 %v15304_v32  ;;  %v15353_v32 = vld [vmem:[#allocation2 + $0x220] sm:$0xf0] }
0x17a9   :  { %v15356_v39 = vor.u32 %v17374_v31, %v15353_v32  ;;  %v17475_v31 = vld [vmem:[#allocation2 + $0x3c4] sm:$0xf]  ;;  %v15769_v32 = vld [vmem:[#allocation2 + $0x548] sm:$0xf0] }
0x17aa   :  { %v15772_v42 = vor.u32 %v17475_v31, %v15769_v32 }
0x17ad   :  { %16001 = vmatmul.msk.bf16.vlgmr.msra.gmra.mxu1 %vm128_vm9, %v18305_v43 }
0x17ae   :  { %16002 = vmatmul.msk.bf16.vlgmr.msra.gmra.mxu3 %vm128_vm9, %v18305_v43  ;;  %9066 = vmatpush.bf16.msra.mxu1 %v15704_v40  ;;  %v15351_v40 = vld [vmem:[#allocation2 + $0x98] sm:$0xf] }
0x17af   :  { %16004 = vmatmul.msk.bf16.vlgmr.msra.gmra.mxu2 %vm128_vm9, %v18305_v43  ;;  %9079 = vmatpush.bf16.msra.mxu3 %v15708_v27  ;;  %v15744_v27 = vor.u32 %v17521_v34, %v15743_v14  ;;  %v15767_v14 = vld [vmem:[#allocation2 + $0x3c0] sm:$0xf]  ;;  %v17524_v34 = vld [vmem:[#allocation2 + $0x544] sm:$0xf0] }
0x17b0   :  { %9105 = vmatpush.bf16.msra.mxu2 %v15716_v41  ;;  %v15352_v41 = vor.u32 %v17423_v18, %v15351_v40  ;;  %v7427_v40 = vperm.slane %v7373_v21, 2  ;;  %v7429_v18 = vperm.slane %v7373_v21, 6 }
0x17b2   :  { %9067 = vmatpush.bf16.msra.mxu1 %v15312_v50 }
0x17b3   :  { %16003 = vmatmul.msk.bf16.vlgmr.msra.gmra.mxu0 %vm128_vm9, %v18305_v43  ;;  %9080 = vmatpush.bf16.msra.mxu3 %v15316_v47  ;;  %v15761_v47 = vld [vmem:[#allocation2 + $0x540] sm:$0xf0] }
0x17b4   :  { %9106 = vmatpush.bf16.msra.mxu2 %v15324_v36  ;;  %9092 = vmatpush.bf16.msra.mxu0 %v15712_v51  ;;  %v7423_v36 = vperm.slane %v7372_v30, 2  ;;  %v7425_v51 = vperm.slane %v7372_v30, 6  ;;  %v15764_v61 = vor.u32 %v17474_v48, %v15761_v47  ;;  %v7426_v30 = vperm.slane %v7373_v21, 0  ;;  %v15375_v48 = vld [vmem:[#allocation2 + $0xb0] sm:$0xf] }
0x17b5   :  { %v17426_v47 = vld [vmem:[#allocation2 + $0x234] sm:$0xf0]  ;;  %v15785_v21 = vld [vmem:[#allocation2 + $0x558] sm:$0xf0] }
0x17b6   :  { %v7621_v55 = vperm.slane %v7425_v51, 0  ;;  %v15775_v51 = vld [vmem:[#allocation2 + $0x3c8] sm:$0xf]  ;;  %v15376_v60 = vor.u32 %v17426_v47, %v15375_v48 }
0x17b8   :  { %9093 = vmatpush.bf16.msra.mxu0 %v15320_v56  ;;  %v15756_v56 = vor.u32 %v17473_v44, %v15753_v33  ;;  %v15768_v44 = vor.u32 %v17524_v34, %v15767_v14  ;;  %v17377_v33 = vld [vmem:[#allocation2 + $0xb4] sm:$0xf] }
0x17b9   :  { %v15380_v58 = vor.u32 %v17377_v33, %v15377_v45 }
0x17bd   :  { %16005 = vmatmul.msk.bf16.vlgmr.msrb.gmra.mxu1 %vm128_vm9, %v18305_v43 }
0x17be   :  { %16006 = vmatmul.msk.bf16.vlgmr.msrb.gmra.mxu3 %vm128_vm9, %v18305_v43  ;;  %9118 = vmatpush.bf16.msrb.mxu1 %v15720_v5  ;;  %v15369_v5 = vld [vmem:[#allocation2 + $0x230] sm:$0xf0] }
0x17bf   :  { %16008 = vmatmul.msk.bf16.vlgmr.msrb.gmra.mxu2 %vm128_vm9, %v18305_v43  ;;  %9131 = vmatpush.bf16.msrb.mxu3 %v15724_v63  ;;  %v17376_v63 = vld [vmem:[#allocation2 + $0xac] sm:$0xf] }
0x17c0   :  { %9157 = vmatpush.bf16.msrb.mxu2 %v15732_v3  ;;  %v7619_v3 = vperm.slane %v7423_v36, 0  ;;  %v15385_v36 = vld [vmem:[#allocation2 + $0x240] sm:$0xf0] }
0x17c2   :  { %9119 = vmatpush.bf16.msrb.mxu1 %v15328_v13  ;;  %v15760_v13 = vor.u32 %v17523_v6, %v15759_v52 }
0x17c3   :  { %16007 = vmatmul.msk.bf16.vlgmr.msrb.gmra.mxu0 %vm128_vm9, %v18305_v43  ;;  %9132 = vmatpush.bf16.msrb.mxu3 %v15332_v1  ;;  %v15372_v1 = vor.u32 %v17376_v63, %v15369_v5  ;;  %v15776_v5 = vor.u32 %v17525_v53, %v15775_v51 }
0x17c4   :  { %9158 = vmatpush.bf16.msrb.mxu2 %v15340_v15  ;;  %9144 = vmatpush.bf16.msrb.mxu0 %v15728_v8 }
0x17c8   :  { %9145 = vmatpush.bf16.msrb.mxu0 %v15336_v17 }
0x17cd   :  { %16009 = vmatmul.msk.bf16.vlgmr.msra.gmra.mxu1 %vm128_vm9, %v18305_v43 }
0x17ce   :  { %16010 = vmatmul.msk.bf16.vlgmr.msra.gmra.mxu3 %vm128_vm9, %v18305_v43  ;;  %9170 = vmatpush.bf16.msra.mxu1 %v15736_v2  ;;  %v15368_v2 = vor.u32 %v17425_v4, %v15367_v16 }
0x17cf   :  { %16012 = vmatmul.msk.bf16.vlgmr.msra.gmra.mxu2 %vm128_vm9, %v18305_v43  ;;  %9183 = vmatpush.bf16.msra.mxu3 %v15740_v23 }
0x17d0   :  { %9209 = vmatpush.bf16.msra.mxu2 %v15748_v26 }
0x17d2   :  { %9171 = vmatpush.bf16.msra.mxu1 %v15344_v37 }
0x17d3   :  { %16011 = vmatmul.msk.bf16.vlgmr.msra.gmra.mxu0 %vm128_vm9, %v18305_v43  ;;  %9184 = vmatpush.bf16.msra.mxu3 %v15348_v35 }
0x17d4   :  { %9210 = vmatpush.bf16.msra.mxu2 %v15356_v39  ;;  %9196 = vmatpush.bf16.msra.mxu0 %v15744_v27  ;;  %v15777_v39 = vld [vmem:[#allocation2 + $0x550] sm:$0xf0] }
0x17d5   :  { %v15780_v46 = vor.u32 %v17476_v38, %v15777_v39  ;;  %v15391_v39 = vld [vmem:[#allocation2 + $0xc0] sm:$0xf] }
0x17d8   :  { %9197 = vmatpush.bf16.msra.mxu0 %v15352_v41  ;;  %v7624_v41 = vperm.slane %v7428_v29, 0 }
0x17da   :  { %v8705_v50 = vpop.f32.mrf.mxu1 }
0x17db   :  { %v8706_v22 = vadd.f32 %v8705_v50, %v7618_v11  ;;  %v17378_v50 = vld [vmem:[#allocation2 + $0xbc] sm:$0xf] }
0x17dc   :  { %v15388_v63 = vor.u32 %v17378_v50, %v15385_v36 }
0x17dd   :  { %16013 = vmatmul.msk.bf16.vlgmr.msrb.gmra.mxu1 %vm128_vm9, %v18305_v43 }
0x17de   :  { %16014 = vmatmul.msk.bf16.vlgmr.msrb.gmra.mxu3 %vm128_vm9, %v18305_v43  ;;  %9222 = vmatpush.bf16.msrb.mxu1 %v15752_v57 }
0x17df   :  { %16016 = vmatmul.msk.bf16.vlgmr.msrb.gmra.mxu2 %vm128_vm9, %v18305_v43  ;;  %9235 = vmatpush.bf16.msrb.mxu3 %v15756_v56  ;;  %v7625_v56 = vperm.slane %v7429_v18, 0  ;;  %v15401_v18 = vld [vmem:[#allocation2 + $0x250] sm:$0xf0] }
0x17e0   :  { %v8731_v7 = vpop.f32.mrf.mxu0  ;;  %9261 = vmatpush.bf16.msrb.mxu2 %v15764_v61  ;;  %v7622_v61 = vperm.slane %v7426_v30, 0  ;;  %v15791_v30 = vld [vmem:[#allocation2 + $0x3d8] sm:$0xf] }
0x17e1   :  { %v8732_v0 = vadd.f32 %v8731_v7, %v7620_v54  ;;  %v8718_v15 = vpop.f32.mrf.mxu3  ;;  %v7623_v54 = vperm.slane %v7427_v40, 0  ;;  %v17380_v40 = vld [vmem:[#allocation2 + $0xcc] sm:$0xf] }
0x17e2   :  { %v8744_v8 = vpop.f32.mrf.mxu2  ;;  %v8719_v17 = vadd.f32 %v8718_v15, %v7619_v3  ;;  %v8707_v20 = vpop.f32.mrf.mxu1  ;;  %9223 = vmatpush.bf16.msrb.mxu1 %v15360_v10  ;;  %v15383_v3 = vld [vmem:[#allocation2 + $0xb8] sm:$0xf]  ;;  %v15404_v50 = vor.u32 %v17380_v40, %v15401_v18 }
0x17e3   :  { %v10069_v19 = vrot.slane %v8732_v0, 4  ;;  %v8745_v59 = vadd.f32 %v8744_v8, %v7621_v55  ;;  %16015 = vmatmul.msk.bf16.vlgmr.msrb.gmra.mxu0 %vm128_vm9, %v18305_v43  ;;  %9236 = vmatpush.bf16.msrb.mxu3 %v15364_v9  ;;  %v17427_v55 = vld [vmem:[#allocation2 + $0x23c] sm:$0xf0]  ;;  %v7374_v0 = vunpack.c.l.bf16 %v18992_v49  ;;  %v17477_v20 = vld [vmem:[#allocation2 + $0x3d4] sm:$0xf] }
0x17e4   :  { %v10068_v12 = vrot.slane %v8719_v17, 6  ;;  %9262 = vmatpush.bf16.msrb.mxu2 %v15372_v1  ;;  %9248 = vmatpush.bf16.msrb.mxu0 %v15760_v13  ;;  %v15384_v8 = vor.u32 %v17427_v55, %v15383_v3  ;;  %v15788_v14 = vor.u32 %v17477_v20, %v15785_v21 }
0x17e5   :  { %v10070_v23 = vrot.slane %v8745_v59, 2  ;;  %v7432_v59 = vperm.slane %v7374_v0, 4  ;;  %v7433_v29 = vperm.slane %v7374_v0, 6  ;;  %v7430_v31 = vperm.slane %v7374_v0, 0 }
0x17e6   :  { %v10141_v24 = vsel %vm3898_vm4, %v8706_v22, %v10068_v12  ;;  %v15783_v22 = vld [vmem:[#allocation2 + $0x3d0] sm:$0xf]  ;;  %v17526_v12 = vld [vmem:[#allocation2 + $0x554] sm:$0xf0] }
0x17e7   :  { %v10142_v25 = vsel %vm3900_vm12, %v10069_v19, %v10070_v23  ;;  %v7628_v32 = vperm.slane %v7432_v59, 0  ;;  %v15784_v34 = vor.u32 %v17526_v12, %v15783_v22  ;;  %v7626_v48 = vperm.slane %v7430_v31, 0  ;;  %v17381_v12 = vld [vmem:[#allocation2 + $0xd4] sm:$0xf]  ;;  %v17529_v31 = vld [vmem:[#allocation2 + $0x56c] sm:$0xf0] }
0x17e8   :  { %v10143_v26 = vsel %vm3902_vm13, %v10141_v24, %v10142_v25  ;;  %v8733_v28 = vpop.f32.mrf.mxu0  ;;  %9249 = vmatpush.bf16.msrb.mxu0 %v15368_v2  ;;  %v17478_v24 = vld [vmem:[#allocation2 + $0x3dc] sm:$0xf]  ;;  %v15793_v25 = vld [vmem:[#allocation2 + $0x560] sm:$0xf0] }
0x17e9   :  { %10239 = vst [vmem:[#allocation13 + $0x188] sm:$0xff] %v10143_v26  ;;  %v8720_v35 = vpop.f32.mrf.mxu3  ;;  %v7431_v28 = vperm.slane %v7374_v0, 2  ;;  %v15796_v38 = vor.u32 %v17478_v24, %v15793_v25  ;;  %v15801_v0 = vld [vmem:[#allocation2 + $0x568] sm:$0xf0]  ;;  %v15407_v24 = vld [vmem:[#allocation2 + $0xd0] sm:$0xf] }
0x17ea   :  { %v8746_v37 = vpop.f32.mrf.mxu2  ;;  %v8757_v27 = vpop.f32.mrf.mxu1  ;;  %v17379_v35 = vld [vmem:[#allocation2 + $0xc4] sm:$0xf]  ;;  %v17430_v25 = vld [vmem:[#allocation2 + $0x254] sm:$0xf0] }
0x17eb   :  { %v8758_v1 = vadd.f32 %v8757_v27, %v7622_v61  ;;  %v15393_v37 = vld [vmem:[#allocation2 + $0x248] sm:$0xf0]  ;;  %v17428_v27 = vld [vmem:[#allocation2 + $0x244] sm:$0xf0] }
0x17ec   :  { %v15396_v45 = vor.u32 %v17379_v35, %v15393_v37  ;;  %v15408_v37 = vor.u32 %v17430_v25, %v15407_v24 }
0x17ed   :  { %16017 = vmatmul.msk.bf16.vlgmr.msra.gmra.mxu1 %vm128_vm9, %v18305_v43 }
0x17ee   :  { %16018 = vmatmul.msk.bf16.vlgmr.msra.gmra.mxu3 %vm128_vm9, %v18305_v43  ;;  %9274 = vmatpush.bf16.msra.mxu1 %v15768_v44  ;;  %v7629_v44 = vperm.slane %v7433_v29, 0  ;;  %v15807_v29 = vld [vmem:[#allocation2 + $0x3e8] sm:$0xf] }
0x17ef   :  { %16020 = vmatmul.msk.bf16.vlgmr.msra.gmra.mxu2 %vm128_vm9, %v18305_v43  ;;  %9287 = vmatpush.bf16.msra.mxu3 %v15772_v42  ;;  %v7627_v42 = vperm.slane %v7431_v28, 0  ;;  %v15417_v28 = vld [vmem:[#allocation2 + $0x260] sm:$0xf0]  ;;  %v15808_v18 = vor.u32 %v17529_v31, %v15807_v29 }
0x17f0   :  { %v8783_v57 = vpop.f32.mrf.mxu0  ;;  %9313 = vmatpush.bf16.msra.mxu2 %v15780_v46  ;;  %v15392_v46 = vor.u32 %v17428_v27, %v15391_v39  ;;  %v19018_v27 = vld [vmem:[#allocation12 + $0xd4] sm:$0xff] }
0x17f1   :  { %v8784_v62 = vadd.f32 %v8783_v57, %v7624_v41  ;;  %v8770_v52 = vpop.f32.mrf.mxu3  ;;  %v17527_v41 = vld [vmem:[#allocation2 + $0x55c] sm:$0xf0] }
0x17f2   :  { %v8796_v6 = vpop.f32.mrf.mxu2  ;;  %v8771_v7 = vadd.f32 %v8770_v52, %v7623_v54  ;;  %v8759_v11 = vpop.f32.mrf.mxu1  ;;  %9275 = vmatpush.bf16.msra.mxu1 %v15376_v60  ;;  %v15792_v36 = vor.u32 %v17527_v41, %v15791_v30  ;;  %v15399_v54 = vld [vmem:[#allocation2 + $0xc8] sm:$0xf] }
0x17f3   :  { %v10072_v9 = vrot.slane %v8784_v62, 4  ;;  %v8797_v10 = vadd.f32 %v8796_v6, %v7625_v56  ;;  %16019 = vmatmul.msk.bf16.vlgmr.msra.gmra.mxu0 %vm128_vm9, %v18305_v43  ;;  %9288 = vmatpush.bf16.msra.mxu3 %v15380_v58  ;;  %v17429_v56 = vld [vmem:[#allocation2 + $0x24c] sm:$0xf0]  ;;  %v7375_v62 = vunpack.c.h.bf16 %v18992_v49  ;;  %v17479_v11 = vld [vmem:[#allocation2 + $0x3e4] sm:$0xf] }
0x17f4   :  { %v10071_v13 = vrot.slane %v8771_v7, 6  ;;  %9314 = vmatpush.bf16.msra.mxu2 %v15388_v63  ;;  %9300 = vmatpush.bf16.msra.mxu0 %v15776_v5  ;;  %v15400_v6 = vor.u32 %v17429_v56, %v15399_v54  ;;  %v15799_v49 = vld [vmem:[#allocation2 + $0x3e0] sm:$0xf]  ;;  %v15804_v21 = vor.u32 %v17479_v11, %v15801_v0 }
0x17f5   :  { %v10073_v15 = vrot.slane %v8797_v10, 2  ;;  %v7436_v10 = vperm.slane %v7375_v62, 4  ;;  %v7434_v59 = vperm.slane %v7375_v62, 0 }
0x17f6   :  { %v10144_v16 = vsel %vm3898_vm4, %v8758_v1, %v10071_v13  ;;  %v17528_v1 = vld [vmem:[#allocation2 + $0x564] sm:$0xf0] }
0x17f7   :  { %v10145_v4 = vsel %vm3900_vm12, %v10072_v9, %v10073_v15  ;;  %v7632_v20 = vperm.slane %v7436_v10, 0  ;;  %v15800_v22 = vor.u32 %v17528_v1, %v15799_v49 }
0x17f8   :  { %v10146_v17 = vsel %vm3902_vm13, %v10144_v16, %v10145_v4  ;;  %v8785_v19 = vpop.f32.mrf.mxu0  ;;  %9301 = vmatpush.bf16.msra.mxu0 %v15384_v8  ;;  %v17480_v8 = vld [vmem:[#allocation2 + $0x3ec] sm:$0xf]  ;;  %v15809_v16 = vld [vmem:[#allocation2 + $0x570] sm:$0xf0] }
0x17f9   :  { %10240 = vst [vmem:[#allocation13 + $0x190] sm:$0xff] %v10146_v17  ;;  %v8772_v23 = vpop.f32.mrf.mxu3  ;;  %v7435_v17 = vperm.slane %v7375_v62, 2  ;;  %v7437_v19 = vperm.slane %v7375_v62, 6  ;;  %v15817_v62 = vld [vmem:[#allocation2 + $0x578] sm:$0xf0] }
0x17fa   :  { %v8798_v2 = vpop.f32.mrf.mxu2  ;;  %v8809_v26 = vpop.f32.mrf.mxu1  ;;  %v15409_v23 = vld [vmem:[#allocation2 + $0x258] sm:$0xf0] }
0x17fb   :  { %v8810_v63 = vadd.f32 %v8809_v26, %v7626_v48  ;;  %v15812_v2 = vor.u32 %v17480_v8, %v15809_v16  ;;  %v17382_v26 = vld [vmem:[#allocation2 + $0xdc] sm:$0xf]  ;;  %v15412_v35 = vor.u32 %v17381_v12, %v15409_v23  ;;  %v15423_v16 = vld [vmem:[#allocation2 + $0xe0] sm:$0xf] }
0x17fc   :  { %v15420_v40 = vor.u32 %v17382_v26, %v15417_v28 }
0x17fd   :  { %16021 = vmatmul.msk.bf16.vlgmr.msrb.gmra.mxu1 %vm128_vm9, %v18305_v43 }
0x17fe   :  { %16022 = vmatmul.msk.bf16.vlgmr.msrb.gmra.mxu3 %vm128_vm9, %v18305_v43  ;;  %9326 = vmatpush.bf16.msrb.mxu1 %v15784_v34 }
0x17ff   :  { %16024 = vmatmul.msk.bf16.vlgmr.msrb.gmra.mxu2 %vm128_vm9, %v18305_v43  ;;  %9339 = vmatpush.bf16.msrb.mxu3 %v15788_v14  ;;  %v7633_v14 = vperm.slane %v7437_v19, 0  ;;  %v15433_v19 = vld [vmem:[#allocation2 + $0x270] sm:$0xf0] }
0x1800   :  { %v8835_v33 = vpop.f32.mrf.mxu0  ;;  %9365 = vmatpush.bf16.msrb.mxu2 %v15796_v38  ;;  %v7630_v38 = vperm.slane %v7434_v59, 0  ;;  %v15823_v59 = vld [vmem:[#allocation2 + $0x3f8] sm:$0xf] }
0x1801   :  { %v8836_v47 = vadd.f32 %v8835_v33, %v7628_v32  ;;  %v8822_v51 = vpop.f32.mrf.mxu3  ;;  %v7631_v32 = vperm.slane %v7435_v17, 0  ;;  %v17384_v17 = vld [vmem:[#allocation2 + $0xec] sm:$0xf] }
0x1802   :  { %v8848_v53 = vpop.f32.mrf.mxu2  ;;  %v8823_v57 = vadd.f32 %v8822_v51, %v7627_v42  ;;  %v8811_v61 = vpop.f32.mrf.mxu1  ;;  %9327 = vmatpush.bf16.msrb.mxu1 %v15392_v46  ;;  %v15415_v42 = vld [vmem:[#allocation2 + $0xd8] sm:$0xf]  ;;  %v15436_v26 = vor.u32 %v17384_v17, %v15433_v19 }
0x1803   :  { %v10075_v58 = vrot.slane %v8836_v47, 4  ;;  %v8849_v60 = vadd.f32 %v8848_v53, %v7629_v44  ;;  %16023 = vmatmul.msk.bf16.vlgmr.msrb.gmra.mxu0 %vm128_vm9, %v18305_v43  ;;  %9340 = vmatpush.bf16.msrb.mxu3 %v15396_v45  ;;  %v17431_v44 = vld [vmem:[#allocation2 + $0x25c] sm:$0xf0]  ;;  %v7376_v47 = vunpack.c.l.bf16 %v19018_v27  ;;  %v17481_v61 = vld [vmem:[#allocation2 + $0x3f4] sm:$0xf] }
0x1804   :  { %v10074_v5 = vrot.slane %v8823_v57, 6  ;;  %9366 = vmatpush.bf16.msrb.mxu2 %v15404_v50  ;;  %9352 = vmatpush.bf16.msrb.mxu0 %v15792_v36  ;;  %v15416_v53 = vor.u32 %v17431_v44, %v15415_v42  ;;  %v15820_v49 = vor.u32 %v17481_v61, %v15817_v62 }
0x1805   :  { %v10076_v52 = vrot.slane %v8849_v60, 2  ;;  %v7440_v60 = vperm.slane %v7376_v47, 4  ;;  %v7441_v10 = vperm.slane %v7376_v47, 6  ;;  %v7438_v11 = vperm.slane %v7376_v47, 0 }
0x1806   :  { %v10147_v3 = vsel %vm3898_vm4, %v8810_v63, %v10074_v5  ;;  %v15815_v63 = vld [vmem:[#allocation2 + $0x3f0] sm:$0xf]  ;;  %v17530_v5 = vld [vmem:[#allocation2 + $0x574] sm:$0xf0] }
0x1807   :  { %v10148_v55 = vsel %vm3900_vm12, %v10075_v58, %v10076_v52  ;;  %v7636_v0 = vperm.slane %v7440_v60, 0  ;;  %v15816_v1 = vor.u32 %v17530_v5, %v15815_v63  ;;  %v7634_v24 = vperm.slane %v7438_v11, 0  ;;  %v17385_v5 = vld [vmem:[#allocation2 + $0xf4] sm:$0xf]  ;;  %v17533_v11 = vld [vmem:[#allocation2 + $0x58c] sm:$0xf0] }
0x1808   :  { %v10149_v7 = vsel %vm3902_vm13, %v10147_v3, %v10148_v55  ;;  %v8837_v9 = vpop.f32.mrf.mxu0  ;;  %9353 = vmatpush.bf16.msrb.mxu0 %v15400_v6  ;;  %v17482_v3 = vld [vmem:[#allocation2 + $0x3fc] sm:$0xf]  ;;  %v15825_v55 = vld [vmem:[#allocation2 + $0x580] sm:$0xf0] }
0x1809   :  { %10241 = vst [vmem:[#allocation13 + $0x198] sm:$0xff] %v10149_v7  ;;  %v8824_v13 = vpop.f32.mrf.mxu3  ;;  %v7439_v9 = vperm.slane %v7376_v47, 2  ;;  %v15828_v8 = vor.u32 %v17482_v3, %v15825_v55  ;;  %v15833_v47 = vld [vmem:[#allocation2 + $0x588] sm:$0xf0]  ;;  %v15439_v3 = vld [vmem:[#allocation2 + $0xf0] sm:$0xf] }
0x180a   :  { %v8850_v15 = vpop.f32.mrf.mxu2  ;;  %v8861_v4 = vpop.f32.mrf.mxu1  ;;  %v17383_v13 = vld [vmem:[#allocation2 + $0xe4] sm:$0xf]  ;;  %v17434_v55 = vld [vmem:[#allocation2 + $0x274] sm:$0xf0] }
0x180b   :  { %v8862_v50 = vadd.f32 %v8861_v4, %v7630_v38  ;;  %v15425_v15 = vld [vmem:[#allocation2 + $0x268] sm:$0xf0]  ;;  %v17432_v4 = vld [vmem:[#allocation2 + $0x264] sm:$0xf0] }
0x180c   :  { %v15428_v23 = vor.u32 %v17383_v13, %v15425_v15  ;;  %v15440_v15 = vor.u32 %v17434_v55, %v15439_v3 }
0x180d   :  { %16025 = vmatmul.msk.bf16.vlgmr.msra.gmra.mxu1 %vm128_vm9, %v18305_v43 }
0x180e   :  { %16026 = vmatmul.msk.bf16.vlgmr.msra.gmra.mxu3 %vm128_vm9, %v18305_v43  ;;  %9378 = vmatpush.bf16.msra.mxu1 %v15800_v22  ;;  %v7637_v22 = vperm.slane %v7441_v10, 0  ;;  %v15839_v10 = vld [vmem:[#allocation2 + $0x408] sm:$0xf] }
0x180f   :  { %16028 = vmatmul.msk.bf16.vlgmr.msra.gmra.mxu2 %vm128_vm9, %v18305_v43  ;;  %9391 = vmatpush.bf16.msra.mxu3 %v15804_v21  ;;  %v7635_v21 = vperm.slane %v7439_v9, 0  ;;  %v15449_v9 = vld [vmem:[#allocation2 + $0x280] sm:$0xf0]  ;;  %v15840_v19 = vor.u32 %v17533_v11, %v15839_v10 }
0x1810   :  { %v8887_v34 = vpop.f32.mrf.mxu0  ;;  %9417 = vmatpush.bf16.msra.mxu2 %v15812_v2  ;;  %v15424_v2 = vor.u32 %v17432_v4, %v15423_v16  ;;  %v19044_v4 = vld [vmem:[#allocation12 + $0xdc] sm:$0xff] }
0x1811   :  { %v8888_v39 = vadd.f32 %v8887_v34, %v7632_v20  ;;  %v8874_v30 = vpop.f32.mrf.mxu3  ;;  %v17531_v20 = vld [vmem:[#allocation2 + $0x57c] sm:$0xf0] }
0x1812   :  { %v8900_v41 = vpop.f32.mrf.mxu2  ;;  %v8875_v33 = vadd.f32 %v8874_v30, %v7631_v32  ;;  %v8863_v48 = vpop.f32.mrf.mxu1  ;;  %9379 = vmatpush.bf16.msra.mxu1 %v15408_v37  ;;  %v15824_v28 = vor.u32 %v17531_v20, %v15823_v59  ;;  %v15431_v32 = vld [vmem:[#allocation2 + $0xe8] sm:$0xf] }
0x1813   :  { %v10078_v45 = vrot.slane %v8888_v39, 4  ;;  %v8901_v46 = vadd.f32 %v8900_v41, %v7633_v14  ;;  %16027 = vmatmul.msk.bf16.vlgmr.msra.gmra.mxu0 %vm128_vm9, %v18305_v43  ;;  %9392 = vmatpush.bf16.msra.mxu3 %v15412_v35  ;;  %v17433_v14 = vld [vmem:[#allocation2 + $0x26c] sm:$0xf0]  ;;  %v7377_v39 = vunpack.c.h.bf16 %v19018_v27  ;;  %v17483_v48 = vld [vmem:[#allocation2 + $0x404] sm:$0xf] }
0x1814   :  { %v10077_v36 = vrot.slane %v8875_v33, 6  ;;  %9418 = vmatpush.bf16.msra.mxu2 %v15420_v40  ;;  %9404 = vmatpush.bf16.msra.mxu0 %v15808_v18  ;;  %v15432_v41 = vor.u32 %v17433_v14, %v15431_v32  ;;  %v15831_v27 = vld [vmem:[#allocation2 + $0x400] sm:$0xf]  ;;  %v15836_v62 = vor.u32 %v17483_v48, %v15833_v47 }
0x1815   :  { %v10079_v51 = vrot.slane %v8901_v46, 2  ;;  %v7444_v46 = vperm.slane %v7377_v39, 4  ;;  %v7442_v60 = vperm.slane %v7377_v39, 0 }
0x1816   :  { %v10150_v54 = vsel %vm3898_vm4, %v8862_v50, %v10077_v36  ;;  %v17532_v50 = vld [vmem:[#allocation2 + $0x584] sm:$0xf0] }
0x1817   :  { %v10151_v56 = vsel %vm3900_vm12, %v10078_v45, %v10079_v51  ;;  %v7640_v61 = vperm.slane %v7444_v46, 0  ;;  %v15832_v63 = vor.u32 %v17532_v50, %v15831_v27 }
0x1818   :  { %v10152_v57 = vsel %vm3902_vm13, %v10150_v54, %v10151_v56  ;;  %v8889_v58 = vpop.f32.mrf.mxu0  ;;  %9405 = vmatpush.bf16.msra.mxu0 %v15416_v53  ;;  %v17484_v53 = vld [vmem:[#allocation2 + $0x40c] sm:$0xf]  ;;  %v15841_v54 = vld [vmem:[#allocation2 + $0x590] sm:$0xf0] }
0x1819   :  { %10242 = vst [vmem:[#allocation13 + $0x1a0] sm:$0xff] %v10152_v57  ;;  %v8876_v52 = vpop.f32.mrf.mxu3  ;;  %v7443_v57 = vperm.slane %v7377_v39, 2  ;;  %v7445_v58 = vperm.slane %v7377_v39, 6  ;;  %v15849_v39 = vld [vmem:[#allocation2 + $0x598] sm:$0xf0] }
0x181a   :  { %v8902_v6 = vpop.f32.mrf.mxu2  ;;  %v8913_v7 = vpop.f32.mrf.mxu1  ;;  %v15441_v52 = vld [vmem:[#allocation2 + $0x278] sm:$0xf0] }
0x181b   :  { %v8914_v40 = vadd.f32 %v8913_v7, %v7634_v24  ;;  %v15844_v6 = vor.u32 %v17484_v53, %v15841_v54  ;;  %v17386_v7 = vld [vmem:[#allocation2 + $0xfc] sm:$0xf]  ;;  %v15444_v13 = vor.u32 %v17385_v5, %v15441_v52  ;;  %v15455_v54 = vld [vmem:[#allocation2 + $0x100] sm:$0xf] }
0x181c   :  { %v15452_v17 = vor.u32 %v17386_v7, %v15449_v9 }
0x181d   :  { %16029 = vmatmul.msk.bf16.vlgmr.msrb.gmra.mxu1 %vm128_vm9, %v18305_v43 }
0x181e   :  { %16030 = vmatmul.msk.bf16.vlgmr.msrb.gmra.mxu3 %vm128_vm9, %v18305_v43  ;;  %9430 = vmatpush.bf16.msrb.mxu1 %v15816_v1 }
0x181f   :  { %16032 = vmatmul.msk.bf16.vlgmr.msrb.gmra.mxu2 %vm128_vm9, %v18305_v43  ;;  %9443 = vmatpush.bf16.msrb.mxu3 %v15820_v49  ;;  %v7641_v49 = vperm.slane %v7445_v58, 0  ;;  %v15465_v58 = vld [vmem:[#allocation2 + $0x290] sm:$0xf0] }
0x1820   :  { %v8939_v12 = vpop.f32.mrf.mxu0  ;;  %9469 = vmatpush.bf16.msrb.mxu2 %v15828_v8  ;;  %v7638_v8 = vperm.slane %v7442_v60, 0  ;;  %v15855_v60 = vld [vmem:[#allocation2 + $0x418] sm:$0xf] }
0x1821   :  { %v8940_v25 = vadd.f32 %v8939_v12, %v7636_v0  ;;  %v8926_v29 = vpop.f32.mrf.mxu3  ;;  %v7639_v0 = vperm.slane %v7443_v57, 0  ;;  %v17388_v57 = vld [vmem:[#allocation2 + $0x10c] sm:$0xf] }
0x1822   :  { %v8952_v31 = vpop.f32.mrf.mxu2  ;;  %v8927_v34 = vadd.f32 %v8926_v29, %v7635_v21  ;;  %v8915_v38 = vpop.f32.mrf.mxu1  ;;  %9431 = vmatpush.bf16.msrb.mxu1 %v15424_v2  ;;  %v15447_v21 = vld [vmem:[#allocation2 + $0xf8] sm:$0xf]  ;;  %v15468_v7 = vor.u32 %v17388_v57, %v15465_v58 }
0x1823   :  { %v10081_v35 = vrot.slane %v8940_v25, 4  ;;  %v8953_v37 = vadd.f32 %v8952_v31, %v7637_v22  ;;  %16031 = vmatmul.msk.bf16.vlgmr.msrb.gmra.mxu0 %vm128_vm9, %v18305_v43  ;;  %9444 = vmatpush.bf16.msrb.mxu3 %v15428_v23  ;;  %v17435_v22 = vld [vmem:[#allocation2 + $0x27c] sm:$0xf0]  ;;  %v7378_v25 = vunpack.c.l.bf16 %v19044_v4  ;;  %v17485_v38 = vld [vmem:[#allocation2 + $0x414] sm:$0xf] }
0x1824   :  { %v10080_v18 = vrot.slane %v8927_v34, 6  ;;  %9470 = vmatpush.bf16.msrb.mxu2 %v15436_v26  ;;  %9456 = vmatpush.bf16.msrb.mxu0 %v15824_v28  ;;  %v15448_v31 = vor.u32 %v17435_v22, %v15447_v21  ;;  %v15852_v27 = vor.u32 %v17485_v38, %v15849_v39 }
0x1825   :  { %v10082_v30 = vrot.slane %v8953_v37, 2  ;;  %v7448_v37 = vperm.slane %v7378_v25, 4  ;;  %v7449_v46 = vperm.slane %v7378_v25, 6  ;;  %v7446_v48 = vperm.slane %v7378_v25, 0 }
0x1826   :  { %v10153_v42 = vsel %vm3898_vm4, %v8914_v40, %v10080_v18  ;;  %v15847_v40 = vld [vmem:[#allocation2 + $0x410] sm:$0xf]  ;;  %v17534_v18 = vld [vmem:[#allocation2 + $0x594] sm:$0xf0] }
0x1827   :  { %v10154_v44 = vsel %vm3900_vm12, %v10081_v35, %v10082_v30  ;;  %v7644_v47 = vperm.slane %v7448_v37, 0  ;;  %v15848_v50 = vor.u32 %v17534_v18, %v15847_v40  ;;  %v7642_v3 = vperm.slane %v7446_v48, 0  ;;  %v17389_v18 = vld [vmem:[#allocation2 + $0x114] sm:$0xf]  ;;  %v17537_v48 = vld [vmem:[#allocation2 + $0x5ac] sm:$0xf0] }
0x1828   :  { %v10155_v33 = vsel %vm3902_vm13, %v10153_v42, %v10154_v44  ;;  %v8941_v45 = vpop.f32.mrf.mxu0  ;;  %9457 = vmatpush.bf16.msrb.mxu0 %v15432_v41  ;;  %v17486_v42 = vld [vmem:[#allocation2 + $0x41c] sm:$0xf]  ;;  %v15857_v44 = vld [vmem:[#allocation2 + $0x5a0] sm:$0xf0] }
0x1829   :  { %10243 = vst [vmem:[#allocation13 + $0x1a8] sm:$0xff] %v10155_v33  ;;  %v8928_v36 = vpop.f32.mrf.mxu3  ;;  %v7447_v45 = vperm.slane %v7378_v25, 2  ;;  %v15860_v53 = vor.u32 %v17486_v42, %v15857_v44  ;;  %v15865_v25 = vld [vmem:[#allocation2 + $0x5a8] sm:$0xf0]  ;;  %v15471_v42 = vld [vmem:[#allocation2 + $0x110] sm:$0xf] }
0x182a   :  { %v8954_v51 = vpop.f32.mrf.mxu2  ;;  %v8965_v56 = vpop.f32.mrf.mxu1  ;;  %v17387_v36 = vld [vmem:[#allocation2 + $0x104] sm:$0xf]  ;;  %v17438_v44 = vld [vmem:[#allocation2 + $0x294] sm:$0xf0] }
0x182b   :  { %v8966_v26 = vadd.f32 %v8965_v56, %v7638_v8  ;;  %v15457_v51 = vld [vmem:[#allocation2 + $0x288] sm:$0xf0]  ;;  %v17436_v56 = vld [vmem:[#allocation2 + $0x284] sm:$0xf0] }
0x182c   :  { %v15460_v52 = vor.u32 %v17387_v36, %v15457_v51  ;;  %v15472_v51 = vor.u32 %v17438_v44, %v15471_v42 }
0x182d   :  { %16033 = vmatmul.msk.bf16.vlgmr.msra.gmra.mxu1 %vm128_vm9, %v18305_v43 }
0x182e   :  { %16034 = vmatmul.msk.bf16.vlgmr.msra.gmra.mxu3 %vm128_vm9, %v18305_v43  ;;  %9482 = vmatpush.bf16.msra.mxu1 %v15832_v63  ;;  %v7645_v63 = vperm.slane %v7449_v46, 0  ;;  %v15871_v46 = vld [vmem:[#allocation2 + $0x428] sm:$0xf] }
0x182f   :  { %16036 = vmatmul.msk.bf16.vlgmr.msra.gmra.mxu2 %vm128_vm9, %v18305_v43  ;;  %9495 = vmatpush.bf16.msra.mxu3 %v15836_v62  ;;  %v7643_v62 = vperm.slane %v7447_v45, 0  ;;  %v15481_v45 = vld [vmem:[#allocation2 + $0x2a0] sm:$0xf0]  ;;  %v15872_v58 = vor.u32 %v17537_v48, %v15871_v46 }
0x1830   :  { %v8991_v1 = vpop.f32.mrf.mxu0  ;;  %9521 = vmatpush.bf16.msra.mxu2 %v15844_v6  ;;  %v15456_v6 = vor.u32 %v17436_v56, %v15455_v54  ;;  %v19070_v56 = vld [vmem:[#allocation12 + $0xe4] sm:$0xff] }
0x1831   :  { %v8992_v16 = vadd.f32 %v8991_v1, %v7640_v61  ;;  %v8978_v59 = vpop.f32.mrf.mxu3  ;;  %v17535_v61 = vld [vmem:[#allocation2 + $0x59c] sm:$0xf0] }
0x1832   :  { %v9004_v20 = vpop.f32.mrf.mxu2  ;;  %v8979_v12 = vadd.f32 %v8978_v59, %v7639_v0  ;;  %v8967_v24 = vpop.f32.mrf.mxu1  ;;  %9483 = vmatpush.bf16.msra.mxu1 %v15440_v15  ;;  %v15856_v9 = vor.u32 %v17535_v61, %v15855_v60  ;;  %v15463_v0 = vld [vmem:[#allocation2 + $0x108] sm:$0xf] }
0x1833   :  { %v10084_v23 = vrot.slane %v8992_v16, 4  ;;  %v9005_v2 = vadd.f32 %v9004_v20, %v7641_v49  ;;  %16035 = vmatmul.msk.bf16.vlgmr.msra.gmra.mxu0 %vm128_vm9, %v18305_v43  ;;  %9496 = vmatpush.bf16.msra.mxu3 %v15444_v13  ;;  %v17437_v49 = vld [vmem:[#allocation2 + $0x28c] sm:$0xf0]  ;;  %v7379_v16 = vunpack.c.h.bf16 %v19044_v4  ;;  %v17487_v24 = vld [vmem:[#allocation2 + $0x424] sm:$0xf] }
0x1834   :  { %v10083_v28 = vrot.slane %v8979_v12, 6  ;;  %9522 = vmatpush.bf16.msra.mxu2 %v15452_v17  ;;  %9508 = vmatpush.bf16.msra.mxu0 %v15840_v19  ;;  %v15464_v20 = vor.u32 %v17437_v49, %v15463_v0  ;;  %v15863_v4 = vld [vmem:[#allocation2 + $0x420] sm:$0xf]  ;;  %v15868_v39 = vor.u32 %v17487_v24, %v15865_v25 }
0x1835   :  { %v10085_v29 = vrot.slane %v9005_v2, 2  ;;  %v7452_v2 = vperm.slane %v7379_v16, 4  ;;  %v7450_v37 = vperm.slane %v7379_v16, 0 }
0x1836   :  { %v10156_v32 = vsel %vm3898_vm4, %v8966_v26, %v10083_v28  ;;  %v17536_v26 = vld [vmem:[#allocation2 + $0x5a4] sm:$0xf0] }
0x1837   :  { %v10157_v14 = vsel %vm3900_vm12, %v10084_v23, %v10085_v29  ;;  %v7648_v38 = vperm.slane %v7452_v2, 0  ;;  %v15864_v40 = vor.u32 %v17536_v26, %v15863_v4 }
0x1838   :  { %v10158_v34 = vsel %vm3902_vm13, %v10156_v32, %v10157_v14  ;;  %v8993_v35 = vpop.f32.mrf.mxu0  ;;  %9509 = vmatpush.bf16.msra.mxu0 %v15448_v31  ;;  %v17488_v31 = vld [vmem:[#allocation2 + $0x42c] sm:$0xf]  ;;  %v15873_v32 = vld [vmem:[#allocation2 + $0x5b0] sm:$0xf0] }
0x1839   :  { %10244 = vst [vmem:[#allocation13 + $0x1b0] sm:$0xff] %v10158_v34  ;;  %v8980_v30 = vpop.f32.mrf.mxu3  ;;  %v7451_v34 = vperm.slane %v7379_v16, 2  ;;  %v7453_v35 = vperm.slane %v7379_v16, 6  ;;  %v15881_v16 = vld [vmem:[#allocation2 + $0x5b8] sm:$0xf0] }
0x183a   :  { %v9006_v41 = vpop.f32.mrf.mxu2  ;;  %v9017_v33 = vpop.f32.mrf.mxu1  ;;  %v15473_v30 = vld [vmem:[#allocation2 + $0x298] sm:$0xf0] }
0x183b   :  { %v9018_v17 = vadd.f32 %v9017_v33, %v7642_v3  ;;  %v15876_v41 = vor.u32 %v17488_v31, %v15873_v32  ;;  %v17390_v33 = vld [vmem:[#allocation2 + $0x11c] sm:$0xf]  ;;  %v15476_v36 = vor.u32 %v17389_v18, %v15473_v30  ;;  %v15487_v32 = vld [vmem:[#allocation2 + $0x120] sm:$0xf] }
0x183c   :  { %v15484_v57 = vor.u32 %v17390_v33, %v15481_v45 }
0x183d   :  { %16037 = vmatmul.msk.bf16.vlgmr.msrb.gmra.mxu1 %vm128_vm9, %v18305_v43 }
0x183e   :  { %16038 = vmatmul.msk.bf16.vlgmr.msrb.gmra.mxu3 %vm128_vm9, %v18305_v43  ;;  %9534 = vmatpush.bf16.msrb.mxu1 %v15848_v50 }
0x183f   :  { %16040 = vmatmul.msk.bf16.vlgmr.msrb.gmra.mxu2 %vm128_vm9, %v18305_v43  ;;  %9547 = vmatpush.bf16.msrb.mxu3 %v15852_v27  ;;  %v7649_v27 = vperm.slane %v7453_v35, 0  ;;  %v15497_v35 = vld [vmem:[#allocation2 + $0x2b0] sm:$0xf0] }
0x1840   :  { %v9043_v5 = vpop.f32.mrf.mxu0  ;;  %9573 = vmatpush.bf16.msrb.mxu2 %v15860_v53  ;;  %v7646_v53 = vperm.slane %v7450_v37, 0  ;;  %v15887_v37 = vld [vmem:[#allocation2 + $0x438] sm:$0xf] }
0x1841   :  { %v9044_v55 = vadd.f32 %v9043_v5, %v7644_v47  ;;  %v9030_v10 = vpop.f32.mrf.mxu3  ;;  %v7647_v47 = vperm.slane %v7451_v34, 0  ;;  %v17392_v34 = vld [vmem:[#allocation2 + $0x12c] sm:$0xf] }
0x1842   :  { %v9056_v11 = vpop.f32.mrf.mxu2  ;;  %v9031_v1 = vadd.f32 %v9030_v10, %v7643_v62  ;;  %v9019_v8 = vpop.f32.mrf.mxu1  ;;  %9535 = vmatpush.bf16.msrb.mxu1 %v15456_v6  ;;  %v15479_v62 = vld [vmem:[#allocation2 + $0x118] sm:$0xf]  ;;  %v15500_v33 = vor.u32 %v17392_v34, %v15497_v35 }
0x1843   :  { %v10087_v13 = vrot.slane %v9044_v55, 4  ;;  %v9057_v15 = vadd.f32 %v9056_v11, %v7645_v63  ;;  %16039 = vmatmul.msk.bf16.vlgmr.msrb.gmra.mxu0 %vm128_vm9, %v18305_v43  ;;  %9548 = vmatpush.bf16.msrb.mxu3 %v15460_v52  ;;  %v17439_v63 = vld [vmem:[#allocation2 + $0x29c] sm:$0xf0]  ;;  %v7380_v55 = vunpack.c.l.bf16 %v19070_v56  ;;  %v17489_v8 = vld [vmem:[#allocation2 + $0x434] sm:$0xf] }
0x1844   :  { %v10086_v19 = vrot.slane %v9031_v1, 6  ;;  %9574 = vmatpush.bf16.msrb.mxu2 %v15468_v7  ;;  %9560 = vmatpush.bf16.msrb.mxu0 %v15856_v9  ;;  %v15480_v11 = vor.u32 %v17439_v63, %v15479_v62  ;;  %v15884_v4 = vor.u32 %v17489_v8, %v15881_v16 }
0x1845   :  { %v10088_v59 = vrot.slane %v9057_v15, 2  ;;  %v7456_v15 = vperm.slane %v7380_v55, 4  ;;  %v7457_v2 = vperm.slane %v7380_v55, 6  ;;  %v7454_v24 = vperm.slane %v7380_v55, 0 }
0x1846   :  { %v10159_v21 = vsel %vm3898_vm4, %v9018_v17, %v10086_v19  ;;  %v15879_v17 = vld [vmem:[#allocation2 + $0x430] sm:$0xf]  ;;  %v17538_v19 = vld [vmem:[#allocation2 + $0x5b4] sm:$0xf0] }
0x1847   :  { %v10160_v22 = vsel %vm3900_vm12, %v10087_v13, %v10088_v59  ;;  %v7652_v25 = vperm.slane %v7456_v15, 0  ;;  %v15880_v26 = vor.u32 %v17538_v19, %v15879_v17  ;;  %v7650_v42 = vperm.slane %v7454_v24, 0  ;;  %v17393_v19 = vld [vmem:[#allocation2 + $0x134] sm:$0xf]  ;;  %v17541_v24 = vld [vmem:[#allocation2 + $0x5cc] sm:$0xf0] }
0x1848   :  { %v10161_v12 = vsel %vm3902_vm13, %v10159_v21, %v10160_v22  ;;  %v9045_v23 = vpop.f32.mrf.mxu0  ;;  %9561 = vmatpush.bf16.msrb.mxu0 %v15464_v20  ;;  %v17490_v21 = vld [vmem:[#allocation2 + $0x43c] sm:$0xf]  ;;  %v15889_v22 = vld [vmem:[#allocation2 + $0x5c0] sm:$0xf0] }
0x1849   :  { %10245 = vst [vmem:[#allocation13 + $0x1b8] sm:$0xff] %v10161_v12  ;;  %v9032_v28 = vpop.f32.mrf.mxu3  ;;  %v7455_v23 = vperm.slane %v7380_v55, 2  ;;  %v15892_v31 = vor.u32 %v17490_v21, %v15889_v22  ;;  %v15897_v55 = vld [vmem:[#allocation2 + $0x5c8] sm:$0xf0]  ;;  %v15503_v21 = vld [vmem:[#allocation2 + $0x130] sm:$0xf] }
0x184a   :  { %v9058_v29 = vpop.f32.mrf.mxu2  ;;  %v9069_v14 = vpop.f32.mrf.mxu1  ;;  %v17391_v28 = vld [vmem:[#allocation2 + $0x124] sm:$0xf]  ;;  %v17442_v22 = vld [vmem:[#allocation2 + $0x2b4] sm:$0xf0] }
0x184b   :  { %v9070_v7 = vadd.f32 %v9069_v14, %v7646_v53  ;;  %v15489_v29 = vld [vmem:[#allocation2 + $0x2a8] sm:$0xf0]  ;;  %v17440_v14 = vld [vmem:[#allocation2 + $0x2a4] sm:$0xf0] }
0x184c   :  { %v15492_v30 = vor.u32 %v17391_v28, %v15489_v29  ;;  %v15504_v29 = vor.u32 %v17442_v22, %v15503_v21 }
0x184d   :  { %16041 = vmatmul.msk.bf16.vlgmr.msra.gmra.mxu1 %vm128_vm9, %v18305_v43 }
0x184e   :  { %16042 = vmatmul.msk.bf16.vlgmr.msra.gmra.mxu3 %vm128_vm9, %v18305_v43  ;;  %9586 = vmatpush.bf16.msra.mxu1 %v15864_v40  ;;  %v7653_v40 = vperm.slane %v7457_v2, 0  ;;  %v15903_v2 = vld [vmem:[#allocation2 + $0x448] sm:$0xf] }
0x184f   :  { %16044 = vmatmul.msk.bf16.vlgmr.msra.gmra.mxu2 %vm128_vm9, %v18305_v43  ;;  %9599 = vmatpush.bf16.msra.mxu3 %v15868_v39  ;;  %v7651_v39 = vperm.slane %v7455_v23, 0  ;;  %v15513_v23 = vld [vmem:[#allocation2 + $0x2c0] sm:$0xf0]  ;;  %v15904_v35 = vor.u32 %v17541_v24, %v15903_v2 }
0x1850   :  { %v9095_v50 = vpop.f32.mrf.mxu0  ;;  %9625 = vmatpush.bf16.msra.mxu2 %v15876_v41  ;;  %v15488_v41 = vor.u32 %v17440_v14, %v15487_v32  ;;  %v19096_v14 = vld [vmem:[#allocation12 + $0xec] sm:$0xff] }
0x1851   :  { %v9096_v54 = vadd.f32 %v9095_v50, %v7648_v38  ;;  %v9082_v60 = vpop.f32.mrf.mxu3  ;;  %v17539_v38 = vld [vmem:[#allocation2 + $0x5bc] sm:$0xf0] }
0x1852   :  { %v9108_v61 = vpop.f32.mrf.mxu2  ;;  %v9083_v5 = vadd.f32 %v9082_v60, %v7647_v47  ;;  %v9071_v3 = vpop.f32.mrf.mxu1  ;;  %9587 = vmatpush.bf16.msra.mxu1 %v15472_v51  ;;  %v15888_v45 = vor.u32 %v17539_v38, %v15887_v37  ;;  %v15495_v47 = vld [vmem:[#allocation2 + $0x128] sm:$0xf] }
0x1853   :  { %v10090_v52 = vrot.slane %v9096_v54, 4  ;;  %v9109_v6 = vadd.f32 %v9108_v61, %v7649_v27  ;;  %16043 = vmatmul.msk.bf16.vlgmr.msra.gmra.mxu0 %vm128_vm9, %v18305_v43  ;;  %9600 = vmatpush.bf16.msra.mxu3 %v15476_v36  ;;  %v17441_v27 = vld [vmem:[#allocation2 + $0x2ac] sm:$0xf0]  ;;  %v7381_v54 = vunpack.c.h.bf16 %v19070_v56  ;;  %v17491_v3 = vld [vmem:[#allocation2 + $0x444] sm:$0xf] }
0x1854   :  { %v10089_v9 = vrot.slane %v9083_v5, 6  ;;  %9626 = vmatpush.bf16.msra.mxu2 %v15484_v57  ;;  %9612 = vmatpush.bf16.msra.mxu0 %v15872_v58  ;;  %v15496_v61 = vor.u32 %v17441_v27, %v15495_v47  ;;  %v15895_v56 = vld [vmem:[#allocation2 + $0x440] sm:$0xf]  ;;  %v15900_v16 = vor.u32 %v17491_v3, %v15897_v55 }
0x1855   :  { %v10091_v10 = vrot.slane %v9109_v6, 2  ;;  %v7460_v6 = vperm.slane %v7381_v54, 4  ;;  %v7458_v15 = vperm.slane %v7381_v54, 0 }
0x1856   :  { %v10162_v0 = vsel %vm3898_vm4, %v9070_v7, %v10089_v9  ;;  %v17540_v7 = vld [vmem:[#allocation2 + $0x5c4] sm:$0xf0] }
0x1857   :  { %v10163_v49 = vsel %vm3900_vm12, %v10090_v52, %v10091_v10  ;;  %v7656_v8 = vperm.slane %v7460_v6, 0  ;;  %v15896_v17 = vor.u32 %v17540_v7, %v15895_v56 }
0x1858   :  { %v10164_v1 = vsel %vm3902_vm13, %v10162_v0, %v10163_v49  ;;  %v9097_v13 = vpop.f32.mrf.mxu0  ;;  %9613 = vmatpush.bf16.msra.mxu0 %v15480_v11  ;;  %v17492_v11 = vld [vmem:[#allocation2 + $0x44c] sm:$0xf]  ;;  %v15905_v0 = vld [vmem:[#allocation2 + $0x5d0] sm:$0xf0] }
0x1859   :  { %10246 = vst [vmem:[#allocation13 + $0x1c0] sm:$0xff] %v10164_v1  ;;  %v9084_v59 = vpop.f32.mrf.mxu3  ;;  %v7459_v1 = vperm.slane %v7381_v54, 2  ;;  %v7461_v13 = vperm.slane %v7381_v54, 6  ;;  %v15913_v54 = vld [vmem:[#allocation2 + $0x5d8] sm:$0xf0] }
0x185a   :  { %v9110_v20 = vpop.f32.mrf.mxu2  ;;  %v9121_v12 = vpop.f32.mrf.mxu1  ;;  %v15505_v59 = vld [vmem:[#allocation2 + $0x2b8] sm:$0xf0] }
0x185b   :  { %v9122_v57 = vadd.f32 %v9121_v12, %v7650_v42  ;;  %v15908_v20 = vor.u32 %v17492_v11, %v15905_v0  ;;  %v17394_v12 = vld [vmem:[#allocation2 + $0x13c] sm:$0xf]  ;;  %v15508_v28 = vor.u32 %v17393_v19, %v15505_v59  ;;  %v15519_v0 = vld [vmem:[#allocation2 + $0x140] sm:$0xf] }
0x185c   :  { %v15516_v34 = vor.u32 %v17394_v12, %v15513_v23 }
0x185d   :  { %16045 = vmatmul.msk.bf16.vlgmr.msrb.gmra.mxu1 %vm128_vm9, %v18305_v43 }
0x185e   :  { %16046 = vmatmul.msk.bf16.vlgmr.msrb.gmra.mxu3 %vm128_vm9, %v18305_v43  ;;  %9638 = vmatpush.bf16.msrb.mxu1 %v15880_v26 }
0x185f   :  { %16048 = vmatmul.msk.bf16.vlgmr.msrb.gmra.mxu2 %vm128_vm9, %v18305_v43  ;;  %9651 = vmatpush.bf16.msrb.mxu3 %v15884_v4  ;;  %v7657_v4 = vperm.slane %v7461_v13, 0  ;;  %v15529_v13 = vld [vmem:[#allocation2 + $0x2d0] sm:$0xf0] }
0x1860   :  { %v9147_v18 = vpop.f32.mrf.mxu0  ;;  %9677 = vmatpush.bf16.msrb.mxu2 %v15892_v31  ;;  %v7654_v31 = vperm.slane %v7458_v15, 0  ;;  %v15919_v15 = vld [vmem:[#allocation2 + $0x458] sm:$0xf] }
0x1861   :  { %v9148_v44 = vadd.f32 %v9147_v18, %v7652_v25  ;;  %v9134_v46 = vpop.f32.mrf.mxu3  ;;  %v7655_v25 = vperm.slane %v7459_v1, 0  ;;  %v17396_v1 = vld [vmem:[#allocation2 + $0x14c] sm:$0xf] }
0x1862   :  { %v9160_v48 = vpop.f32.mrf.mxu2  ;;  %v9135_v50 = vadd.f32 %v9134_v46, %v7651_v39  ;;  %v9123_v53 = vpop.f32.mrf.mxu1  ;;  %9639 = vmatpush.bf16.msrb.mxu1 %v15488_v41  ;;  %v15511_v39 = vld [vmem:[#allocation2 + $0x138] sm:$0xf]  ;;  %v15532_v12 = vor.u32 %v17396_v1, %v15529_v13 }
0x1863   :  { %v10093_v36 = vrot.slane %v9148_v44, 4  ;;  %v9161_v51 = vadd.f32 %v9160_v48, %v7653_v40  ;;  %16047 = vmatmul.msk.bf16.vlgmr.msrb.gmra.mxu0 %vm128_vm9, %v18305_v43  ;;  %9652 = vmatpush.bf16.msrb.mxu3 %v15492_v30  ;;  %v17443_v40 = vld [vmem:[#allocation2 + $0x2bc] sm:$0xf0]  ;;  %v7382_v44 = vunpack.c.l.bf16 %v19096_v14  ;;  %v17493_v53 = vld [vmem:[#allocation2 + $0x454] sm:$0xf] }
0x1864   :  { %v10092_v58 = vrot.slane %v9135_v50, 6  ;;  %9678 = vmatpush.bf16.msrb.mxu2 %v15500_v33  ;;  %9664 = vmatpush.bf16.msrb.mxu0 %v15888_v45  ;;  %v15512_v48 = vor.u32 %v17443_v40, %v15511_v39  ;;  %v15916_v56 = vor.u32 %v17493_v53, %v15913_v54 }
0x1865   :  { %v10094_v60 = vrot.slane %v9161_v51, 2  ;;  %v7464_v51 = vperm.slane %v7382_v44, 4  ;;  %v7465_v6 = vperm.slane %v7382_v44, 6  ;;  %v7462_v3 = vperm.slane %v7382_v44, 0 }
0x1866   :  { %v10165_v62 = vsel %vm3898_vm4, %v9122_v57, %v10092_v58  ;;  %v15911_v57 = vld [vmem:[#allocation2 + $0x450] sm:$0xf]  ;;  %v17542_v58 = vld [vmem:[#allocation2 + $0x5d4] sm:$0xf0] }
0x1867   :  { %v10166_v63 = vsel %vm3900_vm12, %v10093_v36, %v10094_v60  ;;  %v7660_v55 = vperm.slane %v7464_v51, 0  ;;  %v15912_v7 = vor.u32 %v17542_v58, %v15911_v57  ;;  %v7658_v21 = vperm.slane %v7462_v3, 0  ;;  %v17397_v58 = vld [vmem:[#allocation2 + $0x154] sm:$0xf]  ;;  %v17545_v3 = vld [vmem:[#allocation2 + $0x5ec] sm:$0xf0] }
0x1868   :  { %v10167_v5 = vsel %vm3902_vm13, %v10165_v62, %v10166_v63  ;;  %v9149_v52 = vpop.f32.mrf.mxu0  ;;  %9665 = vmatpush.bf16.msrb.mxu0 %v15496_v61  ;;  %v17494_v62 = vld [vmem:[#allocation2 + $0x45c] sm:$0xf]  ;;  %v15921_v63 = vld [vmem:[#allocation2 + $0x5e0] sm:$0xf0] }
0x1869   :  { %10247 = vst [vmem:[#allocation13 + $0x1c8] sm:$0xff] %v10167_v5  ;;  %v9136_v9 = vpop.f32.mrf.mxu3  ;;  %v7463_v52 = vperm.slane %v7382_v44, 2  ;;  %v15924_v11 = vor.u32 %v17494_v62, %v15921_v63  ;;  %v15929_v44 = vld [vmem:[#allocation2 + $0x5e8] sm:$0xf0]  ;;  %v15535_v62 = vld [vmem:[#allocation2 + $0x150] sm:$0xf] }
0x186a   :  { %v9162_v10 = vpop.f32.mrf.mxu2  ;;  %v9173_v49 = vpop.f32.mrf.mxu1  ;;  %v17395_v9 = vld [vmem:[#allocation2 + $0x144] sm:$0xf]  ;;  %v17446_v63 = vld [vmem:[#allocation2 + $0x2d4] sm:$0xf0] }
0x186b   :  { %v9174_v33 = vadd.f32 %v9173_v49, %v7654_v31  ;;  %v15521_v10 = vld [vmem:[#allocation2 + $0x2c8] sm:$0xf0]  ;;  %v17444_v49 = vld [vmem:[#allocation2 + $0x2c4] sm:$0xf0] }
0x186c   :  { %v15524_v59 = vor.u32 %v17395_v9, %v15521_v10  ;;  %v15536_v10 = vor.u32 %v17446_v63, %v15535_v62 }
0x186d   :  { %16049 = vmatmul.msk.bf16.vlgmr.msra.gmra.mxu1 %vm128_vm9, %v18305_v43 }
0x186e   :  { %16050 = vmatmul.msk.bf16.vlgmr.msra.gmra.mxu3 %vm128_vm9, %v18305_v43  ;;  %9690 = vmatpush.bf16.msra.mxu1 %v15896_v17  ;;  %v7661_v17 = vperm.slane %v7465_v6, 0  ;;  %v15935_v6 = vld [vmem:[#allocation2 + $0x468] sm:$0xf] }
0x186f   :  { %16052 = vmatmul.msk.bf16.vlgmr.msra.gmra.mxu2 %vm128_vm9, %v18305_v43  ;;  %9703 = vmatpush.bf16.msra.mxu3 %v15900_v16  ;;  %v7659_v16 = vperm.slane %v7463_v52, 0  ;;  %v15545_v52 = vld [vmem:[#allocation2 + $0x2e0] sm:$0xf0]  ;;  %v15936_v13 = vor.u32 %v17545_v3, %v15935_v6 }
0x1870   :  { %v9199_v26 = vpop.f32.mrf.mxu0  ;;  %9729 = vmatpush.bf16.msra.mxu2 %v15908_v20  ;;  %v15520_v20 = vor.u32 %v17444_v49, %v15519_v0  ;;  %v19122_v49 = vld [vmem:[#allocation12 + $0xf4] sm:$0xff] }
0x1871   :  { %v9200_v32 = vadd.f32 %v9199_v26, %v7656_v8  ;;  %v9186_v37 = vpop.f32.mrf.mxu3  ;;  %v17543_v8 = vld [vmem:[#allocation2 + $0x5dc] sm:$0xf0] }
0x1872   :  { %v9212_v38 = vpop.f32.mrf.mxu2  ;;  %v9187_v18 = vadd.f32 %v9186_v37, %v7655_v25  ;;  %v9175_v42 = vpop.f32.mrf.mxu1  ;;  %9691 = vmatpush.bf16.msra.mxu1 %v15504_v29  ;;  %v15920_v23 = vor.u32 %v17543_v8, %v15919_v15  ;;  %v15527_v25 = vld [vmem:[#allocation2 + $0x148] sm:$0xf] }
0x1873   :  { %v10096_v30 = vrot.slane %v9200_v32, 4  ;;  %v9213_v41 = vadd.f32 %v9212_v38, %v7657_v4  ;;  %16051 = vmatmul.msk.bf16.vlgmr.msra.gmra.mxu0 %vm128_vm9, %v18305_v43  ;;  %9704 = vmatpush.bf16.msra.mxu3 %v15508_v28  ;;  %v17445_v4 = vld [vmem:[#allocation2 + $0x2cc] sm:$0xf0]  ;;  %v7383_v32 = vunpack.c.h.bf16 %v19096_v14  ;;  %v17495_v42 = vld [vmem:[#allocation2 + $0x464] sm:$0xf] }
0x1874   :  { %v10095_v45 = vrot.slane %v9187_v18, 6  ;;  %9730 = vmatpush.bf16.msra.mxu2 %v15516_v34  ;;  %9716 = vmatpush.bf16.msra.mxu0 %v15904_v35  ;;  %v15528_v38 = vor.u32 %v17445_v4, %v15527_v25  ;;  %v15927_v14 = vld [vmem:[#allocation2 + $0x460] sm:$0xf]  ;;  %v15932_v54 = vor.u32 %v17495_v42, %v15929_v44 }
0x1875   :  { %v10097_v46 = vrot.slane %v9213_v41, 2  ;;  %v7468_v41 = vperm.slane %v7383_v32, 4  ;;  %v7466_v51 = vperm.slane %v7383_v32, 0 }
0x1876   :  { %v10168_v47 = vsel %vm3898_vm4, %v9174_v33, %v10095_v45  ;;  %v17544_v33 = vld [vmem:[#allocation2 + $0x5e4] sm:$0xf0] }
0x1877   :  { %v10169_v27 = vsel %vm3900_vm12, %v10096_v30, %v10097_v46  ;;  %v7664_v53 = vperm.slane %v7468_v41, 0  ;;  %v15928_v57 = vor.u32 %v17544_v33, %v15927_v14 }
0x1878   :  { %v10170_v50 = vsel %vm3902_vm13, %v10168_v47, %v10169_v27  ;;  %v9201_v36 = vpop.f32.mrf.mxu0  ;;  %9717 = vmatpush.bf16.msra.mxu0 %v15512_v48  ;;  %v17496_v48 = vld [vmem:[#allocation2 + $0x46c] sm:$0xf]  ;;  %v15937_v47 = vld [vmem:[#allocation2 + $0x5f0] sm:$0xf0] }
0x1879   :  { %10248 = vst [vmem:[#allocation13 + $0x1d0] sm:$0xff] %v10170_v50  ;;  %v9188_v60 = vpop.f32.mrf.mxu3  ;;  %v7467_v50 = vperm.slane %v7383_v32, 2  ;;  %v7469_v36 = vperm.slane %v7383_v32, 6  ;;  %v15945_v32 = vld [vmem:[#allocation2 + $0x5f8] sm:$0xf0] }
0x187a   :  { %v9214_v61 = vpop.f32.mrf.mxu2  ;;  %v9225_v5 = vpop.f32.mrf.mxu1  ;;  %v15537_v60 = vld [vmem:[#allocation2 + $0x2d8] sm:$0xf0] }
0x187b   :  { %v9226_v34 = vadd.f32 %v9225_v5, %v7658_v21  ;;  %v15940_v61 = vor.u32 %v17496_v48, %v15937_v47  ;;  %v17398_v5 = vld [vmem:[#allocation2 + $0x15c] sm:$0xf]  ;;  %v15540_v9 = vor.u32 %v17397_v58, %v15537_v60  ;;  %v15551_v47 = vld [vmem:[#allocation2 + $0x160] sm:$0xf] }
0x187c   :  { %v15548_v1 = vor.u32 %v17398_v5, %v15545_v52 }
0x187d   :  { %16053 = vmatmul.msk.bf16.vlgmr.msrb.gmra.mxu1 %vm128_vm9, %v18305_v43 }
0x187e   :  { %16054 = vmatmul.msk.bf16.vlgmr.msrb.gmra.mxu3 %vm128_vm9, %v18305_v43  ;;  %9742 = vmatpush.bf16.msrb.mxu1 %v15912_v7 }
0x187f   :  { %16056 = vmatmul.msk.bf16.vlgmr.msrb.gmra.mxu2 %vm128_vm9, %v18305_v43  ;;  %9755 = vmatpush.bf16.msrb.mxu3 %v15916_v56  ;;  %v7665_v56 = vperm.slane %v7469_v36, 0  ;;  %v15561_v36 = vld [vmem:[#allocation2 + $0x2f0] sm:$0xf0] }
0x1880   :  { %v9251_v19 = vpop.f32.mrf.mxu0  ;;  %9781 = vmatpush.bf16.msrb.mxu2 %v15924_v11  ;;  %v7662_v11 = vperm.slane %v7466_v51, 0  ;;  %v15951_v51 = vld [vmem:[#allocation2 + $0x478] sm:$0xf] }
0x1881   :  { %v9252_v22 = vadd.f32 %v9251_v19, %v7660_v55  ;;  %v9238_v2 = vpop.f32.mrf.mxu3  ;;  %v7663_v55 = vperm.slane %v7467_v50, 0  ;;  %v17400_v50 = vld [vmem:[#allocation2 + $0x16c] sm:$0xf] }
0x1882   :  { %v9264_v24 = vpop.f32.mrf.mxu2  ;;  %v9239_v26 = vadd.f32 %v9238_v2, %v7659_v16  ;;  %v9227_v31 = vpop.f32.mrf.mxu1  ;;  %9743 = vmatpush.bf16.msrb.mxu1 %v15520_v20  ;;  %v15543_v16 = vld [vmem:[#allocation2 + $0x158] sm:$0xf]  ;;  %v15564_v5 = vor.u32 %v17400_v50, %v15561_v36 }
0x1883   :  { %v10099_v28 = vrot.slane %v9252_v22, 4  ;;  %v9265_v29 = vadd.f32 %v9264_v24, %v7661_v17  ;;  %16055 = vmatmul.msk.bf16.vlgmr.msrb.gmra.mxu0 %vm128_vm9, %v18305_v43  ;;  %9756 = vmatpush.bf16.msrb.mxu3 %v15524_v59  ;;  %v17447_v17 = vld [vmem:[#allocation2 + $0x2dc] sm:$0xf0]  ;;  %v7384_v22 = vunpack.c.l.bf16 %v19122_v49  ;;  %v17497_v31 = vld [vmem:[#allocation2 + $0x474] sm:$0xf] }
0x1884   :  { %v10098_v35 = vrot.slane %v9239_v26, 6  ;;  %9782 = vmatpush.bf16.msrb.mxu2 %v15532_v12  ;;  %9768 = vmatpush.bf16.msrb.mxu0 %v15920_v23  ;;  %v15544_v24 = vor.u32 %v17447_v17, %v15543_v16  ;;  %v15948_v14 = vor.u32 %v17497_v31, %v15945_v32 }
0x1885   :  { %v10100_v37 = vrot.slane %v9265_v29, 2  ;;  %v7472_v29 = vperm.slane %v7384_v22, 4  ;;  %v7473_v41 = vperm.slane %v7384_v22, 6  ;;  %v7470_v42 = vperm.slane %v7384_v22, 0 }
0x1886   :  { %v10171_v39 = vsel %vm3898_vm4, %v9226_v34, %v10098_v35  ;;  %v15943_v34 = vld [vmem:[#allocation2 + $0x470] sm:$0xf]  ;;  %v17546_v35 = vld [vmem:[#allocation2 + $0x5f4] sm:$0xf0] }
0x1887   :  { %v10172_v40 = vsel %vm3900_vm12, %v10099_v28, %v10100_v37  ;;  %v7668_v44 = vperm.slane %v7472_v29, 0  ;;  %v15944_v33 = vor.u32 %v17546_v35, %v15943_v34  ;;  %v7666_v62 = vperm.slane %v7470_v42, 0  ;;  %v17401_v35 = vld [vmem:[#allocation2 + $0x174] sm:$0xf]  ;;  %v17549_v42 = vld [vmem:[#allocation2 + $0x60c] sm:$0xf0] }
0x1888   :  { %v10173_v18 = vsel %vm3902_vm13, %v10171_v39, %v10172_v40  ;;  %v9253_v30 = vpop.f32.mrf.mxu0  ;;  %9769 = vmatpush.bf16.msrb.mxu0 %v15528_v38  ;;  %v17498_v39 = vld [vmem:[#allocation2 + $0x47c] sm:$0xf]  ;;  %v15953_v40 = vld [vmem:[#allocation2 + $0x600] sm:$0xf0] }
0x1889   :  { %10249 = vst [vmem:[#allocation13 + $0x1d8] sm:$0xff] %v10173_v18  ;;  %v9240_v45 = vpop.f32.mrf.mxu3  ;;  %v7471_v30 = vperm.slane %v7384_v22, 2  ;;  %v15956_v48 = vor.u32 %v17498_v39, %v15953_v40  ;;  %v15961_v22 = vld [vmem:[#allocation2 + $0x608] sm:$0xf0]  ;;  %v15567_v39 = vld [vmem:[#allocation2 + $0x170] sm:$0xf] }
0x188a   :  { %v9266_v46 = vpop.f32.mrf.mxu2  ;;  %v9277_v27 = vpop.f32.mrf.mxu1  ;;  %v17399_v45 = vld [vmem:[#allocation2 + $0x164] sm:$0xf]  ;;  %v17450_v40 = vld [vmem:[#allocation2 + $0x2f4] sm:$0xf0] }
0x188b   :  { %v9278_v12 = vadd.f32 %v9277_v27, %v7662_v11  ;;  %v15553_v46 = vld [vmem:[#allocation2 + $0x2e8] sm:$0xf0]  ;;  %v17448_v27 = vld [vmem:[#allocation2 + $0x2e4] sm:$0xf0] }
0x188c   :  { %v15556_v60 = vor.u32 %v17399_v45, %v15553_v46  ;;  %v15568_v46 = vor.u32 %v17450_v40, %v15567_v39 }
0x188d   :  { %16057 = vmatmul.msk.bf16.vlgmr.msra.gmra.mxu1 %vm128_vm9, %v18305_v43 }
0x188e   :  { %16058 = vmatmul.msk.bf16.vlgmr.msra.gmra.mxu3 %vm128_vm9, %v18305_v43  ;;  %9794 = vmatpush.bf16.msra.mxu1 %v15928_v57  ;;  %v7669_v57 = vperm.slane %v7473_v41, 0  ;;  %v15967_v41 = vld [vmem:[#allocation2 + $0x488] sm:$0xf] }
0x188f   :  { %16060 = vmatmul.msk.bf16.vlgmr.msra.gmra.mxu2 %vm128_vm9, %v18305_v43  ;;  %9807 = vmatpush.bf16.msra.mxu3 %v15932_v54  ;;  %v7667_v54 = vperm.slane %v7471_v30, 0  ;;  %v15577_v30 = vld [vmem:[#allocation2 + $0x300] sm:$0xf0]  ;;  %v15968_v36 = vor.u32 %v17549_v42, %v15967_v41 }
0x1890   :  { %v9303_v7 = vpop.f32.mrf.mxu0  ;;  %9833 = vmatpush.bf16.msra.mxu2 %v15940_v61  ;;  %v15552_v61 = vor.u32 %v17448_v27, %v15551_v47  ;;  %v19148_v27 = vld [vmem:[#allocation12 + $0xfc] sm:$0xff] }
0x1891   :  { %v9304_v0 = vadd.f32 %v9303_v7, %v7664_v53  ;;  %v9290_v15 = vpop.f32.mrf.mxu3  ;;  %v17547_v53 = vld [vmem:[#allocation2 + $0x5fc] sm:$0xf0]  ;;  %v7387_v41 = vunpack.c.h.bf16 %v19148_v27 }
0x1892   :  { %v9316_v8 = vpop.f32.mrf.mxu2  ;;  %v9291_v19 = vadd.f32 %v9290_v15, %v7663_v55  ;;  %v9279_v21 = vpop.f32.mrf.mxu1  ;;  %9795 = vmatpush.bf16.msra.mxu1 %v15536_v10  ;;  %v15952_v52 = vor.u32 %v17547_v53, %v15951_v51  ;;  %v15559_v55 = vld [vmem:[#allocation2 + $0x168] sm:$0xf] }
0x1893   :  { %v10102_v59 = vrot.slane %v9304_v0, 4  ;;  %v9317_v20 = vadd.f32 %v9316_v8, %v7665_v56  ;;  %16059 = vmatmul.msk.bf16.vlgmr.msra.gmra.mxu0 %vm128_vm9, %v18305_v43  ;;  %9808 = vmatpush.bf16.msra.mxu3 %v15540_v9  ;;  %v17449_v56 = vld [vmem:[#allocation2 + $0x2ec] sm:$0xf0]  ;;  %v7385_v0 = vunpack.c.h.bf16 %v19122_v49  ;;  %v17499_v21 = vld [vmem:[#allocation2 + $0x484] sm:$0xf] }
0x1894   :  { %v10101_v23 = vrot.slane %v9291_v19, 6  ;;  %9834 = vmatpush.bf16.msra.mxu2 %v15548_v1  ;;  %9820 = vmatpush.bf16.msra.mxu0 %v15936_v13  ;;  %v15560_v8 = vor.u32 %v17449_v56, %v15559_v55  ;;  %v15959_v49 = vld [vmem:[#allocation2 + $0x480] sm:$0xf]  ;;  %v15964_v32 = vor.u32 %v17499_v21, %v15961_v22 }
0x1895   :  { %v10103_v2 = vrot.slane %v9317_v20, 2  ;;  %v7476_v20 = vperm.slane %v7385_v0, 4  ;;  %v7474_v29 = vperm.slane %v7385_v0, 0 }
0x1896   :  { %v10174_v25 = vsel %vm3898_vm4, %v9278_v12, %v10101_v23  ;;  %v17548_v12 = vld [vmem:[#allocation2 + $0x604] sm:$0xf0] }
0x1897   :  { %v10175_v4 = vsel %vm3900_vm12, %v10102_v59, %v10103_v2  ;;  %v7672_v31 = vperm.slane %v7476_v20, 0  ;;  %v15960_v34 = vor.u32 %v17548_v12, %v15959_v49  ;;  %v17403_v49 = vld [vmem:[#allocation2 + $0x184] sm:$0xf]  ;;  %v15585_v12 = vld [vmem:[#allocation2 + $0x308] sm:$0xf0] }
0x1898   :  { %v10176_v26 = vsel %vm3902_vm13, %v10174_v25, %v10175_v4  ;;  %v9305_v28 = vpop.f32.mrf.mxu0  ;;  %9821 = vmatpush.bf16.msra.mxu0 %v15544_v24  ;;  %v17500_v24 = vld [vmem:[#allocation2 + $0x48c] sm:$0xf]  ;;  %v15969_v25 = vld [vmem:[#allocation2 + $0x610] sm:$0xf0] }
0x1899   :  { %10250 = vst [vmem:[#allocation13 + $0x1e0] sm:$0xff] %v10176_v26  ;;  %v9292_v37 = vpop.f32.mrf.mxu3  ;;  %v7475_v26 = vperm.slane %v7385_v0, 2  ;;  %v7477_v28 = vperm.slane %v7385_v0, 6  ;;  %v15977_v0 = vld [vmem:[#allocation2 + $0x618] sm:$0xf0] }
0x189a   :  { %v9318_v38 = vpop.f32.mrf.mxu2  ;;  %v9329_v18 = vpop.f32.mrf.mxu1  ;;  %v15569_v37 = vld [vmem:[#allocation2 + $0x2f8] sm:$0xf0] }
0x189b   :  { %v9330_v1 = vadd.f32 %v9329_v18, %v7666_v62  ;;  %v15972_v38 = vor.u32 %v17500_v24, %v15969_v25  ;;  %v17402_v18 = vld [vmem:[#allocation2 + $0x17c] sm:$0xf]  ;;  %v15572_v45 = vor.u32 %v17401_v35, %v15569_v37 }
0x189c   :  { %v15580_v50 = vor.u32 %v17402_v18, %v15577_v30 }
0x189d   :  { %16061 = vmatmul.msk.bf16.vlgmr.msrb.gmra.mxu1 %vm128_vm9, %v18305_v43 }
0x189e   :  { %16062 = vmatmul.msk.bf16.vlgmr.msrb.gmra.mxu3 %vm128_vm9, %v18305_v43  ;;  %9846 = vmatpush.bf16.msrb.mxu1 %v15944_v33 }
0x189f   :  { %16064 = vmatmul.msk.bf16.vlgmr.msrb.gmra.mxu2 %vm128_vm9, %v18305_v43  ;;  %9859 = vmatpush.bf16.msrb.mxu3 %v15948_v14  ;;  %v7673_v14 = vperm.slane %v7477_v28, 0 }
0x18a0   :  { %v9355_v58 = vpop.f32.mrf.mxu0  ;;  %9885 = vmatpush.bf16.msrb.mxu2 %v15956_v48  ;;  %v7670_v48 = vperm.slane %v7474_v29, 0 }
0x18a1   :  { %v9356_v63 = vadd.f32 %v9355_v58, %v7668_v44  ;;  %v9342_v6 = vpop.f32.mrf.mxu3  ;;  %v7671_v44 = vperm.slane %v7475_v26, 0  ;;  %v15588_v26 = vor.u32 %v17403_v49, %v15585_v12 }
0x18a2   :  { %v9368_v3 = vpop.f32.mrf.mxu2  ;;  %v9343_v7 = vadd.f32 %v9342_v6, %v7667_v54  ;;  %v9331_v11 = vpop.f32.mrf.mxu1  ;;  %9847 = vmatpush.bf16.msrb.mxu1 %v15552_v61  ;;  %v15575_v54 = vld [vmem:[#allocation2 + $0x178] sm:$0xf] }
0x18a3   :  { %v10105_v9 = vrot.slane %v9356_v63, 4  ;;  %v9369_v10 = vadd.f32 %v9368_v3, %v7669_v57  ;;  %16063 = vmatmul.msk.bf16.vlgmr.msrb.gmra.mxu0 %vm128_vm9, %v18305_v43  ;;  %9860 = vmatpush.bf16.msrb.mxu3 %v15556_v60  ;;  %v17451_v57 = vld [vmem:[#allocation2 + $0x2fc] sm:$0xf0]  ;;  %v7386_v63 = vunpack.c.l.bf16 %v19148_v27  ;;  %v17501_v11 = vld [vmem:[#allocation2 + $0x494] sm:$0xf] }
0x18a4   :  { %v10104_v13 = vrot.slane %v9343_v7, 6  ;;  %9886 = vmatpush.bf16.msrb.mxu2 %v15564_v5  ;;  %9872 = vmatpush.bf16.msrb.mxu0 %v15952_v52  ;;  %v15576_v3 = vor.u32 %v17451_v57, %v15575_v54  ;;  %v15980_v21 = vor.u32 %v17501_v11, %v15977_v0 }
0x18a5   :  { %v10106_v15 = vrot.slane %v9369_v10, 2  ;;  %v7480_v10 = vperm.slane %v7386_v63, 4 }
0x18a6   :  { %v10177_v16 = vsel %vm3898_vm4, %v9330_v1, %v10104_v13  ;;  %v15975_v1 = vld [vmem:[#allocation2 + $0x490] sm:$0xf]  ;;  %v17550_v13 = vld [vmem:[#allocation2 + $0x614] sm:$0xf0] }
0x18a7   :  { %v10178_v17 = vsel %vm3900_vm12, %v10105_v9, %v10106_v15  ;;  %v7676_v20 = vperm.slane %v7480_v10, 0  ;;  %v15976_v22 = vor.u32 %v17550_v13, %v15975_v1 }
0x18a8   :  { %v10179_v19 = vsel %vm3902_vm13, %v10177_v16, %v10178_v17  ;;  %v9357_v59 = vpop.f32.mrf.mxu0  ;;  %9873 = vmatpush.bf16.msrb.mxu0 %v15560_v8  ;;  %v7479_v17 = vperm.slane %v7386_v63, 2 }
0x18a9   :  { %10251 = vst [vmem:[#allocation13 + $0x1e8] sm:$0xff] %v10179_v19  ;;  %v9344_v23 = vpop.f32.mrf.mxu3  ;;  %v7481_v19 = vperm.slane %v7386_v63, 6  ;;  %v7478_v59 = vperm.slane %v7386_v63, 0  ;;  %v7367_v63 = vld [vmem:[#allocation12 + $0x104] sm:$0xff] }
0x18aa   :  { %v9370_v2 = vpop.f32.mrf.mxu2  ;;  %v9381_v4 = vpop.f32.mrf.mxu1  ;;  %v15583_v23 = vld [vmem:[#allocation2 + $0x180] sm:$0xf]  ;;  %v7675_v24 = vperm.slane %v7479_v17, 0 }
0x18ab   :  { %v9382_v5 = vadd.f32 %v9381_v4, %v7670_v48  ;;  %v17452_v2 = vld [vmem:[#allocation2 + $0x304] sm:$0xf0]  ;;  %v7677_v25 = vperm.slane %v7481_v19, 0  ;;  %v7674_v29 = vperm.slane %v7478_v59, 0 }
0x18ac   :  { %v15584_v28 = vor.u32 %v17452_v2, %v15583_v23 }
0x18ad   :  { %16065 = vmatmul.msk.bf16.vlgmr.msra.gmra.mxu1 %vm128_vm9, %v18305_v43 }
0x18ae   :  { %16066 = vmatmul.msk.bf16.vlgmr.msra.gmra.mxu3 %vm128_vm9, %v18305_v43  ;;  %9898 = vmatpush.bf16.msra.mxu1 %v15960_v34 }
0x18af   :  { %16068 = vmatmul.msk.bf16.vlgmr.msra.gmra.mxu2 %vm128_vm9, %v18305_v43  ;;  %9911 = vmatpush.bf16.msra.mxu3 %v15964_v32 }
0x18b0   :  { %v9407_v33 = vpop.f32.mrf.mxu0  ;;  %9937 = vmatpush.bf16.msra.mxu2 %v15972_v38 }
0x18b1   :  { %v9408_v47 = vadd.f32 %v9407_v33, %v7672_v31  ;;  %v9394_v51 = vpop.f32.mrf.mxu3 }
0x18b2   :  { %v9420_v53 = vpop.f32.mrf.mxu2  ;;  %v9395_v58 = vadd.f32 %v9394_v51, %v7671_v44  ;;  %v9383_v62 = vpop.f32.mrf.mxu1  ;;  %9899 = vmatpush.bf16.msra.mxu1 %v15568_v46  ;;  %v7482_v51 = vperm.slane %v7387_v41, 0 }
0x18b3   :  { %v10108_v60 = vrot.slane %v9408_v47, 4  ;;  %v9421_v61 = vadd.f32 %v9420_v53, %v7673_v14  ;;  %16067 = vmatmul.msk.bf16.vlgmr.msra.gmra.mxu0 %vm128_vm9, %v18305_v43  ;;  %9912 = vmatpush.bf16.msra.mxu3 %v15572_v45  ;;  %v7484_v45 = vperm.slane %v7387_v41, 4 }
0x18b4   :  { %v10107_v52 = vrot.slane %v9395_v58, 6  ;;  %9938 = vmatpush.bf16.msra.mxu2 %v15580_v50  ;;  %9924 = vmatpush.bf16.msra.mxu0 %v15968_v36  ;;  %v7483_v50 = vperm.slane %v7387_v41, 2  ;;  %v7485_v36 = vperm.slane %v7387_v41, 6  ;;  %v7678_v58 = vperm.slane %v7482_v51, 0 }
0x18b5   :  { %v10109_v6 = vrot.slane %v9421_v61, 2  ;;  %v7680_v53 = vperm.slane %v7484_v45, 0 }
0x18b6   :  { %v10180_v55 = vsel %vm3898_vm4, %v9382_v5, %v10107_v52  ;;  %v7679_v27 = vperm.slane %v7483_v50, 0  ;;  %v7681_v54 = vperm.slane %v7485_v36, 0 }
0x18b7   :  { %v10181_v56 = vsel %vm3900_vm12, %v10108_v60, %v10109_v6 }
0x18b8   :  { %v10182_v7 = vsel %vm3902_vm13, %v10180_v55, %v10181_v56  ;;  %v9409_v9 = vpop.f32.mrf.mxu0  ;;  %9925 = vmatpush.bf16.msra.mxu0 %v15576_v3 }
0x18b9   :  { %10252 = vst [vmem:[#allocation13 + $0x1f0] sm:$0xff] %v10182_v7  ;;  %v9396_v15 = vpop.f32.mrf.mxu3  ;;  %v7388_v9 = vunpack.c.l.bf16 %v7367_v63 }
0x18ba   :  { %v9422_v8 = vpop.f32.mrf.mxu2  ;;  %v9433_v16 = vpop.f32.mrf.mxu1 }
0x18bb   :  { %v9434_v40 = vadd.f32 %v9433_v16, %v7674_v29  ;;  %v7488_v13 = vperm.slane %v7388_v9, 4  ;;  %v7487_v17 = vperm.slane %v7388_v9, 2  ;;  %v7489_v19 = vperm.slane %v7388_v9, 6 }
0x18bc   :  { %v7486_v59 = vperm.slane %v7388_v9, 0 }
0x18bd   :  { %16069 = vmatmul.msk.bf16.vlgmr.msrb.gmra.mxu1 %vm128_vm9, %v18305_v43 }
0x18be   :  { %16070 = vmatmul.msk.bf16.vlgmr.msrb.gmra.mxu3 %vm128_vm9, %v18305_v43  ;;  %9950 = vmatpush.bf16.msrb.mxu1 %v15976_v22  ;;  %v7685_v22 = vperm.slane %v7489_v19, 0  ;;  %v7682_v12 = vperm.slane %v7486_v59, 0 }
0x18bf   :  { %16072 = vmatmul.msk.bf16.vlgmr.msrb.gmra.mxu2 %vm128_vm9, %v18305_v43  ;;  %9963 = vmatpush.bf16.msrb.mxu3 %v15980_v21  ;;  %v7683_v21 = vperm.slane %v7487_v17, 0 }
0x18c0   :  { %v9459_v4 = vpop.f32.mrf.mxu0 }
0x18c1   :  { %v9460_v31 = vadd.f32 %v9459_v4, %v7676_v20  ;;  %v9446_v32 = vpop.f32.mrf.mxu3  ;;  %v7684_v20 = vperm.slane %v7488_v13, 0 }
0x18c2   :  { %v9472_v34 = vpop.f32.mrf.mxu2  ;;  %v9447_v35 = vadd.f32 %v9446_v32, %v7675_v24  ;;  %v9435_v39 = vpop.f32.mrf.mxu1  ;;  %9951 = vmatpush.bf16.msrb.mxu1 %v15584_v28 }
0x18c3   :  { %v10111_v37 = vrot.slane %v9460_v31, 4  ;;  %v9473_v38 = vadd.f32 %v9472_v34, %v7677_v25  ;;  %16071 = vmatmul.msk.bf16.vlgmr.msrb.gmra.mxu0 %vm128_vm9, %v18305_v43  ;;  %9964 = vmatpush.bf16.msrb.mxu3 %v15588_v26  ;;  %v7389_v34 = vunpack.c.h.bf16 %v7367_v63 }
0x18c4   :  { %v10110_v18 = vrot.slane %v9447_v35, 6 }
0x18c5   :  { %v10112_v30 = vrot.slane %v9473_v38, 2 }
0x18c6   :  { %v10183_v42 = vsel %vm3898_vm4, %v9434_v40, %v10110_v18  ;;  %v7492_v40 = vperm.slane %v7389_v34, 4 }
0x18c7   :  { %v10184_v44 = vsel %vm3900_vm12, %v10111_v37, %v10112_v30 }
0x18c8   :  { %v10185_v14 = vsel %vm3902_vm13, %v10183_v42, %v10184_v44  ;;  %v9461_v33 = vpop.f32.mrf.mxu0  ;;  %v7491_v42 = vperm.slane %v7389_v34, 2  ;;  %v7493_v44 = vperm.slane %v7389_v34, 6 }
0x18c9   :  { %10253 = vst [vmem:[#allocation13 + $0x1f8] sm:$0xff] %v10185_v14  ;;  %v9448_v46 = vpop.f32.mrf.mxu3  ;;  %v7490_v14 = vperm.slane %v7389_v34, 0  ;;  %v7688_v33 = vperm.slane %v7492_v40, 0 }
0x18ca   :  { %v9474_v48 = vpop.f32.mrf.mxu2  ;;  %v9485_v47 = vpop.f32.mrf.mxu1  ;;  %v7687_v45 = vperm.slane %v7491_v42, 0  ;;  %v7689_v46 = vperm.slane %v7493_v44, 0 }
0x18cb   :  { %v9486_v55 = vadd.f32 %v9485_v47, %v7678_v58  ;;  %v7686_v47 = vperm.slane %v7490_v14, 0 }
0x18cd   :  { %16073 = vmatmul.msk.bf16.vlgmr.msra.gmra.mxu1 %vm128_vm9, %v18305_v43 }
0x18ce   :  { %16074 = vmatmul.msk.bf16.vlgmr.msra.gmra.mxu3 %vm128_vm9, %v18305_v43 }
0x18cf   :  { %16076 = vmatmul.msk.bf16.vlgmr.msra.gmra.mxu2 %vm128_vm9, %v18305_v43 }
0x18d0   :  { %v9511_v57 = vpop.f32.mrf.mxu0 }
0x18d1   :  { %v9512_v60 = vadd.f32 %v9511_v57, %v7680_v53  ;;  %v9498_v61 = vpop.f32.mrf.mxu3  ;;  %v7368_v53 = vld [vmem:[#allocation12 + $0x10c] sm:$0xff] }
0x18d2   :  { %v9524_v62 = vpop.f32.mrf.mxu2  ;;  %v9499_v5 = vadd.f32 %v9498_v61, %v7679_v27  ;;  %v9487_v3 = vpop.f32.mrf.mxu1  ;;  %v7390_v63 = vunpack.c.l.bf16 %v7368_v53 }
0x18d3   :  { %v10114_v52 = vrot.slane %v9512_v60, 4  ;;  %v9525_v6 = vadd.f32 %v9524_v62, %v7681_v54  ;;  %16075 = vmatmul.msk.bf16.vlgmr.msra.gmra.mxu0 %vm128_vm9, %v18305_v43 }
0x18d4   :  { %v10113_v56 = vrot.slane %v9499_v5, 6 }
0x18d5   :  { %v10115_v7 = vrot.slane %v9525_v6, 2 }
0x18d6   :  { %v10186_v10 = vsel %vm3898_vm4, %v9486_v55, %v10113_v56  ;;  %v7496_v55 = vperm.slane %v7390_v63, 4 }
0x18d7   :  { %v10187_v11 = vsel %vm3900_vm12, %v10114_v52, %v10115_v7 }
0x18d8   :  { %v10188_v0 = vsel %vm3902_vm13, %v10186_v10, %v10187_v11  ;;  %v9513_v1 = vpop.f32.mrf.mxu0  ;;  %v7495_v10 = vperm.slane %v7390_v63, 2  ;;  %v7497_v11 = vperm.slane %v7390_v63, 6 }
0x18d9   :  { %10254 = vst [vmem:[#allocation13 + $0x200] sm:$0xff] %v10188_v0  ;;  %v9500_v15 = vpop.f32.mrf.mxu3  ;;  %v7494_v0 = vperm.slane %v7390_v63, 0  ;;  %v7692_v1 = vperm.slane %v7496_v55, 0 }
0x18da   :  { %v9526_v8 = vpop.f32.mrf.mxu2  ;;  %v9537_v16 = vpop.f32.mrf.mxu1  ;;  %v7691_v13 = vperm.slane %v7495_v10, 0  ;;  %v7693_v15 = vperm.slane %v7497_v11, 0 }
0x18db   :  { %v9538_v29 = vadd.f32 %v9537_v16, %v7682_v12  ;;  %v7690_v16 = vperm.slane %v7494_v0, 0 }
0x18dd   :  { %16077 = vmatmul.msk.bf16.vlgmr.msrb.gmra.mxu1 %vm128_vm9, %v18305_v43 }
0x18de   :  { %16078 = vmatmul.msk.bf16.vlgmr.msrb.gmra.mxu3 %vm128_vm9, %v18305_v43 }
0x18e0   :  { %v9563_v49 = vpop.f32.mrf.mxu0 }
0x18e1   :  { %v9564_v23 = vadd.f32 %v9563_v49, %v7684_v20  ;;  %v9550_v2 = vpop.f32.mrf.mxu3 }
0x18e2   :  { %v9576_v24 = vpop.f32.mrf.mxu2  ;;  %v9551_v25 = vadd.f32 %v9550_v2, %v7683_v21  ;;  %v9539_v28 = vpop.f32.mrf.mxu1 }
0x18e3   :  { %v10117_v4 = vrot.slane %v9564_v23, 4  ;;  %v9577_v26 = vadd.f32 %v9576_v24, %v7685_v22  ;;  %v7391_v24 = vunpack.c.h.bf16 %v7368_v53 }
0x18e4   :  { %v10116_v31 = vrot.slane %v9551_v25, 6 }
0x18e5   :  { %v10118_v32 = vrot.slane %v9577_v26, 2 }
0x18e6   :  { %v10189_v35 = vsel %vm3898_vm4, %v9538_v29, %v10116_v31  ;;  %v7500_v29 = vperm.slane %v7391_v24, 4 }
0x18e7   :  { %v10190_v37 = vsel %vm3900_vm12, %v10117_v4, %v10118_v32 }
0x18e8   :  { %v10191_v38 = vsel %vm3902_vm13, %v10189_v35, %v10190_v37  ;;  %v9565_v39 = vpop.f32.mrf.mxu0  ;;  %v7499_v35 = vperm.slane %v7391_v24, 2  ;;  %v7501_v37 = vperm.slane %v7391_v24, 6 }
0x18e9   :  { %10255 = vst [vmem:[#allocation13 + $0x208] sm:$0xff] %v10191_v38  ;;  %v9552_v18 = vpop.f32.mrf.mxu3  ;;  %v7498_v38 = vperm.slane %v7391_v24, 0  ;;  %v7696_v39 = vperm.slane %v7500_v29, 0 }
0x18ea   :  { %v9578_v30 = vpop.f32.mrf.mxu2  ;;  %v9589_v41 = vpop.f32.mrf.mxu1  ;;  %v7695_v40 = vperm.slane %v7499_v35, 0  ;;  %v7697_v18 = vperm.slane %v7501_v37, 0 }
0x18eb   :  { %v9590_v60 = vadd.f32 %v9589_v41, %v7686_v47  ;;  %v7694_v41 = vperm.slane %v7498_v38, 0 }
0x18f0   :  { %v9615_v48 = vpop.f32.mrf.mxu0 }
0x18f1   :  { %v9616_v50 = vadd.f32 %v9615_v48, %v7688_v33  ;;  %v9602_v36 = vpop.f32.mrf.mxu3  ;;  %v7369_v33 = vld [vmem:[#allocation12 + $0x114] sm:$0xff] }
0x18f2   :  { %v9628_v51 = vpop.f32.mrf.mxu2  ;;  %v9603_v27 = vadd.f32 %v9602_v36, %v7687_v45  ;;  %v9591_v58 = vpop.f32.mrf.mxu1  ;;  %v7392_v53 = vunpack.c.l.bf16 %v7369_v33 }
0x18f3   :  { %v10120_v54 = vrot.slane %v9616_v50, 4  ;;  %v9629_v57 = vadd.f32 %v9628_v51, %v7689_v46 }
0x18f4   :  { %v10119_v61 = vrot.slane %v9603_v27, 6 }
0x18f5   :  { %v10121_v62 = vrot.slane %v9629_v57, 2 }
0x18f6   :  { %v10192_v5 = vsel %vm3898_vm4, %v9590_v60, %v10119_v61  ;;  %v7504_v60 = vperm.slane %v7392_v53, 4 }
0x18f7   :  { %v10193_v52 = vsel %vm3900_vm12, %v10120_v54, %v10121_v62 }
0x18f8   :  { %v10194_v6 = vsel %vm3902_vm13, %v10192_v5, %v10193_v52  ;;  %v9617_v3 = vpop.f32.mrf.mxu0  ;;  %v7503_v5 = vperm.slane %v7392_v53, 2  ;;  %v7505_v52 = vperm.slane %v7392_v53, 6 }
0x18f9   :  { %10256 = vst [vmem:[#allocation13 + $0x210] sm:$0xff] %v10194_v6  ;;  %v9604_v56 = vpop.f32.mrf.mxu3  ;;  %v7502_v6 = vperm.slane %v7392_v53, 0  ;;  %v7700_v3 = vperm.slane %v7504_v60, 0 }
0x18fa   :  { %v9630_v7 = vpop.f32.mrf.mxu2  ;;  %v9641_v9 = vpop.f32.mrf.mxu1  ;;  %v7699_v55 = vperm.slane %v7503_v5, 0  ;;  %v7701_v56 = vperm.slane %v7505_v52, 0 }
0x18fb   :  { %v9642_v12 = vadd.f32 %v9641_v9, %v7690_v16  ;;  %v7698_v9 = vperm.slane %v7502_v6, 0 }
0x1900   :  { %v9667_v8 = vpop.f32.mrf.mxu0 }
0x1901   :  { %v9668_v17 = vadd.f32 %v9667_v8, %v7692_v1  ;;  %v9654_v19 = vpop.f32.mrf.mxu3 }
0x1902   :  { %v9680_v59 = vpop.f32.mrf.mxu2  ;;  %v9655_v20 = vadd.f32 %v9654_v19, %v7691_v13  ;;  %v9643_v49 = vpop.f32.mrf.mxu1 }
0x1903   :  { %v10123_v21 = vrot.slane %v9668_v17, 4  ;;  %v9681_v22 = vadd.f32 %v9680_v59, %v7693_v15  ;;  %v7393_v59 = vunpack.c.h.bf16 %v7369_v33 }
0x1904   :  { %v10122_v23 = vrot.slane %v9655_v20, 6 }
0x1905   :  { %v10124_v2 = vrot.slane %v9681_v22, 2 }
0x1906   :  { %v10195_v25 = vsel %vm3898_vm4, %v9642_v12, %v10122_v23  ;;  %v7508_v12 = vperm.slane %v7393_v59, 4 }
0x1907   :  { %v10196_v4 = vsel %vm3900_vm12, %v10123_v21, %v10124_v2 }
0x1908   :  { %v10197_v26 = vsel %vm3902_vm13, %v10195_v25, %v10196_v4  ;;  %v9669_v28 = vpop.f32.mrf.mxu0  ;;  %v7507_v25 = vperm.slane %v7393_v59, 2  ;;  %v7509_v4 = vperm.slane %v7393_v59, 6 }
0x1909   :  { %10257 = vst [vmem:[#allocation13 + $0x218] sm:$0xff] %v10197_v26  ;;  %v9656_v31 = vpop.f32.mrf.mxu3  ;;  %v7506_v26 = vperm.slane %v7393_v59, 0  ;;  %v7704_v28 = vperm.slane %v7508_v12, 0 }
0x190a   :  { %v9682_v32 = vpop.f32.mrf.mxu2  ;;  %v9693_v34 = vpop.f32.mrf.mxu1  ;;  %v7703_v29 = vperm.slane %v7507_v25, 0  ;;  %v7705_v31 = vperm.slane %v7509_v4, 0 }
0x190b   :  { %v9694_v50 = vadd.f32 %v9693_v34, %v7694_v41  ;;  %v7702_v34 = vperm.slane %v7506_v26, 0 }
0x1910   :  { %v9719_v30 = vpop.f32.mrf.mxu0 }
0x1911   :  { %v9720_v42 = vadd.f32 %v9719_v30, %v7696_v39  ;;  %v9706_v44 = vpop.f32.mrf.mxu3  ;;  %v7370_v39 = vld [vmem:[#allocation12 + $0x11c] sm:$0xff] }
0x1912   :  { %v9732_v14 = vpop.f32.mrf.mxu2  ;;  %v9707_v45 = vadd.f32 %v9706_v44, %v7695_v40  ;;  %v9695_v47 = vpop.f32.mrf.mxu1  ;;  %v7394_v33 = vunpack.c.l.bf16 %v7370_v39 }
0x1913   :  { %v10126_v46 = vrot.slane %v9720_v42, 4  ;;  %v9733_v48 = vadd.f32 %v9732_v14, %v7697_v18 }
0x1914   :  { %v10125_v36 = vrot.slane %v9707_v45, 6 }
0x1915   :  { %v10127_v51 = vrot.slane %v9733_v48, 2 }
0x1916   :  { %v10198_v27 = vsel %vm3898_vm4, %v9694_v50, %v10125_v36  ;;  %v7512_v50 = vperm.slane %v7394_v33, 4 }
0x1917   :  { %v10199_v54 = vsel %vm3900_vm12, %v10126_v46, %v10127_v51 }
0x1918   :  { %v10200_v57 = vsel %vm3902_vm13, %v10198_v27, %v10199_v54  ;;  %v9721_v58 = vpop.f32.mrf.mxu0  ;;  %v7511_v27 = vperm.slane %v7394_v33, 2  ;;  %v7513_v54 = vperm.slane %v7394_v33, 6 }
0x1919   :  { %10258 = vst [vmem:[#allocation13 + $0x220] sm:$0xff] %v10200_v57  ;;  %v9708_v61 = vpop.f32.mrf.mxu3  ;;  %v7510_v57 = vperm.slane %v7394_v33, 0  ;;  %v7708_v58 = vperm.slane %v7512_v50, 0 }
0x191a   :  { %v9734_v62 = vpop.f32.mrf.mxu2  ;;  %v9745_v63 = vpop.f32.mrf.mxu1  ;;  %v7707_v60 = vperm.slane %v7511_v27, 0  ;;  %v7709_v61 = vperm.slane %v7513_v54, 0 }
0x191b   :  { %v9746_v16 = vadd.f32 %v9745_v63, %v7698_v9  ;;  %v7706_v63 = vperm.slane %v7510_v57, 0 }
0x1920   :  { %v9771_v7 = vpop.f32.mrf.mxu0 }
0x1921   :  { %v9772_v10 = vadd.f32 %v9771_v7, %v7700_v3  ;;  %v9758_v11 = vpop.f32.mrf.mxu3 }
0x1922   :  { %v9784_v0 = vpop.f32.mrf.mxu2  ;;  %v9759_v1 = vadd.f32 %v9758_v11, %v7699_v55  ;;  %v9747_v8 = vpop.f32.mrf.mxu1 }
0x1923   :  { %v10129_v13 = vrot.slane %v9772_v10, 4  ;;  %v9785_v15 = vadd.f32 %v9784_v0, %v7701_v56  ;;  %v7395_v0 = vunpack.c.h.bf16 %v7370_v39 }
0x1924   :  { %v10128_v17 = vrot.slane %v9759_v1, 6 }
0x1925   :  { %v10130_v19 = vrot.slane %v9785_v15, 2 }
0x1926   :  { %v10201_v20 = vsel %vm3898_vm4, %v9746_v16, %v10128_v17  ;;  %v7516_v16 = vperm.slane %v7395_v0, 4 }
0x1927   :  { %v10202_v21 = vsel %vm3900_vm12, %v10129_v13, %v10130_v19 }
0x1928   :  { %v10203_v22 = vsel %vm3902_vm13, %v10201_v20, %v10202_v21  ;;  %v9773_v49 = vpop.f32.mrf.mxu0  ;;  %v7515_v20 = vperm.slane %v7395_v0, 2  ;;  %v7517_v21 = vperm.slane %v7395_v0, 6 }
0x1929   :  { %10259 = vst [vmem:[#allocation13 + $0x228] sm:$0xff] %v10203_v22  ;;  %v9760_v23 = vpop.f32.mrf.mxu3  ;;  %v7514_v22 = vperm.slane %v7395_v0, 0  ;;  %v7712_v49 = vperm.slane %v7516_v16, 0 }
0x192a   :  { %v9786_v2 = vpop.f32.mrf.mxu2  ;;  %v9797_v24 = vpop.f32.mrf.mxu1  ;;  %v7711_v12 = vperm.slane %v7515_v20, 0  ;;  %v7713_v23 = vperm.slane %v7517_v21, 0 }
0x192b   :  { %v9798_v42 = vadd.f32 %v9797_v24, %v7702_v34  ;;  %v7710_v24 = vperm.slane %v7514_v22, 0  ;;  %v7371_v34 = vld [vmem:[#allocation12 + $0x124] sm:$0x3] }
0x1930   :  { %v9823_v32 = vpop.f32.mrf.mxu0 }
0x1931   :  { %v9824_v35 = vadd.f32 %v9823_v32, %v7704_v28  ;;  %v9810_v37 = vpop.f32.mrf.mxu3 }
0x1932   :  { %v9836_v38 = vpop.f32.mrf.mxu2  ;;  %v9811_v40 = vadd.f32 %v9810_v37, %v7703_v29  ;;  %v9799_v41 = vpop.f32.mrf.mxu1 }
0x1933   :  { %v10132_v18 = vrot.slane %v9824_v35, 4  ;;  %v9837_v30 = vadd.f32 %v9836_v38, %v7705_v31 }
0x1934   :  { %v10131_v44 = vrot.slane %v9811_v40, 6 }
0x1935   :  { %v10133_v14 = vrot.slane %v9837_v30, 2 }
0x1936   :  { %v10204_v45 = vsel %vm3898_vm4, %v9798_v42, %v10131_v44 }
0x1937   :  { %v10205_v46 = vsel %vm3900_vm12, %v10132_v18, %v10133_v14  ;;  %v7396_v18 = vunpack.c.l.bf16 %v7371_v34 }
0x1938   :  { %v10206_v48 = vsel %vm3902_vm13, %v10204_v45, %v10205_v46  ;;  %v9825_v47 = vpop.f32.mrf.mxu0 }
0x1939   :  { %10260 = vst [vmem:[#allocation13 + $0x230] sm:$0xff] %v10206_v48  ;;  %v9812_v36 = vpop.f32.mrf.mxu3  ;;  %v7519_v33 = vperm.slane %v7396_v18, 2  ;;  %v7518_v45 = vperm.slane %v7396_v18, 0 }
0x193a   :  { %v9838_v51 = vpop.f32.mrf.mxu2  ;;  %v9849_v53 = vpop.f32.mrf.mxu1 }
0x193b   :  { %v9850_v9 = vadd.f32 %v9849_v53, %v7706_v63  ;;  %v7715_v46 = vperm.slane %v7519_v33, 0  ;;  %v7714_v48 = vperm.slane %v7518_v45, 0 }
0x1940   :  { %v9875_v62 = vpop.f32.mrf.mxu0 }
0x1941   :  { %v9876_v5 = vadd.f32 %v9875_v62, %v7708_v58  ;;  %v9862_v52 = vpop.f32.mrf.mxu3 }
0x1942   :  { %v9888_v6 = vpop.f32.mrf.mxu2  ;;  %v9863_v3 = vadd.f32 %v9862_v52, %v7707_v60  ;;  %v9851_v7 = vpop.f32.mrf.mxu1 }
0x1943   :  { %v10135_v55 = vrot.slane %v9876_v5, 4  ;;  %v9889_v56 = vadd.f32 %v9888_v6, %v7709_v61 }
0x1944   :  { %v10134_v10 = vrot.slane %v9863_v3, 6 }
0x1945   :  { %v10136_v11 = vrot.slane %v9889_v56, 2 }
0x1946   :  { %v10207_v1 = vsel %vm3898_vm4, %v9850_v9, %v10134_v10 }
0x1947   :  { %v10208_v13 = vsel %vm3900_vm12, %v10135_v55, %v10136_v11 }
0x1948   :  { %v10209_v15 = vsel %vm3902_vm13, %v10207_v1, %v10208_v13  ;;  %v9877_v8 = vpop.f32.mrf.mxu0 }
0x1949   :  { %10261 = vst [vmem:[#allocation13 + $0x238] sm:$0xff] %v10209_v15  ;;  %v9864_v17 = vpop.f32.mrf.mxu3 }
0x194a   :  { %v9890_v19 = vpop.f32.mrf.mxu2  ;;  %v9901_v59 = vpop.f32.mrf.mxu1 }
0x194b   :  { %v9902_v35 = vadd.f32 %v9901_v59, %v7710_v24 }
0x1950   :  { %v9927_v2 = vpop.f32.mrf.mxu0 }
0x1951   :  { %v9928_v25 = vadd.f32 %v9927_v2, %v7712_v49  ;;  %v9914_v4 = vpop.f32.mrf.mxu3 }
0x1952   :  { %v9940_v26 = vpop.f32.mrf.mxu2  ;;  %v9915_v28 = vadd.f32 %v9914_v4, %v7711_v12  ;;  %v9903_v32 = vpop.f32.mrf.mxu1 }
0x1953   :  { %v10138_v29 = vrot.slane %v9928_v25, 4  ;;  %v9941_v31 = vadd.f32 %v9940_v26, %v7713_v23 }
0x1954   :  { %v10137_v37 = vrot.slane %v9915_v28, 6 }
0x1955   :  { %v10139_v38 = vrot.slane %v9941_v31, 2 }
0x1956   :  { %v10210_v39 = vsel %vm3898_vm4, %v9902_v35, %v10137_v37 }
0x1957   :  { %v10211_v40 = vsel %vm3900_vm12, %v10138_v29, %v10139_v38 }
0x1958   :  { %v10212_v30 = vsel %vm3902_vm13, %v10210_v39, %v10211_v40  ;;  %v9929_v41 = vpop.f32.mrf.mxu0 }
0x1959   :  { %10262 = vst [vmem:[#allocation13 + $0x240] sm:$0xff] %v10212_v30  ;;  %v9916_v42 = vpop.f32.mrf.mxu3 }
0x195a   :  { %v9942_v44 = vpop.f32.mrf.mxu2  ;;  %v9953_v14 = vpop.f32.mrf.mxu1 }
0x195b   :  { %v9954_v51 = vadd.f32 %v9953_v14, %v7714_v48 }
0x1961   :  { %v9966_v47 = vpop.f32.mrf.mxu3 }
0x1962   :  { %v9967_v50 = vadd.f32 %v9966_v47, %v7715_v46  ;;  %v9955_v36 = vpop.f32.mrf.mxu1 }
0x1964   :  { %v10140_v53 = vrot.slane %v9967_v50, 6 }
0x1966   :  { %v10213_v27 = vsel %vm3898_vm4, %v9954_v51, %v10140_v53 }
0x1967   :  { %10263 = vst [vmem:[#allocation13 + $0x248] sm:$0xf] %v10213_v27 }
0x1969   :  { %v9968_v54 = vpop.f32.mrf.mxu3 }
0x196a   :  { %18061 = dma.done.wait [#allocation3 + $0x1], 25088 }
0x196b   :  { %18062 = vsyncadd [#allocation3 + $0x1], 4294942208  ;;  %v16473_v57 = vld [vmem:[#allocation2 + $0x930] sm:$0xf]  ;;  %v17698_v58 = vld [vmem:[#allocation2 + $0xab4] sm:$0xf0] }
0x196c   :  { %v17649_v60 = vld [vmem:[#allocation2 + $0x934] sm:$0xf]  ;;  %v16474_v61 = vor.u32 %v17698_v58, %v16473_v57  ;;  %v16475_v62 = vld [vmem:[#allocation2 + $0xab8] sm:$0xf0]  ;;  %v16483_v5 = vld [vmem:[#allocation2 + $0xac0] sm:$0xf0] }
0x196d   :  { %v17650_v63 = vld [vmem:[#allocation2 + $0x93c] sm:$0xf]  ;;  %v16478_v52 = vor.u32 %v17649_v60, %v16475_v62  ;;  %v16081_v3 = vld [vmem:[#allocation2 + $0x620] sm:$0xf]  ;;  %v17600_v55 = vld [vmem:[#allocation2 + $0x7a4] sm:$0xf0] }
0x196e   :  { %v16486_v6 = vor.u32 %v17650_v63, %v16483_v5  ;;  %v17551_v56 = vld [vmem:[#allocation2 + $0x624] sm:$0xf]  ;;  %11805 = vmatpush.bf16.msrb.mxu0 %v16474_v61  ;;  %v16082_v7 = vor.u32 %v17600_v55, %v16081_v3  ;;  %v16083_v9 = vld [vmem:[#allocation2 + $0x7a8] sm:$0xf0]  ;;  %v16091_v11 = vld [vmem:[#allocation2 + $0x7b0] sm:$0xf0] }
0x196f   :  { %v17552_v10 = vld [vmem:[#allocation2 + $0x62c] sm:$0xf]  ;;  %11818 = vmatpush.bf16.msrb.mxu2 %v16478_v52  ;;  %v16086_v0 = vor.u32 %v17551_v56, %v16083_v9  ;;  %v16481_v13 = vld [vmem:[#allocation2 + $0x938] sm:$0xf]  ;;  %v17699_v15 = vld [vmem:[#allocation2 + $0xabc] sm:$0xf0] }
0x1970   :  { %11844 = vmatpush.bf16.msra.mxu3 %v16486_v6  ;;  %v16094_v1 = vor.u32 %v17552_v10, %v16091_v11  ;;  %v17651_v8 = vld [vmem:[#allocation2 + $0x944] sm:$0xf]  ;;  %v16482_v16 = vor.u32 %v17699_v15, %v16481_v13  ;;  %v16491_v17 = vld [vmem:[#allocation2 + $0xac8] sm:$0xf0]  ;;  %v16089_v19 = vld [vmem:[#allocation2 + $0x628] sm:$0xf] }
0x1971   :  { %v17601_v59 = vld [vmem:[#allocation2 + $0x7ac] sm:$0xf0]  ;;  %v16494_v20 = vor.u32 %v17651_v8, %v16491_v17  ;;  %v16489_v21 = vld [vmem:[#allocation2 + $0x940] sm:$0xf]  ;;  %v17700_v22 = vld [vmem:[#allocation2 + $0xac4] sm:$0xf0] }
0x1972   :  { %v17553_v49 = vld [vmem:[#allocation2 + $0x634] sm:$0xf]  ;;  %11806 = vmatpush.bf16.msrb.mxu0 %v16082_v7  ;;  %11831 = vmatpush.bf16.msra.mxu1 %v16482_v16  ;;  %v16490_v12 = vor.u32 %v17700_v22, %v16489_v21  ;;  %v16099_v23 = vld [vmem:[#allocation2 + $0x7b8] sm:$0xf0]  ;;  %v17652_v2 = vld [vmem:[#allocation2 + $0x94c] sm:$0xf]  ;;  %v16090_v25 = vor.u32 %v17601_v59, %v16089_v19 }
0x1973   :  { %v16499_v24 = vld [vmem:[#allocation2 + $0xad0] sm:$0xf0]  ;;  %11819 = vmatpush.bf16.msrb.mxu2 %v16086_v0  ;;  %v16097_v26 = vld [vmem:[#allocation2 + $0x630] sm:$0xf]  ;;  %v17602_v28 = vld [vmem:[#allocation2 + $0x7b4] sm:$0xf0]  ;;  %v16102_v31 = vor.u32 %v17553_v49, %v16099_v23 }
0x1974   :  { %11845 = vmatpush.bf16.msra.mxu3 %v16094_v1  ;;  %v16502_v4 = vor.u32 %v17652_v2, %v16499_v24  ;;  %v17554_v29 = vld [vmem:[#allocation2 + $0x63c] sm:$0xf]  ;;  %v16098_v32 = vor.u32 %v17602_v28, %v16097_v26  ;;  %v16107_v34 = vld [vmem:[#allocation2 + $0x7c0] sm:$0xf0]  ;;  %v16497_v35 = vld [vmem:[#allocation2 + $0x948] sm:$0xf] }
0x1975   :  { %v17701_v37 = vld [vmem:[#allocation2 + $0xacc] sm:$0xf0]  ;;  %16863 = vmatmul.msk.bf16.vlgmr.msrb.gmra.mxu0 %vm128_vm9, %v18305_v43  ;;  %v16110_v38 = vor.u32 %v17554_v29, %v16107_v34  ;;  %v17653_v40 = vld [vmem:[#allocation2 + $0x954] sm:$0xf]  ;;  %v16507_v18 = vld [vmem:[#allocation2 + $0xad8] sm:$0xf0] }
0x1976   :  { %11857 = vmatpush.bf16.msra.mxu0 %v16490_v12  ;;  %v16498_v39 = vor.u32 %v17701_v37, %v16497_v35  ;;  %v16105_v30 = vld [vmem:[#allocation2 + $0x638] sm:$0xf]  ;;  %16864 = vmatmul.msk.bf16.vlgmr.msrb.gmra.mxu2 %vm128_vm9, %v18305_v43  ;;  %v16510_v41 = vor.u32 %v17653_v40, %v16507_v18  ;;  %v17603_v42 = vld [vmem:[#allocation2 + $0x7bc] sm:$0xf0]  ;;  %v16505_v44 = vld [vmem:[#allocation2 + $0x950] sm:$0xf] }
0x1977   :  { %11870 = vmatpush.bf16.msra.mxu2 %v16494_v20  ;;  %16866 = vmatmul.msk.bf16.vlgmr.msra.gmra.mxu3 %vm128_vm9, %v18305_v43  ;;  %v17702_v14 = vld [vmem:[#allocation2 + $0xad4] sm:$0xf0]  ;;  %v17555_v45 = vld [vmem:[#allocation2 + $0x644] sm:$0xf]  ;;  %v16115_v46 = vld [vmem:[#allocation2 + $0x7c8] sm:$0xf0]  ;;  %v16106_v51 = vor.u32 %v17603_v42, %v16105_v30 }
0x1978   :  { %11896 = vmatpush.bf16.msrb.mxu3 %v16502_v4  ;;  %11832 = vmatpush.bf16.msra.mxu1 %v16090_v25  ;;  %v16506_v33 = vor.u32 %v17702_v14, %v16505_v44  ;;  %v17654_v48 = vld [vmem:[#allocation2 + $0x95c] sm:$0xf]  ;;  %v16515_v47 = vld [vmem:[#allocation2 + $0xae0] sm:$0xf0]  ;;  %v16113_v50 = vld [vmem:[#allocation2 + $0x640] sm:$0xf]  ;;  %v16118_v58 = vor.u32 %v17555_v45, %v16115_v46 }
0x1979   :  { %v17604_v36 = vld [vmem:[#allocation2 + $0x7c4] sm:$0xf0]  ;;  %v16518_v53 = vor.u32 %v17654_v48, %v16515_v47  ;;  %v17556_v27 = vld [vmem:[#allocation2 + $0x64c] sm:$0xf]  ;;  %v16123_v54 = vld [vmem:[#allocation2 + $0x7d0] sm:$0xf0] }
0x197a   :  { %11858 = vmatpush.bf16.msra.mxu0 %v16098_v32  ;;  %v16513_v57 = vld [vmem:[#allocation2 + $0x958] sm:$0xf]  ;;  %v17703_v60 = vld [vmem:[#allocation2 + $0xadc] sm:$0xf0]  ;;  %v16114_v61 = vor.u32 %v17604_v36, %v16113_v50  ;;  %v16126_v62 = vor.u32 %v17556_v27, %v16123_v54  ;;  %v16121_v5 = vld [vmem:[#allocation2 + $0x648] sm:$0xf] }
0x197b   :  { %11871 = vmatpush.bf16.msra.mxu2 %v16102_v31  ;;  %16865 = vmatmul.msk.bf16.vlgmr.msra.gmra.mxu1 %vm128_vm9, %v18305_v43  ;;  %v16514_v63 = vor.u32 %v17703_v60, %v16513_v57  ;;  %v17605_v52 = vld [vmem:[#allocation2 + $0x7cc] sm:$0xf0]  ;;  %v17655_v3 = vld [vmem:[#allocation2 + $0x964] sm:$0xf]  ;;  %v16523_v55 = vld [vmem:[#allocation2 + $0xae8] sm:$0xf0] }
0x197c   :  { %11897 = vmatpush.bf16.msrb.mxu3 %v16110_v38  ;;  %11883 = vmatpush.bf16.msrb.mxu1 %v16498_v39  ;;  %v16122_v6 = vor.u32 %v17605_v52, %v16121_v5  ;;  %v16521_v56 = vld [vmem:[#allocation2 + $0x960] sm:$0xf]  ;;  %v17704_v7 = vld [vmem:[#allocation2 + $0xae4] sm:$0xf0]  ;;  %v17656_v9 = vld [vmem:[#allocation2 + $0x96c] sm:$0xf]  ;;  %v16526_v11 = vor.u32 %v17655_v3, %v16523_v55 }
0x197d   :  { %v16531_v10 = vld [vmem:[#allocation2 + $0xaf0] sm:$0xf0]  ;;  %v16522_v0 = vor.u32 %v17704_v7, %v16521_v56  ;;  %v16131_v13 = vld [vmem:[#allocation2 + $0x7d8] sm:$0xf0]  ;;  %v16129_v8 = vld [vmem:[#allocation2 + $0x650] sm:$0xf] }
0x197e   :  { %11909 = vmatpush.bf16.msrb.mxu0 %v16506_v33  ;;  %v17557_v1 = vld [vmem:[#allocation2 + $0x654] sm:$0xf]  ;;  %v16534_v15 = vor.u32 %v17656_v9, %v16531_v10  ;;  %v17606_v16 = vld [vmem:[#allocation2 + $0x7d4] sm:$0xf0]  ;;  %v17558_v17 = vld [vmem:[#allocation2 + $0x65c] sm:$0xf] }
0x197f   :  { %11922 = vmatpush.bf16.msrb.mxu2 %v16510_v41  ;;  %v16139_v19 = vld [vmem:[#allocation2 + $0x7e0] sm:$0xf0]  ;;  %v16529_v59 = vld [vmem:[#allocation2 + $0x968] sm:$0xf]  ;;  %v17705_v20 = vld [vmem:[#allocation2 + $0xaec] sm:$0xf0]  ;;  %v16134_v21 = vor.u32 %v17557_v1, %v16131_v13  ;;  %v16130_v22 = vor.u32 %v17606_v16, %v16129_v8 }
0x1980   :  { %11948 = vmatpush.bf16.msra.mxu3 %v16518_v53  ;;  %11884 = vmatpush.bf16.msrb.mxu1 %v16106_v51  ;;  %v16142_v49 = vor.u32 %v17558_v17, %v16139_v19  ;;  %v16530_v12 = vor.u32 %v17705_v20, %v16529_v59  ;;  %v16137_v23 = vld [vmem:[#allocation2 + $0x658] sm:$0xf]  ;;  %v17607_v2 = vld [vmem:[#allocation2 + $0x7dc] sm:$0xf0]  ;;  %v17657_v25 = vld [vmem:[#allocation2 + $0x974] sm:$0xf] }
0x1981   :  { %v16138_v24 = vor.u32 %v17607_v2, %v16137_v23  ;;  %v16539_v4 = vld [vmem:[#allocation2 + $0xaf8] sm:$0xf0]  ;;  %v16537_v26 = vld [vmem:[#allocation2 + $0x970] sm:$0xf]  ;;  %v17706_v28 = vld [vmem:[#allocation2 + $0xaf4] sm:$0xf0] }
0x1982   :  { %11910 = vmatpush.bf16.msrb.mxu0 %v16114_v61  ;;  %v17658_v29 = vld [vmem:[#allocation2 + $0x97c] sm:$0xf]  ;;  %v16547_v31 = vld [vmem:[#allocation2 + $0xb00] sm:$0xf0]  ;;  %v16542_v32 = vor.u32 %v17657_v25, %v16539_v4  ;;  %v16538_v34 = vor.u32 %v17706_v28, %v16537_v26  ;;  %v16147_v37 = vld [vmem:[#allocation2 + $0x7e8] sm:$0xf0] }
0x1983   :  { %11923 = vmatpush.bf16.msrb.mxu2 %v16118_v58  ;;  %v17559_v35 = vld [vmem:[#allocation2 + $0x664] sm:$0xf]  ;;  %v16550_v38 = vor.u32 %v17658_v29, %v16547_v31  ;;  %v16145_v39 = vld [vmem:[#allocation2 + $0x660] sm:$0xf]  ;;  %v17608_v40 = vld [vmem:[#allocation2 + $0x7e4] sm:$0xf0] }
0x1984   :  { %11935 = vmatpush.bf16.msra.mxu1 %v16514_v63  ;;  %11949 = vmatpush.bf16.msra.mxu3 %v16126_v62  ;;  %v17560_v18 = vld [vmem:[#allocation2 + $0x66c] sm:$0xf]  ;;  %v16155_v30 = vld [vmem:[#allocation2 + $0x7f0] sm:$0xf0]  ;;  %v16545_v41 = vld [vmem:[#allocation2 + $0x978] sm:$0xf]  ;;  %v16150_v44 = vor.u32 %v17559_v35, %v16147_v37  ;;  %v16146_v14 = vor.u32 %v17608_v40, %v16145_v39 }
0x1985   :  { %16867 = vmatmul.msk.bf16.vlgmr.msra.gmra.mxu0 %vm128_vm9, %v18305_v43  ;;  %v17707_v42 = vld [vmem:[#allocation2 + $0xafc] sm:$0xf0]  ;;  %v16158_v33 = vor.u32 %v17560_v18, %v16155_v30  ;;  %v16153_v46 = vld [vmem:[#allocation2 + $0x668] sm:$0xf]  ;;  %v17609_v48 = vld [vmem:[#allocation2 + $0x7ec] sm:$0xf0] }
0x1986   :  { %16868 = vmatmul.msk.bf16.vlgmr.msra.gmra.mxu2 %vm128_vm9, %v18305_v43  ;;  %11961 = vmatpush.bf16.msra.mxu0 %v16522_v0  ;;  %v16546_v45 = vor.u32 %v17707_v42, %v16545_v41  ;;  %v16154_v47 = vor.u32 %v17609_v48, %v16153_v46  ;;  %v17659_v50 = vld [vmem:[#allocation2 + $0x984] sm:$0xf]  ;;  %v16555_v36 = vld [vmem:[#allocation2 + $0xb08] sm:$0xf0]  ;;  %v16553_v51 = vld [vmem:[#allocation2 + $0x980] sm:$0xf] }
0x1987   :  { %16870 = vmatmul.msk.bf16.vlgmr.msrb.gmra.mxu3 %vm128_vm9, %v18305_v43  ;;  %11974 = vmatpush.bf16.msra.mxu2 %v16526_v11  ;;  %v17708_v53 = vld [vmem:[#allocation2 + $0xb04] sm:$0xf0]  ;;  %v17660_v27 = vld [vmem:[#allocation2 + $0x98c] sm:$0xf]  ;;  %v16563_v54 = vld [vmem:[#allocation2 + $0xb10] sm:$0xf0]  ;;  %v16558_v57 = vor.u32 %v17659_v50, %v16555_v36 }
0x1988   :  { %11936 = vmatpush.bf16.msra.mxu1 %v16122_v6  ;;  %12000 = vmatpush.bf16.msrb.mxu3 %v16534_v15  ;;  %v16554_v58 = vor.u32 %v17708_v53, %v16553_v51  ;;  %v17561_v60 = vld [vmem:[#allocation2 + $0x674] sm:$0xf]  ;;  %v16163_v61 = vld [vmem:[#allocation2 + $0x7f8] sm:$0xf0]  ;;  %v16566_v62 = vor.u32 %v17660_v27, %v16563_v54  ;;  %v16161_v63 = vld [vmem:[#allocation2 + $0x670] sm:$0xf] }
0x1989   :  { %v17610_v5 = vld [vmem:[#allocation2 + $0x7f4] sm:$0xf0]  ;;  %v17562_v52 = vld [vmem:[#allocation2 + $0x67c] sm:$0xf]  ;;  %v16171_v6 = vld [vmem:[#allocation2 + $0x800] sm:$0xf0]  ;;  %v16166_v56 = vor.u32 %v17561_v60, %v16163_v61 }
0x198a   :  { %11962 = vmatpush.bf16.msra.mxu0 %v16130_v22  ;;  %v16561_v3 = vld [vmem:[#allocation2 + $0x988] sm:$0xf]  ;;  %v17709_v55 = vld [vmem:[#allocation2 + $0xb0c] sm:$0xf0]  ;;  %v16162_v7 = vor.u32 %v17610_v5, %v16161_v63  ;;  %v16174_v9 = vor.u32 %v17562_v52, %v16171_v6  ;;  %v16169_v11 = vld [vmem:[#allocation2 + $0x678] sm:$0xf] }
0x198b   :  { %16869 = vmatmul.msk.bf16.vlgmr.msrb.gmra.mxu1 %vm128_vm9, %v18305_v43  ;;  %11975 = vmatpush.bf16.msra.mxu2 %v16134_v21  ;;  %v16562_v10 = vor.u32 %v17709_v55, %v16561_v3  ;;  %v17611_v0 = vld [vmem:[#allocation2 + $0x7fc] sm:$0xf0]  ;;  %v17661_v13 = vld [vmem:[#allocation2 + $0x994] sm:$0xf]  ;;  %v16571_v15 = vld [vmem:[#allocation2 + $0xb18] sm:$0xf0] }
0x198c   :  { %12001 = vmatpush.bf16.msrb.mxu3 %v16142_v49  ;;  %11987 = vmatpush.bf16.msrb.mxu1 %v16530_v12  ;;  %v16170_v1 = vor.u32 %v17611_v0, %v16169_v11  ;;  %v16569_v8 = vld [vmem:[#allocation2 + $0x990] sm:$0xf]  ;;  %v17710_v16 = vld [vmem:[#allocation2 + $0xb14] sm:$0xf0]  ;;  %v17662_v17 = vld [vmem:[#allocation2 + $0x99c] sm:$0xf]  ;;  %v16574_v59 = vor.u32 %v17661_v13, %v16571_v15 }
0x198d   :  { %v16579_v19 = vld [vmem:[#allocation2 + $0xb20] sm:$0xf0]  ;;  %v16570_v20 = vor.u32 %v17710_v16, %v16569_v8  ;;  %v16179_v22 = vld [vmem:[#allocation2 + $0x808] sm:$0xf0]  ;;  %v16177_v12 = vld [vmem:[#allocation2 + $0x680] sm:$0xf] }
0x198e   :  { %v17563_v21 = vld [vmem:[#allocation2 + $0x684] sm:$0xf]  ;;  %v16582_v49 = vor.u32 %v17662_v17, %v16579_v19  ;;  %v17612_v23 = vld [vmem:[#allocation2 + $0x804] sm:$0xf0]  ;;  %v17564_v2 = vld [vmem:[#allocation2 + $0x68c] sm:$0xf] }
0x198f   :  { %v16577_v25 = vld [vmem:[#allocation2 + $0x998] sm:$0xf]  ;;  %v17711_v4 = vld [vmem:[#allocation2 + $0xb1c] sm:$0xf0]  ;;  %v16182_v26 = vor.u32 %v17563_v21, %v16179_v22  ;;  %v16178_v28 = vor.u32 %v17612_v23, %v16177_v12  ;;  %v17663_v37 = vld [vmem:[#allocation2 + $0x9a4] sm:$0xf] }
0x1990   :  { %11988 = vmatpush.bf16.msrb.mxu1 %v16138_v24  ;;  %v16187_v24 = vld [vmem:[#allocation2 + $0x810] sm:$0xf0]  ;;  %v16578_v31 = vor.u32 %v17711_v4, %v16577_v25  ;;  %v16585_v39 = vld [vmem:[#allocation2 + $0x9a0] sm:$0xf]  ;;  %v17712_v40 = vld [vmem:[#allocation2 + $0xb24] sm:$0xf0] }
0x1991   :  { %v16190_v29 = vor.u32 %v17564_v2, %v16187_v24  ;;  %v17664_v18 = vld [vmem:[#allocation2 + $0x9ac] sm:$0xf]  ;;  %v16595_v30 = vld [vmem:[#allocation2 + $0xb30] sm:$0xf0]  ;;  %v16586_v42 = vor.u32 %v17712_v40, %v16585_v39  ;;  %v17614_v46 = vld [vmem:[#allocation2 + $0x814] sm:$0xf0] }
0x1992   :  { %v17566_v48 = vld [vmem:[#allocation2 + $0x69c] sm:$0xf]  ;;  %v16593_v50 = vld [vmem:[#allocation2 + $0x9a8] sm:$0xf]  ;;  %v17713_v36 = vld [vmem:[#allocation2 + $0xb2c] sm:$0xf0] }
0x1993   :  { %v16594_v54 = vor.u32 %v17713_v36, %v16593_v50  ;;  %v17665_v61 = vld [vmem:[#allocation2 + $0x9b4] sm:$0xf]  ;;  %v16601_v63 = vld [vmem:[#allocation2 + $0x9b0] sm:$0xf]  ;;  %v17714_v5 = vld [vmem:[#allocation2 + $0xb34] sm:$0xf0] }
0x1994   :  { %v17666_v52 = vld [vmem:[#allocation2 + $0x9bc] sm:$0xf]  ;;  %v16611_v6 = vld [vmem:[#allocation2 + $0xb40] sm:$0xf0]  ;;  %v16602_v55 = vor.u32 %v17714_v5, %v16601_v63  ;;  %v17616_v11 = vld [vmem:[#allocation2 + $0x824] sm:$0xf0] }
0x1995   :  { %16871 = vmatmul.msk.bf16.vlgmr.msrb.gmra.mxu0 %vm128_vm9, %v18305_v43  ;;  %v17568_v0 = vld [vmem:[#allocation2 + $0x6ac] sm:$0xf]  ;;  %v16609_v13 = vld [vmem:[#allocation2 + $0x9b8] sm:$0xf]  ;;  %v17715_v15 = vld [vmem:[#allocation2 + $0xb3c] sm:$0xf0] }
0x1996   :  { %16872 = vmatmul.msk.bf16.vlgmr.msrb.gmra.mxu2 %vm128_vm9, %v18305_v43  ;;  %12013 = vmatpush.bf16.msrb.mxu0 %v16538_v34  ;;  %v17613_v34 = vld [vmem:[#allocation2 + $0x80c] sm:$0xf0]  ;;  %v16610_v19 = vor.u32 %v17715_v15, %v16609_v13  ;;  %v17667_v22 = vld [vmem:[#allocation2 + $0x9c4] sm:$0xf]  ;;  %v16617_v12 = vld [vmem:[#allocation2 + $0x9c0] sm:$0xf] }
0x1997   :  { %16874 = vmatmul.msk.bf16.vlgmr.msra.gmra.mxu3 %vm128_vm9, %v18305_v43  ;;  %12026 = vmatpush.bf16.msrb.mxu2 %v16542_v32  ;;  %v16185_v32 = vld [vmem:[#allocation2 + $0x688] sm:$0xf]  ;;  %v17668_v2 = vld [vmem:[#allocation2 + $0x9cc] sm:$0xf]  ;;  %v16627_v24 = vld [vmem:[#allocation2 + $0xb50] sm:$0xf0] }
0x1998   :  { %12052 = vmatpush.bf16.msra.mxu3 %v16550_v38  ;;  %v16186_v35 = vor.u32 %v17613_v34, %v16185_v32  ;;  %v16587_v38 = vld [vmem:[#allocation2 + $0xb28] sm:$0xf0]  ;;  %v17716_v23 = vld [vmem:[#allocation2 + $0xb44] sm:$0xf0]  ;;  %v17618_v32 = vld [vmem:[#allocation2 + $0x834] sm:$0xf0] }
0x1999   :  { %v16590_v41 = vor.u32 %v17663_v37, %v16587_v38  ;;  %v16618_v4 = vor.u32 %v17716_v23, %v16617_v12  ;;  %v17570_v34 = vld [vmem:[#allocation2 + $0x6bc] sm:$0xf]  ;;  %v16625_v37 = vld [vmem:[#allocation2 + $0x9c8] sm:$0xf]  ;;  %v17717_v38 = vld [vmem:[#allocation2 + $0xb4c] sm:$0xf0] }
0x199a   :  { %12014 = vmatpush.bf16.msrb.mxu0 %v16146_v14  ;;  %v16195_v14 = vld [vmem:[#allocation2 + $0x818] sm:$0xf0]  ;;  %v17718_v50 = vld [vmem:[#allocation2 + $0xb54] sm:$0xf0]  ;;  %v16243_v63 = vld [vmem:[#allocation2 + $0x848] sm:$0xf0] }
0x199b   :  { %16873 = vmatmul.msk.bf16.vlgmr.msra.gmra.mxu1 %vm128_vm9, %v18305_v43  ;;  %12027 = vmatpush.bf16.msrb.mxu2 %v16150_v44  ;;  %v17565_v44 = vld [vmem:[#allocation2 + $0x694] sm:$0xf]  ;;  %v17670_v36 = vld [vmem:[#allocation2 + $0x9dc] sm:$0xf]  ;;  %s18077_s5 = smov [#allocation13]   ;;  %s13374_s17 = sshll.u32 %s19514_s6, 4  ;;  %s13375_s17 = int_to_ptr.hbm [resolvable:$true] %s13374_s17 }
0x199c   :  { %12053 = vmatpush.bf16.msra.mxu3 %v16158_v33  ;;  %12039 = vmatpush.bf16.msra.mxu1 %v16546_v45  ;;  %v16598_v33 = vor.u32 %v17664_v18, %v16595_v30  ;;  %v16193_v45 = vld [vmem:[#allocation2 + $0x690] sm:$0xf]  ;;  %v16198_v51 = vor.u32 %v17565_v44, %v16195_v14  ;;  %v10462_v18 = vld [vmem:[#allocation12 + $0x126] sm:$0xff]  ;;  %v17619_v44 = vld [vmem:[#allocation2 + $0x83c] sm:$0xf0]  ;;  %s13372_s15 = sshll.u32 %s18077_s5, 4  ;;  %s13373_s15 = int_to_ptr.vmem [resolvable:$true] %s13372_s15 }
0x199d   :  { %v16194_v53 = vor.u32 %v17614_v46, %v16193_v45  ;;  %v10475_v14 = vunpack.c.l.bf16 %v10462_v18  ;;  %v17669_v46 = vld [vmem:[#allocation2 + $0x9d4] sm:$0xf]  ;;  %v10476_v23 = vunpack.c.h.bf16 %v10462_v18  ;;  %v17672_v18 = vld [vmem:[#allocation2 + $0x9ec] sm:$0xf] }
0x199f   :  { %v10527_v45 = vperm.slane %v10475_v14, 4 }
0x19a0   :  { %12040 = vmatpush.bf16.msra.mxu1 %v16154_v47  ;;  %v16203_v47 = vld [vmem:[#allocation2 + $0x820] sm:$0xf0] }
0x19a1   :  { %v16206_v27 = vor.u32 %v17566_v48, %v16203_v47  ;;  %v16635_v48 = vld [vmem:[#allocation2 + $0xb58] sm:$0xf0]  ;;  %v16633_v47 = vld [vmem:[#allocation2 + $0x9d0] sm:$0xf] }
0x19a5   :  { %16875 = vmatmul.msk.bf16.vlgmr.msra.gmra.mxu0 %vm128_vm9, %v18305_v43 }
0x19a6   :  { %16876 = vmatmul.msk.bf16.vlgmr.msra.gmra.mxu2 %vm128_vm9, %v18305_v43  ;;  %12065 = vmatpush.bf16.msra.mxu0 %v16554_v58  ;;  %v17615_v58 = vld [vmem:[#allocation2 + $0x81c] sm:$0xf0] }
0x19a7   :  { %16878 = vmatmul.msk.bf16.vlgmr.msrb.gmra.mxu3 %vm128_vm9, %v18305_v43  ;;  %12078 = vmatpush.bf16.msra.mxu2 %v16558_v57  ;;  %v16201_v57 = vld [vmem:[#allocation2 + $0x698] sm:$0xf] }
0x19a8   :  { %12104 = vmatpush.bf16.msrb.mxu3 %v16566_v62  ;;  %v16202_v60 = vor.u32 %v17615_v58, %v16201_v57  ;;  %v16603_v62 = vld [vmem:[#allocation2 + $0xb38] sm:$0xf0]  ;;  %v10525_v57 = vperm.slane %v10475_v14, 0  ;;  %v10723_v58 = vperm.slane %v10527_v45, 0 }
0x19a9   :  { %v16606_v3 = vor.u32 %v17665_v61, %v16603_v62  ;;  %v16634_v61 = vor.u32 %v17718_v50, %v16633_v47  ;;  %v17571_v62 = vld [vmem:[#allocation2 + $0x6c4] sm:$0xf]  ;;  %v16259_v47 = vld [vmem:[#allocation2 + $0x858] sm:$0xf0] }
0x19aa   :  { %12066 = vmatpush.bf16.msra.mxu0 %v16162_v7  ;;  %v16211_v7 = vld [vmem:[#allocation2 + $0x828] sm:$0xf0]  ;;  %v10721_v13 = vperm.slane %v10525_v57, 0  ;;  %v17721_v57 = vld [vmem:[#allocation2 + $0xb6c] sm:$0xf0] }
0x19ab   :  { %16877 = vmatmul.msk.bf16.vlgmr.msrb.gmra.mxu1 %vm128_vm9, %v18305_v43  ;;  %12079 = vmatpush.bf16.msra.mxu2 %v16166_v56  ;;  %v17567_v56 = vld [vmem:[#allocation2 + $0x6a4] sm:$0xf] }
0x19ac   :  { %12105 = vmatpush.bf16.msrb.mxu3 %v16174_v9  ;;  %12091 = vmatpush.bf16.msrb.mxu1 %v16562_v10  ;;  %v16614_v9 = vor.u32 %v17666_v52, %v16611_v6  ;;  %v16209_v10 = vld [vmem:[#allocation2 + $0x6a0] sm:$0xf]  ;;  %v16214_v8 = vor.u32 %v17567_v56, %v16211_v7  ;;  %v17620_v6 = vld [vmem:[#allocation2 + $0x844] sm:$0xf0]  ;;  %v16641_v56 = vld [vmem:[#allocation2 + $0x9d8] sm:$0xf] }
0x19ad   :  { %v16210_v16 = vor.u32 %v17616_v11, %v16209_v10  ;;  %v16241_v52 = vld [vmem:[#allocation2 + $0x6c0] sm:$0xf] }
0x19ae   :  { %v17719_v7 = vld [vmem:[#allocation2 + $0xb5c] sm:$0xf0] }
0x19b0   :  { %12092 = vmatpush.bf16.msrb.mxu1 %v16170_v1  ;;  %v16219_v1 = vld [vmem:[#allocation2 + $0x830] sm:$0xf0] }
0x19b1   :  { %v16222_v17 = vor.u32 %v17568_v0, %v16219_v1  ;;  %v16246_v0 = vor.u32 %v17571_v62, %v16243_v63  ;;  %v16242_v1 = vor.u32 %v17620_v6, %v16241_v52  ;;  %v19289_v6 = vld [vmem:[#allocation12 + $0x12e] sm:$0xff] }
0x19b5   :  { %16879 = vmatmul.msk.bf16.vlgmr.msrb.gmra.mxu0 %vm128_vm9, %v18305_v43 }
0x19b6   :  { %16880 = vmatmul.msk.bf16.vlgmr.msrb.gmra.mxu2 %vm128_vm9, %v18305_v43  ;;  %12117 = vmatpush.bf16.msrb.mxu0 %v16570_v20  ;;  %v17617_v20 = vld [vmem:[#allocation2 + $0x82c] sm:$0xf0] }
0x19b7   :  { %16882 = vmatmul.msk.bf16.vlgmr.msra.gmra.mxu3 %vm128_vm9, %v18305_v43  ;;  %12130 = vmatpush.bf16.msrb.mxu2 %v16574_v59  ;;  %v16217_v59 = vld [vmem:[#allocation2 + $0x6a8] sm:$0xf] }
0x19b8   :  { %12156 = vmatpush.bf16.msra.mxu3 %v16582_v49  ;;  %v16218_v21 = vor.u32 %v17617_v20, %v16217_v59  ;;  %v16619_v49 = vld [vmem:[#allocation2 + $0xb48] sm:$0xf0]  ;;  %v16249_v59 = vld [vmem:[#allocation2 + $0x6c8] sm:$0xf]  ;;  %v17621_v20 = vld [vmem:[#allocation2 + $0x84c] sm:$0xf0] }
0x19b9   :  { %v16622_v25 = vor.u32 %v17667_v22, %v16619_v49 }
0x19ba   :  { %12118 = vmatpush.bf16.msrb.mxu0 %v16178_v28  ;;  %v16227_v28 = vld [vmem:[#allocation2 + $0x838] sm:$0xf0] }
0x19bb   :  { %16881 = vmatmul.msk.bf16.vlgmr.msra.gmra.mxu1 %vm128_vm9, %v18305_v43  ;;  %12131 = vmatpush.bf16.msrb.mxu2 %v16182_v26  ;;  %v17569_v26 = vld [vmem:[#allocation2 + $0x6b4] sm:$0xf] }
0x19bc   :  { %12157 = vmatpush.bf16.msra.mxu3 %v16190_v29  ;;  %12143 = vmatpush.bf16.msra.mxu1 %v16578_v31  ;;  %v16630_v29 = vor.u32 %v17668_v2, %v16627_v24  ;;  %v16225_v31 = vld [vmem:[#allocation2 + $0x6b0] sm:$0xf]  ;;  %v16230_v39 = vor.u32 %v17569_v26, %v16227_v28 }
0x19bd   :  { %v16226_v40 = vor.u32 %v17618_v32, %v16225_v31  ;;  %v10531_v32 = vperm.slane %v10476_v23, 4 }
0x19c0   :  { %12144 = vmatpush.bf16.msra.mxu1 %v16186_v35  ;;  %v16235_v35 = vld [vmem:[#allocation2 + $0x840] sm:$0xf0] }
0x19c1   :  { %v16238_v30 = vor.u32 %v17570_v34, %v16235_v35  ;;  %v17671_v34 = vld [vmem:[#allocation2 + $0x9e4] sm:$0xf]  ;;  %v16651_v35 = vld [vmem:[#allocation2 + $0xb68] sm:$0xf0] }
0x19c2   :  { %v16654_v45 = vor.u32 %v17671_v34, %v16651_v35 }
0x19c5   :  { %16883 = vmatmul.msk.bf16.vlgmr.msra.gmra.mxu0 %vm128_vm9, %v18305_v43 }
0x19c6   :  { %16884 = vmatmul.msk.bf16.vlgmr.msra.gmra.mxu2 %vm128_vm9, %v18305_v43  ;;  %12169 = vmatpush.bf16.msra.mxu0 %v16586_v42  ;;  %v16233_v42 = vld [vmem:[#allocation2 + $0x6b8] sm:$0xf] }
0x19c7   :  { %16886 = vmatmul.msk.bf16.vlgmr.msrb.gmra.mxu3 %vm128_vm9, %v18305_v43  ;;  %12182 = vmatpush.bf16.msra.mxu2 %v16590_v41  ;;  %v16626_v41 = vor.u32 %v17717_v38, %v16625_v37  ;;  %v16649_v37 = vld [vmem:[#allocation2 + $0x9e0] sm:$0xf]  ;;  %v17720_v38 = vld [vmem:[#allocation2 + $0xb64] sm:$0xf0] }
0x19c8   :  { %12208 = vmatpush.bf16.msrb.mxu3 %v16598_v33  ;;  %v16234_v33 = vor.u32 %v17619_v44, %v16233_v42  ;;  %v10530_v42 = vperm.slane %v10476_v23, 2  ;;  %v10532_v44 = vperm.slane %v10476_v23, 6 }
0x19ca   :  { %12170 = vmatpush.bf16.msra.mxu0 %v16194_v53 }
0x19cb   :  { %16885 = vmatmul.msk.bf16.vlgmr.msrb.gmra.mxu1 %vm128_vm9, %v18305_v43  ;;  %12183 = vmatpush.bf16.msra.mxu2 %v16198_v51  ;;  %v16643_v51 = vld [vmem:[#allocation2 + $0xb60] sm:$0xf0] }
0x19cc   :  { %12209 = vmatpush.bf16.msrb.mxu3 %v16206_v27  ;;  %12195 = vmatpush.bf16.msrb.mxu1 %v16594_v54  ;;  %v10526_v27 = vperm.slane %v10475_v14, 2  ;;  %v10528_v54 = vperm.slane %v10475_v14, 6  ;;  %v16646_v5 = vor.u32 %v17670_v36, %v16643_v51  ;;  %v10529_v14 = vperm.slane %v10476_v23, 0  ;;  %v16257_v36 = vld [vmem:[#allocation2 + $0x6d0] sm:$0xf] }
0x19cd   :  { %v17622_v51 = vld [vmem:[#allocation2 + $0x854] sm:$0xf0]  ;;  %v16667_v23 = vld [vmem:[#allocation2 + $0xb78] sm:$0xf0] }
0x19ce   :  { %v10724_v10 = vperm.slane %v10528_v54, 0  ;;  %v16657_v54 = vld [vmem:[#allocation2 + $0x9e8] sm:$0xf]  ;;  %v16258_v63 = vor.u32 %v17622_v51, %v16257_v36 }
0x19d0   :  { %12196 = vmatpush.bf16.msrb.mxu1 %v16202_v60  ;;  %v16638_v60 = vor.u32 %v17669_v46, %v16635_v48  ;;  %v16650_v46 = vor.u32 %v17720_v38, %v16649_v37  ;;  %v17573_v48 = vld [vmem:[#allocation2 + $0x6d4] sm:$0xf] }
0x19d1   :  { %v16262_v62 = vor.u32 %v17573_v48, %v16259_v47 }
0x19d5   :  { %16887 = vmatmul.msk.bf16.vlgmr.msrb.gmra.mxu0 %vm128_vm9, %v18305_v43 }
0x19d6   :  { %16888 = vmatmul.msk.bf16.vlgmr.msrb.gmra.mxu2 %vm128_vm9, %v18305_v43  ;;  %12221 = vmatpush.bf16.msrb.mxu0 %v16602_v55  ;;  %v16251_v55 = vld [vmem:[#allocation2 + $0x850] sm:$0xf0] }
0x19d7   :  { %16890 = vmatmul.msk.bf16.vlgmr.msra.gmra.mxu3 %vm128_vm9, %v18305_v43  ;;  %12234 = vmatpush.bf16.msrb.mxu2 %v16606_v3  ;;  %v17572_v3 = vld [vmem:[#allocation2 + $0x6cc] sm:$0xf] }
0x19d8   :  { %12260 = vmatpush.bf16.msra.mxu3 %v16614_v9  ;;  %v10722_v9 = vperm.slane %v10526_v27, 0  ;;  %v16267_v27 = vld [vmem:[#allocation2 + $0x860] sm:$0xf0] }
0x19da   :  { %12222 = vmatpush.bf16.msrb.mxu0 %v16210_v16  ;;  %v16642_v16 = vor.u32 %v17719_v7, %v16641_v56 }
0x19db   :  { %16889 = vmatmul.msk.bf16.vlgmr.msra.gmra.mxu1 %vm128_vm9, %v18305_v43  ;;  %12235 = vmatpush.bf16.msrb.mxu2 %v16214_v8  ;;  %v16254_v8 = vor.u32 %v17572_v3, %v16251_v55  ;;  %v16658_v55 = vor.u32 %v17721_v57, %v16657_v54 }
0x19dc   :  { %12261 = vmatpush.bf16.msra.mxu3 %v16222_v17  ;;  %12247 = vmatpush.bf16.msra.mxu1 %v16610_v19 }
0x19e0   :  { %12248 = vmatpush.bf16.msra.mxu1 %v16218_v21 }
0x19e5   :  { %16891 = vmatmul.msk.bf16.vlgmr.msra.gmra.mxu0 %vm128_vm9, %v18305_v43 }
0x19e6   :  { %16892 = vmatmul.msk.bf16.vlgmr.msra.gmra.mxu2 %vm128_vm9, %v18305_v43  ;;  %12273 = vmatpush.bf16.msra.mxu0 %v16618_v4  ;;  %v16250_v4 = vor.u32 %v17621_v20, %v16249_v59 }
0x19e7   :  { %16894 = vmatmul.msk.bf16.vlgmr.msrb.gmra.mxu3 %vm128_vm9, %v18305_v43  ;;  %12286 = vmatpush.bf16.msra.mxu2 %v16622_v25 }
0x19e8   :  { %12312 = vmatpush.bf16.msrb.mxu3 %v16630_v29 }
0x19ea   :  { %12274 = vmatpush.bf16.msra.mxu0 %v16226_v40 }
0x19eb   :  { %16893 = vmatmul.msk.bf16.vlgmr.msrb.gmra.mxu1 %vm128_vm9, %v18305_v43  ;;  %12287 = vmatpush.bf16.msra.mxu2 %v16230_v39 }
0x19ec   :  { %12313 = vmatpush.bf16.msrb.mxu3 %v16238_v30  ;;  %12299 = vmatpush.bf16.msrb.mxu1 %v16626_v41  ;;  %v16659_v30 = vld [vmem:[#allocation2 + $0xb70] sm:$0xf0] }
0x19ed   :  { %v16662_v50 = vor.u32 %v17672_v18, %v16659_v30  ;;  %v16273_v30 = vld [vmem:[#allocation2 + $0x6e0] sm:$0xf] }
0x19f0   :  { %12300 = vmatpush.bf16.msrb.mxu1 %v16234_v33  ;;  %v10727_v33 = vperm.slane %v10531_v32, 0 }
0x19f2   :  { %v11808_v53 = vpop.f32.mrf.mxu0 }
0x19f3   :  { %v11809_v2 = vadd.f32 %v11808_v53, %v10721_v13  ;;  %v17574_v53 = vld [vmem:[#allocation2 + $0x6dc] sm:$0xf] }
0x19f4   :  { %v16270_v3 = vor.u32 %v17574_v53, %v16267_v27 }
0x19f5   :  { %16895 = vmatmul.msk.bf16.vlgmr.msrb.gmra.mxu0 %vm128_vm9, %v18305_v43 }
0x19f6   :  { %16896 = vmatmul.msk.bf16.vlgmr.msrb.gmra.mxu2 %vm128_vm9, %v18305_v43  ;;  %12325 = vmatpush.bf16.msrb.mxu0 %v16634_v61 }
0x19f7   :  { %16898 = vmatmul.msk.bf16.vlgmr.msra.gmra.mxu3 %vm128_vm9, %v18305_v43  ;;  %12338 = vmatpush.bf16.msrb.mxu2 %v16638_v60  ;;  %v10728_v60 = vperm.slane %v10532_v44, 0  ;;  %v16283_v44 = vld [vmem:[#allocation2 + $0x870] sm:$0xf0] }
0x19f8   :  { %v11834_v11 = vpop.f32.mrf.mxu1  ;;  %12364 = vmatpush.bf16.msra.mxu3 %v16646_v5  ;;  %v10725_v5 = vperm.slane %v10529_v14, 0  ;;  %v16673_v14 = vld [vmem:[#allocation2 + $0x9f8] sm:$0xf] }
0x19f9   :  { %v11835_v15 = vadd.f32 %v11834_v11, %v10723_v58  ;;  %v11821_v17 = vpop.f32.mrf.mxu2  ;;  %v10726_v58 = vperm.slane %v10530_v42, 0  ;;  %v17576_v42 = vld [vmem:[#allocation2 + $0x6ec] sm:$0xf] }
0x19fa   :  { %v11847_v19 = vpop.f32.mrf.mxu3  ;;  %v11822_v21 = vadd.f32 %v11821_v17, %v10722_v9  ;;  %v11810_v12 = vpop.f32.mrf.mxu0  ;;  %12326 = vmatpush.bf16.msrb.mxu0 %v16242_v1  ;;  %v16265_v9 = vld [vmem:[#allocation2 + $0x6d8] sm:$0xf]  ;;  %v16286_v53 = vor.u32 %v17576_v42, %v16283_v44 }
0x19fb   :  { %v13172_v22 = vrot.slane %v11835_v15, 4  ;;  %v11848_v49 = vadd.f32 %v11847_v19, %v10724_v10  ;;  %16897 = vmatmul.msk.bf16.vlgmr.msra.gmra.mxu1 %vm128_vm9, %v18305_v43  ;;  %12339 = vmatpush.bf16.msrb.mxu2 %v16246_v0  ;;  %v17623_v10 = vld [vmem:[#allocation2 + $0x85c] sm:$0xf0]  ;;  %v10477_v15 = vunpack.c.l.bf16 %v19289_v6  ;;  %v17673_v12 = vld [vmem:[#allocation2 + $0x9f4] sm:$0xf] }
0x19fc   :  { %v13171_v24 = vrot.slane %v11822_v21, 6  ;;  %12365 = vmatpush.bf16.msra.mxu3 %v16254_v8  ;;  %12351 = vmatpush.bf16.msra.mxu1 %v16642_v16  ;;  %v16266_v19 = vor.u32 %v17623_v10, %v16265_v9  ;;  %v16670_v37 = vor.u32 %v17673_v12, %v16667_v23 }
0x19fd   :  { %v13173_v25 = vrot.slane %v11848_v49, 2  ;;  %v10535_v49 = vperm.slane %v10477_v15, 4  ;;  %v10536_v32 = vperm.slane %v10477_v15, 6  ;;  %v10533_v34 = vperm.slane %v10477_v15, 0 }
0x19fe   :  { %v13244_v26 = vsel %vm3898_vm4, %v11809_v2, %v13171_v24  ;;  %v16665_v2 = vld [vmem:[#allocation2 + $0x9f0] sm:$0xf]  ;;  %v17722_v24 = vld [vmem:[#allocation2 + $0xb74] sm:$0xf0] }
0x19ff   :  { %v13245_v28 = vsel %vm3900_vm12, %v13172_v22, %v13173_v25  ;;  %v10731_v35 = vperm.slane %v10535_v49, 0  ;;  %v16666_v38 = vor.u32 %v17722_v24, %v16665_v2  ;;  %v10729_v36 = vperm.slane %v10533_v34, 0  ;;  %v17577_v24 = vld [vmem:[#allocation2 + $0x6f4] sm:$0xf]  ;;  %v17725_v34 = vld [vmem:[#allocation2 + $0xb8c] sm:$0xf0] }
0x1a00   :  { %v13246_v29 = vsel %vm3902_vm13, %v13244_v26, %v13245_v28  ;;  %v11836_v31 = vpop.f32.mrf.mxu1  ;;  %12352 = vmatpush.bf16.msra.mxu1 %v16250_v4  ;;  %v17674_v26 = vld [vmem:[#allocation2 + $0x9fc] sm:$0xf]  ;;  %v16675_v28 = vld [vmem:[#allocation2 + $0xb80] sm:$0xf0] }
0x1a01   :  { %13342 = vst [vmem:[#allocation13 + $0x24c] sm:$0xff] %v13246_v29  ;;  %v11823_v39 = vpop.f32.mrf.mxu2  ;;  %v10534_v31 = vperm.slane %v10477_v15, 2  ;;  %v16678_v18 = vor.u32 %v17674_v26, %v16675_v28  ;;  %v16683_v15 = vld [vmem:[#allocation2 + $0xb88] sm:$0xf0]  ;;  %v16289_v26 = vld [vmem:[#allocation2 + $0x6f0] sm:$0xf] }
0x1a02   :  { %v11849_v40 = vpop.f32.mrf.mxu3  ;;  %v11860_v41 = vpop.f32.mrf.mxu0  ;;  %v17575_v39 = vld [vmem:[#allocation2 + $0x6e4] sm:$0xf]  ;;  %v17626_v28 = vld [vmem:[#allocation2 + $0x874] sm:$0xf0] }
0x1a03   :  { %v11861_v8 = vadd.f32 %v11860_v41, %v10725_v5  ;;  %v16275_v40 = vld [vmem:[#allocation2 + $0x868] sm:$0xf0]  ;;  %v17624_v41 = vld [vmem:[#allocation2 + $0x864] sm:$0xf0] }
0x1a04   :  { %v16278_v47 = vor.u32 %v17575_v39, %v16275_v40  ;;  %v16290_v40 = vor.u32 %v17626_v28, %v16289_v26 }
0x1a05   :  { %16899 = vmatmul.msk.bf16.vlgmr.msra.gmra.mxu0 %vm128_vm9, %v18305_v43 }
0x1a06   :  { %16900 = vmatmul.msk.bf16.vlgmr.msra.gmra.mxu2 %vm128_vm9, %v18305_v43  ;;  %12377 = vmatpush.bf16.msra.mxu0 %v16650_v46  ;;  %v10732_v46 = vperm.slane %v10536_v32, 0  ;;  %v16689_v32 = vld [vmem:[#allocation2 + $0xa08] sm:$0xf] }
0x1a07   :  { %16902 = vmatmul.msk.bf16.vlgmr.msrb.gmra.mxu3 %vm128_vm9, %v18305_v43  ;;  %12390 = vmatpush.bf16.msra.mxu2 %v16654_v45  ;;  %v10730_v45 = vperm.slane %v10534_v31, 0  ;;  %v16299_v31 = vld [vmem:[#allocation2 + $0x880] sm:$0xf0]  ;;  %v16690_v44 = vor.u32 %v17725_v34, %v16689_v32 }
0x1a08   :  { %v11886_v61 = vpop.f32.mrf.mxu1  ;;  %12416 = vmatpush.bf16.msrb.mxu3 %v16662_v50  ;;  %v16274_v50 = vor.u32 %v17624_v41, %v16273_v30  ;;  %v19315_v41 = vld [vmem:[#allocation12 + $0x136] sm:$0xff] }
0x1a09   :  { %v11887_v52 = vadd.f32 %v11886_v61, %v10727_v33  ;;  %v11873_v56 = vpop.f32.mrf.mxu2  ;;  %v17723_v33 = vld [vmem:[#allocation2 + $0xb7c] sm:$0xf0] }
0x1a0a   :  { %v11899_v7 = vpop.f32.mrf.mxu3  ;;  %v11874_v11 = vadd.f32 %v11873_v56, %v10726_v58  ;;  %v11862_v13 = vpop.f32.mrf.mxu0  ;;  %12378 = vmatpush.bf16.msra.mxu0 %v16258_v63  ;;  %v16674_v27 = vor.u32 %v17723_v33, %v16673_v14  ;;  %v16281_v58 = vld [vmem:[#allocation2 + $0x6e8] sm:$0xf] }
0x1a0b   :  { %v13175_v0 = vrot.slane %v11887_v52, 4  ;;  %v11900_v1 = vadd.f32 %v11899_v7, %v10728_v60  ;;  %16901 = vmatmul.msk.bf16.vlgmr.msrb.gmra.mxu1 %vm128_vm9, %v18305_v43  ;;  %12391 = vmatpush.bf16.msra.mxu2 %v16262_v62  ;;  %v17625_v60 = vld [vmem:[#allocation2 + $0x86c] sm:$0xf0]  ;;  %v10478_v52 = vunpack.c.h.bf16 %v19289_v6  ;;  %v17675_v13 = vld [vmem:[#allocation2 + $0xa04] sm:$0xf] }
0x1a0c   :  { %v13174_v16 = vrot.slane %v11874_v11, 6  ;;  %12417 = vmatpush.bf16.msrb.mxu3 %v16270_v3  ;;  %12403 = vmatpush.bf16.msrb.mxu1 %v16658_v55  ;;  %v16282_v7 = vor.u32 %v17625_v60, %v16281_v58  ;;  %v16681_v6 = vld [vmem:[#allocation2 + $0xa00] sm:$0xf]  ;;  %v16686_v23 = vor.u32 %v17675_v13, %v16683_v15 }
0x1a0d   :  { %v13176_v17 = vrot.slane %v11900_v1, 2  ;;  %v10539_v1 = vperm.slane %v10478_v52, 4  ;;  %v10537_v49 = vperm.slane %v10478_v52, 0 }
0x1a0e   :  { %v13247_v59 = vsel %vm3898_vm4, %v11861_v8, %v13174_v16  ;;  %v17724_v8 = vld [vmem:[#allocation2 + $0xb84] sm:$0xf0] }
0x1a0f   :  { %v13248_v20 = vsel %vm3900_vm12, %v13175_v0, %v13176_v17  ;;  %v10735_v12 = vperm.slane %v10539_v1, 0  ;;  %v16682_v2 = vor.u32 %v17724_v8, %v16681_v6 }
0x1a10   :  { %v13249_v21 = vsel %vm3902_vm13, %v13247_v59, %v13248_v20  ;;  %v11888_v22 = vpop.f32.mrf.mxu1  ;;  %12404 = vmatpush.bf16.msrb.mxu1 %v16266_v19  ;;  %v17676_v19 = vld [vmem:[#allocation2 + $0xa0c] sm:$0xf]  ;;  %v16691_v59 = vld [vmem:[#allocation2 + $0xb90] sm:$0xf0] }
0x1a11   :  { %13343 = vst [vmem:[#allocation13 + $0x254] sm:$0xff] %v13249_v21  ;;  %v11875_v25 = vpop.f32.mrf.mxu2  ;;  %v10538_v21 = vperm.slane %v10478_v52, 2  ;;  %v10540_v22 = vperm.slane %v10478_v52, 6  ;;  %v16699_v52 = vld [vmem:[#allocation2 + $0xb98] sm:$0xf0] }
0x1a12   :  { %v11901_v4 = vpop.f32.mrf.mxu3  ;;  %v11912_v29 = vpop.f32.mrf.mxu0  ;;  %v16291_v25 = vld [vmem:[#allocation2 + $0x878] sm:$0xf0] }
0x1a13   :  { %v11913_v3 = vadd.f32 %v11912_v29, %v10729_v36  ;;  %v16694_v4 = vor.u32 %v17676_v19, %v16691_v59  ;;  %v17578_v29 = vld [vmem:[#allocation2 + $0x6fc] sm:$0xf]  ;;  %v16294_v39 = vor.u32 %v17577_v24, %v16291_v25  ;;  %v16305_v59 = vld [vmem:[#allocation2 + $0x700] sm:$0xf] }
0x1a14   :  { %v16302_v42 = vor.u32 %v17578_v29, %v16299_v31 }
0x1a15   :  { %16903 = vmatmul.msk.bf16.vlgmr.msrb.gmra.mxu0 %vm128_vm9, %v18305_v43 }
0x1a16   :  { %16904 = vmatmul.msk.bf16.vlgmr.msrb.gmra.mxu2 %vm128_vm9, %v18305_v43  ;;  %12429 = vmatpush.bf16.msrb.mxu0 %v16666_v38 }
0x1a17   :  { %16906 = vmatmul.msk.bf16.vlgmr.msra.gmra.mxu3 %vm128_vm9, %v18305_v43  ;;  %12442 = vmatpush.bf16.msrb.mxu2 %v16670_v37  ;;  %v10736_v37 = vperm.slane %v10540_v22, 0  ;;  %v16315_v22 = vld [vmem:[#allocation2 + $0x890] sm:$0xf0] }
0x1a18   :  { %v11938_v48 = vpop.f32.mrf.mxu1  ;;  %12468 = vmatpush.bf16.msra.mxu3 %v16678_v18  ;;  %v10733_v18 = vperm.slane %v10537_v49, 0  ;;  %v16705_v49 = vld [vmem:[#allocation2 + $0xa18] sm:$0xf] }
0x1a19   :  { %v11939_v51 = vadd.f32 %v11938_v48, %v10731_v35  ;;  %v11925_v54 = vpop.f32.mrf.mxu2  ;;  %v10734_v35 = vperm.slane %v10538_v21, 0  ;;  %v17580_v21 = vld [vmem:[#allocation2 + $0x70c] sm:$0xf] }
0x1a1a   :  { %v11951_v57 = vpop.f32.mrf.mxu3  ;;  %v11926_v61 = vadd.f32 %v11925_v54, %v10730_v45  ;;  %v11914_v5 = vpop.f32.mrf.mxu0  ;;  %12430 = vmatpush.bf16.msrb.mxu0 %v16274_v50  ;;  %v16297_v45 = vld [vmem:[#allocation2 + $0x6f8] sm:$0xf]  ;;  %v16318_v29 = vor.u32 %v17580_v21, %v16315_v22 }
0x1a1b   :  { %v13178_v62 = vrot.slane %v11939_v51, 4  ;;  %v11952_v63 = vadd.f32 %v11951_v57, %v10732_v46  ;;  %16905 = vmatmul.msk.bf16.vlgmr.msra.gmra.mxu1 %vm128_vm9, %v18305_v43  ;;  %12443 = vmatpush.bf16.msrb.mxu2 %v16278_v47  ;;  %v17627_v46 = vld [vmem:[#allocation2 + $0x87c] sm:$0xf0]  ;;  %v10479_v51 = vunpack.c.l.bf16 %v19315_v41  ;;  %v17677_v5 = vld [vmem:[#allocation2 + $0xa14] sm:$0xf] }
0x1a1c   :  { %v13177_v55 = vrot.slane %v11926_v61, 6  ;;  %12469 = vmatpush.bf16.msra.mxu3 %v16286_v53  ;;  %12455 = vmatpush.bf16.msra.mxu1 %v16674_v27  ;;  %v16298_v57 = vor.u32 %v17627_v46, %v16297_v45  ;;  %v16702_v6 = vor.u32 %v17677_v5, %v16699_v52 }
0x1a1d   :  { %v13179_v56 = vrot.slane %v11952_v63, 2  ;;  %v10543_v63 = vperm.slane %v10479_v51, 4  ;;  %v10544_v1 = vperm.slane %v10479_v51, 6  ;;  %v10541_v13 = vperm.slane %v10479_v51, 0 }
0x1a1e   :  { %v13250_v9 = vsel %vm3898_vm4, %v11913_v3, %v13177_v55  ;;  %v16697_v3 = vld [vmem:[#allocation2 + $0xa10] sm:$0xf]  ;;  %v17726_v55 = vld [vmem:[#allocation2 + $0xb94] sm:$0xf0] }
0x1a1f   :  { %v13251_v10 = vsel %vm3900_vm12, %v13178_v62, %v13179_v56  ;;  %v10739_v15 = vperm.slane %v10543_v63, 0  ;;  %v16698_v8 = vor.u32 %v17726_v55, %v16697_v3  ;;  %v10737_v26 = vperm.slane %v10541_v13, 0  ;;  %v17581_v55 = vld [vmem:[#allocation2 + $0x714] sm:$0xf]  ;;  %v17729_v13 = vld [vmem:[#allocation2 + $0xbac] sm:$0xf0] }
0x1a20   :  { %v13252_v11 = vsel %vm3902_vm13, %v13250_v9, %v13251_v10  ;;  %v11940_v0 = vpop.f32.mrf.mxu1  ;;  %12456 = vmatpush.bf16.msra.mxu1 %v16282_v7  ;;  %v17678_v9 = vld [vmem:[#allocation2 + $0xa1c] sm:$0xf]  ;;  %v16707_v10 = vld [vmem:[#allocation2 + $0xba0] sm:$0xf0] }
0x1a21   :  { %13344 = vst [vmem:[#allocation13 + $0x25c] sm:$0xff] %v13252_v11  ;;  %v11927_v16 = vpop.f32.mrf.mxu2  ;;  %v10542_v0 = vperm.slane %v10479_v51, 2  ;;  %v16710_v19 = vor.u32 %v17678_v9, %v16707_v10  ;;  %v16715_v51 = vld [vmem:[#allocation2 + $0xba8] sm:$0xf0]  ;;  %v16321_v9 = vld [vmem:[#allocation2 + $0x710] sm:$0xf] }
0x1a22   :  { %v11953_v17 = vpop.f32.mrf.mxu3  ;;  %v11964_v20 = vpop.f32.mrf.mxu0  ;;  %v17579_v16 = vld [vmem:[#allocation2 + $0x704] sm:$0xf]  ;;  %v17630_v10 = vld [vmem:[#allocation2 + $0x894] sm:$0xf0] }
0x1a23   :  { %v11965_v53 = vadd.f32 %v11964_v20, %v10733_v18  ;;  %v16307_v17 = vld [vmem:[#allocation2 + $0x888] sm:$0xf0]  ;;  %v17628_v20 = vld [vmem:[#allocation2 + $0x884] sm:$0xf0] }
0x1a24   :  { %v16310_v25 = vor.u32 %v17579_v16, %v16307_v17  ;;  %v16322_v17 = vor.u32 %v17630_v10, %v16321_v9 }
0x1a25   :  { %16907 = vmatmul.msk.bf16.vlgmr.msra.gmra.mxu0 %vm128_vm9, %v18305_v43 }
0x1a26   :  { %16908 = vmatmul.msk.bf16.vlgmr.msra.gmra.mxu2 %vm128_vm9, %v18305_v43  ;;  %12481 = vmatpush.bf16.msra.mxu0 %v16682_v2  ;;  %v10740_v2 = vperm.slane %v10544_v1, 0  ;;  %v16721_v1 = vld [vmem:[#allocation2 + $0xa28] sm:$0xf] }
0x1a27   :  { %16910 = vmatmul.msk.bf16.vlgmr.msrb.gmra.mxu3 %vm128_vm9, %v18305_v43  ;;  %12494 = vmatpush.bf16.msra.mxu2 %v16686_v23  ;;  %v10738_v23 = vperm.slane %v10542_v0, 0  ;;  %v16331_v0 = vld [vmem:[#allocation2 + $0x8a0] sm:$0xf0]  ;;  %v16722_v22 = vor.u32 %v17729_v13, %v16721_v1 }
0x1a28   :  { %v11990_v38 = vpop.f32.mrf.mxu1  ;;  %12520 = vmatpush.bf16.msrb.mxu3 %v16694_v4  ;;  %v16306_v4 = vor.u32 %v17628_v20, %v16305_v59  ;;  %v19341_v20 = vld [vmem:[#allocation12 + $0x13e] sm:$0xff] }
0x1a29   :  { %v11991_v30 = vadd.f32 %v11990_v38, %v10735_v12  ;;  %v11977_v14 = vpop.f32.mrf.mxu2  ;;  %v17727_v12 = vld [vmem:[#allocation2 + $0xb9c] sm:$0xf0] }
0x1a2a   :  { %v12003_v33 = vpop.f32.mrf.mxu3  ;;  %v11978_v48 = vadd.f32 %v11977_v14, %v10734_v35  ;;  %v11966_v36 = vpop.f32.mrf.mxu0  ;;  %12482 = vmatpush.bf16.msra.mxu0 %v16290_v40  ;;  %v16706_v31 = vor.u32 %v17727_v12, %v16705_v49  ;;  %v16313_v35 = vld [vmem:[#allocation2 + $0x708] sm:$0xf] }
0x1a2b   :  { %v13181_v47 = vrot.slane %v11991_v30, 4  ;;  %v12004_v50 = vadd.f32 %v12003_v33, %v10736_v37  ;;  %16909 = vmatmul.msk.bf16.vlgmr.msrb.gmra.mxu1 %vm128_vm9, %v18305_v43  ;;  %12495 = vmatpush.bf16.msra.mxu2 %v16294_v39  ;;  %v17629_v37 = vld [vmem:[#allocation2 + $0x88c] sm:$0xf0]  ;;  %v10480_v30 = vunpack.c.h.bf16 %v19315_v41  ;;  %v17679_v36 = vld [vmem:[#allocation2 + $0xa24] sm:$0xf] }
0x1a2c   :  { %v13180_v27 = vrot.slane %v11978_v48, 6  ;;  %12521 = vmatpush.bf16.msrb.mxu3 %v16302_v42  ;;  %12507 = vmatpush.bf16.msrb.mxu1 %v16690_v44  ;;  %v16314_v33 = vor.u32 %v17629_v37, %v16313_v35  ;;  %v16713_v41 = vld [vmem:[#allocation2 + $0xa20] sm:$0xf]  ;;  %v16718_v52 = vor.u32 %v17679_v36, %v16715_v51 }
0x1a2d   :  { %v13182_v54 = vrot.slane %v12004_v50, 2  ;;  %v10547_v50 = vperm.slane %v10480_v30, 4  ;;  %v10545_v63 = vperm.slane %v10480_v30, 0 }
0x1a2e   :  { %v13253_v58 = vsel %vm3898_vm4, %v11965_v53, %v13180_v27  ;;  %v17728_v53 = vld [vmem:[#allocation2 + $0xba4] sm:$0xf0] }
0x1a2f   :  { %v13254_v60 = vsel %vm3900_vm12, %v13181_v47, %v13182_v54  ;;  %v10743_v5 = vperm.slane %v10547_v50, 0  ;;  %v16714_v3 = vor.u32 %v17728_v53, %v16713_v41 }
0x1a30   :  { %v13255_v61 = vsel %vm3902_vm13, %v13253_v58, %v13254_v60  ;;  %v11992_v62 = vpop.f32.mrf.mxu1  ;;  %12508 = vmatpush.bf16.msrb.mxu1 %v16298_v57  ;;  %v17680_v57 = vld [vmem:[#allocation2 + $0xa2c] sm:$0xf]  ;;  %v16723_v58 = vld [vmem:[#allocation2 + $0xbb0] sm:$0xf0] }
0x1a31   :  { %13345 = vst [vmem:[#allocation13 + $0x264] sm:$0xff] %v13255_v61  ;;  %v11979_v56 = vpop.f32.mrf.mxu2  ;;  %v10546_v61 = vperm.slane %v10480_v30, 2  ;;  %v10548_v62 = vperm.slane %v10480_v30, 6  ;;  %v16731_v30 = vld [vmem:[#allocation2 + $0xbb8] sm:$0xf0] }
0x1a32   :  { %v12005_v7 = vpop.f32.mrf.mxu3  ;;  %v12016_v11 = vpop.f32.mrf.mxu0  ;;  %v16323_v56 = vld [vmem:[#allocation2 + $0x898] sm:$0xf0] }
0x1a33   :  { %v12017_v42 = vadd.f32 %v12016_v11, %v10737_v26  ;;  %v16726_v7 = vor.u32 %v17680_v57, %v16723_v58  ;;  %v17582_v11 = vld [vmem:[#allocation2 + $0x71c] sm:$0xf]  ;;  %v16326_v16 = vor.u32 %v17581_v55, %v16323_v56  ;;  %v16337_v58 = vld [vmem:[#allocation2 + $0x720] sm:$0xf] }
0x1a34   :  { %v16334_v21 = vor.u32 %v17582_v11, %v16331_v0 }
0x1a35   :  { %16911 = vmatmul.msk.bf16.vlgmr.msrb.gmra.mxu0 %vm128_vm9, %v18305_v43 }
0x1a36   :  { %16912 = vmatmul.msk.bf16.vlgmr.msrb.gmra.mxu2 %vm128_vm9, %v18305_v43  ;;  %12533 = vmatpush.bf16.msrb.mxu0 %v16698_v8 }
0x1a37   :  { %16914 = vmatmul.msk.bf16.vlgmr.msra.gmra.mxu3 %vm128_vm9, %v18305_v43  ;;  %12546 = vmatpush.bf16.msrb.mxu2 %v16702_v6  ;;  %v10744_v6 = vperm.slane %v10548_v62, 0  ;;  %v16347_v62 = vld [vmem:[#allocation2 + $0x8b0] sm:$0xf0] }
0x1a38   :  { %v12042_v24 = vpop.f32.mrf.mxu1  ;;  %12572 = vmatpush.bf16.msra.mxu3 %v16710_v19  ;;  %v10741_v19 = vperm.slane %v10545_v63, 0  ;;  %v16737_v63 = vld [vmem:[#allocation2 + $0xa38] sm:$0xf] }
0x1a39   :  { %v12043_v28 = vadd.f32 %v12042_v24, %v10739_v15  ;;  %v12029_v32 = vpop.f32.mrf.mxu2  ;;  %v10742_v15 = vperm.slane %v10546_v61, 0  ;;  %v17584_v61 = vld [vmem:[#allocation2 + $0x72c] sm:$0xf] }
0x1a3a   :  { %v12055_v34 = vpop.f32.mrf.mxu3  ;;  %v12030_v38 = vadd.f32 %v12029_v32, %v10738_v23  ;;  %v12018_v18 = vpop.f32.mrf.mxu0  ;;  %12534 = vmatpush.bf16.msrb.mxu0 %v16306_v4  ;;  %v16329_v23 = vld [vmem:[#allocation2 + $0x718] sm:$0xf]  ;;  %v16350_v11 = vor.u32 %v17584_v61, %v16347_v62 }
0x1a3b   :  { %v13184_v39 = vrot.slane %v12043_v28, 4  ;;  %v12056_v40 = vadd.f32 %v12055_v34, %v10740_v2  ;;  %16913 = vmatmul.msk.bf16.vlgmr.msra.gmra.mxu1 %vm128_vm9, %v18305_v43  ;;  %12547 = vmatpush.bf16.msrb.mxu2 %v16310_v25  ;;  %v17631_v2 = vld [vmem:[#allocation2 + $0x89c] sm:$0xf0]  ;;  %v10481_v28 = vunpack.c.l.bf16 %v19341_v20  ;;  %v17681_v18 = vld [vmem:[#allocation2 + $0xa34] sm:$0xf] }
0x1a3c   :  { %v13183_v44 = vrot.slane %v12030_v38, 6  ;;  %12573 = vmatpush.bf16.msra.mxu3 %v16318_v29  ;;  %12559 = vmatpush.bf16.msra.mxu1 %v16706_v31  ;;  %v16330_v34 = vor.u32 %v17631_v2, %v16329_v23  ;;  %v16734_v41 = vor.u32 %v17681_v18, %v16731_v30 }
0x1a3d   :  { %v13185_v14 = vrot.slane %v12056_v40, 2  ;;  %v10551_v40 = vperm.slane %v10481_v28, 4  ;;  %v10552_v50 = vperm.slane %v10481_v28, 6  ;;  %v10549_v36 = vperm.slane %v10481_v28, 0 }
0x1a3e   :  { %v13256_v45 = vsel %vm3898_vm4, %v12017_v42, %v13183_v44  ;;  %v16729_v42 = vld [vmem:[#allocation2 + $0xa30] sm:$0xf]  ;;  %v17730_v44 = vld [vmem:[#allocation2 + $0xbb4] sm:$0xf0] }
0x1a3f   :  { %v13257_v46 = vsel %vm3900_vm12, %v13184_v39, %v13185_v14  ;;  %v10747_v51 = vperm.slane %v10551_v40, 0  ;;  %v16730_v53 = vor.u32 %v17730_v44, %v16729_v42  ;;  %v10745_v9 = vperm.slane %v10549_v36, 0  ;;  %v17585_v44 = vld [vmem:[#allocation2 + $0x734] sm:$0xf]  ;;  %v17733_v36 = vld [vmem:[#allocation2 + $0xbcc] sm:$0xf0] }
0x1a40   :  { %v13258_v48 = vsel %vm3902_vm13, %v13256_v45, %v13257_v46  ;;  %v12044_v47 = vpop.f32.mrf.mxu1  ;;  %12560 = vmatpush.bf16.msra.mxu1 %v16314_v33  ;;  %v17682_v45 = vld [vmem:[#allocation2 + $0xa3c] sm:$0xf]  ;;  %v16739_v46 = vld [vmem:[#allocation2 + $0xbc0] sm:$0xf0] }
0x1a41   :  { %13346 = vst [vmem:[#allocation13 + $0x26c] sm:$0xff] %v13258_v48  ;;  %v12031_v27 = vpop.f32.mrf.mxu2  ;;  %v10550_v47 = vperm.slane %v10481_v28, 2  ;;  %v16742_v57 = vor.u32 %v17682_v45, %v16739_v46  ;;  %v16747_v28 = vld [vmem:[#allocation2 + $0xbc8] sm:$0xf0]  ;;  %v16353_v45 = vld [vmem:[#allocation2 + $0x730] sm:$0xf] }
0x1a42   :  { %v12057_v54 = vpop.f32.mrf.mxu3  ;;  %v12068_v60 = vpop.f32.mrf.mxu0  ;;  %v17583_v27 = vld [vmem:[#allocation2 + $0x724] sm:$0xf]  ;;  %v17634_v46 = vld [vmem:[#allocation2 + $0x8b4] sm:$0xf0] }
0x1a43   :  { %v12069_v29 = vadd.f32 %v12068_v60, %v10741_v19  ;;  %v16339_v54 = vld [vmem:[#allocation2 + $0x8a8] sm:$0xf0]  ;;  %v17632_v60 = vld [vmem:[#allocation2 + $0x8a4] sm:$0xf0] }
0x1a44   :  { %v16342_v56 = vor.u32 %v17583_v27, %v16339_v54  ;;  %v16354_v54 = vor.u32 %v17634_v46, %v16353_v45 }
0x1a45   :  { %16915 = vmatmul.msk.bf16.vlgmr.msra.gmra.mxu0 %vm128_vm9, %v18305_v43 }
0x1a46   :  { %16916 = vmatmul.msk.bf16.vlgmr.msra.gmra.mxu2 %vm128_vm9, %v18305_v43  ;;  %12585 = vmatpush.bf16.msra.mxu0 %v16714_v3  ;;  %v10748_v3 = vperm.slane %v10552_v50, 0  ;;  %v16753_v50 = vld [vmem:[#allocation2 + $0xa48] sm:$0xf] }
0x1a47   :  { %16918 = vmatmul.msk.bf16.vlgmr.msrb.gmra.mxu3 %vm128_vm9, %v18305_v43  ;;  %12598 = vmatpush.bf16.msra.mxu2 %v16718_v52  ;;  %v10746_v52 = vperm.slane %v10550_v47, 0  ;;  %v16363_v47 = vld [vmem:[#allocation2 + $0x8c0] sm:$0xf0]  ;;  %v16754_v62 = vor.u32 %v17733_v36, %v16753_v50 }
0x1a48   :  { %v12094_v8 = vpop.f32.mrf.mxu1  ;;  %12624 = vmatpush.bf16.msrb.mxu3 %v16726_v7  ;;  %v16338_v7 = vor.u32 %v17632_v60, %v16337_v58  ;;  %v19367_v60 = vld [vmem:[#allocation12 + $0x146] sm:$0xff] }
0x1a49   :  { %v12095_v59 = vadd.f32 %v12094_v8, %v10743_v5  ;;  %v12081_v49 = vpop.f32.mrf.mxu2  ;;  %v17731_v5 = vld [vmem:[#allocation2 + $0xbbc] sm:$0xf0] }
0x1a4a   :  { %v12107_v12 = vpop.f32.mrf.mxu3  ;;  %v12082_v24 = vadd.f32 %v12081_v49, %v10742_v15  ;;  %v12070_v26 = vpop.f32.mrf.mxu0  ;;  %12586 = vmatpush.bf16.msra.mxu0 %v16322_v17  ;;  %v16738_v0 = vor.u32 %v17731_v5, %v16737_v63  ;;  %v16345_v15 = vld [vmem:[#allocation2 + $0x728] sm:$0xf] }
0x1a4b   :  { %v13187_v25 = vrot.slane %v12095_v59, 4  ;;  %v12108_v4 = vadd.f32 %v12107_v12, %v10744_v6  ;;  %16917 = vmatmul.msk.bf16.vlgmr.msrb.gmra.mxu1 %vm128_vm9, %v18305_v43  ;;  %12599 = vmatpush.bf16.msra.mxu2 %v16326_v16  ;;  %v17633_v6 = vld [vmem:[#allocation2 + $0x8ac] sm:$0xf0]  ;;  %v10482_v59 = vunpack.c.h.bf16 %v19341_v20  ;;  %v17683_v26 = vld [vmem:[#allocation2 + $0xa44] sm:$0xf] }
0x1a4c   :  { %v13186_v31 = vrot.slane %v12082_v24, 6  ;;  %12625 = vmatpush.bf16.msrb.mxu3 %v16334_v21  ;;  %12611 = vmatpush.bf16.msrb.mxu1 %v16722_v22  ;;  %v16346_v12 = vor.u32 %v17633_v6, %v16345_v15  ;;  %v16745_v20 = vld [vmem:[#allocation2 + $0xa40] sm:$0xf]  ;;  %v16750_v30 = vor.u32 %v17683_v26, %v16747_v28 }
0x1a4d   :  { %v13188_v32 = vrot.slane %v12108_v4, 2  ;;  %v10555_v4 = vperm.slane %v10482_v59, 4  ;;  %v10553_v40 = vperm.slane %v10482_v59, 0 }
0x1a4e   :  { %v13259_v35 = vsel %vm3898_vm4, %v12069_v29, %v13186_v31  ;;  %v17732_v29 = vld [vmem:[#allocation2 + $0xbc4] sm:$0xf0] }
0x1a4f   :  { %v13260_v37 = vsel %vm3900_vm12, %v13187_v25, %v13188_v32  ;;  %v10751_v18 = vperm.slane %v10555_v4, 0  ;;  %v16746_v42 = vor.u32 %v17732_v29, %v16745_v20 }
0x1a50   :  { %v13261_v38 = vsel %vm3902_vm13, %v13259_v35, %v13260_v37  ;;  %v12096_v39 = vpop.f32.mrf.mxu1  ;;  %12612 = vmatpush.bf16.msrb.mxu1 %v16330_v34  ;;  %v17684_v34 = vld [vmem:[#allocation2 + $0xa4c] sm:$0xf]  ;;  %v16755_v35 = vld [vmem:[#allocation2 + $0xbd0] sm:$0xf0] }
0x1a51   :  { %13347 = vst [vmem:[#allocation13 + $0x274] sm:$0xff] %v13261_v38  ;;  %v12083_v14 = vpop.f32.mrf.mxu2  ;;  %v10554_v38 = vperm.slane %v10482_v59, 2  ;;  %v10556_v39 = vperm.slane %v10482_v59, 6  ;;  %v16763_v59 = vld [vmem:[#allocation2 + $0xbd8] sm:$0xf0] }
0x1a52   :  { %v12109_v33 = vpop.f32.mrf.mxu3  ;;  %v12120_v48 = vpop.f32.mrf.mxu0  ;;  %v16355_v14 = vld [vmem:[#allocation2 + $0x8b8] sm:$0xf0] }
0x1a53   :  { %v12121_v21 = vadd.f32 %v12120_v48, %v10745_v9  ;;  %v16758_v33 = vor.u32 %v17684_v34, %v16755_v35  ;;  %v17586_v48 = vld [vmem:[#allocation2 + $0x73c] sm:$0xf]  ;;  %v16358_v27 = vor.u32 %v17585_v44, %v16355_v14  ;;  %v16369_v35 = vld [vmem:[#allocation2 + $0x740] sm:$0xf] }
0x1a54   :  { %v16366_v61 = vor.u32 %v17586_v48, %v16363_v47 }
0x1a55   :  { %16919 = vmatmul.msk.bf16.vlgmr.msrb.gmra.mxu0 %vm128_vm9, %v18305_v43 }
0x1a56   :  { %16920 = vmatmul.msk.bf16.vlgmr.msrb.gmra.mxu2 %vm128_vm9, %v18305_v43  ;;  %12637 = vmatpush.bf16.msrb.mxu0 %v16730_v53 }
0x1a57   :  { %16922 = vmatmul.msk.bf16.vlgmr.msra.gmra.mxu3 %vm128_vm9, %v18305_v43  ;;  %12650 = vmatpush.bf16.msrb.mxu2 %v16734_v41  ;;  %v10752_v41 = vperm.slane %v10556_v39, 0  ;;  %v16379_v39 = vld [vmem:[#allocation2 + $0x8d0] sm:$0xf0] }
0x1a58   :  { %v12146_v55 = vpop.f32.mrf.mxu1  ;;  %12676 = vmatpush.bf16.msra.mxu3 %v16742_v57  ;;  %v10749_v57 = vperm.slane %v10553_v40, 0  ;;  %v16769_v40 = vld [vmem:[#allocation2 + $0xa58] sm:$0xf] }
0x1a59   :  { %v12147_v10 = vadd.f32 %v12146_v55, %v10747_v51  ;;  %v12133_v1 = vpop.f32.mrf.mxu2  ;;  %v10750_v51 = vperm.slane %v10554_v38, 0  ;;  %v17588_v38 = vld [vmem:[#allocation2 + $0x74c] sm:$0xf] }
0x1a5a   :  { %v12159_v13 = vpop.f32.mrf.mxu3  ;;  %v12134_v8 = vadd.f32 %v12133_v1, %v10746_v52  ;;  %v12122_v19 = vpop.f32.mrf.mxu0  ;;  %12638 = vmatpush.bf16.msrb.mxu0 %v16338_v7  ;;  %v16361_v52 = vld [vmem:[#allocation2 + $0x738] sm:$0xf]  ;;  %v16382_v48 = vor.u32 %v17588_v38, %v16379_v39 }
0x1a5b   :  { %v13190_v16 = vrot.slane %v12147_v10, 4  ;;  %v12160_v17 = vadd.f32 %v12159_v13, %v10748_v3  ;;  %16921 = vmatmul.msk.bf16.vlgmr.msra.gmra.mxu1 %vm128_vm9, %v18305_v43  ;;  %12651 = vmatpush.bf16.msrb.mxu2 %v16342_v56  ;;  %v17635_v3 = vld [vmem:[#allocation2 + $0x8bc] sm:$0xf0]  ;;  %v10483_v10 = vunpack.c.l.bf16 %v19367_v60  ;;  %v17685_v19 = vld [vmem:[#allocation2 + $0xa54] sm:$0xf] }
0x1a5c   :  { %v13189_v22 = vrot.slane %v12134_v8, 6  ;;  %12677 = vmatpush.bf16.msra.mxu3 %v16350_v11  ;;  %12663 = vmatpush.bf16.msra.mxu1 %v16738_v0  ;;  %v16362_v13 = vor.u32 %v17635_v3, %v16361_v52  ;;  %v16766_v20 = vor.u32 %v17685_v19, %v16763_v59 }
0x1a5d   :  { %v13191_v49 = vrot.slane %v12160_v17, 2  ;;  %v10559_v17 = vperm.slane %v10483_v10, 4  ;;  %v10560_v4 = vperm.slane %v10483_v10, 6  ;;  %v10557_v26 = vperm.slane %v10483_v10, 0 }
0x1a5e   :  { %v13262_v23 = vsel %vm3898_vm4, %v12121_v21, %v13189_v22  ;;  %v16761_v21 = vld [vmem:[#allocation2 + $0xa50] sm:$0xf]  ;;  %v17734_v22 = vld [vmem:[#allocation2 + $0xbd4] sm:$0xf0] }
0x1a5f   :  { %v13263_v2 = vsel %vm3900_vm12, %v13190_v16, %v13191_v49  ;;  %v10755_v28 = vperm.slane %v10559_v17, 0  ;;  %v16762_v29 = vor.u32 %v17734_v22, %v16761_v21  ;;  %v10753_v45 = vperm.slane %v10557_v26, 0  ;;  %v17589_v22 = vld [vmem:[#allocation2 + $0x754] sm:$0xf]  ;;  %v17737_v26 = vld [vmem:[#allocation2 + $0xbec] sm:$0xf0] }
0x1a60   :  { %v13264_v24 = vsel %vm3902_vm13, %v13262_v23, %v13263_v2  ;;  %v12148_v25 = vpop.f32.mrf.mxu1  ;;  %12664 = vmatpush.bf16.msra.mxu1 %v16346_v12  ;;  %v17686_v23 = vld [vmem:[#allocation2 + $0xa5c] sm:$0xf]  ;;  %v16771_v2 = vld [vmem:[#allocation2 + $0xbe0] sm:$0xf0] }
0x1a61   :  { %13348 = vst [vmem:[#allocation13 + $0x27c] sm:$0xff] %v13264_v24  ;;  %v12135_v31 = vpop.f32.mrf.mxu2  ;;  %v10558_v25 = vperm.slane %v10483_v10, 2  ;;  %v16774_v34 = vor.u32 %v17686_v23, %v16771_v2  ;;  %v16779_v10 = vld [vmem:[#allocation2 + $0xbe8] sm:$0xf0]  ;;  %v16385_v23 = vld [vmem:[#allocation2 + $0x750] sm:$0xf] }
0x1a62   :  { %v12161_v32 = vpop.f32.mrf.mxu3  ;;  %v12172_v37 = vpop.f32.mrf.mxu0  ;;  %v17587_v31 = vld [vmem:[#allocation2 + $0x744] sm:$0xf]  ;;  %v17638_v2 = vld [vmem:[#allocation2 + $0x8d4] sm:$0xf0] }
0x1a63   :  { %v12173_v11 = vadd.f32 %v12172_v37, %v10749_v57  ;;  %v16371_v32 = vld [vmem:[#allocation2 + $0x8c8] sm:$0xf0]  ;;  %v17636_v37 = vld [vmem:[#allocation2 + $0x8c4] sm:$0xf0] }
0x1a64   :  { %v16374_v14 = vor.u32 %v17587_v31, %v16371_v32  ;;  %v16386_v32 = vor.u32 %v17638_v2, %v16385_v23 }
0x1a65   :  { %16923 = vmatmul.msk.bf16.vlgmr.msra.gmra.mxu0 %vm128_vm9, %v18305_v43 }
0x1a66   :  { %16924 = vmatmul.msk.bf16.vlgmr.msra.gmra.mxu2 %vm128_vm9, %v18305_v43  ;;  %12689 = vmatpush.bf16.msra.mxu0 %v16746_v42  ;;  %v10756_v42 = vperm.slane %v10560_v4, 0  ;;  %v16785_v4 = vld [vmem:[#allocation2 + $0xa68] sm:$0xf] }
0x1a67   :  { %16926 = vmatmul.msk.bf16.vlgmr.msrb.gmra.mxu3 %vm128_vm9, %v18305_v43  ;;  %12702 = vmatpush.bf16.msra.mxu2 %v16750_v30  ;;  %v10754_v30 = vperm.slane %v10558_v25, 0  ;;  %v16395_v25 = vld [vmem:[#allocation2 + $0x8e0] sm:$0xf0]  ;;  %v16786_v39 = vor.u32 %v17737_v26, %v16785_v4 }
0x1a68   :  { %v12198_v53 = vpop.f32.mrf.mxu1  ;;  %12728 = vmatpush.bf16.msrb.mxu3 %v16758_v33  ;;  %v16370_v33 = vor.u32 %v17636_v37, %v16369_v35  ;;  %v19393_v37 = vld [vmem:[#allocation12 + $0x14e] sm:$0xff] }
0x1a69   :  { %v12199_v58 = vadd.f32 %v12198_v53, %v10751_v18  ;;  %v12185_v63 = vpop.f32.mrf.mxu2  ;;  %v17735_v18 = vld [vmem:[#allocation2 + $0xbdc] sm:$0xf0] }
0x1a6a   :  { %v12211_v5 = vpop.f32.mrf.mxu3  ;;  %v12186_v55 = vadd.f32 %v12185_v63, %v10750_v51  ;;  %v12174_v9 = vpop.f32.mrf.mxu0  ;;  %12690 = vmatpush.bf16.msra.mxu0 %v16354_v54  ;;  %v16770_v47 = vor.u32 %v17735_v18, %v16769_v40  ;;  %v16377_v51 = vld [vmem:[#allocation2 + $0x748] sm:$0xf] }
0x1a6b   :  { %v13193_v56 = vrot.slane %v12199_v58, 4  ;;  %v12212_v7 = vadd.f32 %v12211_v5, %v10752_v41  ;;  %16925 = vmatmul.msk.bf16.vlgmr.msrb.gmra.mxu1 %vm128_vm9, %v18305_v43  ;;  %12703 = vmatpush.bf16.msra.mxu2 %v16358_v27  ;;  %v17637_v41 = vld [vmem:[#allocation2 + $0x8cc] sm:$0xf0]  ;;  %v10484_v58 = vunpack.c.h.bf16 %v19367_v60  ;;  %v17687_v9 = vld [vmem:[#allocation2 + $0xa64] sm:$0xf] }
0x1a6c   :  { %v13192_v0 = vrot.slane %v12186_v55, 6  ;;  %12729 = vmatpush.bf16.msrb.mxu3 %v16366_v61  ;;  %12715 = vmatpush.bf16.msrb.mxu1 %v16754_v62  ;;  %v16378_v5 = vor.u32 %v17637_v41, %v16377_v51  ;;  %v16777_v60 = vld [vmem:[#allocation2 + $0xa60] sm:$0xf]  ;;  %v16782_v59 = vor.u32 %v17687_v9, %v16779_v10 }
0x1a6d   :  { %v13194_v1 = vrot.slane %v12212_v7, 2  ;;  %v10563_v7 = vperm.slane %v10484_v58, 4  ;;  %v10561_v17 = vperm.slane %v10484_v58, 0 }
0x1a6e   :  { %v13265_v15 = vsel %vm3898_vm4, %v12173_v11, %v13192_v0  ;;  %v17736_v11 = vld [vmem:[#allocation2 + $0xbe4] sm:$0xf0] }
0x1a6f   :  { %v13266_v6 = vsel %vm3900_vm12, %v13193_v56, %v13194_v1  ;;  %v10759_v19 = vperm.slane %v10563_v7, 0  ;;  %v16778_v21 = vor.u32 %v17736_v11, %v16777_v60 }
0x1a70   :  { %v13267_v8 = vsel %vm3902_vm13, %v13265_v15, %v13266_v6  ;;  %v12200_v16 = vpop.f32.mrf.mxu1  ;;  %12716 = vmatpush.bf16.msrb.mxu1 %v16362_v13  ;;  %v17688_v13 = vld [vmem:[#allocation2 + $0xa6c] sm:$0xf]  ;;  %v16787_v15 = vld [vmem:[#allocation2 + $0xbf0] sm:$0xf0] }
0x1a71   :  { %13349 = vst [vmem:[#allocation13 + $0x284] sm:$0xff] %v13267_v8  ;;  %v12187_v49 = vpop.f32.mrf.mxu2  ;;  %v10562_v8 = vperm.slane %v10484_v58, 2  ;;  %v10564_v16 = vperm.slane %v10484_v58, 6  ;;  %v16795_v58 = vld [vmem:[#allocation2 + $0xbf8] sm:$0xf0] }
0x1a72   :  { %v12213_v12 = vpop.f32.mrf.mxu3  ;;  %v12224_v24 = vpop.f32.mrf.mxu0  ;;  %v16387_v49 = vld [vmem:[#allocation2 + $0x8d8] sm:$0xf0] }
0x1a73   :  { %v12225_v61 = vadd.f32 %v12224_v24, %v10753_v45  ;;  %v16790_v12 = vor.u32 %v17688_v13, %v16787_v15  ;;  %v17590_v24 = vld [vmem:[#allocation2 + $0x75c] sm:$0xf]  ;;  %v16390_v31 = vor.u32 %v17589_v22, %v16387_v49  ;;  %v16401_v15 = vld [vmem:[#allocation2 + $0x760] sm:$0xf] }
0x1a74   :  { %v16398_v38 = vor.u32 %v17590_v24, %v16395_v25 }
0x1a75   :  { %16927 = vmatmul.msk.bf16.vlgmr.msrb.gmra.mxu0 %vm128_vm9, %v18305_v43 }
0x1a76   :  { %16928 = vmatmul.msk.bf16.vlgmr.msrb.gmra.mxu2 %vm128_vm9, %v18305_v43  ;;  %12741 = vmatpush.bf16.msrb.mxu0 %v16762_v29 }
0x1a77   :  { %16930 = vmatmul.msk.bf16.vlgmr.msra.gmra.mxu3 %vm128_vm9, %v18305_v43  ;;  %12754 = vmatpush.bf16.msrb.mxu2 %v16766_v20  ;;  %v10760_v20 = vperm.slane %v10564_v16, 0  ;;  %v16411_v16 = vld [vmem:[#allocation2 + $0x8f0] sm:$0xf0] }
0x1a78   :  { %v12250_v44 = vpop.f32.mrf.mxu1  ;;  %12780 = vmatpush.bf16.msra.mxu3 %v16774_v34  ;;  %v10757_v34 = vperm.slane %v10561_v17, 0  ;;  %v16801_v17 = vld [vmem:[#allocation2 + $0xa78] sm:$0xf] }
0x1a79   :  { %v12251_v46 = vadd.f32 %v12250_v44, %v10755_v28  ;;  %v12237_v50 = vpop.f32.mrf.mxu2  ;;  %v10758_v28 = vperm.slane %v10562_v8, 0  ;;  %v17592_v8 = vld [vmem:[#allocation2 + $0x76c] sm:$0xf] }
0x1a7a   :  { %v12263_v36 = vpop.f32.mrf.mxu3  ;;  %v12238_v53 = vadd.f32 %v12237_v50, %v10754_v30  ;;  %v12226_v57 = vpop.f32.mrf.mxu0  ;;  %12742 = vmatpush.bf16.msrb.mxu0 %v16370_v33  ;;  %v16393_v30 = vld [vmem:[#allocation2 + $0x758] sm:$0xf]  ;;  %v16414_v24 = vor.u32 %v17592_v8, %v16411_v16 }
0x1a7b   :  { %v13196_v27 = vrot.slane %v12251_v46, 4  ;;  %v12264_v54 = vadd.f32 %v12263_v36, %v10756_v42  ;;  %16929 = vmatmul.msk.bf16.vlgmr.msra.gmra.mxu1 %vm128_vm9, %v18305_v43  ;;  %12755 = vmatpush.bf16.msrb.mxu2 %v16374_v14  ;;  %v17639_v42 = vld [vmem:[#allocation2 + $0x8dc] sm:$0xf0]  ;;  %v10485_v46 = vunpack.c.l.bf16 %v19393_v37  ;;  %v17689_v57 = vld [vmem:[#allocation2 + $0xa74] sm:$0xf] }
0x1a7c   :  { %v13195_v62 = vrot.slane %v12238_v53, 6  ;;  %12781 = vmatpush.bf16.msra.mxu3 %v16382_v48  ;;  %12767 = vmatpush.bf16.msra.mxu1 %v16770_v47  ;;  %v16394_v36 = vor.u32 %v17639_v42, %v16393_v30  ;;  %v16798_v60 = vor.u32 %v17689_v57, %v16795_v58 }
0x1a7d   :  { %v13197_v63 = vrot.slane %v12264_v54, 2  ;;  %v10567_v54 = vperm.slane %v10485_v46, 4  ;;  %v10568_v7 = vperm.slane %v10485_v46, 6  ;;  %v10565_v9 = vperm.slane %v10485_v46, 0 }
0x1a7e   :  { %v13268_v52 = vsel %vm3898_vm4, %v12225_v61, %v13195_v62  ;;  %v16793_v61 = vld [vmem:[#allocation2 + $0xa70] sm:$0xf]  ;;  %v17738_v62 = vld [vmem:[#allocation2 + $0xbf4] sm:$0xf0] }
0x1a7f   :  { %v13269_v3 = vsel %vm3900_vm12, %v13196_v27, %v13197_v63  ;;  %v10763_v10 = vperm.slane %v10567_v54, 0  ;;  %v16794_v11 = vor.u32 %v17738_v62, %v16793_v61  ;;  %v10761_v23 = vperm.slane %v10565_v9, 0  ;;  %v17593_v62 = vld [vmem:[#allocation2 + $0x774] sm:$0xf]  ;;  %v17741_v9 = vld [vmem:[#allocation2 + $0xc0c] sm:$0xf0] }
0x1a80   :  { %v13270_v55 = vsel %vm3902_vm13, %v13268_v52, %v13269_v3  ;;  %v12252_v56 = vpop.f32.mrf.mxu1  ;;  %12768 = vmatpush.bf16.msra.mxu1 %v16378_v5  ;;  %v17690_v52 = vld [vmem:[#allocation2 + $0xa7c] sm:$0xf]  ;;  %v16803_v3 = vld [vmem:[#allocation2 + $0xc00] sm:$0xf0] }
0x1a81   :  { %13350 = vst [vmem:[#allocation13 + $0x28c] sm:$0xff] %v13270_v55  ;;  %v12239_v0 = vpop.f32.mrf.mxu2  ;;  %v10566_v56 = vperm.slane %v10485_v46, 2  ;;  %v16806_v13 = vor.u32 %v17690_v52, %v16803_v3  ;;  %v16811_v46 = vld [vmem:[#allocation2 + $0xc08] sm:$0xf0]  ;;  %v16417_v52 = vld [vmem:[#allocation2 + $0x770] sm:$0xf] }
0x1a82   :  { %v12265_v1 = vpop.f32.mrf.mxu3  ;;  %v12276_v6 = vpop.f32.mrf.mxu0  ;;  %v17591_v0 = vld [vmem:[#allocation2 + $0x764] sm:$0xf]  ;;  %v17642_v3 = vld [vmem:[#allocation2 + $0x8f4] sm:$0xf0] }
0x1a83   :  { %v12277_v48 = vadd.f32 %v12276_v6, %v10757_v34  ;;  %v16403_v1 = vld [vmem:[#allocation2 + $0x8e8] sm:$0xf0]  ;;  %v17640_v6 = vld [vmem:[#allocation2 + $0x8e4] sm:$0xf0] }
0x1a84   :  { %v16406_v49 = vor.u32 %v17591_v0, %v16403_v1  ;;  %v16418_v1 = vor.u32 %v17642_v3, %v16417_v52 }
0x1a85   :  { %16931 = vmatmul.msk.bf16.vlgmr.msra.gmra.mxu0 %vm128_vm9, %v18305_v43 }
0x1a86   :  { %16932 = vmatmul.msk.bf16.vlgmr.msra.gmra.mxu2 %vm128_vm9, %v18305_v43  ;;  %12793 = vmatpush.bf16.msra.mxu0 %v16778_v21  ;;  %v10764_v21 = vperm.slane %v10568_v7, 0  ;;  %v16817_v7 = vld [vmem:[#allocation2 + $0xa88] sm:$0xf] }
0x1a87   :  { %16934 = vmatmul.msk.bf16.vlgmr.msrb.gmra.mxu3 %vm128_vm9, %v18305_v43  ;;  %12806 = vmatpush.bf16.msra.mxu2 %v16782_v59  ;;  %v10762_v59 = vperm.slane %v10566_v56, 0  ;;  %v16427_v56 = vld [vmem:[#allocation2 + $0x900] sm:$0xf0]  ;;  %v16818_v16 = vor.u32 %v17741_v9, %v16817_v7 }
0x1a88   :  { %v12302_v29 = vpop.f32.mrf.mxu1  ;;  %12832 = vmatpush.bf16.msrb.mxu3 %v16790_v12  ;;  %v16402_v12 = vor.u32 %v17640_v6, %v16401_v15  ;;  %v19419_v6 = vld [vmem:[#allocation12 + $0x156] sm:$0xff] }
0x1a89   :  { %v12303_v35 = vadd.f32 %v12302_v29, %v10759_v19  ;;  %v12289_v40 = vpop.f32.mrf.mxu2  ;;  %v17739_v19 = vld [vmem:[#allocation2 + $0xbfc] sm:$0xf0] }
0x1a8a   :  { %v12315_v18 = vpop.f32.mrf.mxu3  ;;  %v12290_v44 = vadd.f32 %v12289_v40, %v10758_v28  ;;  %v12278_v45 = vpop.f32.mrf.mxu0  ;;  %12794 = vmatpush.bf16.msra.mxu0 %v16386_v32  ;;  %v16802_v25 = vor.u32 %v17739_v19, %v16801_v17  ;;  %v16409_v28 = vld [vmem:[#allocation2 + $0x768] sm:$0xf] }
0x1a8b   :  { %v13199_v14 = vrot.slane %v12303_v35, 4  ;;  %v12316_v33 = vadd.f32 %v12315_v18, %v10760_v20  ;;  %16933 = vmatmul.msk.bf16.vlgmr.msrb.gmra.mxu1 %vm128_vm9, %v18305_v43  ;;  %12807 = vmatpush.bf16.msra.mxu2 %v16390_v31  ;;  %v17641_v20 = vld [vmem:[#allocation2 + $0x8ec] sm:$0xf0]  ;;  %v10486_v35 = vunpack.c.h.bf16 %v19393_v37  ;;  %v17691_v45 = vld [vmem:[#allocation2 + $0xa84] sm:$0xf] }
0x1a8c   :  { %v13198_v47 = vrot.slane %v12290_v44, 6  ;;  %12833 = vmatpush.bf16.msrb.mxu3 %v16398_v38  ;;  %12819 = vmatpush.bf16.msrb.mxu1 %v16786_v39  ;;  %v16410_v18 = vor.u32 %v17641_v20, %v16409_v28  ;;  %v16809_v37 = vld [vmem:[#allocation2 + $0xa80] sm:$0xf]  ;;  %v16814_v58 = vor.u32 %v17691_v45, %v16811_v46 }
0x1a8d   :  { %v13200_v50 = vrot.slane %v12316_v33, 2  ;;  %v10571_v33 = vperm.slane %v10486_v35, 4  ;;  %v10569_v54 = vperm.slane %v10486_v35, 0 }
0x1a8e   :  { %v13271_v51 = vsel %vm3898_vm4, %v12277_v48, %v13198_v47  ;;  %v17740_v48 = vld [vmem:[#allocation2 + $0xc04] sm:$0xf0] }
0x1a8f   :  { %v13272_v41 = vsel %vm3900_vm12, %v13199_v14, %v13200_v50  ;;  %v10767_v57 = vperm.slane %v10571_v33, 0  ;;  %v16810_v61 = vor.u32 %v17740_v48, %v16809_v37 }
0x1a90   :  { %v13273_v53 = vsel %vm3902_vm13, %v13271_v51, %v13272_v41  ;;  %v12304_v27 = vpop.f32.mrf.mxu1  ;;  %12820 = vmatpush.bf16.msrb.mxu1 %v16394_v36  ;;  %v17692_v36 = vld [vmem:[#allocation2 + $0xa8c] sm:$0xf]  ;;  %v16819_v51 = vld [vmem:[#allocation2 + $0xc10] sm:$0xf0] }
0x1a91   :  { %13351 = vst [vmem:[#allocation13 + $0x294] sm:$0xff] %v13273_v53  ;;  %v12291_v63 = vpop.f32.mrf.mxu2  ;;  %v10570_v53 = vperm.slane %v10486_v35, 2  ;;  %v10572_v27 = vperm.slane %v10486_v35, 6  ;;  %v16827_v35 = vld [vmem:[#allocation2 + $0xc18] sm:$0xf0] }
0x1a92   :  { %v12317_v5 = vpop.f32.mrf.mxu3  ;;  %v12328_v55 = vpop.f32.mrf.mxu0  ;;  %v16419_v63 = vld [vmem:[#allocation2 + $0x8f8] sm:$0xf0] }
0x1a93   :  { %v12329_v38 = vadd.f32 %v12328_v55, %v10761_v23  ;;  %v16822_v5 = vor.u32 %v17692_v36, %v16819_v51  ;;  %v17594_v55 = vld [vmem:[#allocation2 + $0x77c] sm:$0xf]  ;;  %v16422_v0 = vor.u32 %v17593_v62, %v16419_v63  ;;  %v16433_v51 = vld [vmem:[#allocation2 + $0x780] sm:$0xf] }
0x1a94   :  { %v16430_v8 = vor.u32 %v17594_v55, %v16427_v56 }
0x1a95   :  { %16935 = vmatmul.msk.bf16.vlgmr.msrb.gmra.mxu0 %vm128_vm9, %v18305_v43 }
0x1a96   :  { %16936 = vmatmul.msk.bf16.vlgmr.msrb.gmra.mxu2 %vm128_vm9, %v18305_v43  ;;  %12845 = vmatpush.bf16.msrb.mxu0 %v16794_v11 }
0x1a97   :  { %16938 = vmatmul.msk.bf16.vlgmr.msra.gmra.mxu3 %vm128_vm9, %v18305_v43  ;;  %12858 = vmatpush.bf16.msrb.mxu2 %v16798_v60  ;;  %v10768_v60 = vperm.slane %v10572_v27, 0  ;;  %v16443_v27 = vld [vmem:[#allocation2 + $0x910] sm:$0xf0] }
0x1a98   :  { %v12354_v22 = vpop.f32.mrf.mxu1  ;;  %12884 = vmatpush.bf16.msra.mxu3 %v16806_v13  ;;  %v10765_v13 = vperm.slane %v10569_v54, 0  ;;  %v16833_v54 = vld [vmem:[#allocation2 + $0xa98] sm:$0xf] }
0x1a99   :  { %v12355_v2 = vadd.f32 %v12354_v22, %v10763_v10  ;;  %v12341_v4 = vpop.f32.mrf.mxu2  ;;  %v10766_v10 = vperm.slane %v10570_v53, 0  ;;  %v17596_v53 = vld [vmem:[#allocation2 + $0x78c] sm:$0xf] }
0x1a9a   :  { %v12367_v26 = vpop.f32.mrf.mxu3  ;;  %v12342_v29 = vadd.f32 %v12341_v4, %v10762_v59  ;;  %v12330_v34 = vpop.f32.mrf.mxu0  ;;  %12846 = vmatpush.bf16.msrb.mxu0 %v16402_v12  ;;  %v16425_v59 = vld [vmem:[#allocation2 + $0x778] sm:$0xf]  ;;  %v16446_v55 = vor.u32 %v17596_v53, %v16443_v27 }
0x1a9b   :  { %v13202_v31 = vrot.slane %v12355_v2, 4  ;;  %v12368_v32 = vadd.f32 %v12367_v26, %v10764_v21  ;;  %16937 = vmatmul.msk.bf16.vlgmr.msra.gmra.mxu1 %vm128_vm9, %v18305_v43  ;;  %12859 = vmatpush.bf16.msrb.mxu2 %v16406_v49  ;;  %v17643_v21 = vld [vmem:[#allocation2 + $0x8fc] sm:$0xf0]  ;;  %v10487_v2 = vunpack.c.l.bf16 %v19419_v6  ;;  %v17693_v34 = vld [vmem:[#allocation2 + $0xa94] sm:$0xf] }
0x1a9c   :  { %v13201_v39 = vrot.slane %v12342_v29, 6  ;;  %12885 = vmatpush.bf16.msra.mxu3 %v16414_v24  ;;  %12871 = vmatpush.bf16.msra.mxu1 %v16802_v25  ;;  %v16426_v26 = vor.u32 %v17643_v21, %v16425_v59  ;;  %v16830_v37 = vor.u32 %v17693_v34, %v16827_v35 }
0x1a9d   :  { %v13203_v40 = vrot.slane %v12368_v32, 2  ;;  %v10575_v32 = vperm.slane %v10487_v2, 4  ;;  %v10576_v33 = vperm.slane %v10487_v2, 6  ;;  %v10573_v45 = vperm.slane %v10487_v2, 0 }
0x1a9e   :  { %v13274_v30 = vsel %vm3898_vm4, %v12329_v38, %v13201_v39  ;;  %v16825_v38 = vld [vmem:[#allocation2 + $0xa90] sm:$0xf]  ;;  %v17742_v39 = vld [vmem:[#allocation2 + $0xc14] sm:$0xf0] }
0x1a9f   :  { %v13275_v42 = vsel %vm3900_vm12, %v13202_v31, %v13203_v40  ;;  %v10771_v46 = vperm.slane %v10575_v32, 0  ;;  %v16826_v48 = vor.u32 %v17742_v39, %v16825_v38  ;;  %v10769_v52 = vperm.slane %v10573_v45, 0  ;;  %v17597_v39 = vld [vmem:[#allocation2 + $0x794] sm:$0xf]  ;;  %v17745_v45 = vld [vmem:[#allocation2 + $0xc2c] sm:$0xf0] }
0x1aa0   :  { %v13276_v44 = vsel %vm3902_vm13, %v13274_v30, %v13275_v42  ;;  %v12356_v14 = vpop.f32.mrf.mxu1  ;;  %12872 = vmatpush.bf16.msra.mxu1 %v16410_v18  ;;  %v17694_v30 = vld [vmem:[#allocation2 + $0xa9c] sm:$0xf]  ;;  %v16835_v42 = vld [vmem:[#allocation2 + $0xc20] sm:$0xf0] }
0x1aa1   :  { %13352 = vst [vmem:[#allocation13 + $0x29c] sm:$0xff] %v13276_v44  ;;  %v12343_v47 = vpop.f32.mrf.mxu2  ;;  %v10574_v14 = vperm.slane %v10487_v2, 2  ;;  %v16838_v36 = vor.u32 %v17694_v30, %v16835_v42  ;;  %v16843_v2 = vld [vmem:[#allocation2 + $0xc28] sm:$0xf0]  ;;  %v16449_v30 = vld [vmem:[#allocation2 + $0x790] sm:$0xf] }
0x1aa2   :  { %v12369_v50 = vpop.f32.mrf.mxu3  ;;  %v12380_v41 = vpop.f32.mrf.mxu0  ;;  %v17595_v47 = vld [vmem:[#allocation2 + $0x784] sm:$0xf]  ;;  %v17646_v42 = vld [vmem:[#allocation2 + $0x914] sm:$0xf0] }
0x1aa3   :  { %v12381_v24 = vadd.f32 %v12380_v41, %v10765_v13  ;;  %v16435_v50 = vld [vmem:[#allocation2 + $0x908] sm:$0xf0]  ;;  %v17644_v41 = vld [vmem:[#allocation2 + $0x904] sm:$0xf0] }
0x1aa4   :  { %v16438_v63 = vor.u32 %v17595_v47, %v16435_v50  ;;  %v16450_v50 = vor.u32 %v17646_v42, %v16449_v30 }
0x1aa5   :  { %16939 = vmatmul.msk.bf16.vlgmr.msra.gmra.mxu0 %vm128_vm9, %v18305_v43 }
0x1aa6   :  { %16940 = vmatmul.msk.bf16.vlgmr.msra.gmra.mxu2 %vm128_vm9, %v18305_v43  ;;  %12897 = vmatpush.bf16.msra.mxu0 %v16810_v61  ;;  %v10772_v61 = vperm.slane %v10576_v33, 0  ;;  %v16849_v33 = vld [vmem:[#allocation2 + $0xaa8] sm:$0xf] }
0x1aa7   :  { %16942 = vmatmul.msk.bf16.vlgmr.msrb.gmra.mxu3 %vm128_vm9, %v18305_v43  ;;  %12910 = vmatpush.bf16.msra.mxu2 %v16814_v58  ;;  %v10770_v58 = vperm.slane %v10574_v14, 0  ;;  %v16459_v14 = vld [vmem:[#allocation2 + $0x920] sm:$0xf0]  ;;  %v16850_v27 = vor.u32 %v17745_v45, %v16849_v33 }
0x1aa8   :  { %v12406_v11 = vpop.f32.mrf.mxu1  ;;  %12936 = vmatpush.bf16.msrb.mxu3 %v16822_v5  ;;  %v16434_v5 = vor.u32 %v17644_v41, %v16433_v51  ;;  %v19445_v41 = vld [vmem:[#allocation12 + $0x15e] sm:$0xff] }
0x1aa9   :  { %v12407_v15 = vadd.f32 %v12406_v11, %v10767_v57  ;;  %v12393_v17 = vpop.f32.mrf.mxu2  ;;  %v17743_v57 = vld [vmem:[#allocation2 + $0xc1c] sm:$0xf0]  ;;  %v10490_v33 = vunpack.c.h.bf16 %v19445_v41 }
0x1aaa   :  { %v12419_v19 = vpop.f32.mrf.mxu3  ;;  %v12394_v22 = vadd.f32 %v12393_v17, %v10766_v10  ;;  %v12382_v23 = vpop.f32.mrf.mxu0  ;;  %12898 = vmatpush.bf16.msra.mxu0 %v16418_v1  ;;  %v16834_v56 = vor.u32 %v17743_v57, %v16833_v54  ;;  %v16441_v10 = vld [vmem:[#allocation2 + $0x788] sm:$0xf] }
0x1aab   :  { %v13205_v49 = vrot.slane %v12407_v15, 4  ;;  %v12420_v12 = vadd.f32 %v12419_v19, %v10768_v60  ;;  %16941 = vmatmul.msk.bf16.vlgmr.msrb.gmra.mxu1 %vm128_vm9, %v18305_v43  ;;  %12911 = vmatpush.bf16.msra.mxu2 %v16422_v0  ;;  %v17645_v60 = vld [vmem:[#allocation2 + $0x90c] sm:$0xf0]  ;;  %v10488_v15 = vunpack.c.h.bf16 %v19419_v6  ;;  %v17695_v23 = vld [vmem:[#allocation2 + $0xaa4] sm:$0xf] }
0x1aac   :  { %v13204_v25 = vrot.slane %v12394_v22, 6  ;;  %12937 = vmatpush.bf16.msrb.mxu3 %v16430_v8  ;;  %12923 = vmatpush.bf16.msrb.mxu1 %v16818_v16  ;;  %v16442_v19 = vor.u32 %v17645_v60, %v16441_v10  ;;  %v16841_v6 = vld [vmem:[#allocation2 + $0xaa0] sm:$0xf]  ;;  %v16846_v35 = vor.u32 %v17695_v23, %v16843_v2 }
0x1aad   :  { %v13206_v4 = vrot.slane %v12420_v12, 2  ;;  %v10579_v12 = vperm.slane %v10488_v15, 4  ;;  %v10577_v32 = vperm.slane %v10488_v15, 0 }
0x1aae   :  { %v13277_v28 = vsel %vm3898_vm4, %v12381_v24, %v13204_v25  ;;  %v17744_v24 = vld [vmem:[#allocation2 + $0xc24] sm:$0xf0] }
0x1aaf   :  { %v13278_v20 = vsel %vm3900_vm12, %v13205_v49, %v13206_v4  ;;  %v10775_v34 = vperm.slane %v10579_v12, 0  ;;  %v16842_v38 = vor.u32 %v17744_v24, %v16841_v6  ;;  %v17599_v6 = vld [vmem:[#allocation2 + $0x7a4] sm:$0xf]  ;;  %v16467_v24 = vld [vmem:[#allocation2 + $0x928] sm:$0xf0] }
0x1ab0   :  { %v13279_v29 = vsel %vm3902_vm13, %v13277_v28, %v13278_v20  ;;  %v12408_v31 = vpop.f32.mrf.mxu1  ;;  %12924 = vmatpush.bf16.msrb.mxu1 %v16426_v26  ;;  %v17696_v26 = vld [vmem:[#allocation2 + $0xaac] sm:$0xf]  ;;  %v16851_v28 = vld [vmem:[#allocation2 + $0xc30] sm:$0xf0] }
0x1ab1   :  { %13353 = vst [vmem:[#allocation13 + $0x2a4] sm:$0xff] %v13279_v29  ;;  %v12395_v40 = vpop.f32.mrf.mxu2  ;;  %v10578_v29 = vperm.slane %v10488_v15, 2  ;;  %v10580_v31 = vperm.slane %v10488_v15, 6  ;;  %v16859_v15 = vld [vmem:[#allocation2 + $0xc38] sm:$0xf0] }
0x1ab2   :  { %v12421_v18 = vpop.f32.mrf.mxu3  ;;  %v12432_v44 = vpop.f32.mrf.mxu0  ;;  %v16451_v40 = vld [vmem:[#allocation2 + $0x918] sm:$0xf0] }
0x1ab3   :  { %v12433_v8 = vadd.f32 %v12432_v44, %v10769_v52  ;;  %v16854_v18 = vor.u32 %v17696_v26, %v16851_v28  ;;  %v17598_v44 = vld [vmem:[#allocation2 + $0x79c] sm:$0xf]  ;;  %v16454_v47 = vor.u32 %v17597_v39, %v16451_v40 }
0x1ab4   :  { %v16462_v53 = vor.u32 %v17598_v44, %v16459_v14 }
0x1ab5   :  { %16943 = vmatmul.msk.bf16.vlgmr.msrb.gmra.mxu0 %vm128_vm9, %v18305_v43 }
0x1ab6   :  { %16944 = vmatmul.msk.bf16.vlgmr.msrb.gmra.mxu2 %vm128_vm9, %v18305_v43  ;;  %12949 = vmatpush.bf16.msrb.mxu0 %v16826_v48 }
0x1ab7   :  { %16946 = vmatmul.msk.bf16.vlgmr.msra.gmra.mxu3 %vm128_vm9, %v18305_v43  ;;  %12962 = vmatpush.bf16.msrb.mxu2 %v16830_v37  ;;  %v10776_v37 = vperm.slane %v10580_v31, 0 }
0x1ab8   :  { %v12458_v62 = vpop.f32.mrf.mxu1  ;;  %12988 = vmatpush.bf16.msra.mxu3 %v16838_v36  ;;  %v10773_v36 = vperm.slane %v10577_v32, 0 }
0x1ab9   :  { %v12459_v3 = vadd.f32 %v12458_v62, %v10771_v46  ;;  %v12445_v7 = vpop.f32.mrf.mxu2  ;;  %v10774_v46 = vperm.slane %v10578_v29, 0  ;;  %v16470_v29 = vor.u32 %v17599_v6, %v16467_v24 }
0x1aba   :  { %v12471_v9 = vpop.f32.mrf.mxu3  ;;  %v12446_v11 = vadd.f32 %v12445_v7, %v10770_v58  ;;  %v12434_v13 = vpop.f32.mrf.mxu0  ;;  %12950 = vmatpush.bf16.msrb.mxu0 %v16434_v5  ;;  %v16457_v58 = vld [vmem:[#allocation2 + $0x798] sm:$0xf] }
0x1abb   :  { %v13208_v0 = vrot.slane %v12459_v3, 4  ;;  %v12472_v1 = vadd.f32 %v12471_v9, %v10772_v61  ;;  %16945 = vmatmul.msk.bf16.vlgmr.msra.gmra.mxu1 %vm128_vm9, %v18305_v43  ;;  %12963 = vmatpush.bf16.msrb.mxu2 %v16438_v63  ;;  %v17647_v61 = vld [vmem:[#allocation2 + $0x91c] sm:$0xf0]  ;;  %v10489_v3 = vunpack.c.l.bf16 %v19445_v41  ;;  %v17697_v13 = vld [vmem:[#allocation2 + $0xab4] sm:$0xf] }
0x1abc   :  { %v13207_v16 = vrot.slane %v12446_v11, 6  ;;  %12989 = vmatpush.bf16.msra.mxu3 %v16446_v55  ;;  %12975 = vmatpush.bf16.msra.mxu1 %v16834_v56  ;;  %v16458_v9 = vor.u32 %v17647_v61, %v16457_v58  ;;  %v16862_v23 = vor.u32 %v17697_v13, %v16859_v15 }
0x1abd   :  { %v13209_v17 = vrot.slane %v12472_v1, 2  ;;  %v10583_v1 = vperm.slane %v10489_v3, 4 }
0x1abe   :  { %v13280_v59 = vsel %vm3898_vm4, %v12433_v8, %v13207_v16  ;;  %v16857_v8 = vld [vmem:[#allocation2 + $0xab0] sm:$0xf]  ;;  %v17746_v16 = vld [vmem:[#allocation2 + $0xc34] sm:$0xf0] }
0x1abf   :  { %v13281_v21 = vsel %vm3900_vm12, %v13208_v0, %v13209_v17  ;;  %v10779_v12 = vperm.slane %v10583_v1, 0  ;;  %v16858_v2 = vor.u32 %v17746_v16, %v16857_v8 }
0x1ac0   :  { %v13282_v22 = vsel %vm3902_vm13, %v13280_v59, %v13281_v21  ;;  %v12460_v49 = vpop.f32.mrf.mxu1  ;;  %12976 = vmatpush.bf16.msra.mxu1 %v16442_v19  ;;  %v10582_v21 = vperm.slane %v10489_v3, 2 }
0x1ac1   :  { %13354 = vst [vmem:[#allocation13 + $0x2ac] sm:$0xff] %v13282_v22  ;;  %v12447_v25 = vpop.f32.mrf.mxu2  ;;  %v10584_v22 = vperm.slane %v10489_v3, 6  ;;  %v10581_v49 = vperm.slane %v10489_v3, 0  ;;  %v10470_v3 = vld [vmem:[#allocation12 + $0x166] sm:$0xff] }
0x1ac2   :  { %v12473_v4 = vpop.f32.mrf.mxu3  ;;  %v12484_v20 = vpop.f32.mrf.mxu0  ;;  %v16465_v25 = vld [vmem:[#allocation2 + $0x7a0] sm:$0xf]  ;;  %v10778_v26 = vperm.slane %v10582_v21, 0 }
0x1ac3   :  { %v12485_v55 = vadd.f32 %v12484_v20, %v10773_v36  ;;  %v17648_v4 = vld [vmem:[#allocation2 + $0x924] sm:$0xf0]  ;;  %v10780_v28 = vperm.slane %v10584_v22, 0  ;;  %v10777_v32 = vperm.slane %v10581_v49, 0 }
0x1ac4   :  { %v16466_v31 = vor.u32 %v17648_v4, %v16465_v25 }
0x1ac5   :  { %16947 = vmatmul.msk.bf16.vlgmr.msra.gmra.mxu0 %vm128_vm9, %v18305_v43 }
0x1ac6   :  { %16948 = vmatmul.msk.bf16.vlgmr.msra.gmra.mxu2 %vm128_vm9, %v18305_v43  ;;  %13001 = vmatpush.bf16.msra.mxu0 %v16842_v38 }
0x1ac7   :  { %16950 = vmatmul.msk.bf16.vlgmr.msrb.gmra.mxu3 %vm128_vm9, %v18305_v43  ;;  %13014 = vmatpush.bf16.msra.mxu2 %v16846_v35 }
0x1ac8   :  { %v12510_v48 = vpop.f32.mrf.mxu1  ;;  %13040 = vmatpush.bf16.msrb.mxu3 %v16854_v18 }
0x1ac9   :  { %v12511_v51 = vadd.f32 %v12510_v48, %v10775_v34  ;;  %v12497_v54 = vpop.f32.mrf.mxu2 }
0x1aca   :  { %v12523_v57 = vpop.f32.mrf.mxu3  ;;  %v12498_v62 = vadd.f32 %v12497_v54, %v10774_v46  ;;  %v12486_v52 = vpop.f32.mrf.mxu0  ;;  %13002 = vmatpush.bf16.msra.mxu0 %v16450_v50  ;;  %v10585_v54 = vperm.slane %v10490_v33, 0 }
0x1acb   :  { %v13211_v63 = vrot.slane %v12511_v51, 4  ;;  %v12524_v5 = vadd.f32 %v12523_v57, %v10776_v37  ;;  %16949 = vmatmul.msk.bf16.vlgmr.msrb.gmra.mxu1 %vm128_vm9, %v18305_v43  ;;  %13015 = vmatpush.bf16.msra.mxu2 %v16454_v47  ;;  %v10587_v47 = vperm.slane %v10490_v33, 4 }
0x1acc   :  { %v13210_v56 = vrot.slane %v12498_v62, 6  ;;  %13041 = vmatpush.bf16.msrb.mxu3 %v16462_v53  ;;  %13027 = vmatpush.bf16.msrb.mxu1 %v16850_v27  ;;  %v10586_v53 = vperm.slane %v10490_v33, 2  ;;  %v10588_v27 = vperm.slane %v10490_v33, 6  ;;  %v10781_v62 = vperm.slane %v10585_v54, 0  ;;  %v10471_v54 = vld [vmem:[#allocation12 + $0x16e] sm:$0xff] }
0x1acd   :  { %v13212_v7 = vrot.slane %v12524_v5, 2  ;;  %v10783_v57 = vperm.slane %v10587_v47, 0 }
0x1ace   :  { %v13283_v10 = vsel %vm3898_vm4, %v12485_v55, %v13210_v56  ;;  %v10782_v41 = vperm.slane %v10586_v53, 0  ;;  %v10784_v58 = vperm.slane %v10588_v27, 0 }
0x1acf   :  { %v13284_v60 = vsel %vm3900_vm12, %v13211_v63, %v13212_v7 }
0x1ad0   :  { %v13285_v11 = vsel %vm3902_vm13, %v13283_v10, %v13284_v60  ;;  %v12512_v0 = vpop.f32.mrf.mxu1  ;;  %13028 = vmatpush.bf16.msrb.mxu1 %v16458_v9 }
0x1ad1   :  { %13355 = vst [vmem:[#allocation13 + $0x2b4] sm:$0xff] %v13285_v11  ;;  %v12499_v17 = vpop.f32.mrf.mxu2  ;;  %v10491_v0 = vunpack.c.l.bf16 %v10470_v3 }
0x1ad2   :  { %v12525_v19 = vpop.f32.mrf.mxu3  ;;  %v12536_v59 = vpop.f32.mrf.mxu0 }
0x1ad3   :  { %v12537_v42 = vadd.f32 %v12536_v59, %v10777_v32  ;;  %v10591_v16 = vperm.slane %v10491_v0, 4  ;;  %v10590_v21 = vperm.slane %v10491_v0, 2  ;;  %v10592_v22 = vperm.slane %v10491_v0, 6 }
0x1ad4   :  { %v10589_v49 = vperm.slane %v10491_v0, 0 }
0x1ad5   :  { %16951 = vmatmul.msk.bf16.vlgmr.msrb.gmra.mxu0 %vm128_vm9, %v18305_v43 }
0x1ad6   :  { %16952 = vmatmul.msk.bf16.vlgmr.msrb.gmra.mxu2 %vm128_vm9, %v18305_v43  ;;  %13053 = vmatpush.bf16.msrb.mxu0 %v16858_v2  ;;  %v10788_v2 = vperm.slane %v10592_v22, 0  ;;  %v10785_v24 = vperm.slane %v10589_v49, 0 }
0x1ad7   :  { %16954 = vmatmul.msk.bf16.vlgmr.msra.gmra.mxu3 %vm128_vm9, %v18305_v43  ;;  %13066 = vmatpush.bf16.msrb.mxu2 %v16862_v23  ;;  %v10786_v23 = vperm.slane %v10590_v21, 0 }
0x1ad8   :  { %v12562_v20 = vpop.f32.mrf.mxu1 }
0x1ad9   :  { %v12563_v34 = vadd.f32 %v12562_v20, %v10779_v12  ;;  %v12549_v35 = vpop.f32.mrf.mxu2  ;;  %v10787_v12 = vperm.slane %v10591_v16, 0 }
0x1ada   :  { %v12575_v38 = vpop.f32.mrf.mxu3  ;;  %v12550_v39 = vadd.f32 %v12549_v35, %v10778_v26  ;;  %v12538_v30 = vpop.f32.mrf.mxu0  ;;  %13054 = vmatpush.bf16.msrb.mxu0 %v16466_v31 }
0x1adb   :  { %v13214_v40 = vrot.slane %v12563_v34, 4  ;;  %v12576_v18 = vadd.f32 %v12575_v38, %v10780_v28  ;;  %16953 = vmatmul.msk.bf16.vlgmr.msra.gmra.mxu1 %vm128_vm9, %v18305_v43  ;;  %13067 = vmatpush.bf16.msrb.mxu2 %v16470_v29  ;;  %v10492_v38 = vunpack.c.h.bf16 %v10470_v3 }
0x1adc   :  { %v13213_v44 = vrot.slane %v12550_v39, 6 }
0x1add   :  { %v13215_v14 = vrot.slane %v12576_v18, 2  ;;  %v10595_v30 = vperm.slane %v10492_v38, 4  ;;  %v10594_v33 = vperm.slane %v10492_v38, 2 }
0x1ade   :  { %v13286_v45 = vsel %vm3898_vm4, %v12537_v42, %v13213_v44 }
0x1adf   :  { %v13287_v46 = vsel %vm3900_vm12, %v13214_v40, %v13215_v14 }
0x1ae0   :  { %v13288_v37 = vsel %vm3902_vm13, %v13286_v45, %v13287_v46  ;;  %v12564_v48 = vpop.f32.mrf.mxu1  ;;  %v10596_v45 = vperm.slane %v10492_v38, 6  ;;  %v10593_v46 = vperm.slane %v10492_v38, 0 }
0x1ae1   :  { %13356 = vst [vmem:[#allocation13 + $0x2bc] sm:$0xff] %v13288_v37  ;;  %v12551_v50 = vpop.f32.mrf.mxu2  ;;  %v10791_v37 = vperm.slane %v10595_v30, 0  ;;  %v10790_v48 = vperm.slane %v10594_v33, 0 }
0x1ae2   :  { %v12577_v36 = vpop.f32.mrf.mxu3  ;;  %v12588_v51 = vpop.f32.mrf.mxu0  ;;  %v10792_v47 = vperm.slane %v10596_v45, 0 }
0x1ae3   :  { %v12589_v10 = vadd.f32 %v12588_v51, %v10781_v62  ;;  %v10789_v36 = vperm.slane %v10593_v46, 0  ;;  %v10472_v46 = vld [vmem:[#allocation12 + $0x176] sm:$0xff] }
0x1ae5   :  { %16955 = vmatmul.msk.bf16.vlgmr.msra.gmra.mxu0 %vm128_vm9, %v18305_v43 }
0x1ae6   :  { %16956 = vmatmul.msk.bf16.vlgmr.msra.gmra.mxu2 %vm128_vm9, %v18305_v43 }
0x1ae7   :  { %16958 = vmatmul.msk.bf16.vlgmr.msrb.gmra.mxu3 %vm128_vm9, %v18305_v43 }
0x1ae8   :  { %v12614_v61 = vpop.f32.mrf.mxu1 }
0x1ae9   :  { %v12615_v63 = vadd.f32 %v12614_v61, %v10783_v57  ;;  %v12601_v5 = vpop.f32.mrf.mxu2 }
0x1aea   :  { %v12627_v52 = vpop.f32.mrf.mxu3  ;;  %v12602_v55 = vadd.f32 %v12601_v5, %v10782_v41  ;;  %v12590_v9 = vpop.f32.mrf.mxu0 }
0x1aeb   :  { %v13217_v56 = vrot.slane %v12615_v63, 4  ;;  %v12628_v7 = vadd.f32 %v12627_v52, %v10784_v58  ;;  %16957 = vmatmul.msk.bf16.vlgmr.msrb.gmra.mxu1 %vm128_vm9, %v18305_v43  ;;  %v10493_v52 = vunpack.c.l.bf16 %v10471_v54 }
0x1aec   :  { %v13216_v60 = vrot.slane %v12602_v55, 6 }
0x1aed   :  { %v13218_v11 = vrot.slane %v12628_v7, 2  ;;  %v10599_v9 = vperm.slane %v10493_v52, 4  ;;  %v10598_v0 = vperm.slane %v10493_v52, 2 }
0x1aee   :  { %v13289_v1 = vsel %vm3898_vm4, %v12589_v10, %v13216_v60 }
0x1aef   :  { %v13290_v13 = vsel %vm3900_vm12, %v13217_v56, %v13218_v11 }
0x1af0   :  { %v13291_v15 = vsel %vm3902_vm13, %v13289_v1, %v13290_v13  ;;  %v12616_v8 = vpop.f32.mrf.mxu1  ;;  %v10600_v1 = vperm.slane %v10493_v52, 6  ;;  %v10597_v13 = vperm.slane %v10493_v52, 0 }
0x1af1   :  { %13357 = vst [vmem:[#allocation13 + $0x2c4] sm:$0xff] %v13291_v15  ;;  %v12603_v17 = vpop.f32.mrf.mxu2  ;;  %v10795_v15 = vperm.slane %v10599_v9, 0  ;;  %v10794_v8 = vperm.slane %v10598_v0, 0 }
0x1af2   :  { %v12629_v19 = vpop.f32.mrf.mxu3  ;;  %v12640_v59 = vpop.f32.mrf.mxu0  ;;  %v10796_v16 = vperm.slane %v10600_v1, 0 }
0x1af3   :  { %v12641_v32 = vadd.f32 %v12640_v59, %v10785_v24  ;;  %v10793_v19 = vperm.slane %v10597_v13, 0 }
0x1af5   :  { %16959 = vmatmul.msk.bf16.vlgmr.msrb.gmra.mxu0 %vm128_vm9, %v18305_v43 }
0x1af6   :  { %16960 = vmatmul.msk.bf16.vlgmr.msrb.gmra.mxu2 %vm128_vm9, %v18305_v43 }
0x1af8   :  { %v12666_v6 = vpop.f32.mrf.mxu1 }
0x1af9   :  { %v12667_v25 = vadd.f32 %v12666_v6, %v10787_v12  ;;  %v12653_v4 = vpop.f32.mrf.mxu2 }
0x1afa   :  { %v12679_v26 = vpop.f32.mrf.mxu3  ;;  %v12654_v28 = vadd.f32 %v12653_v4, %v10786_v23  ;;  %v12642_v31 = vpop.f32.mrf.mxu0  ;;  %v10494_v4 = vunpack.c.h.bf16 %v10471_v54 }
0x1afb   :  { %v13220_v20 = vrot.slane %v12667_v25, 4  ;;  %v12680_v29 = vadd.f32 %v12679_v26, %v10788_v2 }
0x1afc   :  { %v13219_v34 = vrot.slane %v12654_v28, 6  ;;  %v10603_v31 = vperm.slane %v10494_v4, 4  ;;  %v10602_v38 = vperm.slane %v10494_v4, 2 }
0x1afd   :  { %v13221_v35 = vrot.slane %v12680_v29, 2 }
0x1afe   :  { %v13292_v39 = vsel %vm3898_vm4, %v12641_v32, %v13219_v34 }
0x1aff   :  { %v13293_v40 = vsel %vm3900_vm12, %v13220_v20, %v13221_v35 }
0x1b00   :  { %v13294_v43 = vsel %vm3902_vm13, %v13292_v39, %v13293_v40  ;;  %v12668_v18 = vpop.f32.mrf.mxu1  ;;  %v10604_v39 = vperm.slane %v10494_v4, 6  ;;  %v10601_v40 = vperm.slane %v10494_v4, 0 }
0x1b01   :  { %13358 = vst [vmem:[#allocation13 + $0x2cc] sm:$0xff] %v13294_v43  ;;  %v12655_v42 = vpop.f32.mrf.mxu2  ;;  %v10799_v43 = vperm.slane %v10603_v31, 0  ;;  %v10798_v18 = vperm.slane %v10602_v38, 0 }
0x1b02   :  { %v12681_v44 = vpop.f32.mrf.mxu3  ;;  %v12692_v14 = vpop.f32.mrf.mxu0  ;;  %v10800_v30 = vperm.slane %v10604_v39, 0 }
0x1b03   :  { %v12693_v62 = vadd.f32 %v12692_v14, %v10789_v36  ;;  %v10797_v44 = vperm.slane %v10601_v40, 0  ;;  %v10473_v40 = vld [vmem:[#allocation12 + $0x17e] sm:$0xff] }
0x1b08   :  { %v12718_v50 = vpop.f32.mrf.mxu1 }
0x1b09   :  { %v12719_v51 = vadd.f32 %v12718_v50, %v10791_v37  ;;  %v12705_v53 = vpop.f32.mrf.mxu2 }
0x1b0a   :  { %v12731_v27 = vpop.f32.mrf.mxu3  ;;  %v12706_v57 = vadd.f32 %v12705_v53, %v10790_v48  ;;  %v12694_v61 = vpop.f32.mrf.mxu0 }
0x1b0b   :  { %v13223_v41 = vrot.slane %v12719_v51, 4  ;;  %v12732_v58 = vadd.f32 %v12731_v27, %v10792_v47  ;;  %v10495_v27 = vunpack.c.l.bf16 %v10472_v46 }
0x1b0c   :  { %v13222_v63 = vrot.slane %v12706_v57, 6 }
0x1b0d   :  { %v13224_v5 = vrot.slane %v12732_v58, 2  ;;  %v10607_v61 = vperm.slane %v10495_v27, 4  ;;  %v10606_v52 = vperm.slane %v10495_v27, 2 }
0x1b0e   :  { %v13295_v3 = vsel %vm3898_vm4, %v12693_v62, %v13222_v63 }
0x1b0f   :  { %v13296_v55 = vsel %vm3900_vm12, %v13223_v41, %v13224_v5 }
0x1b10   :  { %v13297_v56 = vsel %vm3902_vm13, %v13295_v3, %v13296_v55  ;;  %v12720_v7 = vpop.f32.mrf.mxu1  ;;  %v10608_v3 = vperm.slane %v10495_v27, 6  ;;  %v10605_v55 = vperm.slane %v10495_v27, 0 }
0x1b11   :  { %13359 = vst [vmem:[#allocation13 + $0x2d4] sm:$0xff] %v13297_v56  ;;  %v12707_v10 = vpop.f32.mrf.mxu2  ;;  %v10803_v56 = vperm.slane %v10607_v61, 0  ;;  %v10802_v7 = vperm.slane %v10606_v52, 0 }
0x1b12   :  { %v12733_v60 = vpop.f32.mrf.mxu3  ;;  %v12744_v11 = vpop.f32.mrf.mxu0  ;;  %v10804_v9 = vperm.slane %v10608_v3, 0 }
0x1b13   :  { %v12745_v6 = vadd.f32 %v12744_v11, %v10793_v19  ;;  %v10801_v60 = vperm.slane %v10605_v55, 0 }
0x1b18   :  { %v12770_v17 = vpop.f32.mrf.mxu1 }
0x1b19   :  { %v12771_v59 = vadd.f32 %v12770_v17, %v10795_v15  ;;  %v12757_v21 = vpop.f32.mrf.mxu2 }
0x1b1a   :  { %v12783_v22 = vpop.f32.mrf.mxu3  ;;  %v12758_v49 = vadd.f32 %v12757_v21, %v10794_v8  ;;  %v12746_v2 = vpop.f32.mrf.mxu0  ;;  %v10496_v21 = vunpack.c.h.bf16 %v10472_v46 }
0x1b1b   :  { %v13226_v12 = vrot.slane %v12771_v59, 4  ;;  %v12784_v23 = vadd.f32 %v12783_v22, %v10796_v16 }
0x1b1c   :  { %v13225_v24 = vrot.slane %v12758_v49, 6  ;;  %v10611_v2 = vperm.slane %v10496_v21, 4  ;;  %v10610_v4 = vperm.slane %v10496_v21, 2 }
0x1b1d   :  { %v13227_v25 = vrot.slane %v12784_v23, 2 }
0x1b1e   :  { %v13298_v26 = vsel %vm3898_vm4, %v12745_v6, %v13225_v24 }
0x1b1f   :  { %v13299_v28 = vsel %vm3900_vm12, %v13226_v12, %v13227_v25 }
0x1b20   :  { %v13300_v20 = vsel %vm3902_vm13, %v13298_v26, %v13299_v28  ;;  %v12772_v29 = vpop.f32.mrf.mxu1  ;;  %v10612_v26 = vperm.slane %v10496_v21, 6  ;;  %v10609_v28 = vperm.slane %v10496_v21, 0 }
0x1b21   :  { %13360 = vst [vmem:[#allocation13 + $0x2dc] sm:$0xff] %v13300_v20  ;;  %v12759_v32 = vpop.f32.mrf.mxu2  ;;  %v10807_v20 = vperm.slane %v10611_v2, 0  ;;  %v10806_v29 = vperm.slane %v10610_v4, 0 }
0x1b22   :  { %v12785_v34 = vpop.f32.mrf.mxu3  ;;  %v12796_v35 = vpop.f32.mrf.mxu0  ;;  %v10808_v31 = vperm.slane %v10612_v26, 0 }
0x1b23   :  { %v12797_v36 = vadd.f32 %v12796_v35, %v10797_v44  ;;  %v10805_v34 = vperm.slane %v10609_v28, 0 }
0x1b28   :  { %v12822_v42 = vpop.f32.mrf.mxu1 }
0x1b29   :  { %v12823_v14 = vadd.f32 %v12822_v42, %v10799_v43  ;;  %v12809_v33 = vpop.f32.mrf.mxu2 }
0x1b2a   :  { %v12835_v45 = vpop.f32.mrf.mxu3  ;;  %v12810_v37 = vadd.f32 %v12809_v33, %v10798_v18  ;;  %v12798_v50 = vpop.f32.mrf.mxu0 }
0x1b2b   :  { %v13229_v48 = vrot.slane %v12823_v14, 4  ;;  %v12836_v47 = vadd.f32 %v12835_v45, %v10800_v30  ;;  %v10497_v45 = vunpack.c.l.bf16 %v10473_v40 }
0x1b2c   :  { %v13228_v51 = vrot.slane %v12810_v37, 6 }
0x1b2d   :  { %v13230_v53 = vrot.slane %v12836_v47, 2  ;;  %v10615_v50 = vperm.slane %v10497_v45, 4  ;;  %v10614_v27 = vperm.slane %v10497_v45, 2 }
0x1b2e   :  { %v13301_v54 = vsel %vm3898_vm4, %v12797_v36, %v13228_v51 }
0x1b2f   :  { %v13302_v57 = vsel %vm3900_vm12, %v13229_v48, %v13230_v53 }
0x1b30   :  { %v13303_v41 = vsel %vm3902_vm13, %v13301_v54, %v13302_v57  ;;  %v12824_v58 = vpop.f32.mrf.mxu1  ;;  %v10616_v54 = vperm.slane %v10497_v45, 6  ;;  %v10613_v57 = vperm.slane %v10497_v45, 0 }
0x1b31   :  { %13361 = vst [vmem:[#allocation13 + $0x2e4] sm:$0xff] %v13303_v41  ;;  %v12811_v62 = vpop.f32.mrf.mxu2  ;;  %v10811_v41 = vperm.slane %v10615_v50, 0  ;;  %v10810_v58 = vperm.slane %v10614_v27, 0 }
0x1b32   :  { %v12837_v63 = vpop.f32.mrf.mxu3  ;;  %v12848_v5 = vpop.f32.mrf.mxu0  ;;  %v10812_v61 = vperm.slane %v10616_v54, 0 }
0x1b33   :  { %v12849_v17 = vadd.f32 %v12848_v5, %v10801_v60  ;;  %v10809_v63 = vperm.slane %v10613_v57, 0 }
0x1b38   :  { %v12874_v10 = vpop.f32.mrf.mxu1 }
0x1b39   :  { %v12875_v11 = vadd.f32 %v12874_v10, %v10803_v56  ;;  %v12861_v0 = vpop.f32.mrf.mxu2 }
0x1b3a   :  { %v12887_v1 = vpop.f32.mrf.mxu3  ;;  %v12862_v13 = vadd.f32 %v12861_v0, %v10802_v7  ;;  %v12850_v16 = vpop.f32.mrf.mxu0  ;;  %v10498_v0 = vunpack.c.h.bf16 %v10473_v40 }
0x1b3b   :  { %v13232_v15 = vrot.slane %v12875_v11, 4  ;;  %v12888_v8 = vadd.f32 %v12887_v1, %v10804_v9 }
0x1b3c   :  { %v13231_v19 = vrot.slane %v12862_v13, 6  ;;  %v10619_v16 = vperm.slane %v10498_v0, 4  ;;  %v10618_v21 = vperm.slane %v10498_v0, 2 }
0x1b3d   :  { %v13233_v59 = vrot.slane %v12888_v8, 2 }
0x1b3e   :  { %v13304_v22 = vsel %vm3898_vm4, %v12849_v17, %v13231_v19 }
0x1b3f   :  { %v13305_v49 = vsel %vm3900_vm12, %v13232_v15, %v13233_v59 }
0x1b40   :  { %v13306_v12 = vsel %vm3902_vm13, %v13304_v22, %v13305_v49  ;;  %v12876_v23 = vpop.f32.mrf.mxu1  ;;  %v10620_v22 = vperm.slane %v10498_v0, 6  ;;  %v10617_v49 = vperm.slane %v10498_v0, 0 }
0x1b41   :  { %13362 = vst [vmem:[#allocation13 + $0x2ec] sm:$0xff] %v13306_v12  ;;  %v12863_v6 = vpop.f32.mrf.mxu2  ;;  %v10815_v12 = vperm.slane %v10619_v16, 0  ;;  %v10814_v23 = vperm.slane %v10618_v21, 0 }
0x1b42   :  { %v12889_v24 = vpop.f32.mrf.mxu3  ;;  %v12900_v25 = vpop.f32.mrf.mxu0  ;;  %v10816_v2 = vperm.slane %v10620_v22, 0 }
0x1b43   :  { %v12901_v44 = vadd.f32 %v12900_v25, %v10805_v34  ;;  %v10813_v24 = vperm.slane %v10617_v49, 0 }
0x1b48   :  { %v12926_v32 = vpop.f32.mrf.mxu1 }
0x1b49   :  { %v12927_v35 = vadd.f32 %v12926_v32, %v10807_v20  ;;  %v12913_v38 = vpop.f32.mrf.mxu2  ;;  %v10474_v32 = vld [vmem:[#allocation12 + $0x186] sm:$0x3] }
0x1b4a   :  { %v12939_v39 = vpop.f32.mrf.mxu3  ;;  %v12914_v43 = vadd.f32 %v12913_v38, %v10806_v29  ;;  %v12902_v42 = vpop.f32.mrf.mxu0 }
0x1b4b   :  { %v13235_v18 = vrot.slane %v12927_v35, 4  ;;  %v12940_v30 = vadd.f32 %v12939_v39, %v10808_v31 }
0x1b4c   :  { %v13234_v14 = vrot.slane %v12914_v43, 6  ;;  %v10499_v43 = vunpack.c.l.bf16 %v10474_v32 }
0x1b4d   :  { %v13236_v33 = vrot.slane %v12940_v30, 2 }
0x1b4e   :  { %v13307_v46 = vsel %vm3898_vm4, %v12901_v44, %v13234_v14  ;;  %v10621_v45 = vperm.slane %v10499_v43, 0 }
0x1b4f   :  { %v13308_v37 = vsel %vm3900_vm12, %v13235_v18, %v13236_v33  ;;  %v10622_v33 = vperm.slane %v10499_v43, 2 }
0x1b50   :  { %v13309_v48 = vsel %vm3902_vm13, %v13307_v46, %v13308_v37  ;;  %v12928_v47 = vpop.f32.mrf.mxu1  ;;  %v10817_v37 = vperm.slane %v10621_v45, 0 }
0x1b51   :  { %13363 = vst [vmem:[#allocation13 + $0x2f4] sm:$0xff] %v13309_v48  ;;  %v12915_v36 = vpop.f32.mrf.mxu2  ;;  %v10818_v46 = vperm.slane %v10622_v33, 0 }
0x1b52   :  { %v12941_v51 = vpop.f32.mrf.mxu3  ;;  %v12952_v53 = vpop.f32.mrf.mxu0 }
0x1b53   :  { %v12953_v10 = vadd.f32 %v12952_v53, %v10809_v63 }
0x1b58   :  { %v12978_v62 = vpop.f32.mrf.mxu1 }
0x1b59   :  { %v12979_v5 = vadd.f32 %v12978_v62, %v10811_v41  ;;  %v12965_v52 = vpop.f32.mrf.mxu2 }
0x1b5a   :  { %v12991_v3 = vpop.f32.mrf.mxu3  ;;  %v12966_v55 = vadd.f32 %v12965_v52, %v10810_v58  ;;  %v12954_v9 = vpop.f32.mrf.mxu0 }
0x1b5b   :  { %v13238_v56 = vrot.slane %v12979_v5, 4  ;;  %v12992_v7 = vadd.f32 %v12991_v3, %v10812_v61 }
0x1b5c   :  { %v13237_v60 = vrot.slane %v12966_v55, 6 }
0x1b5d   :  { %v13239_v11 = vrot.slane %v12992_v7, 2 }
0x1b5e   :  { %v13310_v1 = vsel %vm3898_vm4, %v12953_v10, %v13237_v60 }
0x1b5f   :  { %v13311_v13 = vsel %vm3900_vm12, %v13238_v56, %v13239_v11 }
0x1b60   :  { %v13312_v15 = vsel %vm3902_vm13, %v13310_v1, %v13311_v13  ;;  %v12980_v8 = vpop.f32.mrf.mxu1 }
0x1b61   :  { %13364 = vst [vmem:[#allocation13 + $0x2fc] sm:$0xff] %v13312_v15  ;;  %v12967_v17 = vpop.f32.mrf.mxu2 }
0x1b62   :  { %v12993_v19 = vpop.f32.mrf.mxu3  ;;  %v13004_v59 = vpop.f32.mrf.mxu0 }
0x1b63   :  { %v13005_v34 = vadd.f32 %v13004_v59, %v10813_v24 }
0x1b68   :  { %v13030_v6 = vpop.f32.mrf.mxu1 }
0x1b69   :  { %v13031_v25 = vadd.f32 %v13030_v6, %v10815_v12  ;;  %v13017_v4 = vpop.f32.mrf.mxu2 }
0x1b6a   :  { %v13043_v26 = vpop.f32.mrf.mxu3  ;;  %v13018_v28 = vadd.f32 %v13017_v4, %v10814_v23  ;;  %v13006_v31 = vpop.f32.mrf.mxu0 }
0x1b6b   :  { %v13241_v20 = vrot.slane %v13031_v25, 4  ;;  %v13044_v29 = vadd.f32 %v13043_v26, %v10816_v2 }
0x1b6c   :  { %v13240_v35 = vrot.slane %v13018_v28, 6 }
0x1b6d   :  { %v13242_v38 = vrot.slane %v13044_v29, 2 }
0x1b6e   :  { %v13313_v39 = vsel %vm3898_vm4, %v13005_v34, %v13240_v35 }
0x1b6f   :  { %v13314_v40 = vsel %vm3900_vm12, %v13241_v20, %v13242_v38 }
0x1b70   :  { %v13315_v18 = vsel %vm3902_vm13, %v13313_v39, %v13314_v40  ;;  %v13032_v30 = vpop.f32.mrf.mxu1 }
0x1b71   :  { %13365 = vst [vmem:[#allocation13 + $0x304] sm:$0xff] %v13315_v18  ;;  %v13019_v42 = vpop.f32.mrf.mxu2 }
0x1b72   :  { %v13045_v44 = vpop.f32.mrf.mxu3  ;;  %v13056_v14 = vpop.f32.mrf.mxu0 }
0x1b73   :  { %v13057_v36 = vadd.f32 %v13056_v14, %v10817_v37 }
0x1b79   :  { %v13069_v48 = vpop.f32.mrf.mxu2 }
0x1b7a   :  { %v13070_v47 = vadd.f32 %v13069_v48, %v10818_v46  ;;  %v13058_v50 = vpop.f32.mrf.mxu0 }
0x1b7c   :  { %v13243_v51 = vrot.slane %v13070_v47, 6 }
0x1b7e   :  { %v13316_v53 = vsel %vm3898_vm4, %v13057_v36, %v13243_v51 }
0x1b7f   :  { %13366 = vst [vmem:[#allocation13 + $0x30c] sm:$0xf] %v13316_v53 }
0x1b80   :  { %13377 = dma.vmem_to_hbm [thread:$0]  %s13373_s15, 12544, %s13375_s17, [#allocation6]  }
0x1b81   :  { %v13071_v27 = vpop.f32.mrf.mxu2 }
0x1b82   :  { %18063 = dma.done.wait [#allocation6], 12544  }
0x1b83   :  { %18064 = vsyncadd [#allocation6], 4294954752 }
0x1b84   :  { %13382 = vsyncpa [#allocation5], 1 }
0x1b85   :  { %13383 = vsyncpa [#allocation8], 1 }
0x1b86   :  { %13384 = vsyncpa [#allocation11], 1 }
0x1b87   :  { %13385 = vsyncpa [#allocation6], 1 }
0x1b88   :  { %13386 = vsyncmov [#allocation3] }
0x1b8b   :  { %s13387_s18 = vpop.sfrf %13386 }
0x1b8c   :  { %p16961_p0 = scmp.ne.s32.totalorder %s13387_s18, 0 }
0x1b8e   :  { %13391 = shalt.err (%p16961_p0)  }
0x1b8f   :  { %13393 = vsyncmov [#allocation3 + $0x1] }
0x1b92   :  { %s13394_s6 = vpop.sfrf %13393 }
0x1b93   :  { %p16962_p1 = scmp.ne.s32.totalorder %s13394_s6, 0 }
0x1b95   :  { %13398 = shalt.err (%p16962_p1)  }

</bundles_post_ra>
